<compile_context>
chip_gen: v5e
topology: v5e:2x2
jax: 0.10.0
libtpu: 0.0.40
codegen_flags: <defaults>
</compile_context>

<pallas_src>
import functools

import jax
import jax.numpy as jnp
from jax import lax
from jax.experimental import pallas as pl
from jax.experimental.pallas import tpu as pltpu


# ==========================================================================
# Fused grouped tap-accumulation conv kernel
# ==========================================================================
def _grouped_tap_conv_kernel(groups, relu, has_res, x_ref, w_ref, b_ref,
                             *rest):
    """groups: static tuple; groups[g] = tuple of (src_idx, w_idx, flat_shift).

    x_ref: [1, S, Cin, Mp + tail]  (bf16)  flattened padded source slab(s)
    w_ref: [T, Cout, Cin]          (bf16)  per-tap, BN-scale folded weights
    b_ref: [Cout, 1]               (f32)   folded BN bias
    r_ref: [1, G, Cout, Mp]        (f32)   optional residual (padded layout)
    o_ref: [1, G, Cout, Mp]                output (padded flat layout)
    """
    if has_res:
        r_ref, o_ref = rest
    else:
        (o_ref,) = rest
    cout = o_ref.shape[2]
    mp = o_ref.shape[3]
    bias = b_ref[...]                                    # [Cout, 1] f32

    for g, taps in enumerate(groups):
        acc = jnp.zeros((cout, mp), jnp.float32)
        for (s, ti, shift) in taps:
            xs = x_ref[0, s, :, shift:shift + mp]        # [Cin, Mp] bf16
            acc = acc + jnp.dot(w_ref[ti], xs,
                                preferred_element_type=jnp.float32)
        acc = acc + bias
        if has_res:
            acc = acc + r_ref[0, g, :, :].astype(jnp.float32)
        if relu:
            acc = jnp.maximum(acc, 0.0)
        o_ref[0, g, :, :] = acc.astype(o_ref.dtype)


def _fused_conv_stage(src, w_taps, bias, groups, mp, *, residual=None,
                      relu=True, out_dtype=jnp.bfloat16):
    """src: [N, S, Cin, Mp+tail] bf16; w_taps: [T, Cout, Cin] bf16;
    bias: [Cout] f32; residual: [N, G, Cout, mp] f32 or None.
    Returns [N, G, Cout, mp] in the padded flat spatial layout."""
    N, S, Cin, Mtot = src.shape
    T, Cout, _ = w_taps.shape
    G = len(groups)
    b2 = bias.reshape(Cout, 1).astype(jnp.float32)

    in_specs = [
        pl.BlockSpec((1, S, Cin, Mtot), lambda n: (n, 0, 0, 0)),
        pl.BlockSpec((T, Cout, Cin), lambda n: (0, 0, 0)),
        pl.BlockSpec((Cout, 1), lambda n: (0, 0)),
    ]
    args = [src, w_taps, b2]
    if residual is not None:
        in_specs.append(pl.BlockSpec((1, G, Cout, mp),
                                     lambda n: (n, 0, 0, 0)))
        args.append(residual)

    kernel = functools.partial(_grouped_tap_conv_kernel,
                               tuple(tuple(g) for g in groups), relu,
                               residual is not None)
    return pl.pallas_call(
        kernel,
        out_shape=jax.ShapeDtypeStruct((N, G, Cout, mp), out_dtype),
        grid=(N,),
        in_specs=in_specs,
        out_specs=pl.BlockSpec((1, G, Cout, mp), lambda n: (n, 0, 0, 0)),
        compiler_params=pltpu.CompilerParams(
            dimension_semantics=("parallel",)),
    )(*args)


# ==========================================================================
# Host-side glue: source preparation (no im2col, ~1x activation size)
# ==========================================================================
def _pack_sources(sources, tail):
    """sources: list of [N, Cin, S1, S2, S3] (same shape) -> [N, S, Cin, M+tail] bf16."""
    stacked = jnp.stack(sources, axis=1)                 # [N, S, Cin, S1, S2, S3]
    N, S, Cin = stacked.shape[:3]
    flat = stacked.reshape(N, S, Cin, -1)
    if tail:
        flat = jnp.pad(flat, ((0, 0), (0, 0), (0, 0), (0, tail)))
    return flat.astype(jnp.bfloat16)


def conv3d_bn(x, wf, bias, *, stride, pad, relu=True, out_dtype=jnp.bfloat16):
    """Conv3d + folded BN (+ ReLU).  x: [N, Cin, D, H, W];
    wf: BN-scale-folded bf16 weight [Cout, Cin, k, k, k]; bias: [Cout] f32."""
    N, Cin, D, H, W = x.shape
    Cout, _, k, _, _ = wf.shape
    taps, wlist, sources = [], [], []

    if stride == 1:
        S1, S2, S3 = D + 2 * pad, H + 2 * pad, W + 2 * pad
        O1, O2, O3 = S1 - k + 1, S2 - k + 1, S3 - k + 1
        xp = x if pad == 0 else jnp.pad(
            x, ((0, 0), (0, 0), (pad, pad), (pad, pad), (pad, pad)))
        sources.append(xp)
        for kd in range(k):
            for kh in range(k):
                for kw in range(k):
                    taps.append((0, len(wlist), kd * S2 * S3 + kh * S3 + kw))
                    wlist.append(wf[:, :, kd, kh, kw])
        tail = (k - 1) * (S2 * S3 + S3 + 1)
    else:
        # stride-2, k=3, pad=1: 8 input parity phases, stride-1 taps only.
        assert stride == 2 and k == 3 and pad == 1
        assert D % 2 == 0 and H % 2 == 0 and W % 2 == 0
        O1, O2, O3 = D // 2, H // 2, W // 2
        S1, S2, S3 = O1 + 1, O2 + 1, O3 + 1
        for pd in (0, 1):
            for phh in (0, 1):
                for pw in (0, 1):
                    phx = x[:, :, pd::2, phh::2, pw::2]
                    padc = tuple((1, 0) if b else (0, 1) for b in (pd, phh, pw))
                    phx = jnp.pad(phx, ((0, 0), (0, 0)) + padc)
                    sidx = len(sources)
                    sources.append(phx)
                    # (offset, kernel-index) options per dim
                    opts = [[(0, 1)] if b == 0 else [(0, 0), (1, 2)]
                            for b in (pd, phh, pw)]
                    for od, kd in opts[0]:
                        for oh, kh in opts[1]:
                            for ow, kw in opts[2]:
                                taps.append((sidx, len(wlist),
                                             od * S2 * S3 + oh * S3 + ow))
                                wlist.append(wf[:, :, kd, kh, kw])
        tail = S2 * S3 + S3 + 1

    mp = S1 * S2 * S3
    src = _pack_sources(sources, tail)
    w_taps = jnp.stack(wlist, axis=0)                    # [T, Cout, Cin] bf16
    out = _fused_conv_stage(src, w_taps, bias, [tuple(taps)], mp,
                            relu=relu, out_dtype=out_dtype)
    return out[:, 0].reshape(N, Cout, S1, S2, S3)[:, :, :O1, :O2, :O3]


def conv_transpose3d_bn(x, wf, bias, *, residual, relu=True,
                        out_dtype=jnp.bfloat16):
    """ConvTranspose3d(k=3, stride=2, padding=1, output_padding=1) + folded BN
    + fused residual + ReLU via sub-pixel (output-phase) decomposition.
    All 8 output phases are computed in one pallas_call.
    wf: [Cout, Cin, 3, 3, 3] with wf[co, ci, t] = w_pt[ci, co, t] * scale[co]
    (channel-swapped, NOT flipped).  residual: [N, Cout, 2D, 2H, 2W]."""
    N, Cin, D, H, W = x.shape
    Cout = wf.shape[0]
    S1, S2, S3 = D + 1, H + 1, W + 1
    mp = S1 * S2 * S3
    tail = S2 * S3 + S3 + 1
    xp = jnp.pad(x, ((0, 0), (0, 0), (0, 1), (0, 1), (0, 1)))
    src = _pack_sources([xp], tail)
    res_f32 = residual.astype(jnp.float32)

    groups, wlist, res_phases = [], [], []
    for a in (0, 1):
        for b in (0, 1):
            for c in (0, 1):
                # per-dim (offset, kernel-index): even phase -> w[1] at 0;
                # odd phase -> w[2] at 0 and w[0] at +1.
                opts = [[(0, 1)] if bit == 0 else [(0, 2), (1, 0)]
                        for bit in (a, b, c)]
                taps = []
                for od, kd in opts[0]:
                    for oh, kh in opts[1]:
                        for ow, kw in opts[2]:
                            taps.append((0, len(wlist),
                                         od * S2 * S3 + oh * S3 + ow))
                            wlist.append(wf[:, :, kd, kh, kw])
                groups.append(tuple(taps))
                res_ph = res_f32[:, :, a::2, b::2, c::2]
                res_ph = jnp.pad(
                    res_ph, ((0, 0), (0, 0), (0, 1), (0, 1), (0, 1))
                ).reshape(N, Cout, mp)
                res_phases.append(res_ph)

    w_taps = jnp.stack(wlist, axis=0)                    # [27, Cout, Cin] bf16
    res_stacked = jnp.stack(res_phases, axis=1)          # [N, 8, Cout, mp] f32
    out = _fused_conv_stage(src, w_taps, bias, groups, mp,
                            residual=res_stacked, relu=relu,
                            out_dtype=out_dtype)          # [N, 8, Cout, mp]
    out = out.reshape(N, 2, 2, 2, Cout, S1, S2, S3)[..., :D, :H, :W]
    out = jnp.transpose(out, (0, 4, 5, 1, 6, 2, 7, 3))
    return out.reshape(N, Cout, 2 * D, 2 * H, 2 * W)


# ==========================================================================
# Parameters (deterministic synthetic init), BN folding, weight preparation
# ==========================================================================
def _fold_bn(gamma, beta, mean, var, eps=1e-5):
    scale = gamma / jnp.sqrt(var + eps)
    return scale, beta - mean * scale


def init_params(key, C):
    def nxt():
        nonlocal key
        key, sub = jax.random.split(key)
        return sub

    def conv_w(cout, cin, k):
        return 0.1 * jax.random.normal(nxt(), (cout, cin, k, k, k), jnp.float32)

    def convt_w(cin, cout, k):
        return 0.1 * jax.random.normal(nxt(), (cin, cout, k, k, k), jnp.float32)

    def bn(c):
        gamma = 1.0 + 0.1 * jax.random.normal(nxt(), (c,), jnp.float32)
        beta = 0.1 * jax.random.normal(nxt(), (c,), jnp.float32)
        mean = 0.1 * jax.random.normal(nxt(), (c,), jnp.float32)
        var = 1.0 + 0.1 * jnp.abs(jax.random.normal(nxt(), (c,), jnp.float32))
        return _fold_bn(gamma, beta, mean, var)

    p = {}
    p['conv1_w'] = conv_w(2 * C, C, 3);      p['conv1_s'], p['conv1_b'] = bn(2 * C)
    p['conv2_w'] = conv_w(2 * C, 2 * C, 3);  p['conv2_s'], p['conv2_b'] = bn(2 * C)
    p['conv3_w'] = conv_w(4 * C, 2 * C, 3);  p['conv3_s'], p['conv3_b'] = bn(4 * C)
    p['conv4_w'] = conv_w(4 * C, 4 * C, 3);  p['conv4_s'], p['conv4_b'] = bn(4 * C)
    p['conv5_w'] = convt_w(4 * C, 2 * C, 3); p['conv5_s'], p['conv5_b'] = bn(2 * C)
    p['conv6_w'] = convt_w(2 * C, C, 3);     p['conv6_s'], p['conv6_b'] = bn(C)
    p['redir1_w'] = conv_w(C, C, 1);         p['redir1_s'], p['redir1_b'] = bn(C)
    p['redir2_w'] = conv_w(2 * C, 2 * C, 1); p['redir2_s'], p['redir2_b'] = bn(2 * C)
    return p


def prepare_params(p):
    """Fold the BN per-channel scale into the conv weights (bf16) and keep the
    bias in f32.  ConvTranspose weights are channel-swapped to [Cout, Cin, k^3]."""
    q = {}

    def conv(name):
        w = p[name + '_w'] * p[name + '_s'][:, None, None, None, None]
        q[name + '_w'] = w.astype(jnp.bfloat16)
        q[name + '_b'] = p[name + '_b'].astype(jnp.float32)

    def convt(name):
        w = jnp.transpose(p[name + '_w'], (1, 0, 2, 3, 4))   # [Cout, Cin, k,k,k]
        w = w * p[name + '_s'][:, None, None, None, None]
        q[name + '_w'] = w.astype(jnp.bfloat16)
        q[name + '_b'] = p[name + '_b'].astype(jnp.float32)

    for n in ('conv1', 'conv2', 'conv3', 'conv4', 'redir1', 'redir2'):
        conv(n)
    for n in ('conv5', 'conv6'):
        convt(n)
    return q


# ==========================================================================
# hourglass forward (Pallas path), NCDHW in / NCDHW out
# ==========================================================================
def hourglass_forward(x, q):
    c1 = conv3d_bn(x, q['conv1_w'], q['conv1_b'], stride=2, pad=1)
    c2 = conv3d_bn(c1, q['conv2_w'], q['conv2_b'], stride=1, pad=1)
    c3 = conv3d_bn(c2, q['conv3_w'], q['conv3_b'], stride=2, pad=1)
    c4 = conv3d_bn(c3, q['conv4_w'], q['conv4_b'], stride=1, pad=1)
    r2 = conv3d_bn(c2, q['redir2_w'], q['redir2_b'], stride=1, pad=0,
                   relu=False, out_dtype=jnp.float32)
    c5 = conv_transpose3d_bn(c4, q['conv5_w'], q['conv5_b'], residual=r2,
                             relu=True, out_dtype=jnp.bfloat16)
    r1 = conv3d_bn(x, q['redir1_w'], q['redir1_b'], stride=1, pad=0,
                   relu=False, out_dtype=jnp.float32)
    c6 = conv_transpose3d_bn(c5, q['conv6_w'], q['conv6_b'], residual=r1,
                             relu=True, out_dtype=jnp.float32)
    return c6


# ==========================================================================
# Pure-JAX reference (XLA convs) mirroring the bf16 operand rounding
# ==========================================================================
def _ref_conv(x, wf, bias, *, stride, pad, relu=True, out_dtype=jnp.bfloat16):
    y = lax.conv_general_dilated(
        x.astype(jnp.bfloat16), wf, (stride,) * 3, [(pad, pad)] * 3,
        dimension_numbers=('NCDHW', 'OIDHW', 'NCDHW'),
        preferred_element_type=jnp.float32)
    y = y + bias[None, :, None, None, None]
    if relu:
        y = jnp.maximum(y, 0.0)
    return y.astype(out_dtype)


def _ref_convT(x, wf, bias, *, residual, relu=True, out_dtype=jnp.bfloat16):
    # zero-dilation rewrite (flip the channel-swapped effective weight)
    w_flip = jnp.flip(wf, axis=(2, 3, 4))
    y = lax.conv_general_dilated(
        x.astype(jnp.bfloat16), w_flip, (1, 1, 1), [(1, 2)] * 3,
        lhs_dilation=(2, 2, 2),
        dimension_numbers=('NCDHW', 'OIDHW', 'NCDHW'),
        preferred_element_type=jnp.float32)
    y = y + bias[None, :, None, None, None]
    y = y + residual.astype(jnp.float32)
    if relu:
        y = jnp.maximum(y, 0.0)
    return y.astype(out_dtype)


def hourglass_forward_ref(x, q):
    c1 = _ref_conv(x, q['conv1_w'], q['conv1_b'], stride=2, pad=1)
    c2 = _ref_conv(c1, q['conv2_w'], q['conv2_b'], stride=1, pad=1)
    c3 = _ref_conv(c2, q['conv3_w'], q['conv3_b'], stride=2, pad=1)
    c4 = _ref_conv(c3, q['conv4_w'], q['conv4_b'], stride=1, pad=1)
    r2 = _ref_conv(c2, q['redir2_w'], q['redir2_b'], stride=1, pad=0,
                   relu=False, out_dtype=jnp.float32)
    c5 = _ref_convT(c4, q['conv5_w'], q['conv5_b'], residual=r2)
    r1 = _ref_conv(x, q['redir1_w'], q['redir1_b'], stride=1, pad=0,
                   relu=False, out_dtype=jnp.float32)
    c6 = _ref_convT(c5, q['conv6_w'], q['conv6_b'], residual=r1,
                    out_dtype=jnp.float32)
    return c6


# ==========================================================================
if __name__ == "__main__":
    key = jax.random.PRNGKey(0)
    kx, kp = jax.random.split(key)

    C = 4                      # in_channels
    N, D, H, W = 2, 8, 8, 8    # NCDHW cost-volume style input
    x = jax.random.normal(kx, (N, C, D, H, W), jnp.float32)
    params = prepare_params(init_params(kp, C))

    fwd = jax.jit(hourglass_forward)
    out = jax.block_until_ready(fwd(x, params))

    assert out.shape == (N, C, D, H, W)
    ref = hourglass_forward_ref(x, params)
    err = float(jnp.max(jnp.abs(out - ref)))
    assert jnp.allclose(out, ref, rtol=2e-2, atol=2e-2), err

    print("KERNEL_OK")
</pallas_src>

<mosaic_0001>
module attributes {stable_mosaic.version = 11 : i64} {
  func.func @_grouped_tap_conv_kernel(%arg0: i32, %arg1: memref<1x1x4x512xbf16, #tpu.memory_space<vmem>>, %arg2: memref<1x4x4xbf16, #tpu.memory_space<vmem>>, %arg3: memref<4x1xf32, #tpu.memory_space<vmem>>, %arg4: memref<1x1x4x512xf32, #tpu.memory_space<vmem>>) attributes {dimension_semantics = [#tpu.dimension_semantics<parallel>], iteration_bounds = array<i64: 2>, scalar_prefetch = 0 : i64, scratch_operands = 0 : i64, tpu.core_type = #tpu.core_type<tc>, window_params = [{transform_indices = @transform_0, window_bounds = array<i64: 1, 1, 4, 512>}, {pipeline_mode = #tpu.pipeline_mode<synchronous>, transform_indices = @transform_1, window_bounds = array<i64: 1, 4, 4>}, {pipeline_mode = #tpu.pipeline_mode<synchronous>, transform_indices = @transform_2, window_bounds = array<i64: 4, 1>}, {transform_indices = @transform_3, window_bounds = array<i64: 1, 1, 4, 512>}]} {
    %c0 = arith.constant 0 : index
    %c0_0 = arith.constant 0 : index
    %0 = vector.load %arg3[%c0, %c0_0] : memref<4x1xf32, #tpu.memory_space<vmem>>, vector<4x1xf32>
    %cst = arith.constant 0.000000e+00 : f32
    %1 = vector.broadcast %cst : f32 to vector<4x512xf32>
    %c0_1 = arith.constant 0 : index
    %c0_2 = arith.constant 0 : index
    %c0_3 = arith.constant 0 : index
    %c0_4 = arith.constant 0 : index
    %2 = vector.load %arg1[%c0_1, %c0_2, %c0_3, %c0_4] : memref<1x1x4x512xbf16, #tpu.memory_space<vmem>>, vector<1x1x4x512xbf16>
    %3 = vector.shape_cast %2 : vector<1x1x4x512xbf16> to vector<4x512xbf16>
    %c0_5 = arith.constant 0 : index
    %c0_6 = arith.constant 0 : index
    %c0_7 = arith.constant 0 : index
    %4 = vector.load %arg2[%c0_5, %c0_6, %c0_7] : memref<1x4x4xbf16, #tpu.memory_space<vmem>>, vector<1x4x4xbf16>
    %5 = vector.shape_cast %4 : vector<1x4x4xbf16> to vector<4x4xbf16>
    %cst_8 = arith.constant dense<0.000000e+00> : vector<4x512xf32>
    %6 = tpu.matmul %5, %3, %cst_8 {dimension_numbers = #tpu.dot_dimension_numbers<[1], [0], [0], [1], [0, 0, 1, 1], [], []>} : vector<4x4xbf16>, vector<4x512xbf16>, vector<4x512xf32> -> vector<4x512xf32>
    %7 = arith.addf %1, %6 : vector<4x512xf32>
    %8 = vector.broadcast %0 : vector<4x1xf32> to vector<4x512xf32>
    %9 = arith.addf %7, %8 : vector<4x512xf32>
    %c0_9 = arith.constant 0 : index
    %c0_10 = arith.constant 0 : index
    %c0_11 = arith.constant 0 : index
    %c0_12 = arith.constant 0 : index
    %10 = vector.load %arg4[%c0_9, %c0_10, %c0_11, %c0_12] : memref<1x1x4x512xf32, #tpu.memory_space<vmem>>, vector<1x1x4x512xf32>
    %11 = vector.shape_cast %10 : vector<1x1x4x512xf32> to vector<4x512xf32>
    %12 = vector.shape_cast %9 : vector<4x512xf32> to vector<1x1x4x512xf32>
    tpu.vector_store %arg4[%c0_9, %c0_10, %c0_11, %c0_12], %12 {strides = array<i32>} : memref<1x1x4x512xf32, #tpu.memory_space<vmem>>, vector<1x1x4x512xf32>,
    return
  }
  func.func @transform_0(%arg0: i32) -> (i32, i32, i32, i32) {
    %c0_i32 = arith.constant 0 : i32
    %c0_i32_0 = arith.constant 0 : i32
    %c0_i32_1 = arith.constant 0 : i32
    %c0_i32_2 = arith.constant 0 : i32
    return %arg0, %c0_i32, %c0_i32_0, %c0_i32_1 : i32, i32, i32, i32
  }
  func.func @transform_1(%arg0: i32) -> (i32, i32, i32) {
    %c0_i32 = arith.constant 0 : i32
    %c0_i32_0 = arith.constant 0 : i32
    %c0_i32_1 = arith.constant 0 : i32
    %c0_i32_2 = arith.constant 0 : i32
    return %c0_i32, %c0_i32_0, %c0_i32_1 : i32, i32, i32
  }
  func.func @transform_2(%arg0: i32) -> (i32, i32) {
    %c0_i32 = arith.constant 0 : i32
    %c0_i32_0 = arith.constant 0 : i32
    %c0_i32_1 = arith.constant 0 : i32
    return %c0_i32, %c0_i32_0 : i32, i32
  }
  func.func @transform_3(%arg0: i32) -> (i32, i32, i32, i32) {
    %c0_i32 = arith.constant 0 : i32
    %c0_i32_0 = arith.constant 0 : i32
    %c0_i32_1 = arith.constant 0 : i32
    %c0_i32_2 = arith.constant 0 : i32
    return %arg0, %c0_i32, %c0_i32_0, %c0_i32_1 : i32, i32, i32, i32
  }
}

module attributes {stable_mosaic.version = 11 : i64} {
  func.func @_grouped_tap_conv_kernel(%arg0: i32, %arg1: memref<1x8x4x156xbf16, #tpu.memory_space<vmem>>, %arg2: memref<27x8x4xbf16, #tpu.memory_space<vmem>>, %arg3: memref<8x1xf32, #tpu.memory_space<vmem>>, %arg4: memref<1x1x8x125xbf16, #tpu.memory_space<vmem>>) attributes {dimension_semantics = [#tpu.dimension_semantics<parallel>], iteration_bounds = array<i64: 2>, scalar_prefetch = 0 : i64, scratch_operands = 0 : i64, tpu.core_type = #tpu.core_type<tc>, window_params = [{transform_indices = @transform_0, window_bounds = array<i64: 1, 8, 4, 156>}, {pipeline_mode = #tpu.pipeline_mode<synchronous>, transform_indices = @transform_1, window_bounds = array<i64: 27, 8, 4>}, {pipeline_mode = #tpu.pipeline_mode<synchronous>, transform_indices = @transform_2, window_bounds = array<i64: 8, 1>}, {transform_indices = @transform_3, window_bounds = array<i64: 1, 1, 8, 125>}]} {
    %c0 = arith.constant 0 : index
    %c0_0 = arith.constant 0 : index
    %0 = vector.load %arg3[%c0, %c0_0] : memref<8x1xf32, #tpu.memory_space<vmem>>, vector<8x1xf32>
    %cst = arith.constant 0.000000e+00 : f32
    %1 = vector.broadcast %cst : f32 to vector<8x125xf32>
    %c0_1 = arith.constant 0 : index
    %c0_2 = arith.constant 0 : index
    %c0_3 = arith.constant 0 : index
    %c0_4 = arith.constant 0 : index
    %2 = vector.load %arg1[%c0_1, %c0_2, %c0_3, %c0_4] : memref<1x8x4x156xbf16, #tpu.memory_space<vmem>>, vector<1x1x4x125xbf16>
    %3 = vector.shape_cast %2 : vector<1x1x4x125xbf16> to vector<4x125xbf16>
    %c0_5 = arith.constant 0 : index
    %c0_6 = arith.constant 0 : index
    %c0_7 = arith.constant 0 : index
    %4 = vector.load %arg2[%c0_5, %c0_6, %c0_7] : memref<27x8x4xbf16, #tpu.memory_space<vmem>>, vector<1x8x4xbf16>
    %5 = vector.shape_cast %4 : vector<1x8x4xbf16> to vector<8x4xbf16>
    %cst_8 = arith.constant dense<0.000000e+00> : vector<8x125xf32>
    %6 = tpu.matmul %5, %3, %cst_8 {dimension_numbers = #tpu.dot_dimension_numbers<[1], [0], [0], [1], [0, 0, 1, 1], [], []>} : vector<8x4xbf16>, vector<4x125xbf16>, vector<8x125xf32> -> vector<8x125xf32>
    %7 = arith.addf %1, %6 : vector<8x125xf32>
    %c0_9 = arith.constant 0 : index
    %c1 = arith.constant 1 : index
    %c0_10 = arith.constant 0 : index
    %c0_11 = arith.constant 0 : index
    %8 = vector.load %arg1[%c0_9, %c1, %c0_10, %c0_11] : memref<1x8x4x156xbf16, #tpu.memory_space<vmem>>, vector<1x1x4x125xbf16>
    %9 = vector.shape_cast %8 : vector<1x1x4x125xbf16> to vector<4x125xbf16>
    %c1_12 = arith.constant 1 : index
    %c0_13 = arith.constant 0 : index
    %c0_14 = arith.constant 0 : index
    %10 = vector.load %arg2[%c1_12, %c0_13, %c0_14] : memref<27x8x4xbf16, #tpu.memory_space<vmem>>, vector<1x8x4xbf16>
    %11 = vector.shape_cast %10 : vector<1x8x4xbf16> to vector<8x4xbf16>
    %cst_15 = arith.constant dense<0.000000e+00> : vector<8x125xf32>
    %12 = tpu.matmul %11, %9, %cst_15 {dimension_numbers = #tpu.dot_dimension_numbers<[1], [0], [0], [1], [0, 0, 1, 1], [], []>} : vector<8x4xbf16>, vector<4x125xbf16>, vector<8x125xf32> -> vector<8x125xf32>
    %13 = arith.addf %7, %12 : vector<8x125xf32>
    %c0_16 = arith.constant 0 : index
    %c1_17 = arith.constant 1 : index
    %c0_18 = arith.constant 0 : index
    %c1_19 = arith.constant 1 : index
    %14 = vector.load %arg1[%c0_16, %c1_17, %c0_18, %c1_19] : memref<1x8x4x156xbf16, #tpu.memory_space<vmem>>, vector<1x1x4x125xbf16>
    %15 = vector.shape_cast %14 : vector<1x1x4x125xbf16> to vector<4x125xbf16>
    %c2 = arith.constant 2 : index
    %c0_20 = arith.constant 0 : index
    %c0_21 = arith.constant 0 : index
    %16 = vector.load %arg2[%c2, %c0_20, %c0_21] : memref<27x8x4xbf16, #tpu.memory_space<vmem>>, vector<1x8x4xbf16>
    %17 = vector.shape_cast %16 : vector<1x8x4xbf16> to vector<8x4xbf16>
    %cst_22 = arith.constant dense<0.000000e+00> : vector<8x125xf32>
    %18 = tpu.matmul %17, %15, %cst_22 {dimension_numbers = #tpu.dot_dimension_numbers<[1], [0], [0], [1], [0, 0, 1, 1], [], []>} : vector<8x4xbf16>, vector<4x125xbf16>, vector<8x125xf32> -> vector<8x125xf32>
    %19 = arith.addf %13, %18 : vector<8x125xf32>
    %c0_23 = arith.constant 0 : index
    %c2_24 = arith.constant 2 : index
    %c0_25 = arith.constant 0 : index
    %c0_26 = arith.constant 0 : index
    %20 = vector.load %arg1[%c0_23, %c2_24, %c0_25, %c0_26] : memref<1x8x4x156xbf16, #tpu.memory_space<vmem>>, vector<1x1x4x125xbf16>
    %21 = vector.shape_cast %20 : vector<1x1x4x125xbf16> to vector<4x125xbf16>
    %c3 = arith.constant 3 : index
    %c0_27 = arith.constant 0 : index
    %c0_28 = arith.constant 0 : index
    %22 = vector.load %arg2[%c3, %c0_27, %c0_28] : memref<27x8x4xbf16, #tpu.memory_space<vmem>>, vector<1x8x4xbf16>
    %23 = vector.shape_cast %22 : vector<1x8x4xbf16> to vector<8x4xbf16>
    %cst_29 = arith.constant dense<0.000000e+00> : vector<8x125xf32>
    %24 = tpu.matmul %23, %21, %cst_29 {dimension_numbers = #tpu.dot_dimension_numbers<[1], [0], [0], [1], [0, 0, 1, 1], [], []>} : vector<8x4xbf16>, vector<4x125xbf16>, vector<8x125xf32> -> vector<8x125xf32>
    %25 = arith.addf %19, %24 : vector<8x125xf32>
    %c0_30 = arith.constant 0 : index
    %c2_31 = arith.constant 2 : index
    %c0_32 = arith.constant 0 : index
    %c5 = arith.constant 5 : index
    %26 = vector.load %arg1[%c0_30, %c2_31, %c0_32, %c5] : memref<1x8x4x156xbf16, #tpu.memory_space<vmem>>, vector<1x1x4x125xbf16>
    %27 = vector.shape_cast %26 : vector<1x1x4x125xbf16> to vector<4x125xbf16>
    %c4 = arith.constant 4 : index
    %c0_33 = arith.constant 0 : index
    %c0_34 = arith.constant 0 : index
    %28 = vector.load %arg2[%c4, %c0_33, %c0_34] : memref<27x8x4xbf16, #tpu.memory_space<vmem>>, vector<1x8x4xbf16>
    %29 = vector.shape_cast %28 : vector<1x8x4xbf16> to vector<8x4xbf16>
    %cst_35 = arith.constant dense<0.000000e+00> : vector<8x125xf32>
    %30 = tpu.matmul %29, %27, %cst_35 {dimension_numbers = #tpu.dot_dimension_numbers<[1], [0], [0], [1], [0, 0, 1, 1], [], []>} : vector<8x4xbf16>, vector<4x125xbf16>, vector<8x125xf32> -> vector<8x125xf32>
    %31 = arith.addf %25, %30 : vector<8x125xf32>
    %c0_36 = arith.constant 0 : index
    %c3_37 = arith.constant 3 : index
    %c0_38 = arith.constant 0 : index
    %c0_39 = arith.constant 0 : index
    %32 = vector.load %arg1[%c0_36, %c3_37, %c0_38, %c0_39] : memref<1x8x4x156xbf16, #tpu.memory_space<vmem>>, vector<1x1x4x125xbf16>
    %33 = vector.shape_cast %32 : vector<1x1x4x125xbf16> to vector<4x125xbf16>
    %c5_40 = arith.constant 5 : index
    %c0_41 = arith.constant 0 : index
    %c0_42 = arith.constant 0 : index
    %34 = vector.load %arg2[%c5_40, %c0_41, %c0_42] : memref<27x8x4xbf16, #tpu.memory_space<vmem>>, vector<1x8x4xbf16>
    %35 = vector.shape_cast %34 : vector<1x8x4xbf16> to vector<8x4xbf16>
    %cst_43 = arith.constant dense<0.000000e+00> : vector<8x125xf32>
    %36 = tpu.matmul %35, %33, %cst_43 {dimension_numbers = #tpu.dot_dimension_numbers<[1], [0], [0], [1], [0, 0, 1, 1], [], []>} : vector<8x4xbf16>, vector<4x125xbf16>, vector<8x125xf32> -> vector<8x125xf32>
    %37 = arith.addf %31, %36 : vector<8x125xf32>
    %c0_44 = arith.constant 0 : index
    %c3_45 = arith.constant 3 : index
    %c0_46 = arith.constant 0 : index
    %c1_47 = arith.constant 1 : index
    %38 = vector.load %arg1[%c0_44, %c3_45, %c0_46, %c1_47] : memref<1x8x4x156xbf16, #tpu.memory_space<vmem>>, vector<1x1x4x125xbf16>
    %39 = vector.shape_cast %38 : vector<1x1x4x125xbf16> to vector<4x125xbf16>
    %c6 = arith.constant 6 : index
    %c0_48 = arith.constant 0 : index
    %c0_49 = arith.constant 0 : index
    %40 = vector.load %arg2[%c6, %c0_48, %c0_49] : memref<27x8x4xbf16, #tpu.memory_space<vmem>>, vector<1x8x4xbf16>
    %41 = vector.shape_cast %40 : vector<1x8x4xbf16> to vector<8x4xbf16>
    %cst_50 = arith.constant dense<0.000000e+00> : vector<8x125xf32>
    %42 = tpu.matmul %41, %39, %cst_50 {dimension_numbers = #tpu.dot_dimension_numbers<[1], [0], [0], [1], [0, 0, 1, 1], [], []>} : vector<8x4xbf16>, vector<4x125xbf16>, vector<8x125xf32> -> vector<8x125xf32>
    %43 = arith.addf %37, %42 : vector<8x125xf32>
    %c0_51 = arith.constant 0 : index
    %c3_52 = arith.constant 3 : index
    %c0_53 = arith.constant 0 : index
    %c5_54 = arith.constant 5 : index
    %44 = vector.load %arg1[%c0_51, %c3_52, %c0_53, %c5_54] : memref<1x8x4x156xbf16, #tpu.memory_space<vmem>>, vector<1x1x4x125xbf16>
    %45 = vector.shape_cast %44 : vector<1x1x4x125xbf16> to vector<4x125xbf16>
    %c7 = arith.constant 7 : index
    %c0_55 = arith.constant 0 : index
    %c0_56 = arith.constant 0 : index
    %46 = vector.load %arg2[%c7, %c0_55, %c0_56] : memref<27x8x4xbf16, #tpu.memory_space<vmem>>, vector<1x8x4xbf16>
    %47 = vector.shape_cast %46 : vector<1x8x4xbf16> to vector<8x4xbf16>
    %cst_57 = arith.constant dense<0.000000e+00> : vector<8x125xf32>
    %48 = tpu.matmul %47, %45, %cst_57 {dimension_numbers = #tpu.dot_dimension_numbers<[1], [0], [0], [1], [0, 0, 1, 1], [], []>} : vector<8x4xbf16>, vector<4x125xbf16>, vector<8x125xf32> -> vector<8x125xf32>
    %49 = arith.addf %43, %48 : vector<8x125xf32>
    %c0_58 = arith.constant 0 : index
    %c3_59 = arith.constant 3 : index
    %c0_60 = arith.constant 0 : index
    %c6_61 = arith.constant 6 : index
    %50 = vector.load %arg1[%c0_58, %c3_59, %c0_60, %c6_61] : memref<1x8x4x156xbf16, #tpu.memory_space<vmem>>, vector<1x1x4x125xbf16>
    %51 = vector.shape_cast %50 : vector<1x1x4x125xbf16> to vector<4x125xbf16>
    %c8 = arith.constant 8 : index
    %c0_62 = arith.constant 0 : index
    %c0_63 = arith.constant 0 : index
    %52 = vector.load %arg2[%c8, %c0_62, %c0_63] : memref<27x8x4xbf16, #tpu.memory_space<vmem>>, vector<1x8x4xbf16>
    %53 = vector.shape_cast %52 : vector<1x8x4xbf16> to vector<8x4xbf16>
    %cst_64 = arith.constant dense<0.000000e+00> : vector<8x125xf32>
    %54 = tpu.matmul %53, %51, %cst_64 {dimension_numbers = #tpu.dot_dimension_numbers<[1], [0], [0], [1], [0, 0, 1, 1], [], []>} : vector<8x4xbf16>, vector<4x125xbf16>, vector<8x125xf32> -> vector<8x125xf32>
    %55 = arith.addf %49, %54 : vector<8x125xf32>
    %c0_65 = arith.constant 0 : index
    %c4_66 = arith.constant 4 : index
    %c0_67 = arith.constant 0 : index
    %c0_68 = arith.constant 0 : index
    %56 = vector.load %arg1[%c0_65, %c4_66, %c0_67, %c0_68] : memref<1x8x4x156xbf16, #tpu.memory_space<vmem>>, vector<1x1x4x125xbf16>
    %57 = vector.shape_cast %56 : vector<1x1x4x125xbf16> to vector<4x125xbf16>
    %c9 = arith.constant 9 : index
    %c0_69 = arith.constant 0 : index
    %c0_70 = arith.constant 0 : index
    %58 = vector.load %arg2[%c9, %c0_69, %c0_70] : memref<27x8x4xbf16, #tpu.memory_space<vmem>>, vector<1x8x4xbf16>
    %59 = vector.shape_cast %58 : vector<1x8x4xbf16> to vector<8x4xbf16>
    %cst_71 = arith.constant dense<0.000000e+00> : vector<8x125xf32>
    %60 = tpu.matmul %59, %57, %cst_71 {dimension_numbers = #tpu.dot_dimension_numbers<[1], [0], [0], [1], [0, 0, 1, 1], [], []>} : vector<8x4xbf16>, vector<4x125xbf16>, vector<8x125xf32> -> vector<8x125xf32>
    %61 = arith.addf %55, %60 : vector<8x125xf32>
    %c0_72 = arith.constant 0 : index
    %c4_73 = arith.constant 4 : index
    %c0_74 = arith.constant 0 : index
    %c25 = arith.constant 25 : index
    %62 = vector.load %arg1[%c0_72, %c4_73, %c0_74, %c25] : memref<1x8x4x156xbf16, #tpu.memory_space<vmem>>, vector<1x1x4x125xbf16>
    %63 = vector.shape_cast %62 : vector<1x1x4x125xbf16> to vector<4x125xbf16>
    %c10 = arith.constant 10 : index
    %c0_75 = arith.constant 0 : index
    %c0_76 = arith.constant 0 : index
    %64 = vector.load %arg2[%c10, %c0_75, %c0_76] : memref<27x8x4xbf16, #tpu.memory_space<vmem>>, vector<1x8x4xbf16>
    %65 = vector.shape_cast %64 : vector<1x8x4xbf16> to vector<8x4xbf16>
    %cst_77 = arith.constant dense<0.000000e+00> : vector<8x125xf32>
    %66 = tpu.matmul %65, %63, %cst_77 {dimension_numbers = #tpu.dot_dimension_numbers<[1], [0], [0], [1], [0, 0, 1, 1], [], []>} : vector<8x4xbf16>, vector<4x125xbf16>, vector<8x125xf32> -> vector<8x125xf32>
    %67 = arith.addf %61, %66 : vector<8x125xf32>
    %c0_78 = arith.constant 0 : index
    %c5_79 = arith.constant 5 : index
    %c0_80 = arith.constant 0 : index
    %c0_81 = arith.constant 0 : index
    %68 = vector.load %arg1[%c0_78, %c5_79, %c0_80, %c0_81] : memref<1x8x4x156xbf16, #tpu.memory_space<vmem>>, vector<1x1x4x125xbf16>
    %69 = vector.shape_cast %68 : vector<1x1x4x125xbf16> to vector<4x125xbf16>
    %c11 = arith.constant 11 : index
    %c0_82 = arith.constant 0 : index
    %c0_83 = arith.constant 0 : index
    %70 = vector.load %arg2[%c11, %c0_82, %c0_83] : memref<27x8x4xbf16, #tpu.memory_space<vmem>>, vector<1x8x4xbf16>
    %71 = vector.shape_cast %70 : vector<1x8x4xbf16> to vector<8x4xbf16>
    %cst_84 = arith.constant dense<0.000000e+00> : vector<8x125xf32>
    %72 = tpu.matmul %71, %69, %cst_84 {dimension_numbers = #tpu.dot_dimension_numbers<[1], [0], [0], [1], [0, 0, 1, 1], [], []>} : vector<8x4xbf16>, vector<4x125xbf16>, vector<8x125xf32> -> vector<8x125xf32>
    %73 = arith.addf %67, %72 : vector<8x125xf32>
    %c0_85 = arith.constant 0 : index
    %c5_86 = arith.constant 5 : index
    %c0_87 = arith.constant 0 : index
    %c1_88 = arith.constant 1 : index
    %74 = vector.load %arg1[%c0_85, %c5_86, %c0_87, %c1_88] : memref<1x8x4x156xbf16, #tpu.memory_space<vmem>>, vector<1x1x4x125xbf16>
    %75 = vector.shape_cast %74 : vector<1x1x4x125xbf16> to vector<4x125xbf16>
    %c12 = arith.constant 12 : index
    %c0_89 = arith.constant 0 : index
    %c0_90 = arith.constant 0 : index
    %76 = vector.load %arg2[%c12, %c0_89, %c0_90] : memref<27x8x4xbf16, #tpu.memory_space<vmem>>, vector<1x8x4xbf16>
    %77 = vector.shape_cast %76 : vector<1x8x4xbf16> to vector<8x4xbf16>
    %cst_91 = arith.constant dense<0.000000e+00> : vector<8x125xf32>
    %78 = tpu.matmul %77, %75, %cst_91 {dimension_numbers = #tpu.dot_dimension_numbers<[1], [0], [0], [1], [0, 0, 1, 1], [], []>} : vector<8x4xbf16>, vector<4x125xbf16>, vector<8x125xf32> -> vector<8x125xf32>
    %79 = arith.addf %73, %78 : vector<8x125xf32>
    %c0_92 = arith.constant 0 : index
    %c5_93 = arith.constant 5 : index
    %c0_94 = arith.constant 0 : index
    %c25_95 = arith.constant 25 : index
    %80 = vector.load %arg1[%c0_92, %c5_93, %c0_94, %c25_95] : memref<1x8x4x156xbf16, #tpu.memory_space<vmem>>, vector<1x1x4x125xbf16>
    %81 = vector.shape_cast %80 : vector<1x1x4x125xbf16> to vector<4x125xbf16>
    %c13 = arith.constant 13 : index
    %c0_96 = arith.constant 0 : index
    %c0_97 = arith.constant 0 : index
    %82 = vector.load %arg2[%c13, %c0_96, %c0_97] : memref<27x8x4xbf16, #tpu.memory_space<vmem>>, vector<1x8x4xbf16>
    %83 = vector.shape_cast %82 : vector<1x8x4xbf16> to vector<8x4xbf16>
    %cst_98 = arith.constant dense<0.000000e+00> : vector<8x125xf32>
    %84 = tpu.matmul %83, %81, %cst_98 {dimension_numbers = #tpu.dot_dimension_numbers<[1], [0], [0], [1], [0, 0, 1, 1], [], []>} : vector<8x4xbf16>, vector<4x125xbf16>, vector<8x125xf32> -> vector<8x125xf32>
    %85 = arith.addf %79, %84 : vector<8x125xf32>
    %c0_99 = arith.constant 0 : index
    %c5_100 = arith.constant 5 : index
    %c0_101 = arith.constant 0 : index
    %c26 = arith.constant 26 : index
    %86 = vector.load %arg1[%c0_99, %c5_100, %c0_101, %c26] : memref<1x8x4x156xbf16, #tpu.memory_space<vmem>>, vector<1x1x4x125xbf16>
    %87 = vector.shape_cast %86 : vector<1x1x4x125xbf16> to vector<4x125xbf16>
    %c14 = arith.constant 14 : index
    %c0_102 = arith.constant 0 : index
    %c0_103 = arith.constant 0 : index
    %88 = vector.load %arg2[%c14, %c0_102, %c0_103] : memref<27x8x4xbf16, #tpu.memory_space<vmem>>, vector<1x8x4xbf16>
    %89 = vector.shape_cast %88 : vector<1x8x4xbf16> to vector<8x4xbf16>
    %cst_104 = arith.constant dense<0.000000e+00> : vector<8x125xf32>
    %90 = tpu.matmul %89, %87, %cst_104 {dimension_numbers = #tpu.dot_dimension_numbers<[1], [0], [0], [1], [0, 0, 1, 1], [], []>} : vector<8x4xbf16>, vector<4x125xbf16>, vector<8x125xf32> -> vector<8x125xf32>
    %91 = arith.addf %85, %90 : vector<8x125xf32>
    %c0_105 = arith.constant 0 : index
    %c6_106 = arith.constant 6 : index
    %c0_107 = arith.constant 0 : index
    %c0_108 = arith.constant 0 : index
    %92 = vector.load %arg1[%c0_105, %c6_106, %c0_107, %c0_108] : memref<1x8x4x156xbf16, #tpu.memory_space<vmem>>, vector<1x1x4x125xbf16>
    %93 = vector.shape_cast %92 : vector<1x1x4x125xbf16> to vector<4x125xbf16>
    %c15 = arith.constant 15 : index
    %c0_109 = arith.constant 0 : index
    %c0_110 = arith.constant 0 : index
    %94 = vector.load %arg2[%c15, %c0_109, %c0_110] : memref<27x8x4xbf16, #tpu.memory_space<vmem>>, vector<1x8x4xbf16>
    %95 = vector.shape_cast %94 : vector<1x8x4xbf16> to vector<8x4xbf16>
    %cst_111 = arith.constant dense<0.000000e+00> : vector<8x125xf32>
    %96 = tpu.matmul %95, %93, %cst_111 {dimension_numbers = #tpu.dot_dimension_numbers<[1], [0], [0], [1], [0, 0, 1, 1], [], []>} : vector<8x4xbf16>, vector<4x125xbf16>, vector<8x125xf32> -> vector<8x125xf32>
    %97 = arith.addf %91, %96 : vector<8x125xf32>
    %c0_112 = arith.constant 0 : index
    %c6_113 = arith.constant 6 : index
    %c0_114 = arith.constant 0 : index
    %c5_115 = arith.constant 5 : index
    %98 = vector.load %arg1[%c0_112, %c6_113, %c0_114, %c5_115] : memref<1x8x4x156xbf16, #tpu.memory_space<vmem>>, vector<1x1x4x125xbf16>
    %99 = vector.shape_cast %98 : vector<1x1x4x125xbf16> to vector<4x125xbf16>
    %c16 = arith.constant 16 : index
    %c0_116 = arith.constant 0 : index
    %c0_117 = arith.constant 0 : index
    %100 = vector.load %arg2[%c16, %c0_116, %c0_117] : memref<27x8x4xbf16, #tpu.memory_space<vmem>>, vector<1x8x4xbf16>
    %101 = vector.shape_cast %100 : vector<1x8x4xbf16> to vector<8x4xbf16>
    %cst_118 = arith.constant dense<0.000000e+00> : vector<8x125xf32>
    %102 = tpu.matmul %101, %99, %cst_118 {dimension_numbers = #tpu.dot_dimension_numbers<[1], [0], [0], [1], [0, 0, 1, 1], [], []>} : vector<8x4xbf16>, vector<4x125xbf16>, vector<8x125xf32> -> vector<8x125xf32>
    %103 = arith.addf %97, %102 : vector<8x125xf32>
    %c0_119 = arith.constant 0 : index
    %c6_120 = arith.constant 6 : index
    %c0_121 = arith.constant 0 : index
    %c25_122 = arith.constant 25 : index
    %104 = vector.load %arg1[%c0_119, %c6_120, %c0_121, %c25_122] : memref<1x8x4x156xbf16, #tpu.memory_space<vmem>>, vector<1x1x4x125xbf16>
    %105 = vector.shape_cast %104 : vector<1x1x4x125xbf16> to vector<4x125xbf16>
    %c17 = arith.constant 17 : index
    %c0_123 = arith.constant 0 : index
    %c0_124 = arith.constant 0 : index
    %106 = vector.load %arg2[%c17, %c0_123, %c0_124] : memref<27x8x4xbf16, #tpu.memory_space<vmem>>, vector<1x8x4xbf16>
    %107 = vector.shape_cast %106 : vector<1x8x4xbf16> to vector<8x4xbf16>
    %cst_125 = arith.constant dense<0.000000e+00> : vector<8x125xf32>
    %108 = tpu.matmul %107, %105, %cst_125 {dimension_numbers = #tpu.dot_dimension_numbers<[1], [0], [0], [1], [0, 0, 1, 1], [], []>} : vector<8x4xbf16>, vector<4x125xbf16>, vector<8x125xf32> -> vector<8x125xf32>
    %109 = arith.addf %103, %108 : vector<8x125xf32>
    %c0_126 = arith.constant 0 : index
    %c6_127 = arith.constant 6 : index
    %c0_128 = arith.constant 0 : index
    %c30 = arith.constant 30 : index
    %110 = vector.load %arg1[%c0_126, %c6_127, %c0_128, %c30] : memref<1x8x4x156xbf16, #tpu.memory_space<vmem>>, vector<1x1x4x125xbf16>
    %111 = vector.shape_cast %110 : vector<1x1x4x125xbf16> to vector<4x125xbf16>
    %c18 = arith.constant 18 : index
    %c0_129 = arith.constant 0 : index
    %c0_130 = arith.constant 0 : index
    %112 = vector.load %arg2[%c18, %c0_129, %c0_130] : memref<27x8x4xbf16, #tpu.memory_space<vmem>>, vector<1x8x4xbf16>
    %113 = vector.shape_cast %112 : vector<1x8x4xbf16> to vector<8x4xbf16>
    %cst_131 = arith.constant dense<0.000000e+00> : vector<8x125xf32>
    %114 = tpu.matmul %113, %111, %cst_131 {dimension_numbers = #tpu.dot_dimension_numbers<[1], [0], [0], [1], [0, 0, 1, 1], [], []>} : vector<8x4xbf16>, vector<4x125xbf16>, vector<8x125xf32> -> vector<8x125xf32>
    %115 = arith.addf %109, %114 : vector<8x125xf32>
    %c0_132 = arith.constant 0 : index
    %c7_133 = arith.constant 7 : index
    %c0_134 = arith.constant 0 : index
    %c0_135 = arith.constant 0 : index
    %116 = vector.load %arg1[%c0_132, %c7_133, %c0_134, %c0_135] : memref<1x8x4x156xbf16, #tpu.memory_space<vmem>>, vector<1x1x4x125xbf16>
    %117 = vector.shape_cast %116 : vector<1x1x4x125xbf16> to vector<4x125xbf16>
    %c19 = arith.constant 19 : index
    %c0_136 = arith.constant 0 : index
    %c0_137 = arith.constant 0 : index
    %118 = vector.load %arg2[%c19, %c0_136, %c0_137] : memref<27x8x4xbf16, #tpu.memory_space<vmem>>, vector<1x8x4xbf16>
    %119 = vector.shape_cast %118 : vector<1x8x4xbf16> to vector<8x4xbf16>
    %cst_138 = arith.constant dense<0.000000e+00> : vector<8x125xf32>
    %120 = tpu.matmul %119, %117, %cst_138 {dimension_numbers = #tpu.dot_dimension_numbers<[1], [0], [0], [1], [0, 0, 1, 1], [], []>} : vector<8x4xbf16>, vector<4x125xbf16>, vector<8x125xf32> -> vector<8x125xf32>
    %121 = arith.addf %115, %120 : vector<8x125xf32>
    %c0_139 = arith.constant 0 : index
    %c7_140 = arith.constant 7 : index
    %c0_141 = arith.constant 0 : index
    %c1_142 = arith.constant 1 : index
    %122 = vector.load %arg1[%c0_139, %c7_140, %c0_141, %c1_142] : memref<1x8x4x156xbf16, #tpu.memory_space<vmem>>, vector<1x1x4x125xbf16>
    %123 = vector.shape_cast %122 : vector<1x1x4x125xbf16> to vector<4x125xbf16>
    %c20 = arith.constant 20 : index
    %c0_143 = arith.constant 0 : index
    %c0_144 = arith.constant 0 : index
    %124 = vector.load %arg2[%c20, %c0_143, %c0_144] : memref<27x8x4xbf16, #tpu.memory_space<vmem>>, vector<1x8x4xbf16>
    %125 = vector.shape_cast %124 : vector<1x8x4xbf16> to vector<8x4xbf16>
    %cst_145 = arith.constant dense<0.000000e+00> : vector<8x125xf32>
    %126 = tpu.matmul %125, %123, %cst_145 {dimension_numbers = #tpu.dot_dimension_numbers<[1], [0], [0], [1], [0, 0, 1, 1], [], []>} : vector<8x4xbf16>, vector<4x125xbf16>, vector<8x125xf32> -> vector<8x125xf32>
    %127 = arith.addf %121, %126 : vector<8x125xf32>
    %c0_146 = arith.constant 0 : index
    %c7_147 = arith.constant 7 : index
    %c0_148 = arith.constant 0 : index
    %c5_149 = arith.constant 5 : index
    %128 = vector.load %arg1[%c0_146, %c7_147, %c0_148, %c5_149] : memref<1x8x4x156xbf16, #tpu.memory_space<vmem>>, vector<1x1x4x125xbf16>
    %129 = vector.shape_cast %128 : vector<1x1x4x125xbf16> to vector<4x125xbf16>
    %c21 = arith.constant 21 : index
    %c0_150 = arith.constant 0 : index
    %c0_151 = arith.constant 0 : index
    %130 = vector.load %arg2[%c21, %c0_150, %c0_151] : memref<27x8x4xbf16, #tpu.memory_space<vmem>>, vector<1x8x4xbf16>
    %131 = vector.shape_cast %130 : vector<1x8x4xbf16> to vector<8x4xbf16>
    %cst_152 = arith.constant dense<0.000000e+00> : vector<8x125xf32>
    %132 = tpu.matmul %131, %129, %cst_152 {dimension_numbers = #tpu.dot_dimension_numbers<[1], [0], [0], [1], [0, 0, 1, 1], [], []>} : vector<8x4xbf16>, vector<4x125xbf16>, vector<8x125xf32> -> vector<8x125xf32>
    %133 = arith.addf %127, %132 : vector<8x125xf32>
    %c0_153 = arith.constant 0 : index
    %c7_154 = arith.constant 7 : index
    %c0_155 = arith.constant 0 : index
    %c6_156 = arith.constant 6 : index
    %134 = vector.load %arg1[%c0_153, %c7_154, %c0_155, %c6_156] : memref<1x8x4x156xbf16, #tpu.memory_space<vmem>>, vector<1x1x4x125xbf16>
    %135 = vector.shape_cast %134 : vector<1x1x4x125xbf16> to vector<4x125xbf16>
    %c22 = arith.constant 22 : index
    %c0_157 = arith.constant 0 : index
    %c0_158 = arith.constant 0 : index
    %136 = vector.load %arg2[%c22, %c0_157, %c0_158] : memref<27x8x4xbf16, #tpu.memory_space<vmem>>, vector<1x8x4xbf16>
    %137 = vector.shape_cast %136 : vector<1x8x4xbf16> to vector<8x4xbf16>
    %cst_159 = arith.constant dense<0.000000e+00> : vector<8x125xf32>
    %138 = tpu.matmul %137, %135, %cst_159 {dimension_numbers = #tpu.dot_dimension_numbers<[1], [0], [0], [1], [0, 0, 1, 1], [], []>} : vector<8x4xbf16>, vector<4x125xbf16>, vector<8x125xf32> -> vector<8x125xf32>
    %139 = arith.addf %133, %138 : vector<8x125xf32>
    %c0_160 = arith.constant 0 : index
    %c7_161 = arith.constant 7 : index
    %c0_162 = arith.constant 0 : index
    %c25_163 = arith.constant 25 : index
    %140 = vector.load %arg1[%c0_160, %c7_161, %c0_162, %c25_163] : memref<1x8x4x156xbf16, #tpu.memory_space<vmem>>, vector<1x1x4x125xbf16>
    %141 = vector.shape_cast %140 : vector<1x1x4x125xbf16> to vector<4x125xbf16>
    %c23 = arith.constant 23 : index
    %c0_164 = arith.constant 0 : index
    %c0_165 = arith.constant 0 : index
    %142 = vector.load %arg2[%c23, %c0_164, %c0_165] : memref<27x8x4xbf16, #tpu.memory_space<vmem>>, vector<1x8x4xbf16>
    %143 = vector.shape_cast %142 : vector<1x8x4xbf16> to vector<8x4xbf16>
    %cst_166 = arith.constant dense<0.000000e+00> : vector<8x125xf32>
    %144 = tpu.matmul %143, %141, %cst_166 {dimension_numbers = #tpu.dot_dimension_numbers<[1], [0], [0], [1], [0, 0, 1, 1], [], []>} : vector<8x4xbf16>, vector<4x125xbf16>, vector<8x125xf32> -> vector<8x125xf32>
    %145 = arith.addf %139, %144 : vector<8x125xf32>
    %c0_167 = arith.constant 0 : index
    %c7_168 = arith.constant 7 : index
    %c0_169 = arith.constant 0 : index
    %c26_170 = arith.constant 26 : index
    %146 = vector.load %arg1[%c0_167, %c7_168, %c0_169, %c26_170] : memref<1x8x4x156xbf16, #tpu.memory_space<vmem>>, vector<1x1x4x125xbf16>
    %147 = vector.shape_cast %146 : vector<1x1x4x125xbf16> to vector<4x125xbf16>
    %c24 = arith.constant 24 : index
    %c0_171 = arith.constant 0 : index
    %c0_172 = arith.constant 0 : index
    %148 = vector.load %arg2[%c24, %c0_171, %c0_172] : memref<27x8x4xbf16, #tpu.memory_space<vmem>>, vector<1x8x4xbf16>
    %149 = vector.shape_cast %148 : vector<1x8x4xbf16> to vector<8x4xbf16>
    %cst_173 = arith.constant dense<0.000000e+00> : vector<8x125xf32>
    %150 = tpu.matmul %149, %147, %cst_173 {dimension_numbers = #tpu.dot_dimension_numbers<[1], [0], [0], [1], [0, 0, 1, 1], [], []>} : vector<8x4xbf16>, vector<4x125xbf16>, vector<8x125xf32> -> vector<8x125xf32>
    %151 = arith.addf %145, %150 : vector<8x125xf32>
    %c0_174 = arith.constant 0 : index
    %c7_175 = arith.constant 7 : index
    %c0_176 = arith.constant 0 : index
    %c30_177 = arith.constant 30 : index
    %152 = vector.load %arg1[%c0_174, %c7_175, %c0_176, %c30_177] : memref<1x8x4x156xbf16, #tpu.memory_space<vmem>>, vector<1x1x4x125xbf16>
    %153 = vector.shape_cast %152 : vector<1x1x4x125xbf16> to vector<4x125xbf16>
    %c25_178 = arith.constant 25 : index
    %c0_179 = arith.constant 0 : index
    %c0_180 = arith.constant 0 : index
    %154 = vector.load %arg2[%c25_178, %c0_179, %c0_180] : memref<27x8x4xbf16, #tpu.memory_space<vmem>>, vector<1x8x4xbf16>
    %155 = vector.shape_cast %154 : vector<1x8x4xbf16> to vector<8x4xbf16>
    %cst_181 = arith.constant dense<0.000000e+00> : vector<8x125xf32>
    %156 = tpu.matmul %155, %153, %cst_181 {dimension_numbers = #tpu.dot_dimension_numbers<[1], [0], [0], [1], [0, 0, 1, 1], [], []>} : vector<8x4xbf16>, vector<4x125xbf16>, vector<8x125xf32> -> vector<8x125xf32>
    %157 = arith.addf %151, %156 : vector<8x125xf32>
    %c0_182 = arith.constant 0 : index
    %c7_183 = arith.constant 7 : index
    %c0_184 = arith.constant 0 : index
    %c31 = arith.constant 31 : index
    %158 = vector.load %arg1[%c0_182, %c7_183, %c0_184, %c31] : memref<1x8x4x156xbf16, #tpu.memory_space<vmem>>, vector<1x1x4x125xbf16>
    %159 = vector.shape_cast %158 : vector<1x1x4x125xbf16> to vector<4x125xbf16>
    %c26_185 = arith.constant 26 : index
    %c0_186 = arith.constant 0 : index
    %c0_187 = arith.constant 0 : index
    %160 = vector.load %arg2[%c26_185, %c0_186, %c0_187] : memref<27x8x4xbf16, #tpu.memory_space<vmem>>, vector<1x8x4xbf16>
    %161 = vector.shape_cast %160 : vector<1x8x4xbf16> to vector<8x4xbf16>
    %cst_188 = arith.constant dense<0.000000e+00> : vector<8x125xf32>
    %162 = tpu.matmul %161, %159, %cst_188 {dimension_numbers = #tpu.dot_dimension_numbers<[1], [0], [0], [1], [0, 0, 1, 1], [], []>} : vector<8x4xbf16>, vector<4x125xbf16>, vector<8x125xf32> -> vector<8x125xf32>
    %163 = arith.addf %157, %162 : vector<8x125xf32>
    %164 = vector.broadcast %0 : vector<8x1xf32> to vector<8x125xf32>
    %165 = arith.addf %163, %164 : vector<8x125xf32>
    %cst_189 = arith.constant 0.000000e+00 : f32
    %166 = vector.broadcast %cst_189 : f32 to vector<8x125xf32>
    %167 = arith.maximumf %165, %166 : vector<8x125xf32>
    %168 = arith.truncf %167 : vector<8x125xf32> to vector<8x125xbf16>
    %c0_190 = arith.constant 0 : index
    %c0_191 = arith.constant 0 : index
    %c0_192 = arith.constant 0 : index
    %c0_193 = arith.constant 0 : index
    %169 = vector.load %arg4[%c0_190, %c0_191, %c0_192, %c0_193] : memref<1x1x8x125xbf16, #tpu.memory_space<vmem>>, vector<1x1x8x125xbf16>
    %170 = vector.shape_cast %169 : vector<1x1x8x125xbf16> to vector<8x125xbf16>
    %171 = vector.shape_cast %168 : vector<8x125xbf16> to vector<1x1x8x125xbf16>
    tpu.vector_store %arg4[%c0_190, %c0_191, %c0_192, %c0_193], %171 {strides = array<i32>} : memref<1x1x8x125xbf16, #tpu.memory_space<vmem>>, vector<1x1x8x125xbf16>,
    return
  }
  func.func @transform_0(%arg0: i32) -> (i32, i32, i32, i32) {
    %c0_i32 = arith.constant 0 : i32
    %c0_i32_0 = arith.constant 0 : i32
    %c0_i32_1 = arith.constant 0 : i32
    %c0_i32_2 = arith.constant 0 : i32
    return %arg0, %c0_i32, %c0_i32_0, %c0_i32_1 : i32, i32, i32, i32
  }
  func.func @transform_1(%arg0: i32) -> (i32, i32, i32) {
    %c0_i32 = arith.constant 0 : i32
    %c0_i32_0 = arith.constant 0 : i32
    %c0_i32_1 = arith.constant 0 : i32
    %c0_i32_2 = arith.constant 0 : i32
    return %c0_i32, %c0_i32_0, %c0_i32_1 : i32, i32, i32
  }
  func.func @transform_2(%arg0: i32) -> (i32, i32) {
    %c0_i32 = arith.constant 0 : i32
    %c0_i32_0 = arith.constant 0 : i32
    %c0_i32_1 = arith.constant 0 : i32
    return %c0_i32, %c0_i32_0 : i32, i32
  }
  func.func @transform_3(%arg0: i32) -> (i32, i32, i32, i32) {
    %c0_i32 = arith.constant 0 : i32
    %c0_i32_0 = arith.constant 0 : i32
    %c0_i32_1 = arith.constant 0 : i32
    %c0_i32_2 = arith.constant 0 : i32
    return %arg0, %c0_i32, %c0_i32_0, %c0_i32_1 : i32, i32, i32, i32
  }
}

module attributes {stable_mosaic.version = 11 : i64} {
  func.func @_grouped_tap_conv_kernel(%arg0: i32, %arg1: memref<1x1x8x302xbf16, #tpu.memory_space<vmem>>, %arg2: memref<27x8x8xbf16, #tpu.memory_space<vmem>>, %arg3: memref<8x1xf32, #tpu.memory_space<vmem>>, %arg4: memref<1x1x8x216xbf16, #tpu.memory_space<vmem>>) attributes {dimension_semantics = [#tpu.dimension_semantics<parallel>], iteration_bounds = array<i64: 2>, scalar_prefetch = 0 : i64, scratch_operands = 0 : i64, tpu.core_type = #tpu.core_type<tc>, window_params = [{transform_indices = @transform_0, window_bounds = array<i64: 1, 1, 8, 302>}, {pipeline_mode = #tpu.pipeline_mode<synchronous>, transform_indices = @transform_1, window_bounds = array<i64: 27, 8, 8>}, {pipeline_mode = #tpu.pipeline_mode<synchronous>, transform_indices = @transform_2, window_bounds = array<i64: 8, 1>}, {transform_indices = @transform_3, window_bounds = array<i64: 1, 1, 8, 216>}]} {
    %c0 = arith.constant 0 : index
    %c0_0 = arith.constant 0 : index
    %0 = vector.load %arg3[%c0, %c0_0] : memref<8x1xf32, #tpu.memory_space<vmem>>, vector<8x1xf32>
    %cst = arith.constant 0.000000e+00 : f32
    %1 = vector.broadcast %cst : f32 to vector<8x216xf32>
    %c0_1 = arith.constant 0 : index
    %c0_2 = arith.constant 0 : index
    %c0_3 = arith.constant 0 : index
    %c0_4 = arith.constant 0 : index
    %2 = vector.load %arg1[%c0_1, %c0_2, %c0_3, %c0_4] : memref<1x1x8x302xbf16, #tpu.memory_space<vmem>>, vector<1x1x8x216xbf16>
    %3 = vector.shape_cast %2 : vector<1x1x8x216xbf16> to vector<8x216xbf16>
    %c0_5 = arith.constant 0 : index
    %c0_6 = arith.constant 0 : index
    %c0_7 = arith.constant 0 : index
    %4 = vector.load %arg2[%c0_5, %c0_6, %c0_7] : memref<27x8x8xbf16, #tpu.memory_space<vmem>>, vector<1x8x8xbf16>
    %5 = vector.shape_cast %4 : vector<1x8x8xbf16> to vector<8x8xbf16>
    %cst_8 = arith.constant dense<0.000000e+00> : vector<8x216xf32>
    %6 = tpu.matmul %5, %3, %cst_8 {dimension_numbers = #tpu.dot_dimension_numbers<[1], [0], [0], [1], [0, 0, 1, 1], [], []>} : vector<8x8xbf16>, vector<8x216xbf16>, vector<8x216xf32> -> vector<8x216xf32>
    %7 = arith.addf %1, %6 : vector<8x216xf32>
    %c0_9 = arith.constant 0 : index
    %c0_10 = arith.constant 0 : index
    %c0_11 = arith.constant 0 : index
    %c1 = arith.constant 1 : index
    %8 = vector.load %arg1[%c0_9, %c0_10, %c0_11, %c1] : memref<1x1x8x302xbf16, #tpu.memory_space<vmem>>, vector<1x1x8x216xbf16>
    %9 = vector.shape_cast %8 : vector<1x1x8x216xbf16> to vector<8x216xbf16>
    %c1_12 = arith.constant 1 : index
    %c0_13 = arith.constant 0 : index
    %c0_14 = arith.constant 0 : index
    %10 = vector.load %arg2[%c1_12, %c0_13, %c0_14] : memref<27x8x8xbf16, #tpu.memory_space<vmem>>, vector<1x8x8xbf16>
    %11 = vector.shape_cast %10 : vector<1x8x8xbf16> to vector<8x8xbf16>
    %cst_15 = arith.constant dense<0.000000e+00> : vector<8x216xf32>
    %12 = tpu.matmul %11, %9, %cst_15 {dimension_numbers = #tpu.dot_dimension_numbers<[1], [0], [0], [1], [0, 0, 1, 1], [], []>} : vector<8x8xbf16>, vector<8x216xbf16>, vector<8x216xf32> -> vector<8x216xf32>
    %13 = arith.addf %7, %12 : vector<8x216xf32>
    %c0_16 = arith.constant 0 : index
    %c0_17 = arith.constant 0 : index
    %c0_18 = arith.constant 0 : index
    %c2 = arith.constant 2 : index
    %14 = vector.load %arg1[%c0_16, %c0_17, %c0_18, %c2] : memref<1x1x8x302xbf16, #tpu.memory_space<vmem>>, vector<1x1x8x216xbf16>
    %15 = vector.shape_cast %14 : vector<1x1x8x216xbf16> to vector<8x216xbf16>
    %c2_19 = arith.constant 2 : index
    %c0_20 = arith.constant 0 : index
    %c0_21 = arith.constant 0 : index
    %16 = vector.load %arg2[%c2_19, %c0_20, %c0_21] : memref<27x8x8xbf16, #tpu.memory_space<vmem>>, vector<1x8x8xbf16>
    %17 = vector.shape_cast %16 : vector<1x8x8xbf16> to vector<8x8xbf16>
    %cst_22 = arith.constant dense<0.000000e+00> : vector<8x216xf32>
    %18 = tpu.matmul %17, %15, %cst_22 {dimension_numbers = #tpu.dot_dimension_numbers<[1], [0], [0], [1], [0, 0, 1, 1], [], []>} : vector<8x8xbf16>, vector<8x216xbf16>, vector<8x216xf32> -> vector<8x216xf32>
    %19 = arith.addf %13, %18 : vector<8x216xf32>
    %c0_23 = arith.constant 0 : index
    %c0_24 = arith.constant 0 : index
    %c0_25 = arith.constant 0 : index
    %c6 = arith.constant 6 : index
    %20 = vector.load %arg1[%c0_23, %c0_24, %c0_25, %c6] : memref<1x1x8x302xbf16, #tpu.memory_space<vmem>>, vector<1x1x8x216xbf16>
    %21 = vector.shape_cast %20 : vector<1x1x8x216xbf16> to vector<8x216xbf16>
    %c3 = arith.constant 3 : index
    %c0_26 = arith.constant 0 : index
    %c0_27 = arith.constant 0 : index
    %22 = vector.load %arg2[%c3, %c0_26, %c0_27] : memref<27x8x8xbf16, #tpu.memory_space<vmem>>, vector<1x8x8xbf16>
    %23 = vector.shape_cast %22 : vector<1x8x8xbf16> to vector<8x8xbf16>
    %cst_28 = arith.constant dense<0.000000e+00> : vector<8x216xf32>
    %24 = tpu.matmul %23, %21, %cst_28 {dimension_numbers = #tpu.dot_dimension_numbers<[1], [0], [0], [1], [0, 0, 1, 1], [], []>} : vector<8x8xbf16>, vector<8x216xbf16>, vector<8x216xf32> -> vector<8x216xf32>
    %25 = arith.addf %19, %24 : vector<8x216xf32>
    %c0_29 = arith.constant 0 : index
    %c0_30 = arith.constant 0 : index
    %c0_31 = arith.constant 0 : index
    %c7 = arith.constant 7 : index
    %26 = vector.load %arg1[%c0_29, %c0_30, %c0_31, %c7] : memref<1x1x8x302xbf16, #tpu.memory_space<vmem>>, vector<1x1x8x216xbf16>
    %27 = vector.shape_cast %26 : vector<1x1x8x216xbf16> to vector<8x216xbf16>
    %c4 = arith.constant 4 : index
    %c0_32 = arith.constant 0 : index
    %c0_33 = arith.constant 0 : index
    %28 = vector.load %arg2[%c4, %c0_32, %c0_33] : memref<27x8x8xbf16, #tpu.memory_space<vmem>>, vector<1x8x8xbf16>
    %29 = vector.shape_cast %28 : vector<1x8x8xbf16> to vector<8x8xbf16>
    %cst_34 = arith.constant dense<0.000000e+00> : vector<8x216xf32>
    %30 = tpu.matmul %29, %27, %cst_34 {dimension_numbers = #tpu.dot_dimension_numbers<[1], [0], [0], [1], [0, 0, 1, 1], [], []>} : vector<8x8xbf16>, vector<8x216xbf16>, vector<8x216xf32> -> vector<8x216xf32>
    %31 = arith.addf %25, %30 : vector<8x216xf32>
    %c0_35 = arith.constant 0 : index
    %c0_36 = arith.constant 0 : index
    %c0_37 = arith.constant 0 : index
    %c8 = arith.constant 8 : index
    %32 = vector.load %arg1[%c0_35, %c0_36, %c0_37, %c8] : memref<1x1x8x302xbf16, #tpu.memory_space<vmem>>, vector<1x1x8x216xbf16>
    %33 = vector.shape_cast %32 : vector<1x1x8x216xbf16> to vector<8x216xbf16>
    %c5 = arith.constant 5 : index
    %c0_38 = arith.constant 0 : index
    %c0_39 = arith.constant 0 : index
    %34 = vector.load %arg2[%c5, %c0_38, %c0_39] : memref<27x8x8xbf16, #tpu.memory_space<vmem>>, vector<1x8x8xbf16>
    %35 = vector.shape_cast %34 : vector<1x8x8xbf16> to vector<8x8xbf16>
    %cst_40 = arith.constant dense<0.000000e+00> : vector<8x216xf32>
    %36 = tpu.matmul %35, %33, %cst_40 {dimension_numbers = #tpu.dot_dimension_numbers<[1], [0], [0], [1], [0, 0, 1, 1], [], []>} : vector<8x8xbf16>, vector<8x216xbf16>, vector<8x216xf32> -> vector<8x216xf32>
    %37 = arith.addf %31, %36 : vector<8x216xf32>
    %c0_41 = arith.constant 0 : index
    %c0_42 = arith.constant 0 : index
    %c0_43 = arith.constant 0 : index
    %c12 = arith.constant 12 : index
    %38 = vector.load %arg1[%c0_41, %c0_42, %c0_43, %c12] : memref<1x1x8x302xbf16, #tpu.memory_space<vmem>>, vector<1x1x8x216xbf16>
    %39 = vector.shape_cast %38 : vector<1x1x8x216xbf16> to vector<8x216xbf16>
    %c6_44 = arith.constant 6 : index
    %c0_45 = arith.constant 0 : index
    %c0_46 = arith.constant 0 : index
    %40 = vector.load %arg2[%c6_44, %c0_45, %c0_46] : memref<27x8x8xbf16, #tpu.memory_space<vmem>>, vector<1x8x8xbf16>
    %41 = vector.shape_cast %40 : vector<1x8x8xbf16> to vector<8x8xbf16>
    %cst_47 = arith.constant dense<0.000000e+00> : vector<8x216xf32>
    %42 = tpu.matmul %41, %39, %cst_47 {dimension_numbers = #tpu.dot_dimension_numbers<[1], [0], [0], [1], [0, 0, 1, 1], [], []>} : vector<8x8xbf16>, vector<8x216xbf16>, vector<8x216xf32> -> vector<8x216xf32>
    %43 = arith.addf %37, %42 : vector<8x216xf32>
    %c0_48 = arith.constant 0 : index
    %c0_49 = arith.constant 0 : index
    %c0_50 = arith.constant 0 : index
    %c13 = arith.constant 13 : index
    %44 = vector.load %arg1[%c0_48, %c0_49, %c0_50, %c13] : memref<1x1x8x302xbf16, #tpu.memory_space<vmem>>, vector<1x1x8x216xbf16>
    %45 = vector.shape_cast %44 : vector<1x1x8x216xbf16> to vector<8x216xbf16>
    %c7_51 = arith.constant 7 : index
    %c0_52 = arith.constant 0 : index
    %c0_53 = arith.constant 0 : index
    %46 = vector.load %arg2[%c7_51, %c0_52, %c0_53] : memref<27x8x8xbf16, #tpu.memory_space<vmem>>, vector<1x8x8xbf16>
    %47 = vector.shape_cast %46 : vector<1x8x8xbf16> to vector<8x8xbf16>
    %cst_54 = arith.constant dense<0.000000e+00> : vector<8x216xf32>
    %48 = tpu.matmul %47, %45, %cst_54 {dimension_numbers = #tpu.dot_dimension_numbers<[1], [0], [0], [1], [0, 0, 1, 1], [], []>} : vector<8x8xbf16>, vector<8x216xbf16>, vector<8x216xf32> -> vector<8x216xf32>
    %49 = arith.addf %43, %48 : vector<8x216xf32>
    %c0_55 = arith.constant 0 : index
    %c0_56 = arith.constant 0 : index
    %c0_57 = arith.constant 0 : index
    %c14 = arith.constant 14 : index
    %50 = vector.load %arg1[%c0_55, %c0_56, %c0_57, %c14] : memref<1x1x8x302xbf16, #tpu.memory_space<vmem>>, vector<1x1x8x216xbf16>
    %51 = vector.shape_cast %50 : vector<1x1x8x216xbf16> to vector<8x216xbf16>
    %c8_58 = arith.constant 8 : index
    %c0_59 = arith.constant 0 : index
    %c0_60 = arith.constant 0 : index
    %52 = vector.load %arg2[%c8_58, %c0_59, %c0_60] : memref<27x8x8xbf16, #tpu.memory_space<vmem>>, vector<1x8x8xbf16>
    %53 = vector.shape_cast %52 : vector<1x8x8xbf16> to vector<8x8xbf16>
    %cst_61 = arith.constant dense<0.000000e+00> : vector<8x216xf32>
    %54 = tpu.matmul %53, %51, %cst_61 {dimension_numbers = #tpu.dot_dimension_numbers<[1], [0], [0], [1], [0, 0, 1, 1], [], []>} : vector<8x8xbf16>, vector<8x216xbf16>, vector<8x216xf32> -> vector<8x216xf32>
    %55 = arith.addf %49, %54 : vector<8x216xf32>
    %c0_62 = arith.constant 0 : index
    %c0_63 = arith.constant 0 : index
    %c0_64 = arith.constant 0 : index
    %c36 = arith.constant 36 : index
    %56 = vector.load %arg1[%c0_62, %c0_63, %c0_64, %c36] : memref<1x1x8x302xbf16, #tpu.memory_space<vmem>>, vector<1x1x8x216xbf16>
    %57 = vector.shape_cast %56 : vector<1x1x8x216xbf16> to vector<8x216xbf16>
    %c9 = arith.constant 9 : index
    %c0_65 = arith.constant 0 : index
    %c0_66 = arith.constant 0 : index
    %58 = vector.load %arg2[%c9, %c0_65, %c0_66] : memref<27x8x8xbf16, #tpu.memory_space<vmem>>, vector<1x8x8xbf16>
    %59 = vector.shape_cast %58 : vector<1x8x8xbf16> to vector<8x8xbf16>
    %cst_67 = arith.constant dense<0.000000e+00> : vector<8x216xf32>
    %60 = tpu.matmul %59, %57, %cst_67 {dimension_numbers = #tpu.dot_dimension_numbers<[1], [0], [0], [1], [0, 0, 1, 1], [], []>} : vector<8x8xbf16>, vector<8x216xbf16>, vector<8x216xf32> -> vector<8x216xf32>
    %61 = arith.addf %55, %60 : vector<8x216xf32>
    %c0_68 = arith.constant 0 : index
    %c0_69 = arith.constant 0 : index
    %c0_70 = arith.constant 0 : index
    %c37 = arith.constant 37 : index
    %62 = vector.load %arg1[%c0_68, %c0_69, %c0_70, %c37] : memref<1x1x8x302xbf16, #tpu.memory_space<vmem>>, vector<1x1x8x216xbf16>
    %63 = vector.shape_cast %62 : vector<1x1x8x216xbf16> to vector<8x216xbf16>
    %c10 = arith.constant 10 : index
    %c0_71 = arith.constant 0 : index
    %c0_72 = arith.constant 0 : index
    %64 = vector.load %arg2[%c10, %c0_71, %c0_72] : memref<27x8x8xbf16, #tpu.memory_space<vmem>>, vector<1x8x8xbf16>
    %65 = vector.shape_cast %64 : vector<1x8x8xbf16> to vector<8x8xbf16>
    %cst_73 = arith.constant dense<0.000000e+00> : vector<8x216xf32>
    %66 = tpu.matmul %65, %63, %cst_73 {dimension_numbers = #tpu.dot_dimension_numbers<[1], [0], [0], [1], [0, 0, 1, 1], [], []>} : vector<8x8xbf16>, vector<8x216xbf16>, vector<8x216xf32> -> vector<8x216xf32>
    %67 = arith.addf %61, %66 : vector<8x216xf32>
    %c0_74 = arith.constant 0 : index
    %c0_75 = arith.constant 0 : index
    %c0_76 = arith.constant 0 : index
    %c38 = arith.constant 38 : index
    %68 = vector.load %arg1[%c0_74, %c0_75, %c0_76, %c38] : memref<1x1x8x302xbf16, #tpu.memory_space<vmem>>, vector<1x1x8x216xbf16>
    %69 = vector.shape_cast %68 : vector<1x1x8x216xbf16> to vector<8x216xbf16>
    %c11 = arith.constant 11 : index
    %c0_77 = arith.constant 0 : index
    %c0_78 = arith.constant 0 : index
    %70 = vector.load %arg2[%c11, %c0_77, %c0_78] : memref<27x8x8xbf16, #tpu.memory_space<vmem>>, vector<1x8x8xbf16>
    %71 = vector.shape_cast %70 : vector<1x8x8xbf16> to vector<8x8xbf16>
    %cst_79 = arith.constant dense<0.000000e+00> : vector<8x216xf32>
    %72 = tpu.matmul %71, %69, %cst_79 {dimension_numbers = #tpu.dot_dimension_numbers<[1], [0], [0], [1], [0, 0, 1, 1], [], []>} : vector<8x8xbf16>, vector<8x216xbf16>, vector<8x216xf32> -> vector<8x216xf32>
    %73 = arith.addf %67, %72 : vector<8x216xf32>
    %c0_80 = arith.constant 0 : index
    %c0_81 = arith.constant 0 : index
    %c0_82 = arith.constant 0 : index
    %c42 = arith.constant 42 : index
    %74 = vector.load %arg1[%c0_80, %c0_81, %c0_82, %c42] : memref<1x1x8x302xbf16, #tpu.memory_space<vmem>>, vector<1x1x8x216xbf16>
    %75 = vector.shape_cast %74 : vector<1x1x8x216xbf16> to vector<8x216xbf16>
    %c12_83 = arith.constant 12 : index
    %c0_84 = arith.constant 0 : index
    %c0_85 = arith.constant 0 : index
    %76 = vector.load %arg2[%c12_83, %c0_84, %c0_85] : memref<27x8x8xbf16, #tpu.memory_space<vmem>>, vector<1x8x8xbf16>
    %77 = vector.shape_cast %76 : vector<1x8x8xbf16> to vector<8x8xbf16>
    %cst_86 = arith.constant dense<0.000000e+00> : vector<8x216xf32>
    %78 = tpu.matmul %77, %75, %cst_86 {dimension_numbers = #tpu.dot_dimension_numbers<[1], [0], [0], [1], [0, 0, 1, 1], [], []>} : vector<8x8xbf16>, vector<8x216xbf16>, vector<8x216xf32> -> vector<8x216xf32>
    %79 = arith.addf %73, %78 : vector<8x216xf32>
    %c0_87 = arith.constant 0 : index
    %c0_88 = arith.constant 0 : index
    %c0_89 = arith.constant 0 : index
    %c43 = arith.constant 43 : index
    %80 = vector.load %arg1[%c0_87, %c0_88, %c0_89, %c43] : memref<1x1x8x302xbf16, #tpu.memory_space<vmem>>, vector<1x1x8x216xbf16>
    %81 = vector.shape_cast %80 : vector<1x1x8x216xbf16> to vector<8x216xbf16>
    %c13_90 = arith.constant 13 : index
    %c0_91 = arith.constant 0 : index
    %c0_92 = arith.constant 0 : index
    %82 = vector.load %arg2[%c13_90, %c0_91, %c0_92] : memref<27x8x8xbf16, #tpu.memory_space<vmem>>, vector<1x8x8xbf16>
    %83 = vector.shape_cast %82 : vector<1x8x8xbf16> to vector<8x8xbf16>
    %cst_93 = arith.constant dense<0.000000e+00> : vector<8x216xf32>
    %84 = tpu.matmul %83, %81, %cst_93 {dimension_numbers = #tpu.dot_dimension_numbers<[1], [0], [0], [1], [0, 0, 1, 1], [], []>} : vector<8x8xbf16>, vector<8x216xbf16>, vector<8x216xf32> -> vector<8x216xf32>
    %85 = arith.addf %79, %84 : vector<8x216xf32>
    %c0_94 = arith.constant 0 : index
    %c0_95 = arith.constant 0 : index
    %c0_96 = arith.constant 0 : index
    %c44 = arith.constant 44 : index
    %86 = vector.load %arg1[%c0_94, %c0_95, %c0_96, %c44] : memref<1x1x8x302xbf16, #tpu.memory_space<vmem>>, vector<1x1x8x216xbf16>
    %87 = vector.shape_cast %86 : vector<1x1x8x216xbf16> to vector<8x216xbf16>
    %c14_97 = arith.constant 14 : index
    %c0_98 = arith.constant 0 : index
    %c0_99 = arith.constant 0 : index
    %88 = vector.load %arg2[%c14_97, %c0_98, %c0_99] : memref<27x8x8xbf16, #tpu.memory_space<vmem>>, vector<1x8x8xbf16>
    %89 = vector.shape_cast %88 : vector<1x8x8xbf16> to vector<8x8xbf16>
    %cst_100 = arith.constant dense<0.000000e+00> : vector<8x216xf32>
    %90 = tpu.matmul %89, %87, %cst_100 {dimension_numbers = #tpu.dot_dimension_numbers<[1], [0], [0], [1], [0, 0, 1, 1], [], []>} : vector<8x8xbf16>, vector<8x216xbf16>, vector<8x216xf32> -> vector<8x216xf32>
    %91 = arith.addf %85, %90 : vector<8x216xf32>
    %c0_101 = arith.constant 0 : index
    %c0_102 = arith.constant 0 : index
    %c0_103 = arith.constant 0 : index
    %c48 = arith.constant 48 : index
    %92 = vector.load %arg1[%c0_101, %c0_102, %c0_103, %c48] : memref<1x1x8x302xbf16, #tpu.memory_space<vmem>>, vector<1x1x8x216xbf16>
    %93 = vector.shape_cast %92 : vector<1x1x8x216xbf16> to vector<8x216xbf16>
    %c15 = arith.constant 15 : index
    %c0_104 = arith.constant 0 : index
    %c0_105 = arith.constant 0 : index
    %94 = vector.load %arg2[%c15, %c0_104, %c0_105] : memref<27x8x8xbf16, #tpu.memory_space<vmem>>, vector<1x8x8xbf16>
    %95 = vector.shape_cast %94 : vector<1x8x8xbf16> to vector<8x8xbf16>
    %cst_106 = arith.constant dense<0.000000e+00> : vector<8x216xf32>
    %96 = tpu.matmul %95, %93, %cst_106 {dimension_numbers = #tpu.dot_dimension_numbers<[1], [0], [0], [1], [0, 0, 1, 1], [], []>} : vector<8x8xbf16>, vector<8x216xbf16>, vector<8x216xf32> -> vector<8x216xf32>
    %97 = arith.addf %91, %96 : vector<8x216xf32>
    %c0_107 = arith.constant 0 : index
    %c0_108 = arith.constant 0 : index
    %c0_109 = arith.constant 0 : index
    %c49 = arith.constant 49 : index
    %98 = vector.load %arg1[%c0_107, %c0_108, %c0_109, %c49] : memref<1x1x8x302xbf16, #tpu.memory_space<vmem>>, vector<1x1x8x216xbf16>
    %99 = vector.shape_cast %98 : vector<1x1x8x216xbf16> to vector<8x216xbf16>
    %c16 = arith.constant 16 : index
    %c0_110 = arith.constant 0 : index
    %c0_111 = arith.constant 0 : index
    %100 = vector.load %arg2[%c16, %c0_110, %c0_111] : memref<27x8x8xbf16, #tpu.memory_space<vmem>>, vector<1x8x8xbf16>
    %101 = vector.shape_cast %100 : vector<1x8x8xbf16> to vector<8x8xbf16>
    %cst_112 = arith.constant dense<0.000000e+00> : vector<8x216xf32>
    %102 = tpu.matmul %101, %99, %cst_112 {dimension_numbers = #tpu.dot_dimension_numbers<[1], [0], [0], [1], [0, 0, 1, 1], [], []>} : vector<8x8xbf16>, vector<8x216xbf16>, vector<8x216xf32> -> vector<8x216xf32>
    %103 = arith.addf %97, %102 : vector<8x216xf32>
    %c0_113 = arith.constant 0 : index
    %c0_114 = arith.constant 0 : index
    %c0_115 = arith.constant 0 : index
    %c50 = arith.constant 50 : index
    %104 = vector.load %arg1[%c0_113, %c0_114, %c0_115, %c50] : memref<1x1x8x302xbf16, #tpu.memory_space<vmem>>, vector<1x1x8x216xbf16>
    %105 = vector.shape_cast %104 : vector<1x1x8x216xbf16> to vector<8x216xbf16>
    %c17 = arith.constant 17 : index
    %c0_116 = arith.constant 0 : index
    %c0_117 = arith.constant 0 : index
    %106 = vector.load %arg2[%c17, %c0_116, %c0_117] : memref<27x8x8xbf16, #tpu.memory_space<vmem>>, vector<1x8x8xbf16>
    %107 = vector.shape_cast %106 : vector<1x8x8xbf16> to vector<8x8xbf16>
    %cst_118 = arith.constant dense<0.000000e+00> : vector<8x216xf32>
    %108 = tpu.matmul %107, %105, %cst_118 {dimension_numbers = #tpu.dot_dimension_numbers<[1], [0], [0], [1], [0, 0, 1, 1], [], []>} : vector<8x8xbf16>, vector<8x216xbf16>, vector<8x216xf32> -> vector<8x216xf32>
    %109 = arith.addf %103, %108 : vector<8x216xf32>
    %c0_119 = arith.constant 0 : index
    %c0_120 = arith.constant 0 : index
    %c0_121 = arith.constant 0 : index
    %c72 = arith.constant 72 : index
    %110 = vector.load %arg1[%c0_119, %c0_120, %c0_121, %c72] : memref<1x1x8x302xbf16, #tpu.memory_space<vmem>>, vector<1x1x8x216xbf16>
    %111 = vector.shape_cast %110 : vector<1x1x8x216xbf16> to vector<8x216xbf16>
    %c18 = arith.constant 18 : index
    %c0_122 = arith.constant 0 : index
    %c0_123 = arith.constant 0 : index
    %112 = vector.load %arg2[%c18, %c0_122, %c0_123] : memref<27x8x8xbf16, #tpu.memory_space<vmem>>, vector<1x8x8xbf16>
    %113 = vector.shape_cast %112 : vector<1x8x8xbf16> to vector<8x8xbf16>
    %cst_124 = arith.constant dense<0.000000e+00> : vector<8x216xf32>
    %114 = tpu.matmul %113, %111, %cst_124 {dimension_numbers = #tpu.dot_dimension_numbers<[1], [0], [0], [1], [0, 0, 1, 1], [], []>} : vector<8x8xbf16>, vector<8x216xbf16>, vector<8x216xf32> -> vector<8x216xf32>
    %115 = arith.addf %109, %114 : vector<8x216xf32>
    %c0_125 = arith.constant 0 : index
    %c0_126 = arith.constant 0 : index
    %c0_127 = arith.constant 0 : index
    %c73 = arith.constant 73 : index
    %116 = vector.load %arg1[%c0_125, %c0_126, %c0_127, %c73] : memref<1x1x8x302xbf16, #tpu.memory_space<vmem>>, vector<1x1x8x216xbf16>
    %117 = vector.shape_cast %116 : vector<1x1x8x216xbf16> to vector<8x216xbf16>
    %c19 = arith.constant 19 : index
    %c0_128 = arith.constant 0 : index
    %c0_129 = arith.constant 0 : index
    %118 = vector.load %arg2[%c19, %c0_128, %c0_129] : memref<27x8x8xbf16, #tpu.memory_space<vmem>>, vector<1x8x8xbf16>
    %119 = vector.shape_cast %118 : vector<1x8x8xbf16> to vector<8x8xbf16>
    %cst_130 = arith.constant dense<0.000000e+00> : vector<8x216xf32>
    %120 = tpu.matmul %119, %117, %cst_130 {dimension_numbers = #tpu.dot_dimension_numbers<[1], [0], [0], [1], [0, 0, 1, 1], [], []>} : vector<8x8xbf16>, vector<8x216xbf16>, vector<8x216xf32> -> vector<8x216xf32>
    %121 = arith.addf %115, %120 : vector<8x216xf32>
    %c0_131 = arith.constant 0 : index
    %c0_132 = arith.constant 0 : index
    %c0_133 = arith.constant 0 : index
    %c74 = arith.constant 74 : index
    %122 = vector.load %arg1[%c0_131, %c0_132, %c0_133, %c74] : memref<1x1x8x302xbf16, #tpu.memory_space<vmem>>, vector<1x1x8x216xbf16>
    %123 = vector.shape_cast %122 : vector<1x1x8x216xbf16> to vector<8x216xbf16>
    %c20 = arith.constant 20 : index
    %c0_134 = arith.constant 0 : index
    %c0_135 = arith.constant 0 : index
    %124 = vector.load %arg2[%c20, %c0_134, %c0_135] : memref<27x8x8xbf16, #tpu.memory_space<vmem>>, vector<1x8x8xbf16>
    %125 = vector.shape_cast %124 : vector<1x8x8xbf16> to vector<8x8xbf16>
    %cst_136 = arith.constant dense<0.000000e+00> : vector<8x216xf32>
    %126 = tpu.matmul %125, %123, %cst_136 {dimension_numbers = #tpu.dot_dimension_numbers<[1], [0], [0], [1], [0, 0, 1, 1], [], []>} : vector<8x8xbf16>, vector<8x216xbf16>, vector<8x216xf32> -> vector<8x216xf32>
    %127 = arith.addf %121, %126 : vector<8x216xf32>
    %c0_137 = arith.constant 0 : index
    %c0_138 = arith.constant 0 : index
    %c0_139 = arith.constant 0 : index
    %c78 = arith.constant 78 : index
    %128 = vector.load %arg1[%c0_137, %c0_138, %c0_139, %c78] : memref<1x1x8x302xbf16, #tpu.memory_space<vmem>>, vector<1x1x8x216xbf16>
    %129 = vector.shape_cast %128 : vector<1x1x8x216xbf16> to vector<8x216xbf16>
    %c21 = arith.constant 21 : index
    %c0_140 = arith.constant 0 : index
    %c0_141 = arith.constant 0 : index
    %130 = vector.load %arg2[%c21, %c0_140, %c0_141] : memref<27x8x8xbf16, #tpu.memory_space<vmem>>, vector<1x8x8xbf16>
    %131 = vector.shape_cast %130 : vector<1x8x8xbf16> to vector<8x8xbf16>
    %cst_142 = arith.constant dense<0.000000e+00> : vector<8x216xf32>
    %132 = tpu.matmul %131, %129, %cst_142 {dimension_numbers = #tpu.dot_dimension_numbers<[1], [0], [0], [1], [0, 0, 1, 1], [], []>} : vector<8x8xbf16>, vector<8x216xbf16>, vector<8x216xf32> -> vector<8x216xf32>
    %133 = arith.addf %127, %132 : vector<8x216xf32>
    %c0_143 = arith.constant 0 : index
    %c0_144 = arith.constant 0 : index
    %c0_145 = arith.constant 0 : index
    %c79 = arith.constant 79 : index
    %134 = vector.load %arg1[%c0_143, %c0_144, %c0_145, %c79] : memref<1x1x8x302xbf16, #tpu.memory_space<vmem>>, vector<1x1x8x216xbf16>
    %135 = vector.shape_cast %134 : vector<1x1x8x216xbf16> to vector<8x216xbf16>
    %c22 = arith.constant 22 : index
    %c0_146 = arith.constant 0 : index
    %c0_147 = arith.constant 0 : index
    %136 = vector.load %arg2[%c22, %c0_146, %c0_147] : memref<27x8x8xbf16, #tpu.memory_space<vmem>>, vector<1x8x8xbf16>
    %137 = vector.shape_cast %136 : vector<1x8x8xbf16> to vector<8x8xbf16>
    %cst_148 = arith.constant dense<0.000000e+00> : vector<8x216xf32>
    %138 = tpu.matmul %137, %135, %cst_148 {dimension_numbers = #tpu.dot_dimension_numbers<[1], [0], [0], [1], [0, 0, 1, 1], [], []>} : vector<8x8xbf16>, vector<8x216xbf16>, vector<8x216xf32> -> vector<8x216xf32>
    %139 = arith.addf %133, %138 : vector<8x216xf32>
    %c0_149 = arith.constant 0 : index
    %c0_150 = arith.constant 0 : index
    %c0_151 = arith.constant 0 : index
    %c80 = arith.constant 80 : index
    %140 = vector.load %arg1[%c0_149, %c0_150, %c0_151, %c80] : memref<1x1x8x302xbf16, #tpu.memory_space<vmem>>, vector<1x1x8x216xbf16>
    %141 = vector.shape_cast %140 : vector<1x1x8x216xbf16> to vector<8x216xbf16>
    %c23 = arith.constant 23 : index
    %c0_152 = arith.constant 0 : index
    %c0_153 = arith.constant 0 : index
    %142 = vector.load %arg2[%c23, %c0_152, %c0_153] : memref<27x8x8xbf16, #tpu.memory_space<vmem>>, vector<1x8x8xbf16>
    %143 = vector.shape_cast %142 : vector<1x8x8xbf16> to vector<8x8xbf16>
    %cst_154 = arith.constant dense<0.000000e+00> : vector<8x216xf32>
    %144 = tpu.matmul %143, %141, %cst_154 {dimension_numbers = #tpu.dot_dimension_numbers<[1], [0], [0], [1], [0, 0, 1, 1], [], []>} : vector<8x8xbf16>, vector<8x216xbf16>, vector<8x216xf32> -> vector<8x216xf32>
    %145 = arith.addf %139, %144 : vector<8x216xf32>
    %c0_155 = arith.constant 0 : index
    %c0_156 = arith.constant 0 : index
    %c0_157 = arith.constant 0 : index
    %c84 = arith.constant 84 : index
    %146 = vector.load %arg1[%c0_155, %c0_156, %c0_157, %c84] : memref<1x1x8x302xbf16, #tpu.memory_space<vmem>>, vector<1x1x8x216xbf16>
    %147 = vector.shape_cast %146 : vector<1x1x8x216xbf16> to vector<8x216xbf16>
    %c24 = arith.constant 24 : index
    %c0_158 = arith.constant 0 : index
    %c0_159 = arith.constant 0 : index
    %148 = vector.load %arg2[%c24, %c0_158, %c0_159] : memref<27x8x8xbf16, #tpu.memory_space<vmem>>, vector<1x8x8xbf16>
    %149 = vector.shape_cast %148 : vector<1x8x8xbf16> to vector<8x8xbf16>
    %cst_160 = arith.constant dense<0.000000e+00> : vector<8x216xf32>
    %150 = tpu.matmul %149, %147, %cst_160 {dimension_numbers = #tpu.dot_dimension_numbers<[1], [0], [0], [1], [0, 0, 1, 1], [], []>} : vector<8x8xbf16>, vector<8x216xbf16>, vector<8x216xf32> -> vector<8x216xf32>
    %151 = arith.addf %145, %150 : vector<8x216xf32>
    %c0_161 = arith.constant 0 : index
    %c0_162 = arith.constant 0 : index
    %c0_163 = arith.constant 0 : index
    %c85 = arith.constant 85 : index
    %152 = vector.load %arg1[%c0_161, %c0_162, %c0_163, %c85] : memref<1x1x8x302xbf16, #tpu.memory_space<vmem>>, vector<1x1x8x216xbf16>
    %153 = vector.shape_cast %152 : vector<1x1x8x216xbf16> to vector<8x216xbf16>
    %c25 = arith.constant 25 : index
    %c0_164 = arith.constant 0 : index
    %c0_165 = arith.constant 0 : index
    %154 = vector.load %arg2[%c25, %c0_164, %c0_165] : memref<27x8x8xbf16, #tpu.memory_space<vmem>>, vector<1x8x8xbf16>
    %155 = vector.shape_cast %154 : vector<1x8x8xbf16> to vector<8x8xbf16>
    %cst_166 = arith.constant dense<0.000000e+00> : vector<8x216xf32>
    %156 = tpu.matmul %155, %153, %cst_166 {dimension_numbers = #tpu.dot_dimension_numbers<[1], [0], [0], [1], [0, 0, 1, 1], [], []>} : vector<8x8xbf16>, vector<8x216xbf16>, vector<8x216xf32> -> vector<8x216xf32>
    %157 = arith.addf %151, %156 : vector<8x216xf32>
    %c0_167 = arith.constant 0 : index
    %c0_168 = arith.constant 0 : index
    %c0_169 = arith.constant 0 : index
    %c86 = arith.constant 86 : index
    %158 = vector.load %arg1[%c0_167, %c0_168, %c0_169, %c86] : memref<1x1x8x302xbf16, #tpu.memory_space<vmem>>, vector<1x1x8x216xbf16>
    %159 = vector.shape_cast %158 : vector<1x1x8x216xbf16> to vector<8x216xbf16>
    %c26 = arith.constant 26 : index
    %c0_170 = arith.constant 0 : index
    %c0_171 = arith.constant 0 : index
    %160 = vector.load %arg2[%c26, %c0_170, %c0_171] : memref<27x8x8xbf16, #tpu.memory_space<vmem>>, vector<1x8x8xbf16>
    %161 = vector.shape_cast %160 : vector<1x8x8xbf16> to vector<8x8xbf16>
    %cst_172 = arith.constant dense<0.000000e+00> : vector<8x216xf32>
    %162 = tpu.matmul %161, %159, %cst_172 {dimension_numbers = #tpu.dot_dimension_numbers<[1], [0], [0], [1], [0, 0, 1, 1], [], []>} : vector<8x8xbf16>, vector<8x216xbf16>, vector<8x216xf32> -> vector<8x216xf32>
    %163 = arith.addf %157, %162 : vector<8x216xf32>
    %164 = vector.broadcast %0 : vector<8x1xf32> to vector<8x216xf32>
    %165 = arith.addf %163, %164 : vector<8x216xf32>
    %cst_173 = arith.constant 0.000000e+00 : f32
    %166 = vector.broadcast %cst_173 : f32 to vector<8x216xf32>
    %167 = arith.maximumf %165, %166 : vector<8x216xf32>
    %168 = arith.truncf %167 : vector<8x216xf32> to vector<8x216xbf16>
    %c0_174 = arith.constant 0 : index
    %c0_175 = arith.constant 0 : index
    %c0_176 = arith.constant 0 : index
    %c0_177 = arith.constant 0 : index
    %169 = vector.load %arg4[%c0_174, %c0_175, %c0_176, %c0_177] : memref<1x1x8x216xbf16, #tpu.memory_space<vmem>>, vector<1x1x8x216xbf16>
    %170 = vector.shape_cast %169 : vector<1x1x8x216xbf16> to vector<8x216xbf16>
    %171 = vector.shape_cast %168 : vector<8x216xbf16> to vector<1x1x8x216xbf16>
    tpu.vector_store %arg4[%c0_174, %c0_175, %c0_176, %c0_177], %171 {strides = array<i32>} : memref<1x1x8x216xbf16, #tpu.memory_space<vmem>>, vector<1x1x8x216xbf16>,
    return
  }
  func.func @transform_0(%arg0: i32) -> (i32, i32, i32, i32) {
    %c0_i32 = arith.constant 0 : i32
    %c0_i32_0 = arith.constant 0 : i32
    %c0_i32_1 = arith.constant 0 : i32
    %c0_i32_2 = arith.constant 0 : i32
    return %arg0, %c0_i32, %c0_i32_0, %c0_i32_1 : i32, i32, i32, i32
  }
  func.func @transform_1(%arg0: i32) -> (i32, i32, i32) {
    %c0_i32 = arith.constant 0 : i32
    %c0_i32_0 = arith.constant 0 : i32
    %c0_i32_1 = arith.constant 0 : i32
    %c0_i32_2 = arith.constant 0 : i32
    return %c0_i32, %c0_i32_0, %c0_i32_1 : i32, i32, i32
  }
  func.func @transform_2(%arg0: i32) -> (i32, i32) {
    %c0_i32 = arith.constant 0 : i32
    %c0_i32_0 = arith.constant 0 : i32
    %c0_i32_1 = arith.constant 0 : i32
    return %c0_i32, %c0_i32_0 : i32, i32
  }
  func.func @transform_3(%arg0: i32) -> (i32, i32, i32, i32) {
    %c0_i32 = arith.constant 0 : i32
    %c0_i32_0 = arith.constant 0 : i32
    %c0_i32_1 = arith.constant 0 : i32
    %c0_i32_2 = arith.constant 0 : i32
    return %arg0, %c0_i32, %c0_i32_0, %c0_i32_1 : i32, i32, i32, i32
  }
}

module attributes {stable_mosaic.version = 11 : i64} {
  func.func @_grouped_tap_conv_kernel(%arg0: i32, %arg1: memref<1x1x8x64xbf16, #tpu.memory_space<vmem>>, %arg2: memref<1x8x8xbf16, #tpu.memory_space<vmem>>, %arg3: memref<8x1xf32, #tpu.memory_space<vmem>>, %arg4: memref<1x1x8x64xf32, #tpu.memory_space<vmem>>) attributes {dimension_semantics = [#tpu.dimension_semantics<parallel>], iteration_bounds = array<i64: 2>, scalar_prefetch = 0 : i64, scratch_operands = 0 : i64, tpu.core_type = #tpu.core_type<tc>, window_params = [{transform_indices = @transform_0, window_bounds = array<i64: 1, 1, 8, 64>}, {pipeline_mode = #tpu.pipeline_mode<synchronous>, transform_indices = @transform_1, window_bounds = array<i64: 1, 8, 8>}, {pipeline_mode = #tpu.pipeline_mode<synchronous>, transform_indices = @transform_2, window_bounds = array<i64: 8, 1>}, {transform_indices = @transform_3, window_bounds = array<i64: 1, 1, 8, 64>}]} {
    %c0 = arith.constant 0 : index
    %c0_0 = arith.constant 0 : index
    %0 = vector.load %arg3[%c0, %c0_0] : memref<8x1xf32, #tpu.memory_space<vmem>>, vector<8x1xf32>
    %cst = arith.constant 0.000000e+00 : f32
    %1 = vector.broadcast %cst : f32 to vector<8x64xf32>
    %c0_1 = arith.constant 0 : index
    %c0_2 = arith.constant 0 : index
    %c0_3 = arith.constant 0 : index
    %c0_4 = arith.constant 0 : index
    %2 = vector.load %arg1[%c0_1, %c0_2, %c0_3, %c0_4] : memref<1x1x8x64xbf16, #tpu.memory_space<vmem>>, vector<1x1x8x64xbf16>
    %3 = vector.shape_cast %2 : vector<1x1x8x64xbf16> to vector<8x64xbf16>
    %c0_5 = arith.constant 0 : index
    %c0_6 = arith.constant 0 : index
    %c0_7 = arith.constant 0 : index
    %4 = vector.load %arg2[%c0_5, %c0_6, %c0_7] : memref<1x8x8xbf16, #tpu.memory_space<vmem>>, vector<1x8x8xbf16>
    %5 = vector.shape_cast %4 : vector<1x8x8xbf16> to vector<8x8xbf16>
    %cst_8 = arith.constant dense<0.000000e+00> : vector<8x64xf32>
    %6 = tpu.matmul %5, %3, %cst_8 {dimension_numbers = #tpu.dot_dimension_numbers<[1], [0], [0], [1], [0, 0, 1, 1], [], []>} : vector<8x8xbf16>, vector<8x64xbf16>, vector<8x64xf32> -> vector<8x64xf32>
    %7 = arith.addf %1, %6 : vector<8x64xf32>
    %8 = vector.broadcast %0 : vector<8x1xf32> to vector<8x64xf32>
    %9 = arith.addf %7, %8 : vector<8x64xf32>
    %c0_9 = arith.constant 0 : index
    %c0_10 = arith.constant 0 : index
    %c0_11 = arith.constant 0 : index
    %c0_12 = arith.constant 0 : index
    %10 = vector.load %arg4[%c0_9, %c0_10, %c0_11, %c0_12] : memref<1x1x8x64xf32, #tpu.memory_space<vmem>>, vector<1x1x8x64xf32>
    %11 = vector.shape_cast %10 : vector<1x1x8x64xf32> to vector<8x64xf32>
    %12 = vector.shape_cast %9 : vector<8x64xf32> to vector<1x1x8x64xf32>
    tpu.vector_store %arg4[%c0_9, %c0_10, %c0_11, %c0_12], %12 {strides = array<i32>} : memref<1x1x8x64xf32, #tpu.memory_space<vmem>>, vector<1x1x8x64xf32>,
    return
  }
  func.func @transform_0(%arg0: i32) -> (i32, i32, i32, i32) {
    %c0_i32 = arith.constant 0 : i32
    %c0_i32_0 = arith.constant 0 : i32
    %c0_i32_1 = arith.constant 0 : i32
    %c0_i32_2 = arith.constant 0 : i32
    return %arg0, %c0_i32, %c0_i32_0, %c0_i32_1 : i32, i32, i32, i32
  }
  func.func @transform_1(%arg0: i32) -> (i32, i32, i32) {
    %c0_i32 = arith.constant 0 : i32
    %c0_i32_0 = arith.constant 0 : i32
    %c0_i32_1 = arith.constant 0 : i32
    %c0_i32_2 = arith.constant 0 : i32
    return %c0_i32, %c0_i32_0, %c0_i32_1 : i32, i32, i32
  }
  func.func @transform_2(%arg0: i32) -> (i32, i32) {
    %c0_i32 = arith.constant 0 : i32
    %c0_i32_0 = arith.constant 0 : i32
    %c0_i32_1 = arith.constant 0 : i32
    return %c0_i32, %c0_i32_0 : i32, i32
  }
  func.func @transform_3(%arg0: i32) -> (i32, i32, i32, i32) {
    %c0_i32 = arith.constant 0 : i32
    %c0_i32_0 = arith.constant 0 : i32
    %c0_i32_1 = arith.constant 0 : i32
    %c0_i32_2 = arith.constant 0 : i32
    return %arg0, %c0_i32, %c0_i32_0, %c0_i32_1 : i32, i32, i32, i32
  }
}

module attributes {stable_mosaic.version = 11 : i64} {
  func.func @_grouped_tap_conv_kernel(%arg0: i32, %arg1: memref<1x8x8x40xbf16, #tpu.memory_space<vmem>>, %arg2: memref<27x16x8xbf16, #tpu.memory_space<vmem>>, %arg3: memref<16x1xf32, #tpu.memory_space<vmem>>, %arg4: memref<1x1x16x27xbf16, #tpu.memory_space<vmem>>) attributes {dimension_semantics = [#tpu.dimension_semantics<parallel>], iteration_bounds = array<i64: 2>, scalar_prefetch = 0 : i64, scratch_operands = 0 : i64, tpu.core_type = #tpu.core_type<tc>, window_params = [{transform_indices = @transform_0, window_bounds = array<i64: 1, 8, 8, 40>}, {pipeline_mode = #tpu.pipeline_mode<synchronous>, transform_indices = @transform_1, window_bounds = array<i64: 27, 16, 8>}, {pipeline_mode = #tpu.pipeline_mode<synchronous>, transform_indices = @transform_2, window_bounds = array<i64: 16, 1>}, {transform_indices = @transform_3, window_bounds = array<i64: 1, 1, 16, 27>}]} {
    %c0 = arith.constant 0 : index
    %c0_0 = arith.constant 0 : index
    %0 = vector.load %arg3[%c0, %c0_0] : memref<16x1xf32, #tpu.memory_space<vmem>>, vector<16x1xf32>
    %cst = arith.constant 0.000000e+00 : f32
    %1 = vector.broadcast %cst : f32 to vector<16x27xf32>
    %c0_1 = arith.constant 0 : index
    %c0_2 = arith.constant 0 : index
    %c0_3 = arith.constant 0 : index
    %c0_4 = arith.constant 0 : index
    %2 = vector.load %arg1[%c0_1, %c0_2, %c0_3, %c0_4] : memref<1x8x8x40xbf16, #tpu.memory_space<vmem>>, vector<1x1x8x27xbf16>
    %3 = vector.shape_cast %2 : vector<1x1x8x27xbf16> to vector<8x27xbf16>
    %c0_5 = arith.constant 0 : index
    %c0_6 = arith.constant 0 : index
    %c0_7 = arith.constant 0 : index
    %4 = vector.load %arg2[%c0_5, %c0_6, %c0_7] : memref<27x16x8xbf16, #tpu.memory_space<vmem>>, vector<1x16x8xbf16>
    %5 = vector.shape_cast %4 : vector<1x16x8xbf16> to vector<16x8xbf16>
    %cst_8 = arith.constant dense<0.000000e+00> : vector<16x27xf32>
    %6 = tpu.matmul %5, %3, %cst_8 {dimension_numbers = #tpu.dot_dimension_numbers<[1], [0], [0], [1], [0, 0, 1, 1], [], []>} : vector<16x8xbf16>, vector<8x27xbf16>, vector<16x27xf32> -> vector<16x27xf32>
    %7 = arith.addf %1, %6 : vector<16x27xf32>
    %c0_9 = arith.constant 0 : index
    %c1 = arith.constant 1 : index
    %c0_10 = arith.constant 0 : index
    %c0_11 = arith.constant 0 : index
    %8 = vector.load %arg1[%c0_9, %c1, %c0_10, %c0_11] : memref<1x8x8x40xbf16, #tpu.memory_space<vmem>>, vector<1x1x8x27xbf16>
    %9 = vector.shape_cast %8 : vector<1x1x8x27xbf16> to vector<8x27xbf16>
    %c1_12 = arith.constant 1 : index
    %c0_13 = arith.constant 0 : index
    %c0_14 = arith.constant 0 : index
    %10 = vector.load %arg2[%c1_12, %c0_13, %c0_14] : memref<27x16x8xbf16, #tpu.memory_space<vmem>>, vector<1x16x8xbf16>
    %11 = vector.shape_cast %10 : vector<1x16x8xbf16> to vector<16x8xbf16>
    %cst_15 = arith.constant dense<0.000000e+00> : vector<16x27xf32>
    %12 = tpu.matmul %11, %9, %cst_15 {dimension_numbers = #tpu.dot_dimension_numbers<[1], [0], [0], [1], [0, 0, 1, 1], [], []>} : vector<16x8xbf16>, vector<8x27xbf16>, vector<16x27xf32> -> vector<16x27xf32>
    %13 = arith.addf %7, %12 : vector<16x27xf32>
    %c0_16 = arith.constant 0 : index
    %c1_17 = arith.constant 1 : index
    %c0_18 = arith.constant 0 : index
    %c1_19 = arith.constant 1 : index
    %14 = vector.load %arg1[%c0_16, %c1_17, %c0_18, %c1_19] : memref<1x8x8x40xbf16, #tpu.memory_space<vmem>>, vector<1x1x8x27xbf16>
    %15 = vector.shape_cast %14 : vector<1x1x8x27xbf16> to vector<8x27xbf16>
    %c2 = arith.constant 2 : index
    %c0_20 = arith.constant 0 : index
    %c0_21 = arith.constant 0 : index
    %16 = vector.load %arg2[%c2, %c0_20, %c0_21] : memref<27x16x8xbf16, #tpu.memory_space<vmem>>, vector<1x16x8xbf16>
    %17 = vector.shape_cast %16 : vector<1x16x8xbf16> to vector<16x8xbf16>
    %cst_22 = arith.constant dense<0.000000e+00> : vector<16x27xf32>
    %18 = tpu.matmul %17, %15, %cst_22 {dimension_numbers = #tpu.dot_dimension_numbers<[1], [0], [0], [1], [0, 0, 1, 1], [], []>} : vector<16x8xbf16>, vector<8x27xbf16>, vector<16x27xf32> -> vector<16x27xf32>
    %19 = arith.addf %13, %18 : vector<16x27xf32>
    %c0_23 = arith.constant 0 : index
    %c2_24 = arith.constant 2 : index
    %c0_25 = arith.constant 0 : index
    %c0_26 = arith.constant 0 : index
    %20 = vector.load %arg1[%c0_23, %c2_24, %c0_25, %c0_26] : memref<1x8x8x40xbf16, #tpu.memory_space<vmem>>, vector<1x1x8x27xbf16>
    %21 = vector.shape_cast %20 : vector<1x1x8x27xbf16> to vector<8x27xbf16>
    %c3 = arith.constant 3 : index
    %c0_27 = arith.constant 0 : index
    %c0_28 = arith.constant 0 : index
    %22 = vector.load %arg2[%c3, %c0_27, %c0_28] : memref<27x16x8xbf16, #tpu.memory_space<vmem>>, vector<1x16x8xbf16>
    %23 = vector.shape_cast %22 : vector<1x16x8xbf16> to vector<16x8xbf16>
    %cst_29 = arith.constant dense<0.000000e+00> : vector<16x27xf32>
    %24 = tpu.matmul %23, %21, %cst_29 {dimension_numbers = #tpu.dot_dimension_numbers<[1], [0], [0], [1], [0, 0, 1, 1], [], []>} : vector<16x8xbf16>, vector<8x27xbf16>, vector<16x27xf32> -> vector<16x27xf32>
    %25 = arith.addf %19, %24 : vector<16x27xf32>
    %c0_30 = arith.constant 0 : index
    %c2_31 = arith.constant 2 : index
    %c0_32 = arith.constant 0 : index
    %c3_33 = arith.constant 3 : index
    %26 = vector.load %arg1[%c0_30, %c2_31, %c0_32, %c3_33] : memref<1x8x8x40xbf16, #tpu.memory_space<vmem>>, vector<1x1x8x27xbf16>
    %27 = vector.shape_cast %26 : vector<1x1x8x27xbf16> to vector<8x27xbf16>
    %c4 = arith.constant 4 : index
    %c0_34 = arith.constant 0 : index
    %c0_35 = arith.constant 0 : index
    %28 = vector.load %arg2[%c4, %c0_34, %c0_35] : memref<27x16x8xbf16, #tpu.memory_space<vmem>>, vector<1x16x8xbf16>
    %29 = vector.shape_cast %28 : vector<1x16x8xbf16> to vector<16x8xbf16>
    %cst_36 = arith.constant dense<0.000000e+00> : vector<16x27xf32>
    %30 = tpu.matmul %29, %27, %cst_36 {dimension_numbers = #tpu.dot_dimension_numbers<[1], [0], [0], [1], [0, 0, 1, 1], [], []>} : vector<16x8xbf16>, vector<8x27xbf16>, vector<16x27xf32> -> vector<16x27xf32>
    %31 = arith.addf %25, %30 : vector<16x27xf32>
    %c0_37 = arith.constant 0 : index
    %c3_38 = arith.constant 3 : index
    %c0_39 = arith.constant 0 : index
    %c0_40 = arith.constant 0 : index
    %32 = vector.load %arg1[%c0_37, %c3_38, %c0_39, %c0_40] : memref<1x8x8x40xbf16, #tpu.memory_space<vmem>>, vector<1x1x8x27xbf16>
    %33 = vector.shape_cast %32 : vector<1x1x8x27xbf16> to vector<8x27xbf16>
    %c5 = arith.constant 5 : index
    %c0_41 = arith.constant 0 : index
    %c0_42 = arith.constant 0 : index
    %34 = vector.load %arg2[%c5, %c0_41, %c0_42] : memref<27x16x8xbf16, #tpu.memory_space<vmem>>, vector<1x16x8xbf16>
    %35 = vector.shape_cast %34 : vector<1x16x8xbf16> to vector<16x8xbf16>
    %cst_43 = arith.constant dense<0.000000e+00> : vector<16x27xf32>
    %36 = tpu.matmul %35, %33, %cst_43 {dimension_numbers = #tpu.dot_dimension_numbers<[1], [0], [0], [1], [0, 0, 1, 1], [], []>} : vector<16x8xbf16>, vector<8x27xbf16>, vector<16x27xf32> -> vector<16x27xf32>
    %37 = arith.addf %31, %36 : vector<16x27xf32>
    %c0_44 = arith.constant 0 : index
    %c3_45 = arith.constant 3 : index
    %c0_46 = arith.constant 0 : index
    %c1_47 = arith.constant 1 : index
    %38 = vector.load %arg1[%c0_44, %c3_45, %c0_46, %c1_47] : memref<1x8x8x40xbf16, #tpu.memory_space<vmem>>, vector<1x1x8x27xbf16>
    %39 = vector.shape_cast %38 : vector<1x1x8x27xbf16> to vector<8x27xbf16>
    %c6 = arith.constant 6 : index
    %c0_48 = arith.constant 0 : index
    %c0_49 = arith.constant 0 : index
    %40 = vector.load %arg2[%c6, %c0_48, %c0_49] : memref<27x16x8xbf16, #tpu.memory_space<vmem>>, vector<1x16x8xbf16>
    %41 = vector.shape_cast %40 : vector<1x16x8xbf16> to vector<16x8xbf16>
    %cst_50 = arith.constant dense<0.000000e+00> : vector<16x27xf32>
    %42 = tpu.matmul %41, %39, %cst_50 {dimension_numbers = #tpu.dot_dimension_numbers<[1], [0], [0], [1], [0, 0, 1, 1], [], []>} : vector<16x8xbf16>, vector<8x27xbf16>, vector<16x27xf32> -> vector<16x27xf32>
    %43 = arith.addf %37, %42 : vector<16x27xf32>
    %c0_51 = arith.constant 0 : index
    %c3_52 = arith.constant 3 : index
    %c0_53 = arith.constant 0 : index
    %c3_54 = arith.constant 3 : index
    %44 = vector.load %arg1[%c0_51, %c3_52, %c0_53, %c3_54] : memref<1x8x8x40xbf16, #tpu.memory_space<vmem>>, vector<1x1x8x27xbf16>
    %45 = vector.shape_cast %44 : vector<1x1x8x27xbf16> to vector<8x27xbf16>
    %c7 = arith.constant 7 : index
    %c0_55 = arith.constant 0 : index
    %c0_56 = arith.constant 0 : index
    %46 = vector.load %arg2[%c7, %c0_55, %c0_56] : memref<27x16x8xbf16, #tpu.memory_space<vmem>>, vector<1x16x8xbf16>
    %47 = vector.shape_cast %46 : vector<1x16x8xbf16> to vector<16x8xbf16>
    %cst_57 = arith.constant dense<0.000000e+00> : vector<16x27xf32>
    %48 = tpu.matmul %47, %45, %cst_57 {dimension_numbers = #tpu.dot_dimension_numbers<[1], [0], [0], [1], [0, 0, 1, 1], [], []>} : vector<16x8xbf16>, vector<8x27xbf16>, vector<16x27xf32> -> vector<16x27xf32>
    %49 = arith.addf %43, %48 : vector<16x27xf32>
    %c0_58 = arith.constant 0 : index
    %c3_59 = arith.constant 3 : index
    %c0_60 = arith.constant 0 : index
    %c4_61 = arith.constant 4 : index
    %50 = vector.load %arg1[%c0_58, %c3_59, %c0_60, %c4_61] : memref<1x8x8x40xbf16, #tpu.memory_space<vmem>>, vector<1x1x8x27xbf16>
    %51 = vector.shape_cast %50 : vector<1x1x8x27xbf16> to vector<8x27xbf16>
    %c8 = arith.constant 8 : index
    %c0_62 = arith.constant 0 : index
    %c0_63 = arith.constant 0 : index
    %52 = vector.load %arg2[%c8, %c0_62, %c0_63] : memref<27x16x8xbf16, #tpu.memory_space<vmem>>, vector<1x16x8xbf16>
    %53 = vector.shape_cast %52 : vector<1x16x8xbf16> to vector<16x8xbf16>
    %cst_64 = arith.constant dense<0.000000e+00> : vector<16x27xf32>
    %54 = tpu.matmul %53, %51, %cst_64 {dimension_numbers = #tpu.dot_dimension_numbers<[1], [0], [0], [1], [0, 0, 1, 1], [], []>} : vector<16x8xbf16>, vector<8x27xbf16>, vector<16x27xf32> -> vector<16x27xf32>
    %55 = arith.addf %49, %54 : vector<16x27xf32>
    %c0_65 = arith.constant 0 : index
    %c4_66 = arith.constant 4 : index
    %c0_67 = arith.constant 0 : index
    %c0_68 = arith.constant 0 : index
    %56 = vector.load %arg1[%c0_65, %c4_66, %c0_67, %c0_68] : memref<1x8x8x40xbf16, #tpu.memory_space<vmem>>, vector<1x1x8x27xbf16>
    %57 = vector.shape_cast %56 : vector<1x1x8x27xbf16> to vector<8x27xbf16>
    %c9 = arith.constant 9 : index
    %c0_69 = arith.constant 0 : index
    %c0_70 = arith.constant 0 : index
    %58 = vector.load %arg2[%c9, %c0_69, %c0_70] : memref<27x16x8xbf16, #tpu.memory_space<vmem>>, vector<1x16x8xbf16>
    %59 = vector.shape_cast %58 : vector<1x16x8xbf16> to vector<16x8xbf16>
    %cst_71 = arith.constant dense<0.000000e+00> : vector<16x27xf32>
    %60 = tpu.matmul %59, %57, %cst_71 {dimension_numbers = #tpu.dot_dimension_numbers<[1], [0], [0], [1], [0, 0, 1, 1], [], []>} : vector<16x8xbf16>, vector<8x27xbf16>, vector<16x27xf32> -> vector<16x27xf32>
    %61 = arith.addf %55, %60 : vector<16x27xf32>
    %c0_72 = arith.constant 0 : index
    %c4_73 = arith.constant 4 : index
    %c0_74 = arith.constant 0 : index
    %c9_75 = arith.constant 9 : index
    %62 = vector.load %arg1[%c0_72, %c4_73, %c0_74, %c9_75] : memref<1x8x8x40xbf16, #tpu.memory_space<vmem>>, vector<1x1x8x27xbf16>
    %63 = vector.shape_cast %62 : vector<1x1x8x27xbf16> to vector<8x27xbf16>
    %c10 = arith.constant 10 : index
    %c0_76 = arith.constant 0 : index
    %c0_77 = arith.constant 0 : index
    %64 = vector.load %arg2[%c10, %c0_76, %c0_77] : memref<27x16x8xbf16, #tpu.memory_space<vmem>>, vector<1x16x8xbf16>
    %65 = vector.shape_cast %64 : vector<1x16x8xbf16> to vector<16x8xbf16>
    %cst_78 = arith.constant dense<0.000000e+00> : vector<16x27xf32>
    %66 = tpu.matmul %65, %63, %cst_78 {dimension_numbers = #tpu.dot_dimension_numbers<[1], [0], [0], [1], [0, 0, 1, 1], [], []>} : vector<16x8xbf16>, vector<8x27xbf16>, vector<16x27xf32> -> vector<16x27xf32>
    %67 = arith.addf %61, %66 : vector<16x27xf32>
    %c0_79 = arith.constant 0 : index
    %c5_80 = arith.constant 5 : index
    %c0_81 = arith.constant 0 : index
    %c0_82 = arith.constant 0 : index
    %68 = vector.load %arg1[%c0_79, %c5_80, %c0_81, %c0_82] : memref<1x8x8x40xbf16, #tpu.memory_space<vmem>>, vector<1x1x8x27xbf16>
    %69 = vector.shape_cast %68 : vector<1x1x8x27xbf16> to vector<8x27xbf16>
    %c11 = arith.constant 11 : index
    %c0_83 = arith.constant 0 : index
    %c0_84 = arith.constant 0 : index
    %70 = vector.load %arg2[%c11, %c0_83, %c0_84] : memref<27x16x8xbf16, #tpu.memory_space<vmem>>, vector<1x16x8xbf16>
    %71 = vector.shape_cast %70 : vector<1x16x8xbf16> to vector<16x8xbf16>
    %cst_85 = arith.constant dense<0.000000e+00> : vector<16x27xf32>
    %72 = tpu.matmul %71, %69, %cst_85 {dimension_numbers = #tpu.dot_dimension_numbers<[1], [0], [0], [1], [0, 0, 1, 1], [], []>} : vector<16x8xbf16>, vector<8x27xbf16>, vector<16x27xf32> -> vector<16x27xf32>
    %73 = arith.addf %67, %72 : vector<16x27xf32>
    %c0_86 = arith.constant 0 : index
    %c5_87 = arith.constant 5 : index
    %c0_88 = arith.constant 0 : index
    %c1_89 = arith.constant 1 : index
    %74 = vector.load %arg1[%c0_86, %c5_87, %c0_88, %c1_89] : memref<1x8x8x40xbf16, #tpu.memory_space<vmem>>, vector<1x1x8x27xbf16>
    %75 = vector.shape_cast %74 : vector<1x1x8x27xbf16> to vector<8x27xbf16>
    %c12 = arith.constant 12 : index
    %c0_90 = arith.constant 0 : index
    %c0_91 = arith.constant 0 : index
    %76 = vector.load %arg2[%c12, %c0_90, %c0_91] : memref<27x16x8xbf16, #tpu.memory_space<vmem>>, vector<1x16x8xbf16>
    %77 = vector.shape_cast %76 : vector<1x16x8xbf16> to vector<16x8xbf16>
    %cst_92 = arith.constant dense<0.000000e+00> : vector<16x27xf32>
    %78 = tpu.matmul %77, %75, %cst_92 {dimension_numbers = #tpu.dot_dimension_numbers<[1], [0], [0], [1], [0, 0, 1, 1], [], []>} : vector<16x8xbf16>, vector<8x27xbf16>, vector<16x27xf32> -> vector<16x27xf32>
    %79 = arith.addf %73, %78 : vector<16x27xf32>
    %c0_93 = arith.constant 0 : index
    %c5_94 = arith.constant 5 : index
    %c0_95 = arith.constant 0 : index
    %c9_96 = arith.constant 9 : index
    %80 = vector.load %arg1[%c0_93, %c5_94, %c0_95, %c9_96] : memref<1x8x8x40xbf16, #tpu.memory_space<vmem>>, vector<1x1x8x27xbf16>
    %81 = vector.shape_cast %80 : vector<1x1x8x27xbf16> to vector<8x27xbf16>
    %c13 = arith.constant 13 : index
    %c0_97 = arith.constant 0 : index
    %c0_98 = arith.constant 0 : index
    %82 = vector.load %arg2[%c13, %c0_97, %c0_98] : memref<27x16x8xbf16, #tpu.memory_space<vmem>>, vector<1x16x8xbf16>
    %83 = vector.shape_cast %82 : vector<1x16x8xbf16> to vector<16x8xbf16>
    %cst_99 = arith.constant dense<0.000000e+00> : vector<16x27xf32>
    %84 = tpu.matmul %83, %81, %cst_99 {dimension_numbers = #tpu.dot_dimension_numbers<[1], [0], [0], [1], [0, 0, 1, 1], [], []>} : vector<16x8xbf16>, vector<8x27xbf16>, vector<16x27xf32> -> vector<16x27xf32>
    %85 = arith.addf %79, %84 : vector<16x27xf32>
    %c0_100 = arith.constant 0 : index
    %c5_101 = arith.constant 5 : index
    %c0_102 = arith.constant 0 : index
    %c10_103 = arith.constant 10 : index
    %86 = vector.load %arg1[%c0_100, %c5_101, %c0_102, %c10_103] : memref<1x8x8x40xbf16, #tpu.memory_space<vmem>>, vector<1x1x8x27xbf16>
    %87 = vector.shape_cast %86 : vector<1x1x8x27xbf16> to vector<8x27xbf16>
    %c14 = arith.constant 14 : index
    %c0_104 = arith.constant 0 : index
    %c0_105 = arith.constant 0 : index
    %88 = vector.load %arg2[%c14, %c0_104, %c0_105] : memref<27x16x8xbf16, #tpu.memory_space<vmem>>, vector<1x16x8xbf16>
    %89 = vector.shape_cast %88 : vector<1x16x8xbf16> to vector<16x8xbf16>
    %cst_106 = arith.constant dense<0.000000e+00> : vector<16x27xf32>
    %90 = tpu.matmul %89, %87, %cst_106 {dimension_numbers = #tpu.dot_dimension_numbers<[1], [0], [0], [1], [0, 0, 1, 1], [], []>} : vector<16x8xbf16>, vector<8x27xbf16>, vector<16x27xf32> -> vector<16x27xf32>
    %91 = arith.addf %85, %90 : vector<16x27xf32>
    %c0_107 = arith.constant 0 : index
    %c6_108 = arith.constant 6 : index
    %c0_109 = arith.constant 0 : index
    %c0_110 = arith.constant 0 : index
    %92 = vector.load %arg1[%c0_107, %c6_108, %c0_109, %c0_110] : memref<1x8x8x40xbf16, #tpu.memory_space<vmem>>, vector<1x1x8x27xbf16>
    %93 = vector.shape_cast %92 : vector<1x1x8x27xbf16> to vector<8x27xbf16>
    %c15 = arith.constant 15 : index
    %c0_111 = arith.constant 0 : index
    %c0_112 = arith.constant 0 : index
    %94 = vector.load %arg2[%c15, %c0_111, %c0_112] : memref<27x16x8xbf16, #tpu.memory_space<vmem>>, vector<1x16x8xbf16>
    %95 = vector.shape_cast %94 : vector<1x16x8xbf16> to vector<16x8xbf16>
    %cst_113 = arith.constant dense<0.000000e+00> : vector<16x27xf32>
    %96 = tpu.matmul %95, %93, %cst_113 {dimension_numbers = #tpu.dot_dimension_numbers<[1], [0], [0], [1], [0, 0, 1, 1], [], []>} : vector<16x8xbf16>, vector<8x27xbf16>, vector<16x27xf32> -> vector<16x27xf32>
    %97 = arith.addf %91, %96 : vector<16x27xf32>
    %c0_114 = arith.constant 0 : index
    %c6_115 = arith.constant 6 : index
    %c0_116 = arith.constant 0 : index
    %c3_117 = arith.constant 3 : index
    %98 = vector.load %arg1[%c0_114, %c6_115, %c0_116, %c3_117] : memref<1x8x8x40xbf16, #tpu.memory_space<vmem>>, vector<1x1x8x27xbf16>
    %99 = vector.shape_cast %98 : vector<1x1x8x27xbf16> to vector<8x27xbf16>
    %c16 = arith.constant 16 : index
    %c0_118 = arith.constant 0 : index
    %c0_119 = arith.constant 0 : index
    %100 = vector.load %arg2[%c16, %c0_118, %c0_119] : memref<27x16x8xbf16, #tpu.memory_space<vmem>>, vector<1x16x8xbf16>
    %101 = vector.shape_cast %100 : vector<1x16x8xbf16> to vector<16x8xbf16>
    %cst_120 = arith.constant dense<0.000000e+00> : vector<16x27xf32>
    %102 = tpu.matmul %101, %99, %cst_120 {dimension_numbers = #tpu.dot_dimension_numbers<[1], [0], [0], [1], [0, 0, 1, 1], [], []>} : vector<16x8xbf16>, vector<8x27xbf16>, vector<16x27xf32> -> vector<16x27xf32>
    %103 = arith.addf %97, %102 : vector<16x27xf32>
    %c0_121 = arith.constant 0 : index
    %c6_122 = arith.constant 6 : index
    %c0_123 = arith.constant 0 : index
    %c9_124 = arith.constant 9 : index
    %104 = vector.load %arg1[%c0_121, %c6_122, %c0_123, %c9_124] : memref<1x8x8x40xbf16, #tpu.memory_space<vmem>>, vector<1x1x8x27xbf16>
    %105 = vector.shape_cast %104 : vector<1x1x8x27xbf16> to vector<8x27xbf16>
    %c17 = arith.constant 17 : index
    %c0_125 = arith.constant 0 : index
    %c0_126 = arith.constant 0 : index
    %106 = vector.load %arg2[%c17, %c0_125, %c0_126] : memref<27x16x8xbf16, #tpu.memory_space<vmem>>, vector<1x16x8xbf16>
    %107 = vector.shape_cast %106 : vector<1x16x8xbf16> to vector<16x8xbf16>
    %cst_127 = arith.constant dense<0.000000e+00> : vector<16x27xf32>
    %108 = tpu.matmul %107, %105, %cst_127 {dimension_numbers = #tpu.dot_dimension_numbers<[1], [0], [0], [1], [0, 0, 1, 1], [], []>} : vector<16x8xbf16>, vector<8x27xbf16>, vector<16x27xf32> -> vector<16x27xf32>
    %109 = arith.addf %103, %108 : vector<16x27xf32>
    %c0_128 = arith.constant 0 : index
    %c6_129 = arith.constant 6 : index
    %c0_130 = arith.constant 0 : index
    %c12_131 = arith.constant 12 : index
    %110 = vector.load %arg1[%c0_128, %c6_129, %c0_130, %c12_131] : memref<1x8x8x40xbf16, #tpu.memory_space<vmem>>, vector<1x1x8x27xbf16>
    %111 = vector.shape_cast %110 : vector<1x1x8x27xbf16> to vector<8x27xbf16>
    %c18 = arith.constant 18 : index
    %c0_132 = arith.constant 0 : index
    %c0_133 = arith.constant 0 : index
    %112 = vector.load %arg2[%c18, %c0_132, %c0_133] : memref<27x16x8xbf16, #tpu.memory_space<vmem>>, vector<1x16x8xbf16>
    %113 = vector.shape_cast %112 : vector<1x16x8xbf16> to vector<16x8xbf16>
    %cst_134 = arith.constant dense<0.000000e+00> : vector<16x27xf32>
    %114 = tpu.matmul %113, %111, %cst_134 {dimension_numbers = #tpu.dot_dimension_numbers<[1], [0], [0], [1], [0, 0, 1, 1], [], []>} : vector<16x8xbf16>, vector<8x27xbf16>, vector<16x27xf32> -> vector<16x27xf32>
    %115 = arith.addf %109, %114 : vector<16x27xf32>
    %c0_135 = arith.constant 0 : index
    %c7_136 = arith.constant 7 : index
    %c0_137 = arith.constant 0 : index
    %c0_138 = arith.constant 0 : index
    %116 = vector.load %arg1[%c0_135, %c7_136, %c0_137, %c0_138] : memref<1x8x8x40xbf16, #tpu.memory_space<vmem>>, vector<1x1x8x27xbf16>
    %117 = vector.shape_cast %116 : vector<1x1x8x27xbf16> to vector<8x27xbf16>
    %c19 = arith.constant 19 : index
    %c0_139 = arith.constant 0 : index
    %c0_140 = arith.constant 0 : index
    %118 = vector.load %arg2[%c19, %c0_139, %c0_140] : memref<27x16x8xbf16, #tpu.memory_space<vmem>>, vector<1x16x8xbf16>
    %119 = vector.shape_cast %118 : vector<1x16x8xbf16> to vector<16x8xbf16>
    %cst_141 = arith.constant dense<0.000000e+00> : vector<16x27xf32>
    %120 = tpu.matmul %119, %117, %cst_141 {dimension_numbers = #tpu.dot_dimension_numbers<[1], [0], [0], [1], [0, 0, 1, 1], [], []>} : vector<16x8xbf16>, vector<8x27xbf16>, vector<16x27xf32> -> vector<16x27xf32>
    %121 = arith.addf %115, %120 : vector<16x27xf32>
    %c0_142 = arith.constant 0 : index
    %c7_143 = arith.constant 7 : index
    %c0_144 = arith.constant 0 : index
    %c1_145 = arith.constant 1 : index
    %122 = vector.load %arg1[%c0_142, %c7_143, %c0_144, %c1_145] : memref<1x8x8x40xbf16, #tpu.memory_space<vmem>>, vector<1x1x8x27xbf16>
    %123 = vector.shape_cast %122 : vector<1x1x8x27xbf16> to vector<8x27xbf16>
    %c20 = arith.constant 20 : index
    %c0_146 = arith.constant 0 : index
    %c0_147 = arith.constant 0 : index
    %124 = vector.load %arg2[%c20, %c0_146, %c0_147] : memref<27x16x8xbf16, #tpu.memory_space<vmem>>, vector<1x16x8xbf16>
    %125 = vector.shape_cast %124 : vector<1x16x8xbf16> to vector<16x8xbf16>
    %cst_148 = arith.constant dense<0.000000e+00> : vector<16x27xf32>
    %126 = tpu.matmul %125, %123, %cst_148 {dimension_numbers = #tpu.dot_dimension_numbers<[1], [0], [0], [1], [0, 0, 1, 1], [], []>} : vector<16x8xbf16>, vector<8x27xbf16>, vector<16x27xf32> -> vector<16x27xf32>
    %127 = arith.addf %121, %126 : vector<16x27xf32>
    %c0_149 = arith.constant 0 : index
    %c7_150 = arith.constant 7 : index
    %c0_151 = arith.constant 0 : index
    %c3_152 = arith.constant 3 : index
    %128 = vector.load %arg1[%c0_149, %c7_150, %c0_151, %c3_152] : memref<1x8x8x40xbf16, #tpu.memory_space<vmem>>, vector<1x1x8x27xbf16>
    %129 = vector.shape_cast %128 : vector<1x1x8x27xbf16> to vector<8x27xbf16>
    %c21 = arith.constant 21 : index
    %c0_153 = arith.constant 0 : index
    %c0_154 = arith.constant 0 : index
    %130 = vector.load %arg2[%c21, %c0_153, %c0_154] : memref<27x16x8xbf16, #tpu.memory_space<vmem>>, vector<1x16x8xbf16>
    %131 = vector.shape_cast %130 : vector<1x16x8xbf16> to vector<16x8xbf16>
    %cst_155 = arith.constant dense<0.000000e+00> : vector<16x27xf32>
    %132 = tpu.matmul %131, %129, %cst_155 {dimension_numbers = #tpu.dot_dimension_numbers<[1], [0], [0], [1], [0, 0, 1, 1], [], []>} : vector<16x8xbf16>, vector<8x27xbf16>, vector<16x27xf32> -> vector<16x27xf32>
    %133 = arith.addf %127, %132 : vector<16x27xf32>
    %c0_156 = arith.constant 0 : index
    %c7_157 = arith.constant 7 : index
    %c0_158 = arith.constant 0 : index
    %c4_159 = arith.constant 4 : index
    %134 = vector.load %arg1[%c0_156, %c7_157, %c0_158, %c4_159] : memref<1x8x8x40xbf16, #tpu.memory_space<vmem>>, vector<1x1x8x27xbf16>
    %135 = vector.shape_cast %134 : vector<1x1x8x27xbf16> to vector<8x27xbf16>
    %c22 = arith.constant 22 : index
    %c0_160 = arith.constant 0 : index
    %c0_161 = arith.constant 0 : index
    %136 = vector.load %arg2[%c22, %c0_160, %c0_161] : memref<27x16x8xbf16, #tpu.memory_space<vmem>>, vector<1x16x8xbf16>
    %137 = vector.shape_cast %136 : vector<1x16x8xbf16> to vector<16x8xbf16>
    %cst_162 = arith.constant dense<0.000000e+00> : vector<16x27xf32>
    %138 = tpu.matmul %137, %135, %cst_162 {dimension_numbers = #tpu.dot_dimension_numbers<[1], [0], [0], [1], [0, 0, 1, 1], [], []>} : vector<16x8xbf16>, vector<8x27xbf16>, vector<16x27xf32> -> vector<16x27xf32>
    %139 = arith.addf %133, %138 : vector<16x27xf32>
    %c0_163 = arith.constant 0 : index
    %c7_164 = arith.constant 7 : index
    %c0_165 = arith.constant 0 : index
    %c9_166 = arith.constant 9 : index
    %140 = vector.load %arg1[%c0_163, %c7_164, %c0_165, %c9_166] : memref<1x8x8x40xbf16, #tpu.memory_space<vmem>>, vector<1x1x8x27xbf16>
    %141 = vector.shape_cast %140 : vector<1x1x8x27xbf16> to vector<8x27xbf16>
    %c23 = arith.constant 23 : index
    %c0_167 = arith.constant 0 : index
    %c0_168 = arith.constant 0 : index
    %142 = vector.load %arg2[%c23, %c0_167, %c0_168] : memref<27x16x8xbf16, #tpu.memory_space<vmem>>, vector<1x16x8xbf16>
    %143 = vector.shape_cast %142 : vector<1x16x8xbf16> to vector<16x8xbf16>
    %cst_169 = arith.constant dense<0.000000e+00> : vector<16x27xf32>
    %144 = tpu.matmul %143, %141, %cst_169 {dimension_numbers = #tpu.dot_dimension_numbers<[1], [0], [0], [1], [0, 0, 1, 1], [], []>} : vector<16x8xbf16>, vector<8x27xbf16>, vector<16x27xf32> -> vector<16x27xf32>
    %145 = arith.addf %139, %144 : vector<16x27xf32>
    %c0_170 = arith.constant 0 : index
    %c7_171 = arith.constant 7 : index
    %c0_172 = arith.constant 0 : index
    %c10_173 = arith.constant 10 : index
    %146 = vector.load %arg1[%c0_170, %c7_171, %c0_172, %c10_173] : memref<1x8x8x40xbf16, #tpu.memory_space<vmem>>, vector<1x1x8x27xbf16>
    %147 = vector.shape_cast %146 : vector<1x1x8x27xbf16> to vector<8x27xbf16>
    %c24 = arith.constant 24 : index
    %c0_174 = arith.constant 0 : index
    %c0_175 = arith.constant 0 : index
    %148 = vector.load %arg2[%c24, %c0_174, %c0_175] : memref<27x16x8xbf16, #tpu.memory_space<vmem>>, vector<1x16x8xbf16>
    %149 = vector.shape_cast %148 : vector<1x16x8xbf16> to vector<16x8xbf16>
    %cst_176 = arith.constant dense<0.000000e+00> : vector<16x27xf32>
    %150 = tpu.matmul %149, %147, %cst_176 {dimension_numbers = #tpu.dot_dimension_numbers<[1], [0], [0], [1], [0, 0, 1, 1], [], []>} : vector<16x8xbf16>, vector<8x27xbf16>, vector<16x27xf32> -> vector<16x27xf32>
    %151 = arith.addf %145, %150 : vector<16x27xf32>
    %c0_177 = arith.constant 0 : index
    %c7_178 = arith.constant 7 : index
    %c0_179 = arith.constant 0 : index
    %c12_180 = arith.constant 12 : index
    %152 = vector.load %arg1[%c0_177, %c7_178, %c0_179, %c12_180] : memref<1x8x8x40xbf16, #tpu.memory_space<vmem>>, vector<1x1x8x27xbf16>
    %153 = vector.shape_cast %152 : vector<1x1x8x27xbf16> to vector<8x27xbf16>
    %c25 = arith.constant 25 : index
    %c0_181 = arith.constant 0 : index
    %c0_182 = arith.constant 0 : index
    %154 = vector.load %arg2[%c25, %c0_181, %c0_182] : memref<27x16x8xbf16, #tpu.memory_space<vmem>>, vector<1x16x8xbf16>
    %155 = vector.shape_cast %154 : vector<1x16x8xbf16> to vector<16x8xbf16>
    %cst_183 = arith.constant dense<0.000000e+00> : vector<16x27xf32>
    %156 = tpu.matmul %155, %153, %cst_183 {dimension_numbers = #tpu.dot_dimension_numbers<[1], [0], [0], [1], [0, 0, 1, 1], [], []>} : vector<16x8xbf16>, vector<8x27xbf16>, vector<16x27xf32> -> vector<16x27xf32>
    %157 = arith.addf %151, %156 : vector<16x27xf32>
    %c0_184 = arith.constant 0 : index
    %c7_185 = arith.constant 7 : index
    %c0_186 = arith.constant 0 : index
    %c13_187 = arith.constant 13 : index
    %158 = vector.load %arg1[%c0_184, %c7_185, %c0_186, %c13_187] : memref<1x8x8x40xbf16, #tpu.memory_space<vmem>>, vector<1x1x8x27xbf16>
    %159 = vector.shape_cast %158 : vector<1x1x8x27xbf16> to vector<8x27xbf16>
    %c26 = arith.constant 26 : index
    %c0_188 = arith.constant 0 : index
    %c0_189 = arith.constant 0 : index
    %160 = vector.load %arg2[%c26, %c0_188, %c0_189] : memref<27x16x8xbf16, #tpu.memory_space<vmem>>, vector<1x16x8xbf16>
    %161 = vector.shape_cast %160 : vector<1x16x8xbf16> to vector<16x8xbf16>
    %cst_190 = arith.constant dense<0.000000e+00> : vector<16x27xf32>
    %162 = tpu.matmul %161, %159, %cst_190 {dimension_numbers = #tpu.dot_dimension_numbers<[1], [0], [0], [1], [0, 0, 1, 1], [], []>} : vector<16x8xbf16>, vector<8x27xbf16>, vector<16x27xf32> -> vector<16x27xf32>
    %163 = arith.addf %157, %162 : vector<16x27xf32>
    %164 = vector.broadcast %0 : vector<16x1xf32> to vector<16x27xf32>
    %165 = arith.addf %163, %164 : vector<16x27xf32>
    %cst_191 = arith.constant 0.000000e+00 : f32
    %166 = vector.broadcast %cst_191 : f32 to vector<16x27xf32>
    %167 = arith.maximumf %165, %166 : vector<16x27xf32>
    %168 = arith.truncf %167 : vector<16x27xf32> to vector<16x27xbf16>
    %c0_192 = arith.constant 0 : index
    %c0_193 = arith.constant 0 : index
    %c0_194 = arith.constant 0 : index
    %c0_195 = arith.constant 0 : index
    %169 = vector.load %arg4[%c0_192, %c0_193, %c0_194, %c0_195] : memref<1x1x16x27xbf16, #tpu.memory_space<vmem>>, vector<1x1x16x27xbf16>
    %170 = vector.shape_cast %169 : vector<1x1x16x27xbf16> to vector<16x27xbf16>
    %171 = vector.shape_cast %168 : vector<16x27xbf16> to vector<1x1x16x27xbf16>
    tpu.vector_store %arg4[%c0_192, %c0_193, %c0_194, %c0_195], %171 {strides = array<i32>} : memref<1x1x16x27xbf16, #tpu.memory_space<vmem>>, vector<1x1x16x27xbf16>,
    return
  }
  func.func @transform_0(%arg0: i32) -> (i32, i32, i32, i32) {
    %c0_i32 = arith.constant 0 : i32
    %c0_i32_0 = arith.constant 0 : i32
    %c0_i32_1 = arith.constant 0 : i32
    %c0_i32_2 = arith.constant 0 : i32
    return %arg0, %c0_i32, %c0_i32_0, %c0_i32_1 : i32, i32, i32, i32
  }
  func.func @transform_1(%arg0: i32) -> (i32, i32, i32) {
    %c0_i32 = arith.constant 0 : i32
    %c0_i32_0 = arith.constant 0 : i32
    %c0_i32_1 = arith.constant 0 : i32
    %c0_i32_2 = arith.constant 0 : i32
    return %c0_i32, %c0_i32_0, %c0_i32_1 : i32, i32, i32
  }
  func.func @transform_2(%arg0: i32) -> (i32, i32) {
    %c0_i32 = arith.constant 0 : i32
    %c0_i32_0 = arith.constant 0 : i32
    %c0_i32_1 = arith.constant 0 : i32
    return %c0_i32, %c0_i32_0 : i32, i32
  }
  func.func @transform_3(%arg0: i32) -> (i32, i32, i32, i32) {
    %c0_i32 = arith.constant 0 : i32
    %c0_i32_0 = arith.constant 0 : i32
    %c0_i32_1 = arith.constant 0 : i32
    %c0_i32_2 = arith.constant 0 : i32
    return %arg0, %c0_i32, %c0_i32_0, %c0_i32_1 : i32, i32, i32, i32
  }
}

module attributes {stable_mosaic.version = 11 : i64} {
  func.func @_grouped_tap_conv_kernel(%arg0: i32, %arg1: memref<1x1x16x106xbf16, #tpu.memory_space<vmem>>, %arg2: memref<27x16x16xbf16, #tpu.memory_space<vmem>>, %arg3: memref<16x1xf32, #tpu.memory_space<vmem>>, %arg4: memref<1x1x16x64xbf16, #tpu.memory_space<vmem>>) attributes {dimension_semantics = [#tpu.dimension_semantics<parallel>], iteration_bounds = array<i64: 2>, scalar_prefetch = 0 : i64, scratch_operands = 0 : i64, tpu.core_type = #tpu.core_type<tc>, window_params = [{transform_indices = @transform_0, window_bounds = array<i64: 1, 1, 16, 106>}, {pipeline_mode = #tpu.pipeline_mode<synchronous>, transform_indices = @transform_1, window_bounds = array<i64: 27, 16, 16>}, {pipeline_mode = #tpu.pipeline_mode<synchronous>, transform_indices = @transform_2, window_bounds = array<i64: 16, 1>}, {transform_indices = @transform_3, window_bounds = array<i64: 1, 1, 16, 64>}]} {
    %c0 = arith.constant 0 : index
    %c0_0 = arith.constant 0 : index
    %0 = vector.load %arg3[%c0, %c0_0] : memref<16x1xf32, #tpu.memory_space<vmem>>, vector<16x1xf32>
    %cst = arith.constant 0.000000e+00 : f32
    %1 = vector.broadcast %cst : f32 to vector<16x64xf32>
    %c0_1 = arith.constant 0 : index
    %c0_2 = arith.constant 0 : index
    %c0_3 = arith.constant 0 : index
    %c0_4 = arith.constant 0 : index
    %2 = vector.load %arg1[%c0_1, %c0_2, %c0_3, %c0_4] : memref<1x1x16x106xbf16, #tpu.memory_space<vmem>>, vector<1x1x16x64xbf16>
    %3 = vector.shape_cast %2 : vector<1x1x16x64xbf16> to vector<16x64xbf16>
    %c0_5 = arith.constant 0 : index
    %c0_6 = arith.constant 0 : index
    %c0_7 = arith.constant 0 : index
    %4 = vector.load %arg2[%c0_5, %c0_6, %c0_7] : memref<27x16x16xbf16, #tpu.memory_space<vmem>>, vector<1x16x16xbf16>
    %5 = vector.shape_cast %4 : vector<1x16x16xbf16> to vector<16x16xbf16>
    %cst_8 = arith.constant dense<0.000000e+00> : vector<16x64xf32>
    %6 = tpu.matmul %5, %3, %cst_8 {dimension_numbers = #tpu.dot_dimension_numbers<[1], [0], [0], [1], [0, 0, 1, 1], [], []>} : vector<16x16xbf16>, vector<16x64xbf16>, vector<16x64xf32> -> vector<16x64xf32>
    %7 = arith.addf %1, %6 : vector<16x64xf32>
    %c0_9 = arith.constant 0 : index
    %c0_10 = arith.constant 0 : index
    %c0_11 = arith.constant 0 : index
    %c1 = arith.constant 1 : index
    %8 = vector.load %arg1[%c0_9, %c0_10, %c0_11, %c1] : memref<1x1x16x106xbf16, #tpu.memory_space<vmem>>, vector<1x1x16x64xbf16>
    %9 = vector.shape_cast %8 : vector<1x1x16x64xbf16> to vector<16x64xbf16>
    %c1_12 = arith.constant 1 : index
    %c0_13 = arith.constant 0 : index
    %c0_14 = arith.constant 0 : index
    %10 = vector.load %arg2[%c1_12, %c0_13, %c0_14] : memref<27x16x16xbf16, #tpu.memory_space<vmem>>, vector<1x16x16xbf16>
    %11 = vector.shape_cast %10 : vector<1x16x16xbf16> to vector<16x16xbf16>
    %cst_15 = arith.constant dense<0.000000e+00> : vector<16x64xf32>
    %12 = tpu.matmul %11, %9, %cst_15 {dimension_numbers = #tpu.dot_dimension_numbers<[1], [0], [0], [1], [0, 0, 1, 1], [], []>} : vector<16x16xbf16>, vector<16x64xbf16>, vector<16x64xf32> -> vector<16x64xf32>
    %13 = arith.addf %7, %12 : vector<16x64xf32>
    %c0_16 = arith.constant 0 : index
    %c0_17 = arith.constant 0 : index
    %c0_18 = arith.constant 0 : index
    %c2 = arith.constant 2 : index
    %14 = vector.load %arg1[%c0_16, %c0_17, %c0_18, %c2] : memref<1x1x16x106xbf16, #tpu.memory_space<vmem>>, vector<1x1x16x64xbf16>
    %15 = vector.shape_cast %14 : vector<1x1x16x64xbf16> to vector<16x64xbf16>
    %c2_19 = arith.constant 2 : index
    %c0_20 = arith.constant 0 : index
    %c0_21 = arith.constant 0 : index
    %16 = vector.load %arg2[%c2_19, %c0_20, %c0_21] : memref<27x16x16xbf16, #tpu.memory_space<vmem>>, vector<1x16x16xbf16>
    %17 = vector.shape_cast %16 : vector<1x16x16xbf16> to vector<16x16xbf16>
    %cst_22 = arith.constant dense<0.000000e+00> : vector<16x64xf32>
    %18 = tpu.matmul %17, %15, %cst_22 {dimension_numbers = #tpu.dot_dimension_numbers<[1], [0], [0], [1], [0, 0, 1, 1], [], []>} : vector<16x16xbf16>, vector<16x64xbf16>, vector<16x64xf32> -> vector<16x64xf32>
    %19 = arith.addf %13, %18 : vector<16x64xf32>
    %c0_23 = arith.constant 0 : index
    %c0_24 = arith.constant 0 : index
    %c0_25 = arith.constant 0 : index
    %c4 = arith.constant 4 : index
    %20 = vector.load %arg1[%c0_23, %c0_24, %c0_25, %c4] : memref<1x1x16x106xbf16, #tpu.memory_space<vmem>>, vector<1x1x16x64xbf16>
    %21 = vector.shape_cast %20 : vector<1x1x16x64xbf16> to vector<16x64xbf16>
    %c3 = arith.constant 3 : index
    %c0_26 = arith.constant 0 : index
    %c0_27 = arith.constant 0 : index
    %22 = vector.load %arg2[%c3, %c0_26, %c0_27] : memref<27x16x16xbf16, #tpu.memory_space<vmem>>, vector<1x16x16xbf16>
    %23 = vector.shape_cast %22 : vector<1x16x16xbf16> to vector<16x16xbf16>
    %cst_28 = arith.constant dense<0.000000e+00> : vector<16x64xf32>
    %24 = tpu.matmul %23, %21, %cst_28 {dimension_numbers = #tpu.dot_dimension_numbers<[1], [0], [0], [1], [0, 0, 1, 1], [], []>} : vector<16x16xbf16>, vector<16x64xbf16>, vector<16x64xf32> -> vector<16x64xf32>
    %25 = arith.addf %19, %24 : vector<16x64xf32>
    %c0_29 = arith.constant 0 : index
    %c0_30 = arith.constant 0 : index
    %c0_31 = arith.constant 0 : index
    %c5 = arith.constant 5 : index
    %26 = vector.load %arg1[%c0_29, %c0_30, %c0_31, %c5] : memref<1x1x16x106xbf16, #tpu.memory_space<vmem>>, vector<1x1x16x64xbf16>
    %27 = vector.shape_cast %26 : vector<1x1x16x64xbf16> to vector<16x64xbf16>
    %c4_32 = arith.constant 4 : index
    %c0_33 = arith.constant 0 : index
    %c0_34 = arith.constant 0 : index
    %28 = vector.load %arg2[%c4_32, %c0_33, %c0_34] : memref<27x16x16xbf16, #tpu.memory_space<vmem>>, vector<1x16x16xbf16>
    %29 = vector.shape_cast %28 : vector<1x16x16xbf16> to vector<16x16xbf16>
    %cst_35 = arith.constant dense<0.000000e+00> : vector<16x64xf32>
    %30 = tpu.matmul %29, %27, %cst_35 {dimension_numbers = #tpu.dot_dimension_numbers<[1], [0], [0], [1], [0, 0, 1, 1], [], []>} : vector<16x16xbf16>, vector<16x64xbf16>, vector<16x64xf32> -> vector<16x64xf32>
    %31 = arith.addf %25, %30 : vector<16x64xf32>
    %c0_36 = arith.constant 0 : index
    %c0_37 = arith.constant 0 : index
    %c0_38 = arith.constant 0 : index
    %c6 = arith.constant 6 : index
    %32 = vector.load %arg1[%c0_36, %c0_37, %c0_38, %c6] : memref<1x1x16x106xbf16, #tpu.memory_space<vmem>>, vector<1x1x16x64xbf16>
    %33 = vector.shape_cast %32 : vector<1x1x16x64xbf16> to vector<16x64xbf16>
    %c5_39 = arith.constant 5 : index
    %c0_40 = arith.constant 0 : index
    %c0_41 = arith.constant 0 : index
    %34 = vector.load %arg2[%c5_39, %c0_40, %c0_41] : memref<27x16x16xbf16, #tpu.memory_space<vmem>>, vector<1x16x16xbf16>
    %35 = vector.shape_cast %34 : vector<1x16x16xbf16> to vector<16x16xbf16>
    %cst_42 = arith.constant dense<0.000000e+00> : vector<16x64xf32>
    %36 = tpu.matmul %35, %33, %cst_42 {dimension_numbers = #tpu.dot_dimension_numbers<[1], [0], [0], [1], [0, 0, 1, 1], [], []>} : vector<16x16xbf16>, vector<16x64xbf16>, vector<16x64xf32> -> vector<16x64xf32>
    %37 = arith.addf %31, %36 : vector<16x64xf32>
    %c0_43 = arith.constant 0 : index
    %c0_44 = arith.constant 0 : index
    %c0_45 = arith.constant 0 : index
    %c8 = arith.constant 8 : index
    %38 = vector.load %arg1[%c0_43, %c0_44, %c0_45, %c8] : memref<1x1x16x106xbf16, #tpu.memory_space<vmem>>, vector<1x1x16x64xbf16>
    %39 = vector.shape_cast %38 : vector<1x1x16x64xbf16> to vector<16x64xbf16>
    %c6_46 = arith.constant 6 : index
    %c0_47 = arith.constant 0 : index
    %c0_48 = arith.constant 0 : index
    %40 = vector.load %arg2[%c6_46, %c0_47, %c0_48] : memref<27x16x16xbf16, #tpu.memory_space<vmem>>, vector<1x16x16xbf16>
    %41 = vector.shape_cast %40 : vector<1x16x16xbf16> to vector<16x16xbf16>
    %cst_49 = arith.constant dense<0.000000e+00> : vector<16x64xf32>
    %42 = tpu.matmul %41, %39, %cst_49 {dimension_numbers = #tpu.dot_dimension_numbers<[1], [0], [0], [1], [0, 0, 1, 1], [], []>} : vector<16x16xbf16>, vector<16x64xbf16>, vector<16x64xf32> -> vector<16x64xf32>
    %43 = arith.addf %37, %42 : vector<16x64xf32>
    %c0_50 = arith.constant 0 : index
    %c0_51 = arith.constant 0 : index
    %c0_52 = arith.constant 0 : index
    %c9 = arith.constant 9 : index
    %44 = vector.load %arg1[%c0_50, %c0_51, %c0_52, %c9] : memref<1x1x16x106xbf16, #tpu.memory_space<vmem>>, vector<1x1x16x64xbf16>
    %45 = vector.shape_cast %44 : vector<1x1x16x64xbf16> to vector<16x64xbf16>
    %c7 = arith.constant 7 : index
    %c0_53 = arith.constant 0 : index
    %c0_54 = arith.constant 0 : index
    %46 = vector.load %arg2[%c7, %c0_53, %c0_54] : memref<27x16x16xbf16, #tpu.memory_space<vmem>>, vector<1x16x16xbf16>
    %47 = vector.shape_cast %46 : vector<1x16x16xbf16> to vector<16x16xbf16>
    %cst_55 = arith.constant dense<0.000000e+00> : vector<16x64xf32>
    %48 = tpu.matmul %47, %45, %cst_55 {dimension_numbers = #tpu.dot_dimension_numbers<[1], [0], [0], [1], [0, 0, 1, 1], [], []>} : vector<16x16xbf16>, vector<16x64xbf16>, vector<16x64xf32> -> vector<16x64xf32>
    %49 = arith.addf %43, %48 : vector<16x64xf32>
    %c0_56 = arith.constant 0 : index
    %c0_57 = arith.constant 0 : index
    %c0_58 = arith.constant 0 : index
    %c10 = arith.constant 10 : index
    %50 = vector.load %arg1[%c0_56, %c0_57, %c0_58, %c10] : memref<1x1x16x106xbf16, #tpu.memory_space<vmem>>, vector<1x1x16x64xbf16>
    %51 = vector.shape_cast %50 : vector<1x1x16x64xbf16> to vector<16x64xbf16>
    %c8_59 = arith.constant 8 : index
    %c0_60 = arith.constant 0 : index
    %c0_61 = arith.constant 0 : index
    %52 = vector.load %arg2[%c8_59, %c0_60, %c0_61] : memref<27x16x16xbf16, #tpu.memory_space<vmem>>, vector<1x16x16xbf16>
    %53 = vector.shape_cast %52 : vector<1x16x16xbf16> to vector<16x16xbf16>
    %cst_62 = arith.constant dense<0.000000e+00> : vector<16x64xf32>
    %54 = tpu.matmul %53, %51, %cst_62 {dimension_numbers = #tpu.dot_dimension_numbers<[1], [0], [0], [1], [0, 0, 1, 1], [], []>} : vector<16x16xbf16>, vector<16x64xbf16>, vector<16x64xf32> -> vector<16x64xf32>
    %55 = arith.addf %49, %54 : vector<16x64xf32>
    %c0_63 = arith.constant 0 : index
    %c0_64 = arith.constant 0 : index
    %c0_65 = arith.constant 0 : index
    %c16 = arith.constant 16 : index
    %56 = vector.load %arg1[%c0_63, %c0_64, %c0_65, %c16] : memref<1x1x16x106xbf16, #tpu.memory_space<vmem>>, vector<1x1x16x64xbf16>
    %57 = vector.shape_cast %56 : vector<1x1x16x64xbf16> to vector<16x64xbf16>
    %c9_66 = arith.constant 9 : index
    %c0_67 = arith.constant 0 : index
    %c0_68 = arith.constant 0 : index
    %58 = vector.load %arg2[%c9_66, %c0_67, %c0_68] : memref<27x16x16xbf16, #tpu.memory_space<vmem>>, vector<1x16x16xbf16>
    %59 = vector.shape_cast %58 : vector<1x16x16xbf16> to vector<16x16xbf16>
    %cst_69 = arith.constant dense<0.000000e+00> : vector<16x64xf32>
    %60 = tpu.matmul %59, %57, %cst_69 {dimension_numbers = #tpu.dot_dimension_numbers<[1], [0], [0], [1], [0, 0, 1, 1], [], []>} : vector<16x16xbf16>, vector<16x64xbf16>, vector<16x64xf32> -> vector<16x64xf32>
    %61 = arith.addf %55, %60 : vector<16x64xf32>
    %c0_70 = arith.constant 0 : index
    %c0_71 = arith.constant 0 : index
    %c0_72 = arith.constant 0 : index
    %c17 = arith.constant 17 : index
    %62 = vector.load %arg1[%c0_70, %c0_71, %c0_72, %c17] : memref<1x1x16x106xbf16, #tpu.memory_space<vmem>>, vector<1x1x16x64xbf16>
    %63 = vector.shape_cast %62 : vector<1x1x16x64xbf16> to vector<16x64xbf16>
    %c10_73 = arith.constant 10 : index
    %c0_74 = arith.constant 0 : index
    %c0_75 = arith.constant 0 : index
    %64 = vector.load %arg2[%c10_73, %c0_74, %c0_75] : memref<27x16x16xbf16, #tpu.memory_space<vmem>>, vector<1x16x16xbf16>
    %65 = vector.shape_cast %64 : vector<1x16x16xbf16> to vector<16x16xbf16>
    %cst_76 = arith.constant dense<0.000000e+00> : vector<16x64xf32>
    %66 = tpu.matmul %65, %63, %cst_76 {dimension_numbers = #tpu.dot_dimension_numbers<[1], [0], [0], [1], [0, 0, 1, 1], [], []>} : vector<16x16xbf16>, vector<16x64xbf16>, vector<16x64xf32> -> vector<16x64xf32>
    %67 = arith.addf %61, %66 : vector<16x64xf32>
    %c0_77 = arith.constant 0 : index
    %c0_78 = arith.constant 0 : index
    %c0_79 = arith.constant 0 : index
    %c18 = arith.constant 18 : index
    %68 = vector.load %arg1[%c0_77, %c0_78, %c0_79, %c18] : memref<1x1x16x106xbf16, #tpu.memory_space<vmem>>, vector<1x1x16x64xbf16>
    %69 = vector.shape_cast %68 : vector<1x1x16x64xbf16> to vector<16x64xbf16>
    %c11 = arith.constant 11 : index
    %c0_80 = arith.constant 0 : index
    %c0_81 = arith.constant 0 : index
    %70 = vector.load %arg2[%c11, %c0_80, %c0_81] : memref<27x16x16xbf16, #tpu.memory_space<vmem>>, vector<1x16x16xbf16>
    %71 = vector.shape_cast %70 : vector<1x16x16xbf16> to vector<16x16xbf16>
    %cst_82 = arith.constant dense<0.000000e+00> : vector<16x64xf32>
    %72 = tpu.matmul %71, %69, %cst_82 {dimension_numbers = #tpu.dot_dimension_numbers<[1], [0], [0], [1], [0, 0, 1, 1], [], []>} : vector<16x16xbf16>, vector<16x64xbf16>, vector<16x64xf32> -> vector<16x64xf32>
    %73 = arith.addf %67, %72 : vector<16x64xf32>
    %c0_83 = arith.constant 0 : index
    %c0_84 = arith.constant 0 : index
    %c0_85 = arith.constant 0 : index
    %c20 = arith.constant 20 : index
    %74 = vector.load %arg1[%c0_83, %c0_84, %c0_85, %c20] : memref<1x1x16x106xbf16, #tpu.memory_space<vmem>>, vector<1x1x16x64xbf16>
    %75 = vector.shape_cast %74 : vector<1x1x16x64xbf16> to vector<16x64xbf16>
    %c12 = arith.constant 12 : index
    %c0_86 = arith.constant 0 : index
    %c0_87 = arith.constant 0 : index
    %76 = vector.load %arg2[%c12, %c0_86, %c0_87] : memref<27x16x16xbf16, #tpu.memory_space<vmem>>, vector<1x16x16xbf16>
    %77 = vector.shape_cast %76 : vector<1x16x16xbf16> to vector<16x16xbf16>
    %cst_88 = arith.constant dense<0.000000e+00> : vector<16x64xf32>
    %78 = tpu.matmul %77, %75, %cst_88 {dimension_numbers = #tpu.dot_dimension_numbers<[1], [0], [0], [1], [0, 0, 1, 1], [], []>} : vector<16x16xbf16>, vector<16x64xbf16>, vector<16x64xf32> -> vector<16x64xf32>
    %79 = arith.addf %73, %78 : vector<16x64xf32>
    %c0_89 = arith.constant 0 : index
    %c0_90 = arith.constant 0 : index
    %c0_91 = arith.constant 0 : index
    %c21 = arith.constant 21 : index
    %80 = vector.load %arg1[%c0_89, %c0_90, %c0_91, %c21] : memref<1x1x16x106xbf16, #tpu.memory_space<vmem>>, vector<1x1x16x64xbf16>
    %81 = vector.shape_cast %80 : vector<1x1x16x64xbf16> to vector<16x64xbf16>
    %c13 = arith.constant 13 : index
    %c0_92 = arith.constant 0 : index
    %c0_93 = arith.constant 0 : index
    %82 = vector.load %arg2[%c13, %c0_92, %c0_93] : memref<27x16x16xbf16, #tpu.memory_space<vmem>>, vector<1x16x16xbf16>
    %83 = vector.shape_cast %82 : vector<1x16x16xbf16> to vector<16x16xbf16>
    %cst_94 = arith.constant dense<0.000000e+00> : vector<16x64xf32>
    %84 = tpu.matmul %83, %81, %cst_94 {dimension_numbers = #tpu.dot_dimension_numbers<[1], [0], [0], [1], [0, 0, 1, 1], [], []>} : vector<16x16xbf16>, vector<16x64xbf16>, vector<16x64xf32> -> vector<16x64xf32>
    %85 = arith.addf %79, %84 : vector<16x64xf32>
    %c0_95 = arith.constant 0 : index
    %c0_96 = arith.constant 0 : index
    %c0_97 = arith.constant 0 : index
    %c22 = arith.constant 22 : index
    %86 = vector.load %arg1[%c0_95, %c0_96, %c0_97, %c22] : memref<1x1x16x106xbf16, #tpu.memory_space<vmem>>, vector<1x1x16x64xbf16>
    %87 = vector.shape_cast %86 : vector<1x1x16x64xbf16> to vector<16x64xbf16>
    %c14 = arith.constant 14 : index
    %c0_98 = arith.constant 0 : index
    %c0_99 = arith.constant 0 : index
    %88 = vector.load %arg2[%c14, %c0_98, %c0_99] : memref<27x16x16xbf16, #tpu.memory_space<vmem>>, vector<1x16x16xbf16>
    %89 = vector.shape_cast %88 : vector<1x16x16xbf16> to vector<16x16xbf16>
    %cst_100 = arith.constant dense<0.000000e+00> : vector<16x64xf32>
    %90 = tpu.matmul %89, %87, %cst_100 {dimension_numbers = #tpu.dot_dimension_numbers<[1], [0], [0], [1], [0, 0, 1, 1], [], []>} : vector<16x16xbf16>, vector<16x64xbf16>, vector<16x64xf32> -> vector<16x64xf32>
    %91 = arith.addf %85, %90 : vector<16x64xf32>
    %c0_101 = arith.constant 0 : index
    %c0_102 = arith.constant 0 : index
    %c0_103 = arith.constant 0 : index
    %c24 = arith.constant 24 : index
    %92 = vector.load %arg1[%c0_101, %c0_102, %c0_103, %c24] : memref<1x1x16x106xbf16, #tpu.memory_space<vmem>>, vector<1x1x16x64xbf16>
    %93 = vector.shape_cast %92 : vector<1x1x16x64xbf16> to vector<16x64xbf16>
    %c15 = arith.constant 15 : index
    %c0_104 = arith.constant 0 : index
    %c0_105 = arith.constant 0 : index
    %94 = vector.load %arg2[%c15, %c0_104, %c0_105] : memref<27x16x16xbf16, #tpu.memory_space<vmem>>, vector<1x16x16xbf16>
    %95 = vector.shape_cast %94 : vector<1x16x16xbf16> to vector<16x16xbf16>
    %cst_106 = arith.constant dense<0.000000e+00> : vector<16x64xf32>
    %96 = tpu.matmul %95, %93, %cst_106 {dimension_numbers = #tpu.dot_dimension_numbers<[1], [0], [0], [1], [0, 0, 1, 1], [], []>} : vector<16x16xbf16>, vector<16x64xbf16>, vector<16x64xf32> -> vector<16x64xf32>
    %97 = arith.addf %91, %96 : vector<16x64xf32>
    %c0_107 = arith.constant 0 : index
    %c0_108 = arith.constant 0 : index
    %c0_109 = arith.constant 0 : index
    %c25 = arith.constant 25 : index
    %98 = vector.load %arg1[%c0_107, %c0_108, %c0_109, %c25] : memref<1x1x16x106xbf16, #tpu.memory_space<vmem>>, vector<1x1x16x64xbf16>
    %99 = vector.shape_cast %98 : vector<1x1x16x64xbf16> to vector<16x64xbf16>
    %c16_110 = arith.constant 16 : index
    %c0_111 = arith.constant 0 : index
    %c0_112 = arith.constant 0 : index
    %100 = vector.load %arg2[%c16_110, %c0_111, %c0_112] : memref<27x16x16xbf16, #tpu.memory_space<vmem>>, vector<1x16x16xbf16>
    %101 = vector.shape_cast %100 : vector<1x16x16xbf16> to vector<16x16xbf16>
    %cst_113 = arith.constant dense<0.000000e+00> : vector<16x64xf32>
    %102 = tpu.matmul %101, %99, %cst_113 {dimension_numbers = #tpu.dot_dimension_numbers<[1], [0], [0], [1], [0, 0, 1, 1], [], []>} : vector<16x16xbf16>, vector<16x64xbf16>, vector<16x64xf32> -> vector<16x64xf32>
    %103 = arith.addf %97, %102 : vector<16x64xf32>
    %c0_114 = arith.constant 0 : index
    %c0_115 = arith.constant 0 : index
    %c0_116 = arith.constant 0 : index
    %c26 = arith.constant 26 : index
    %104 = vector.load %arg1[%c0_114, %c0_115, %c0_116, %c26] : memref<1x1x16x106xbf16, #tpu.memory_space<vmem>>, vector<1x1x16x64xbf16>
    %105 = vector.shape_cast %104 : vector<1x1x16x64xbf16> to vector<16x64xbf16>
    %c17_117 = arith.constant 17 : index
    %c0_118 = arith.constant 0 : index
    %c0_119 = arith.constant 0 : index
    %106 = vector.load %arg2[%c17_117, %c0_118, %c0_119] : memref<27x16x16xbf16, #tpu.memory_space<vmem>>, vector<1x16x16xbf16>
    %107 = vector.shape_cast %106 : vector<1x16x16xbf16> to vector<16x16xbf16>
    %cst_120 = arith.constant dense<0.000000e+00> : vector<16x64xf32>
    %108 = tpu.matmul %107, %105, %cst_120 {dimension_numbers = #tpu.dot_dimension_numbers<[1], [0], [0], [1], [0, 0, 1, 1], [], []>} : vector<16x16xbf16>, vector<16x64xbf16>, vector<16x64xf32> -> vector<16x64xf32>
    %109 = arith.addf %103, %108 : vector<16x64xf32>
    %c0_121 = arith.constant 0 : index
    %c0_122 = arith.constant 0 : index
    %c0_123 = arith.constant 0 : index
    %c32 = arith.constant 32 : index
    %110 = vector.load %arg1[%c0_121, %c0_122, %c0_123, %c32] : memref<1x1x16x106xbf16, #tpu.memory_space<vmem>>, vector<1x1x16x64xbf16>
    %111 = vector.shape_cast %110 : vector<1x1x16x64xbf16> to vector<16x64xbf16>
    %c18_124 = arith.constant 18 : index
    %c0_125 = arith.constant 0 : index
    %c0_126 = arith.constant 0 : index
    %112 = vector.load %arg2[%c18_124, %c0_125, %c0_126] : memref<27x16x16xbf16, #tpu.memory_space<vmem>>, vector<1x16x16xbf16>
    %113 = vector.shape_cast %112 : vector<1x16x16xbf16> to vector<16x16xbf16>
    %cst_127 = arith.constant dense<0.000000e+00> : vector<16x64xf32>
    %114 = tpu.matmul %113, %111, %cst_127 {dimension_numbers = #tpu.dot_dimension_numbers<[1], [0], [0], [1], [0, 0, 1, 1], [], []>} : vector<16x16xbf16>, vector<16x64xbf16>, vector<16x64xf32> -> vector<16x64xf32>
    %115 = arith.addf %109, %114 : vector<16x64xf32>
    %c0_128 = arith.constant 0 : index
    %c0_129 = arith.constant 0 : index
    %c0_130 = arith.constant 0 : index
    %c33 = arith.constant 33 : index
    %116 = vector.load %arg1[%c0_128, %c0_129, %c0_130, %c33] : memref<1x1x16x106xbf16, #tpu.memory_space<vmem>>, vector<1x1x16x64xbf16>
    %117 = vector.shape_cast %116 : vector<1x1x16x64xbf16> to vector<16x64xbf16>
    %c19 = arith.constant 19 : index
    %c0_131 = arith.constant 0 : index
    %c0_132 = arith.constant 0 : index
    %118 = vector.load %arg2[%c19, %c0_131, %c0_132] : memref<27x16x16xbf16, #tpu.memory_space<vmem>>, vector<1x16x16xbf16>
    %119 = vector.shape_cast %118 : vector<1x16x16xbf16> to vector<16x16xbf16>
    %cst_133 = arith.constant dense<0.000000e+00> : vector<16x64xf32>
    %120 = tpu.matmul %119, %117, %cst_133 {dimension_numbers = #tpu.dot_dimension_numbers<[1], [0], [0], [1], [0, 0, 1, 1], [], []>} : vector<16x16xbf16>, vector<16x64xbf16>, vector<16x64xf32> -> vector<16x64xf32>
    %121 = arith.addf %115, %120 : vector<16x64xf32>
    %c0_134 = arith.constant 0 : index
    %c0_135 = arith.constant 0 : index
    %c0_136 = arith.constant 0 : index
    %c34 = arith.constant 34 : index
    %122 = vector.load %arg1[%c0_134, %c0_135, %c0_136, %c34] : memref<1x1x16x106xbf16, #tpu.memory_space<vmem>>, vector<1x1x16x64xbf16>
    %123 = vector.shape_cast %122 : vector<1x1x16x64xbf16> to vector<16x64xbf16>
    %c20_137 = arith.constant 20 : index
    %c0_138 = arith.constant 0 : index
    %c0_139 = arith.constant 0 : index
    %124 = vector.load %arg2[%c20_137, %c0_138, %c0_139] : memref<27x16x16xbf16, #tpu.memory_space<vmem>>, vector<1x16x16xbf16>
    %125 = vector.shape_cast %124 : vector<1x16x16xbf16> to vector<16x16xbf16>
    %cst_140 = arith.constant dense<0.000000e+00> : vector<16x64xf32>
    %126 = tpu.matmul %125, %123, %cst_140 {dimension_numbers = #tpu.dot_dimension_numbers<[1], [0], [0], [1], [0, 0, 1, 1], [], []>} : vector<16x16xbf16>, vector<16x64xbf16>, vector<16x64xf32> -> vector<16x64xf32>
    %127 = arith.addf %121, %126 : vector<16x64xf32>
    %c0_141 = arith.constant 0 : index
    %c0_142 = arith.constant 0 : index
    %c0_143 = arith.constant 0 : index
    %c36 = arith.constant 36 : index
    %128 = vector.load %arg1[%c0_141, %c0_142, %c0_143, %c36] : memref<1x1x16x106xbf16, #tpu.memory_space<vmem>>, vector<1x1x16x64xbf16>
    %129 = vector.shape_cast %128 : vector<1x1x16x64xbf16> to vector<16x64xbf16>
    %c21_144 = arith.constant 21 : index
    %c0_145 = arith.constant 0 : index
    %c0_146 = arith.constant 0 : index
    %130 = vector.load %arg2[%c21_144, %c0_145, %c0_146] : memref<27x16x16xbf16, #tpu.memory_space<vmem>>, vector<1x16x16xbf16>
    %131 = vector.shape_cast %130 : vector<1x16x16xbf16> to vector<16x16xbf16>
    %cst_147 = arith.constant dense<0.000000e+00> : vector<16x64xf32>
    %132 = tpu.matmul %131, %129, %cst_147 {dimension_numbers = #tpu.dot_dimension_numbers<[1], [0], [0], [1], [0, 0, 1, 1], [], []>} : vector<16x16xbf16>, vector<16x64xbf16>, vector<16x64xf32> -> vector<16x64xf32>
    %133 = arith.addf %127, %132 : vector<16x64xf32>
    %c0_148 = arith.constant 0 : index
    %c0_149 = arith.constant 0 : index
    %c0_150 = arith.constant 0 : index
    %c37 = arith.constant 37 : index
    %134 = vector.load %arg1[%c0_148, %c0_149, %c0_150, %c37] : memref<1x1x16x106xbf16, #tpu.memory_space<vmem>>, vector<1x1x16x64xbf16>
    %135 = vector.shape_cast %134 : vector<1x1x16x64xbf16> to vector<16x64xbf16>
    %c22_151 = arith.constant 22 : index
    %c0_152 = arith.constant 0 : index
    %c0_153 = arith.constant 0 : index
    %136 = vector.load %arg2[%c22_151, %c0_152, %c0_153] : memref<27x16x16xbf16, #tpu.memory_space<vmem>>, vector<1x16x16xbf16>
    %137 = vector.shape_cast %136 : vector<1x16x16xbf16> to vector<16x16xbf16>
    %cst_154 = arith.constant dense<0.000000e+00> : vector<16x64xf32>
    %138 = tpu.matmul %137, %135, %cst_154 {dimension_numbers = #tpu.dot_dimension_numbers<[1], [0], [0], [1], [0, 0, 1, 1], [], []>} : vector<16x16xbf16>, vector<16x64xbf16>, vector<16x64xf32> -> vector<16x64xf32>
    %139 = arith.addf %133, %138 : vector<16x64xf32>
    %c0_155 = arith.constant 0 : index
    %c0_156 = arith.constant 0 : index
    %c0_157 = arith.constant 0 : index
    %c38 = arith.constant 38 : index
    %140 = vector.load %arg1[%c0_155, %c0_156, %c0_157, %c38] : memref<1x1x16x106xbf16, #tpu.memory_space<vmem>>, vector<1x1x16x64xbf16>
    %141 = vector.shape_cast %140 : vector<1x1x16x64xbf16> to vector<16x64xbf16>
    %c23 = arith.constant 23 : index
    %c0_158 = arith.constant 0 : index
    %c0_159 = arith.constant 0 : index
    %142 = vector.load %arg2[%c23, %c0_158, %c0_159] : memref<27x16x16xbf16, #tpu.memory_space<vmem>>, vector<1x16x16xbf16>
    %143 = vector.shape_cast %142 : vector<1x16x16xbf16> to vector<16x16xbf16>
    %cst_160 = arith.constant dense<0.000000e+00> : vector<16x64xf32>
    %144 = tpu.matmul %143, %141, %cst_160 {dimension_numbers = #tpu.dot_dimension_numbers<[1], [0], [0], [1], [0, 0, 1, 1], [], []>} : vector<16x16xbf16>, vector<16x64xbf16>, vector<16x64xf32> -> vector<16x64xf32>
    %145 = arith.addf %139, %144 : vector<16x64xf32>
    %c0_161 = arith.constant 0 : index
    %c0_162 = arith.constant 0 : index
    %c0_163 = arith.constant 0 : index
    %c40 = arith.constant 40 : index
    %146 = vector.load %arg1[%c0_161, %c0_162, %c0_163, %c40] : memref<1x1x16x106xbf16, #tpu.memory_space<vmem>>, vector<1x1x16x64xbf16>
    %147 = vector.shape_cast %146 : vector<1x1x16x64xbf16> to vector<16x64xbf16>
    %c24_164 = arith.constant 24 : index
    %c0_165 = arith.constant 0 : index
    %c0_166 = arith.constant 0 : index
    %148 = vector.load %arg2[%c24_164, %c0_165, %c0_166] : memref<27x16x16xbf16, #tpu.memory_space<vmem>>, vector<1x16x16xbf16>
    %149 = vector.shape_cast %148 : vector<1x16x16xbf16> to vector<16x16xbf16>
    %cst_167 = arith.constant dense<0.000000e+00> : vector<16x64xf32>
    %150 = tpu.matmul %149, %147, %cst_167 {dimension_numbers = #tpu.dot_dimension_numbers<[1], [0], [0], [1], [0, 0, 1, 1], [], []>} : vector<16x16xbf16>, vector<16x64xbf16>, vector<16x64xf32> -> vector<16x64xf32>
    %151 = arith.addf %145, %150 : vector<16x64xf32>
    %c0_168 = arith.constant 0 : index
    %c0_169 = arith.constant 0 : index
    %c0_170 = arith.constant 0 : index
    %c41 = arith.constant 41 : index
    %152 = vector.load %arg1[%c0_168, %c0_169, %c0_170, %c41] : memref<1x1x16x106xbf16, #tpu.memory_space<vmem>>, vector<1x1x16x64xbf16>
    %153 = vector.shape_cast %152 : vector<1x1x16x64xbf16> to vector<16x64xbf16>
    %c25_171 = arith.constant 25 : index
    %c0_172 = arith.constant 0 : index
    %c0_173 = arith.constant 0 : index
    %154 = vector.load %arg2[%c25_171, %c0_172, %c0_173] : memref<27x16x16xbf16, #tpu.memory_space<vmem>>, vector<1x16x16xbf16>
    %155 = vector.shape_cast %154 : vector<1x16x16xbf16> to vector<16x16xbf16>
    %cst_174 = arith.constant dense<0.000000e+00> : vector<16x64xf32>
    %156 = tpu.matmul %155, %153, %cst_174 {dimension_numbers = #tpu.dot_dimension_numbers<[1], [0], [0], [1], [0, 0, 1, 1], [], []>} : vector<16x16xbf16>, vector<16x64xbf16>, vector<16x64xf32> -> vector<16x64xf32>
    %157 = arith.addf %151, %156 : vector<16x64xf32>
    %c0_175 = arith.constant 0 : index
    %c0_176 = arith.constant 0 : index
    %c0_177 = arith.constant 0 : index
    %c42 = arith.constant 42 : index
    %158 = vector.load %arg1[%c0_175, %c0_176, %c0_177, %c42] : memref<1x1x16x106xbf16, #tpu.memory_space<vmem>>, vector<1x1x16x64xbf16>
    %159 = vector.shape_cast %158 : vector<1x1x16x64xbf16> to vector<16x64xbf16>
    %c26_178 = arith.constant 26 : index
    %c0_179 = arith.constant 0 : index
    %c0_180 = arith.constant 0 : index
    %160 = vector.load %arg2[%c26_178, %c0_179, %c0_180] : memref<27x16x16xbf16, #tpu.memory_space<vmem>>, vector<1x16x16xbf16>
    %161 = vector.shape_cast %160 : vector<1x16x16xbf16> to vector<16x16xbf16>
    %cst_181 = arith.constant dense<0.000000e+00> : vector<16x64xf32>
    %162 = tpu.matmul %161, %159, %cst_181 {dimension_numbers = #tpu.dot_dimension_numbers<[1], [0], [0], [1], [0, 0, 1, 1], [], []>} : vector<16x16xbf16>, vector<16x64xbf16>, vector<16x64xf32> -> vector<16x64xf32>
    %163 = arith.addf %157, %162 : vector<16x64xf32>
    %164 = vector.broadcast %0 : vector<16x1xf32> to vector<16x64xf32>
    %165 = arith.addf %163, %164 : vector<16x64xf32>
    %cst_182 = arith.constant 0.000000e+00 : f32
    %166 = vector.broadcast %cst_182 : f32 to vector<16x64xf32>
    %167 = arith.maximumf %165, %166 : vector<16x64xf32>
    %168 = arith.truncf %167 : vector<16x64xf32> to vector<16x64xbf16>
    %c0_183 = arith.constant 0 : index
    %c0_184 = arith.constant 0 : index
    %c0_185 = arith.constant 0 : index
    %c0_186 = arith.constant 0 : index
    %169 = vector.load %arg4[%c0_183, %c0_184, %c0_185, %c0_186] : memref<1x1x16x64xbf16, #tpu.memory_space<vmem>>, vector<1x1x16x64xbf16>
    %170 = vector.shape_cast %169 : vector<1x1x16x64xbf16> to vector<16x64xbf16>
    %171 = vector.shape_cast %168 : vector<16x64xbf16> to vector<1x1x16x64xbf16>
    tpu.vector_store %arg4[%c0_183, %c0_184, %c0_185, %c0_186], %171 {strides = array<i32>} : memref<1x1x16x64xbf16, #tpu.memory_space<vmem>>, vector<1x1x16x64xbf16>,
    return
  }
  func.func @transform_0(%arg0: i32) -> (i32, i32, i32, i32) {
    %c0_i32 = arith.constant 0 : i32
    %c0_i32_0 = arith.constant 0 : i32
    %c0_i32_1 = arith.constant 0 : i32
    %c0_i32_2 = arith.constant 0 : i32
    return %arg0, %c0_i32, %c0_i32_0, %c0_i32_1 : i32, i32, i32, i32
  }
  func.func @transform_1(%arg0: i32) -> (i32, i32, i32) {
    %c0_i32 = arith.constant 0 : i32
    %c0_i32_0 = arith.constant 0 : i32
    %c0_i32_1 = arith.constant 0 : i32
    %c0_i32_2 = arith.constant 0 : i32
    return %c0_i32, %c0_i32_0, %c0_i32_1 : i32, i32, i32
  }
  func.func @transform_2(%arg0: i32) -> (i32, i32) {
    %c0_i32 = arith.constant 0 : i32
    %c0_i32_0 = arith.constant 0 : i32
    %c0_i32_1 = arith.constant 0 : i32
    return %c0_i32, %c0_i32_0 : i32, i32
  }
  func.func @transform_3(%arg0: i32) -> (i32, i32, i32, i32) {
    %c0_i32 = arith.constant 0 : i32
    %c0_i32_0 = arith.constant 0 : i32
    %c0_i32_1 = arith.constant 0 : i32
    %c0_i32_2 = arith.constant 0 : i32
    return %arg0, %c0_i32, %c0_i32_0, %c0_i32_1 : i32, i32, i32, i32
  }
}

module attributes {stable_mosaic.version = 11 : i64} {
  func.func @_grouped_tap_conv_kernel(%arg0: i32, %arg1: memref<1x1x16x40xbf16, #tpu.memory_space<vmem>>, %arg2: memref<27x8x16xbf16, #tpu.memory_space<vmem>>, %arg3: memref<8x1xf32, #tpu.memory_space<vmem>>, %arg4: memref<1x8x8x27xf32, #tpu.memory_space<vmem>>, %arg5: memref<1x8x8x27xbf16, #tpu.memory_space<vmem>>) attributes {dimension_semantics = [#tpu.dimension_semantics<parallel>], iteration_bounds = array<i64: 2>, scalar_prefetch = 0 : i64, scratch_operands = 0 : i64, tpu.core_type = #tpu.core_type<tc>, window_params = [{transform_indices = @transform_0, window_bounds = array<i64: 1, 1, 16, 40>}, {pipeline_mode = #tpu.pipeline_mode<synchronous>, transform_indices = @transform_1, window_bounds = array<i64: 27, 8, 16>}, {pipeline_mode = #tpu.pipeline_mode<synchronous>, transform_indices = @transform_2, window_bounds = array<i64: 8, 1>}, {transform_indices = @transform_3, window_bounds = array<i64: 1, 8, 8, 27>}, {transform_indices = @transform_4, window_bounds = array<i64: 1, 8, 8, 27>}]} {
    %c0 = arith.constant 0 : index
    %c0_0 = arith.constant 0 : index
    %0 = vector.load %arg3[%c0, %c0_0] : memref<8x1xf32, #tpu.memory_space<vmem>>, vector<8x1xf32>
    %cst = arith.constant 0.000000e+00 : f32
    %1 = vector.broadcast %cst : f32 to vector<8x27xf32>
    %c0_1 = arith.constant 0 : index
    %c0_2 = arith.constant 0 : index
    %c0_3 = arith.constant 0 : index
    %c0_4 = arith.constant 0 : index
    %2 = vector.load %arg1[%c0_1, %c0_2, %c0_3, %c0_4] : memref<1x1x16x40xbf16, #tpu.memory_space<vmem>>, vector<1x1x16x27xbf16>
    %3 = vector.shape_cast %2 : vector<1x1x16x27xbf16> to vector<16x27xbf16>
    %c0_5 = arith.constant 0 : index
    %c0_6 = arith.constant 0 : index
    %c0_7 = arith.constant 0 : index
    %4 = vector.load %arg2[%c0_5, %c0_6, %c0_7] : memref<27x8x16xbf16, #tpu.memory_space<vmem>>, vector<1x8x16xbf16>
    %5 = vector.shape_cast %4 : vector<1x8x16xbf16> to vector<8x16xbf16>
    %cst_8 = arith.constant dense<0.000000e+00> : vector<8x27xf32>
    %6 = tpu.matmul %5, %3, %cst_8 {dimension_numbers = #tpu.dot_dimension_numbers<[1], [0], [0], [1], [0, 0, 1, 1], [], []>} : vector<8x16xbf16>, vector<16x27xbf16>, vector<8x27xf32> -> vector<8x27xf32>
    %7 = arith.addf %1, %6 : vector<8x27xf32>
    %8 = vector.broadcast %0 : vector<8x1xf32> to vector<8x27xf32>
    %9 = arith.addf %7, %8 : vector<8x27xf32>
    %c0_9 = arith.constant 0 : index
    %c0_10 = arith.constant 0 : index
    %c0_11 = arith.constant 0 : index
    %c0_12 = arith.constant 0 : index
    %10 = vector.load %arg4[%c0_9, %c0_10, %c0_11, %c0_12] : memref<1x8x8x27xf32, #tpu.memory_space<vmem>>, vector<1x1x8x27xf32>
    %11 = vector.shape_cast %10 : vector<1x1x8x27xf32> to vector<8x27xf32>
    %12 = arith.addf %9, %11 : vector<8x27xf32>
    %cst_13 = arith.constant 0.000000e+00 : f32
    %13 = vector.broadcast %cst_13 : f32 to vector<8x27xf32>
    %14 = arith.maximumf %12, %13 : vector<8x27xf32>
    %15 = arith.truncf %14 : vector<8x27xf32> to vector<8x27xbf16>
    %c0_14 = arith.constant 0 : index
    %c0_15 = arith.constant 0 : index
    %c0_16 = arith.constant 0 : index
    %c0_17 = arith.constant 0 : index
    %16 = vector.load %arg5[%c0_14, %c0_15, %c0_16, %c0_17] : memref<1x8x8x27xbf16, #tpu.memory_space<vmem>>, vector<1x1x8x27xbf16>
    %17 = vector.shape_cast %16 : vector<1x1x8x27xbf16> to vector<8x27xbf16>
    %18 = vector.shape_cast %15 : vector<8x27xbf16> to vector<1x1x8x27xbf16>
    tpu.vector_store %arg5[%c0_14, %c0_15, %c0_16, %c0_17], %18 {strides = array<i32>} : memref<1x8x8x27xbf16, #tpu.memory_space<vmem>>, vector<1x1x8x27xbf16>,
    %cst_18 = arith.constant 0.000000e+00 : f32
    %19 = vector.broadcast %cst_18 : f32 to vector<8x27xf32>
    %c0_19 = arith.constant 0 : index
    %c0_20 = arith.constant 0 : index
    %c0_21 = arith.constant 0 : index
    %c0_22 = arith.constant 0 : index
    %20 = vector.load %arg1[%c0_19, %c0_20, %c0_21, %c0_22] : memref<1x1x16x40xbf16, #tpu.memory_space<vmem>>, vector<1x1x16x27xbf16>
    %21 = vector.shape_cast %20 : vector<1x1x16x27xbf16> to vector<16x27xbf16>
    %c1 = arith.constant 1 : index
    %c0_23 = arith.constant 0 : index
    %c0_24 = arith.constant 0 : index
    %22 = vector.load %arg2[%c1, %c0_23, %c0_24] : memref<27x8x16xbf16, #tpu.memory_space<vmem>>, vector<1x8x16xbf16>
    %23 = vector.shape_cast %22 : vector<1x8x16xbf16> to vector<8x16xbf16>
    %cst_25 = arith.constant dense<0.000000e+00> : vector<8x27xf32>
    %24 = tpu.matmul %23, %21, %cst_25 {dimension_numbers = #tpu.dot_dimension_numbers<[1], [0], [0], [1], [0, 0, 1, 1], [], []>} : vector<8x16xbf16>, vector<16x27xbf16>, vector<8x27xf32> -> vector<8x27xf32>
    %25 = arith.addf %19, %24 : vector<8x27xf32>
    %c0_26 = arith.constant 0 : index
    %c0_27 = arith.constant 0 : index
    %c0_28 = arith.constant 0 : index
    %c1_29 = arith.constant 1 : index
    %26 = vector.load %arg1[%c0_26, %c0_27, %c0_28, %c1_29] : memref<1x1x16x40xbf16, #tpu.memory_space<vmem>>, vector<1x1x16x27xbf16>
    %27 = vector.shape_cast %26 : vector<1x1x16x27xbf16> to vector<16x27xbf16>
    %c2 = arith.constant 2 : index
    %c0_30 = arith.constant 0 : index
    %c0_31 = arith.constant 0 : index
    %28 = vector.load %arg2[%c2, %c0_30, %c0_31] : memref<27x8x16xbf16, #tpu.memory_space<vmem>>, vector<1x8x16xbf16>
    %29 = vector.shape_cast %28 : vector<1x8x16xbf16> to vector<8x16xbf16>
    %cst_32 = arith.constant dense<0.000000e+00> : vector<8x27xf32>
    %30 = tpu.matmul %29, %27, %cst_32 {dimension_numbers = #tpu.dot_dimension_numbers<[1], [0], [0], [1], [0, 0, 1, 1], [], []>} : vector<8x16xbf16>, vector<16x27xbf16>, vector<8x27xf32> -> vector<8x27xf32>
    %31 = arith.addf %25, %30 : vector<8x27xf32>
    %32 = vector.broadcast %0 : vector<8x1xf32> to vector<8x27xf32>
    %33 = arith.addf %31, %32 : vector<8x27xf32>
    %c0_33 = arith.constant 0 : index
    %c1_34 = arith.constant 1 : index
    %c0_35 = arith.constant 0 : index
    %c0_36 = arith.constant 0 : index
    %34 = vector.load %arg4[%c0_33, %c1_34, %c0_35, %c0_36] : memref<1x8x8x27xf32, #tpu.memory_space<vmem>>, vector<1x1x8x27xf32>
    %35 = vector.shape_cast %34 : vector<1x1x8x27xf32> to vector<8x27xf32>
    %36 = arith.addf %33, %35 : vector<8x27xf32>
    %cst_37 = arith.constant 0.000000e+00 : f32
    %37 = vector.broadcast %cst_37 : f32 to vector<8x27xf32>
    %38 = arith.maximumf %36, %37 : vector<8x27xf32>
    %39 = arith.truncf %38 : vector<8x27xf32> to vector<8x27xbf16>
    %c0_38 = arith.constant 0 : index
    %c1_39 = arith.constant 1 : index
    %c0_40 = arith.constant 0 : index
    %c0_41 = arith.constant 0 : index
    %40 = vector.load %arg5[%c0_38, %c1_39, %c0_40, %c0_41] : memref<1x8x8x27xbf16, #tpu.memory_space<vmem>>, vector<1x1x8x27xbf16>
    %41 = vector.shape_cast %40 : vector<1x1x8x27xbf16> to vector<8x27xbf16>
    %42 = vector.shape_cast %39 : vector<8x27xbf16> to vector<1x1x8x27xbf16>
    tpu.vector_store %arg5[%c0_38, %c1_39, %c0_40, %c0_41], %42 {strides = array<i32>} : memref<1x8x8x27xbf16, #tpu.memory_space<vmem>>, vector<1x1x8x27xbf16>,
    %cst_42 = arith.constant 0.000000e+00 : f32
    %43 = vector.broadcast %cst_42 : f32 to vector<8x27xf32>
    %c0_43 = arith.constant 0 : index
    %c0_44 = arith.constant 0 : index
    %c0_45 = arith.constant 0 : index
    %c0_46 = arith.constant 0 : index
    %44 = vector.load %arg1[%c0_43, %c0_44, %c0_45, %c0_46] : memref<1x1x16x40xbf16, #tpu.memory_space<vmem>>, vector<1x1x16x27xbf16>
    %45 = vector.shape_cast %44 : vector<1x1x16x27xbf16> to vector<16x27xbf16>
    %c3 = arith.constant 3 : index
    %c0_47 = arith.constant 0 : index
    %c0_48 = arith.constant 0 : index
    %46 = vector.load %arg2[%c3, %c0_47, %c0_48] : memref<27x8x16xbf16, #tpu.memory_space<vmem>>, vector<1x8x16xbf16>
    %47 = vector.shape_cast %46 : vector<1x8x16xbf16> to vector<8x16xbf16>
    %cst_49 = arith.constant dense<0.000000e+00> : vector<8x27xf32>
    %48 = tpu.matmul %47, %45, %cst_49 {dimension_numbers = #tpu.dot_dimension_numbers<[1], [0], [0], [1], [0, 0, 1, 1], [], []>} : vector<8x16xbf16>, vector<16x27xbf16>, vector<8x27xf32> -> vector<8x27xf32>
    %49 = arith.addf %43, %48 : vector<8x27xf32>
    %c0_50 = arith.constant 0 : index
    %c0_51 = arith.constant 0 : index
    %c0_52 = arith.constant 0 : index
    %c3_53 = arith.constant 3 : index
    %50 = vector.load %arg1[%c0_50, %c0_51, %c0_52, %c3_53] : memref<1x1x16x40xbf16, #tpu.memory_space<vmem>>, vector<1x1x16x27xbf16>
    %51 = vector.shape_cast %50 : vector<1x1x16x27xbf16> to vector<16x27xbf16>
    %c4 = arith.constant 4 : index
    %c0_54 = arith.constant 0 : index
    %c0_55 = arith.constant 0 : index
    %52 = vector.load %arg2[%c4, %c0_54, %c0_55] : memref<27x8x16xbf16, #tpu.memory_space<vmem>>, vector<1x8x16xbf16>
    %53 = vector.shape_cast %52 : vector<1x8x16xbf16> to vector<8x16xbf16>
    %cst_56 = arith.constant dense<0.000000e+00> : vector<8x27xf32>
    %54 = tpu.matmul %53, %51, %cst_56 {dimension_numbers = #tpu.dot_dimension_numbers<[1], [0], [0], [1], [0, 0, 1, 1], [], []>} : vector<8x16xbf16>, vector<16x27xbf16>, vector<8x27xf32> -> vector<8x27xf32>
    %55 = arith.addf %49, %54 : vector<8x27xf32>
    %56 = vector.broadcast %0 : vector<8x1xf32> to vector<8x27xf32>
    %57 = arith.addf %55, %56 : vector<8x27xf32>
    %c0_57 = arith.constant 0 : index
    %c2_58 = arith.constant 2 : index
    %c0_59 = arith.constant 0 : index
    %c0_60 = arith.constant 0 : index
    %58 = vector.load %arg4[%c0_57, %c2_58, %c0_59, %c0_60] : memref<1x8x8x27xf32, #tpu.memory_space<vmem>>, vector<1x1x8x27xf32>
    %59 = vector.shape_cast %58 : vector<1x1x8x27xf32> to vector<8x27xf32>
    %60 = arith.addf %57, %59 : vector<8x27xf32>
    %cst_61 = arith.constant 0.000000e+00 : f32
    %61 = vector.broadcast %cst_61 : f32 to vector<8x27xf32>
    %62 = arith.maximumf %60, %61 : vector<8x27xf32>
    %63 = arith.truncf %62 : vector<8x27xf32> to vector<8x27xbf16>
    %c0_62 = arith.constant 0 : index
    %c2_63 = arith.constant 2 : index
    %c0_64 = arith.constant 0 : index
    %c0_65 = arith.constant 0 : index
    %64 = vector.load %arg5[%c0_62, %c2_63, %c0_64, %c0_65] : memref<1x8x8x27xbf16, #tpu.memory_space<vmem>>, vector<1x1x8x27xbf16>
    %65 = vector.shape_cast %64 : vector<1x1x8x27xbf16> to vector<8x27xbf16>
    %66 = vector.shape_cast %63 : vector<8x27xbf16> to vector<1x1x8x27xbf16>
    tpu.vector_store %arg5[%c0_62, %c2_63, %c0_64, %c0_65], %66 {strides = array<i32>} : memref<1x8x8x27xbf16, #tpu.memory_space<vmem>>, vector<1x1x8x27xbf16>,
    %cst_66 = arith.constant 0.000000e+00 : f32
    %67 = vector.broadcast %cst_66 : f32 to vector<8x27xf32>
    %c0_67 = arith.constant 0 : index
    %c0_68 = arith.constant 0 : index
    %c0_69 = arith.constant 0 : index
    %c0_70 = arith.constant 0 : index
    %68 = vector.load %arg1[%c0_67, %c0_68, %c0_69, %c0_70] : memref<1x1x16x40xbf16, #tpu.memory_space<vmem>>, vector<1x1x16x27xbf16>
    %69 = vector.shape_cast %68 : vector<1x1x16x27xbf16> to vector<16x27xbf16>
    %c5 = arith.constant 5 : index
    %c0_71 = arith.constant 0 : index
    %c0_72 = arith.constant 0 : index
    %70 = vector.load %arg2[%c5, %c0_71, %c0_72] : memref<27x8x16xbf16, #tpu.memory_space<vmem>>, vector<1x8x16xbf16>
    %71 = vector.shape_cast %70 : vector<1x8x16xbf16> to vector<8x16xbf16>
    %cst_73 = arith.constant dense<0.000000e+00> : vector<8x27xf32>
    %72 = tpu.matmul %71, %69, %cst_73 {dimension_numbers = #tpu.dot_dimension_numbers<[1], [0], [0], [1], [0, 0, 1, 1], [], []>} : vector<8x16xbf16>, vector<16x27xbf16>, vector<8x27xf32> -> vector<8x27xf32>
    %73 = arith.addf %67, %72 : vector<8x27xf32>
    %c0_74 = arith.constant 0 : index
    %c0_75 = arith.constant 0 : index
    %c0_76 = arith.constant 0 : index
    %c1_77 = arith.constant 1 : index
    %74 = vector.load %arg1[%c0_74, %c0_75, %c0_76, %c1_77] : memref<1x1x16x40xbf16, #tpu.memory_space<vmem>>, vector<1x1x16x27xbf16>
    %75 = vector.shape_cast %74 : vector<1x1x16x27xbf16> to vector<16x27xbf16>
    %c6 = arith.constant 6 : index
    %c0_78 = arith.constant 0 : index
    %c0_79 = arith.constant 0 : index
    %76 = vector.load %arg2[%c6, %c0_78, %c0_79] : memref<27x8x16xbf16, #tpu.memory_space<vmem>>, vector<1x8x16xbf16>
    %77 = vector.shape_cast %76 : vector<1x8x16xbf16> to vector<8x16xbf16>
    %cst_80 = arith.constant dense<0.000000e+00> : vector<8x27xf32>
    %78 = tpu.matmul %77, %75, %cst_80 {dimension_numbers = #tpu.dot_dimension_numbers<[1], [0], [0], [1], [0, 0, 1, 1], [], []>} : vector<8x16xbf16>, vector<16x27xbf16>, vector<8x27xf32> -> vector<8x27xf32>
    %79 = arith.addf %73, %78 : vector<8x27xf32>
    %c0_81 = arith.constant 0 : index
    %c0_82 = arith.constant 0 : index
    %c0_83 = arith.constant 0 : index
    %c3_84 = arith.constant 3 : index
    %80 = vector.load %arg1[%c0_81, %c0_82, %c0_83, %c3_84] : memref<1x1x16x40xbf16, #tpu.memory_space<vmem>>, vector<1x1x16x27xbf16>
    %81 = vector.shape_cast %80 : vector<1x1x16x27xbf16> to vector<16x27xbf16>
    %c7 = arith.constant 7 : index
    %c0_85 = arith.constant 0 : index
    %c0_86 = arith.constant 0 : index
    %82 = vector.load %arg2[%c7, %c0_85, %c0_86] : memref<27x8x16xbf16, #tpu.memory_space<vmem>>, vector<1x8x16xbf16>
    %83 = vector.shape_cast %82 : vector<1x8x16xbf16> to vector<8x16xbf16>
    %cst_87 = arith.constant dense<0.000000e+00> : vector<8x27xf32>
    %84 = tpu.matmul %83, %81, %cst_87 {dimension_numbers = #tpu.dot_dimension_numbers<[1], [0], [0], [1], [0, 0, 1, 1], [], []>} : vector<8x16xbf16>, vector<16x27xbf16>, vector<8x27xf32> -> vector<8x27xf32>
    %85 = arith.addf %79, %84 : vector<8x27xf32>
    %c0_88 = arith.constant 0 : index
    %c0_89 = arith.constant 0 : index
    %c0_90 = arith.constant 0 : index
    %c4_91 = arith.constant 4 : index
    %86 = vector.load %arg1[%c0_88, %c0_89, %c0_90, %c4_91] : memref<1x1x16x40xbf16, #tpu.memory_space<vmem>>, vector<1x1x16x27xbf16>
    %87 = vector.shape_cast %86 : vector<1x1x16x27xbf16> to vector<16x27xbf16>
    %c8 = arith.constant 8 : index
    %c0_92 = arith.constant 0 : index
    %c0_93 = arith.constant 0 : index
    %88 = vector.load %arg2[%c8, %c0_92, %c0_93] : memref<27x8x16xbf16, #tpu.memory_space<vmem>>, vector<1x8x16xbf16>
    %89 = vector.shape_cast %88 : vector<1x8x16xbf16> to vector<8x16xbf16>
    %cst_94 = arith.constant dense<0.000000e+00> : vector<8x27xf32>
    %90 = tpu.matmul %89, %87, %cst_94 {dimension_numbers = #tpu.dot_dimension_numbers<[1], [0], [0], [1], [0, 0, 1, 1], [], []>} : vector<8x16xbf16>, vector<16x27xbf16>, vector<8x27xf32> -> vector<8x27xf32>
    %91 = arith.addf %85, %90 : vector<8x27xf32>
    %92 = vector.broadcast %0 : vector<8x1xf32> to vector<8x27xf32>
    %93 = arith.addf %91, %92 : vector<8x27xf32>
    %c0_95 = arith.constant 0 : index
    %c3_96 = arith.constant 3 : index
    %c0_97 = arith.constant 0 : index
    %c0_98 = arith.constant 0 : index
    %94 = vector.load %arg4[%c0_95, %c3_96, %c0_97, %c0_98] : memref<1x8x8x27xf32, #tpu.memory_space<vmem>>, vector<1x1x8x27xf32>
    %95 = vector.shape_cast %94 : vector<1x1x8x27xf32> to vector<8x27xf32>
    %96 = arith.addf %93, %95 : vector<8x27xf32>
    %cst_99 = arith.constant 0.000000e+00 : f32
    %97 = vector.broadcast %cst_99 : f32 to vector<8x27xf32>
    %98 = arith.maximumf %96, %97 : vector<8x27xf32>
    %99 = arith.truncf %98 : vector<8x27xf32> to vector<8x27xbf16>
    %c0_100 = arith.constant 0 : index
    %c3_101 = arith.constant 3 : index
    %c0_102 = arith.constant 0 : index
    %c0_103 = arith.constant 0 : index
    %100 = vector.load %arg5[%c0_100, %c3_101, %c0_102, %c0_103] : memref<1x8x8x27xbf16, #tpu.memory_space<vmem>>, vector<1x1x8x27xbf16>
    %101 = vector.shape_cast %100 : vector<1x1x8x27xbf16> to vector<8x27xbf16>
    %102 = vector.shape_cast %99 : vector<8x27xbf16> to vector<1x1x8x27xbf16>
    tpu.vector_store %arg5[%c0_100, %c3_101, %c0_102, %c0_103], %102 {strides = array<i32>} : memref<1x8x8x27xbf16, #tpu.memory_space<vmem>>, vector<1x1x8x27xbf16>,
    %cst_104 = arith.constant 0.000000e+00 : f32
    %103 = vector.broadcast %cst_104 : f32 to vector<8x27xf32>
    %c0_105 = arith.constant 0 : index
    %c0_106 = arith.constant 0 : index
    %c0_107 = arith.constant 0 : index
    %c0_108 = arith.constant 0 : index
    %104 = vector.load %arg1[%c0_105, %c0_106, %c0_107, %c0_108] : memref<1x1x16x40xbf16, #tpu.memory_space<vmem>>, vector<1x1x16x27xbf16>
    %105 = vector.shape_cast %104 : vector<1x1x16x27xbf16> to vector<16x27xbf16>
    %c9 = arith.constant 9 : index
    %c0_109 = arith.constant 0 : index
    %c0_110 = arith.constant 0 : index
    %106 = vector.load %arg2[%c9, %c0_109, %c0_110] : memref<27x8x16xbf16, #tpu.memory_space<vmem>>, vector<1x8x16xbf16>
    %107 = vector.shape_cast %106 : vector<1x8x16xbf16> to vector<8x16xbf16>
    %cst_111 = arith.constant dense<0.000000e+00> : vector<8x27xf32>
    %108 = tpu.matmul %107, %105, %cst_111 {dimension_numbers = #tpu.dot_dimension_numbers<[1], [0], [0], [1], [0, 0, 1, 1], [], []>} : vector<8x16xbf16>, vector<16x27xbf16>, vector<8x27xf32> -> vector<8x27xf32>
    %109 = arith.addf %103, %108 : vector<8x27xf32>
    %c0_112 = arith.constant 0 : index
    %c0_113 = arith.constant 0 : index
    %c0_114 = arith.constant 0 : index
    %c9_115 = arith.constant 9 : index
    %110 = vector.load %arg1[%c0_112, %c0_113, %c0_114, %c9_115] : memref<1x1x16x40xbf16, #tpu.memory_space<vmem>>, vector<1x1x16x27xbf16>
    %111 = vector.shape_cast %110 : vector<1x1x16x27xbf16> to vector<16x27xbf16>
    %c10 = arith.constant 10 : index
    %c0_116 = arith.constant 0 : index
    %c0_117 = arith.constant 0 : index
    %112 = vector.load %arg2[%c10, %c0_116, %c0_117] : memref<27x8x16xbf16, #tpu.memory_space<vmem>>, vector<1x8x16xbf16>
    %113 = vector.shape_cast %112 : vector<1x8x16xbf16> to vector<8x16xbf16>
    %cst_118 = arith.constant dense<0.000000e+00> : vector<8x27xf32>
    %114 = tpu.matmul %113, %111, %cst_118 {dimension_numbers = #tpu.dot_dimension_numbers<[1], [0], [0], [1], [0, 0, 1, 1], [], []>} : vector<8x16xbf16>, vector<16x27xbf16>, vector<8x27xf32> -> vector<8x27xf32>
    %115 = arith.addf %109, %114 : vector<8x27xf32>
    %116 = vector.broadcast %0 : vector<8x1xf32> to vector<8x27xf32>
    %117 = arith.addf %115, %116 : vector<8x27xf32>
    %c0_119 = arith.constant 0 : index
    %c4_120 = arith.constant 4 : index
    %c0_121 = arith.constant 0 : index
    %c0_122 = arith.constant 0 : index
    %118 = vector.load %arg4[%c0_119, %c4_120, %c0_121, %c0_122] : memref<1x8x8x27xf32, #tpu.memory_space<vmem>>, vector<1x1x8x27xf32>
    %119 = vector.shape_cast %118 : vector<1x1x8x27xf32> to vector<8x27xf32>
    %120 = arith.addf %117, %119 : vector<8x27xf32>
    %cst_123 = arith.constant 0.000000e+00 : f32
    %121 = vector.broadcast %cst_123 : f32 to vector<8x27xf32>
    %122 = arith.maximumf %120, %121 : vector<8x27xf32>
    %123 = arith.truncf %122 : vector<8x27xf32> to vector<8x27xbf16>
    %c0_124 = arith.constant 0 : index
    %c4_125 = arith.constant 4 : index
    %c0_126 = arith.constant 0 : index
    %c0_127 = arith.constant 0 : index
    %124 = vector.load %arg5[%c0_124, %c4_125, %c0_126, %c0_127] : memref<1x8x8x27xbf16, #tpu.memory_space<vmem>>, vector<1x1x8x27xbf16>
    %125 = vector.shape_cast %124 : vector<1x1x8x27xbf16> to vector<8x27xbf16>
    %126 = vector.shape_cast %123 : vector<8x27xbf16> to vector<1x1x8x27xbf16>
    tpu.vector_store %arg5[%c0_124, %c4_125, %c0_126, %c0_127], %126 {strides = array<i32>} : memref<1x8x8x27xbf16, #tpu.memory_space<vmem>>, vector<1x1x8x27xbf16>,
    %cst_128 = arith.constant 0.000000e+00 : f32
    %127 = vector.broadcast %cst_128 : f32 to vector<8x27xf32>
    %c0_129 = arith.constant 0 : index
    %c0_130 = arith.constant 0 : index
    %c0_131 = arith.constant 0 : index
    %c0_132 = arith.constant 0 : index
    %128 = vector.load %arg1[%c0_129, %c0_130, %c0_131, %c0_132] : memref<1x1x16x40xbf16, #tpu.memory_space<vmem>>, vector<1x1x16x27xbf16>
    %129 = vector.shape_cast %128 : vector<1x1x16x27xbf16> to vector<16x27xbf16>
    %c11 = arith.constant 11 : index
    %c0_133 = arith.constant 0 : index
    %c0_134 = arith.constant 0 : index
    %130 = vector.load %arg2[%c11, %c0_133, %c0_134] : memref<27x8x16xbf16, #tpu.memory_space<vmem>>, vector<1x8x16xbf16>
    %131 = vector.shape_cast %130 : vector<1x8x16xbf16> to vector<8x16xbf16>
    %cst_135 = arith.constant dense<0.000000e+00> : vector<8x27xf32>
    %132 = tpu.matmul %131, %129, %cst_135 {dimension_numbers = #tpu.dot_dimension_numbers<[1], [0], [0], [1], [0, 0, 1, 1], [], []>} : vector<8x16xbf16>, vector<16x27xbf16>, vector<8x27xf32> -> vector<8x27xf32>
    %133 = arith.addf %127, %132 : vector<8x27xf32>
    %c0_136 = arith.constant 0 : index
    %c0_137 = arith.constant 0 : index
    %c0_138 = arith.constant 0 : index
    %c1_139 = arith.constant 1 : index
    %134 = vector.load %arg1[%c0_136, %c0_137, %c0_138, %c1_139] : memref<1x1x16x40xbf16, #tpu.memory_space<vmem>>, vector<1x1x16x27xbf16>
    %135 = vector.shape_cast %134 : vector<1x1x16x27xbf16> to vector<16x27xbf16>
    %c12 = arith.constant 12 : index
    %c0_140 = arith.constant 0 : index
    %c0_141 = arith.constant 0 : index
    %136 = vector.load %arg2[%c12, %c0_140, %c0_141] : memref<27x8x16xbf16, #tpu.memory_space<vmem>>, vector<1x8x16xbf16>
    %137 = vector.shape_cast %136 : vector<1x8x16xbf16> to vector<8x16xbf16>
    %cst_142 = arith.constant dense<0.000000e+00> : vector<8x27xf32>
    %138 = tpu.matmul %137, %135, %cst_142 {dimension_numbers = #tpu.dot_dimension_numbers<[1], [0], [0], [1], [0, 0, 1, 1], [], []>} : vector<8x16xbf16>, vector<16x27xbf16>, vector<8x27xf32> -> vector<8x27xf32>
    %139 = arith.addf %133, %138 : vector<8x27xf32>
    %c0_143 = arith.constant 0 : index
    %c0_144 = arith.constant 0 : index
    %c0_145 = arith.constant 0 : index
    %c9_146 = arith.constant 9 : index
    %140 = vector.load %arg1[%c0_143, %c0_144, %c0_145, %c9_146] : memref<1x1x16x40xbf16, #tpu.memory_space<vmem>>, vector<1x1x16x27xbf16>
    %141 = vector.shape_cast %140 : vector<1x1x16x27xbf16> to vector<16x27xbf16>
    %c13 = arith.constant 13 : index
    %c0_147 = arith.constant 0 : index
    %c0_148 = arith.constant 0 : index
    %142 = vector.load %arg2[%c13, %c0_147, %c0_148] : memref<27x8x16xbf16, #tpu.memory_space<vmem>>, vector<1x8x16xbf16>
    %143 = vector.shape_cast %142 : vector<1x8x16xbf16> to vector<8x16xbf16>
    %cst_149 = arith.constant dense<0.000000e+00> : vector<8x27xf32>
    %144 = tpu.matmul %143, %141, %cst_149 {dimension_numbers = #tpu.dot_dimension_numbers<[1], [0], [0], [1], [0, 0, 1, 1], [], []>} : vector<8x16xbf16>, vector<16x27xbf16>, vector<8x27xf32> -> vector<8x27xf32>
    %145 = arith.addf %139, %144 : vector<8x27xf32>
    %c0_150 = arith.constant 0 : index
    %c0_151 = arith.constant 0 : index
    %c0_152 = arith.constant 0 : index
    %c10_153 = arith.constant 10 : index
    %146 = vector.load %arg1[%c0_150, %c0_151, %c0_152, %c10_153] : memref<1x1x16x40xbf16, #tpu.memory_space<vmem>>, vector<1x1x16x27xbf16>
    %147 = vector.shape_cast %146 : vector<1x1x16x27xbf16> to vector<16x27xbf16>
    %c14 = arith.constant 14 : index
    %c0_154 = arith.constant 0 : index
    %c0_155 = arith.constant 0 : index
    %148 = vector.load %arg2[%c14, %c0_154, %c0_155] : memref<27x8x16xbf16, #tpu.memory_space<vmem>>, vector<1x8x16xbf16>
    %149 = vector.shape_cast %148 : vector<1x8x16xbf16> to vector<8x16xbf16>
    %cst_156 = arith.constant dense<0.000000e+00> : vector<8x27xf32>
    %150 = tpu.matmul %149, %147, %cst_156 {dimension_numbers = #tpu.dot_dimension_numbers<[1], [0], [0], [1], [0, 0, 1, 1], [], []>} : vector<8x16xbf16>, vector<16x27xbf16>, vector<8x27xf32> -> vector<8x27xf32>
    %151 = arith.addf %145, %150 : vector<8x27xf32>
    %152 = vector.broadcast %0 : vector<8x1xf32> to vector<8x27xf32>
    %153 = arith.addf %151, %152 : vector<8x27xf32>
    %c0_157 = arith.constant 0 : index
    %c5_158 = arith.constant 5 : index
    %c0_159 = arith.constant 0 : index
    %c0_160 = arith.constant 0 : index
    %154 = vector.load %arg4[%c0_157, %c5_158, %c0_159, %c0_160] : memref<1x8x8x27xf32, #tpu.memory_space<vmem>>, vector<1x1x8x27xf32>
    %155 = vector.shape_cast %154 : vector<1x1x8x27xf32> to vector<8x27xf32>
    %156 = arith.addf %153, %155 : vector<8x27xf32>
    %cst_161 = arith.constant 0.000000e+00 : f32
    %157 = vector.broadcast %cst_161 : f32 to vector<8x27xf32>
    %158 = arith.maximumf %156, %157 : vector<8x27xf32>
    %159 = arith.truncf %158 : vector<8x27xf32> to vector<8x27xbf16>
    %c0_162 = arith.constant 0 : index
    %c5_163 = arith.constant 5 : index
    %c0_164 = arith.constant 0 : index
    %c0_165 = arith.constant 0 : index
    %160 = vector.load %arg5[%c0_162, %c5_163, %c0_164, %c0_165] : memref<1x8x8x27xbf16, #tpu.memory_space<vmem>>, vector<1x1x8x27xbf16>
    %161 = vector.shape_cast %160 : vector<1x1x8x27xbf16> to vector<8x27xbf16>
    %162 = vector.shape_cast %159 : vector<8x27xbf16> to vector<1x1x8x27xbf16>
    tpu.vector_store %arg5[%c0_162, %c5_163, %c0_164, %c0_165], %162 {strides = array<i32>} : memref<1x8x8x27xbf16, #tpu.memory_space<vmem>>, vector<1x1x8x27xbf16>,
    %cst_166 = arith.constant 0.000000e+00 : f32
    %163 = vector.broadcast %cst_166 : f32 to vector<8x27xf32>
    %c0_167 = arith.constant 0 : index
    %c0_168 = arith.constant 0 : index
    %c0_169 = arith.constant 0 : index
    %c0_170 = arith.constant 0 : index
    %164 = vector.load %arg1[%c0_167, %c0_168, %c0_169, %c0_170] : memref<1x1x16x40xbf16, #tpu.memory_space<vmem>>, vector<1x1x16x27xbf16>
    %165 = vector.shape_cast %164 : vector<1x1x16x27xbf16> to vector<16x27xbf16>
    %c15 = arith.constant 15 : index
    %c0_171 = arith.constant 0 : index
    %c0_172 = arith.constant 0 : index
    %166 = vector.load %arg2[%c15, %c0_171, %c0_172] : memref<27x8x16xbf16, #tpu.memory_space<vmem>>, vector<1x8x16xbf16>
    %167 = vector.shape_cast %166 : vector<1x8x16xbf16> to vector<8x16xbf16>
    %cst_173 = arith.constant dense<0.000000e+00> : vector<8x27xf32>
    %168 = tpu.matmul %167, %165, %cst_173 {dimension_numbers = #tpu.dot_dimension_numbers<[1], [0], [0], [1], [0, 0, 1, 1], [], []>} : vector<8x16xbf16>, vector<16x27xbf16>, vector<8x27xf32> -> vector<8x27xf32>
    %169 = arith.addf %163, %168 : vector<8x27xf32>
    %c0_174 = arith.constant 0 : index
    %c0_175 = arith.constant 0 : index
    %c0_176 = arith.constant 0 : index
    %c3_177 = arith.constant 3 : index
    %170 = vector.load %arg1[%c0_174, %c0_175, %c0_176, %c3_177] : memref<1x1x16x40xbf16, #tpu.memory_space<vmem>>, vector<1x1x16x27xbf16>
    %171 = vector.shape_cast %170 : vector<1x1x16x27xbf16> to vector<16x27xbf16>
    %c16 = arith.constant 16 : index
    %c0_178 = arith.constant 0 : index
    %c0_179 = arith.constant 0 : index
    %172 = vector.load %arg2[%c16, %c0_178, %c0_179] : memref<27x8x16xbf16, #tpu.memory_space<vmem>>, vector<1x8x16xbf16>
    %173 = vector.shape_cast %172 : vector<1x8x16xbf16> to vector<8x16xbf16>
    %cst_180 = arith.constant dense<0.000000e+00> : vector<8x27xf32>
    %174 = tpu.matmul %173, %171, %cst_180 {dimension_numbers = #tpu.dot_dimension_numbers<[1], [0], [0], [1], [0, 0, 1, 1], [], []>} : vector<8x16xbf16>, vector<16x27xbf16>, vector<8x27xf32> -> vector<8x27xf32>
    %175 = arith.addf %169, %174 : vector<8x27xf32>
    %c0_181 = arith.constant 0 : index
    %c0_182 = arith.constant 0 : index
    %c0_183 = arith.constant 0 : index
    %c9_184 = arith.constant 9 : index
    %176 = vector.load %arg1[%c0_181, %c0_182, %c0_183, %c9_184] : memref<1x1x16x40xbf16, #tpu.memory_space<vmem>>, vector<1x1x16x27xbf16>
    %177 = vector.shape_cast %176 : vector<1x1x16x27xbf16> to vector<16x27xbf16>
    %c17 = arith.constant 17 : index
    %c0_185 = arith.constant 0 : index
    %c0_186 = arith.constant 0 : index
    %178 = vector.load %arg2[%c17, %c0_185, %c0_186] : memref<27x8x16xbf16, #tpu.memory_space<vmem>>, vector<1x8x16xbf16>
    %179 = vector.shape_cast %178 : vector<1x8x16xbf16> to vector<8x16xbf16>
    %cst_187 = arith.constant dense<0.000000e+00> : vector<8x27xf32>
    %180 = tpu.matmul %179, %177, %cst_187 {dimension_numbers = #tpu.dot_dimension_numbers<[1], [0], [0], [1], [0, 0, 1, 1], [], []>} : vector<8x16xbf16>, vector<16x27xbf16>, vector<8x27xf32> -> vector<8x27xf32>
    %181 = arith.addf %175, %180 : vector<8x27xf32>
    %c0_188 = arith.constant 0 : index
    %c0_189 = arith.constant 0 : index
    %c0_190 = arith.constant 0 : index
    %c12_191 = arith.constant 12 : index
    %182 = vector.load %arg1[%c0_188, %c0_189, %c0_190, %c12_191] : memref<1x1x16x40xbf16, #tpu.memory_space<vmem>>, vector<1x1x16x27xbf16>
    %183 = vector.shape_cast %182 : vector<1x1x16x27xbf16> to vector<16x27xbf16>
    %c18 = arith.constant 18 : index
    %c0_192 = arith.constant 0 : index
    %c0_193 = arith.constant 0 : index
    %184 = vector.load %arg2[%c18, %c0_192, %c0_193] : memref<27x8x16xbf16, #tpu.memory_space<vmem>>, vector<1x8x16xbf16>
    %185 = vector.shape_cast %184 : vector<1x8x16xbf16> to vector<8x16xbf16>
    %cst_194 = arith.constant dense<0.000000e+00> : vector<8x27xf32>
    %186 = tpu.matmul %185, %183, %cst_194 {dimension_numbers = #tpu.dot_dimension_numbers<[1], [0], [0], [1], [0, 0, 1, 1], [], []>} : vector<8x16xbf16>, vector<16x27xbf16>, vector<8x27xf32> -> vector<8x27xf32>
    %187 = arith.addf %181, %186 : vector<8x27xf32>
    %188 = vector.broadcast %0 : vector<8x1xf32> to vector<8x27xf32>
    %189 = arith.addf %187, %188 : vector<8x27xf32>
    %c0_195 = arith.constant 0 : index
    %c6_196 = arith.constant 6 : index
    %c0_197 = arith.constant 0 : index
    %c0_198 = arith.constant 0 : index
    %190 = vector.load %arg4[%c0_195, %c6_196, %c0_197, %c0_198] : memref<1x8x8x27xf32, #tpu.memory_space<vmem>>, vector<1x1x8x27xf32>
    %191 = vector.shape_cast %190 : vector<1x1x8x27xf32> to vector<8x27xf32>
    %192 = arith.addf %189, %191 : vector<8x27xf32>
    %cst_199 = arith.constant 0.000000e+00 : f32
    %193 = vector.broadcast %cst_199 : f32 to vector<8x27xf32>
    %194 = arith.maximumf %192, %193 : vector<8x27xf32>
    %195 = arith.truncf %194 : vector<8x27xf32> to vector<8x27xbf16>
    %c0_200 = arith.constant 0 : index
    %c6_201 = arith.constant 6 : index
    %c0_202 = arith.constant 0 : index
    %c0_203 = arith.constant 0 : index
    %196 = vector.load %arg5[%c0_200, %c6_201, %c0_202, %c0_203] : memref<1x8x8x27xbf16, #tpu.memory_space<vmem>>, vector<1x1x8x27xbf16>
    %197 = vector.shape_cast %196 : vector<1x1x8x27xbf16> to vector<8x27xbf16>
    %198 = vector.shape_cast %195 : vector<8x27xbf16> to vector<1x1x8x27xbf16>
    tpu.vector_store %arg5[%c0_200, %c6_201, %c0_202, %c0_203], %198 {strides = array<i32>} : memref<1x8x8x27xbf16, #tpu.memory_space<vmem>>, vector<1x1x8x27xbf16>,
    %cst_204 = arith.constant 0.000000e+00 : f32
    %199 = vector.broadcast %cst_204 : f32 to vector<8x27xf32>
    %c0_205 = arith.constant 0 : index
    %c0_206 = arith.constant 0 : index
    %c0_207 = arith.constant 0 : index
    %c0_208 = arith.constant 0 : index
    %200 = vector.load %arg1[%c0_205, %c0_206, %c0_207, %c0_208] : memref<1x1x16x40xbf16, #tpu.memory_space<vmem>>, vector<1x1x16x27xbf16>
    %201 = vector.shape_cast %200 : vector<1x1x16x27xbf16> to vector<16x27xbf16>
    %c19 = arith.constant 19 : index
    %c0_209 = arith.constant 0 : index
    %c0_210 = arith.constant 0 : index
    %202 = vector.load %arg2[%c19, %c0_209, %c0_210] : memref<27x8x16xbf16, #tpu.memory_space<vmem>>, vector<1x8x16xbf16>
    %203 = vector.shape_cast %202 : vector<1x8x16xbf16> to vector<8x16xbf16>
    %cst_211 = arith.constant dense<0.000000e+00> : vector<8x27xf32>
    %204 = tpu.matmul %203, %201, %cst_211 {dimension_numbers = #tpu.dot_dimension_numbers<[1], [0], [0], [1], [0, 0, 1, 1], [], []>} : vector<8x16xbf16>, vector<16x27xbf16>, vector<8x27xf32> -> vector<8x27xf32>
    %205 = arith.addf %199, %204 : vector<8x27xf32>
    %c0_212 = arith.constant 0 : index
    %c0_213 = arith.constant 0 : index
    %c0_214 = arith.constant 0 : index
    %c1_215 = arith.constant 1 : index
    %206 = vector.load %arg1[%c0_212, %c0_213, %c0_214, %c1_215] : memref<1x1x16x40xbf16, #tpu.memory_space<vmem>>, vector<1x1x16x27xbf16>
    %207 = vector.shape_cast %206 : vector<1x1x16x27xbf16> to vector<16x27xbf16>
    %c20 = arith.constant 20 : index
    %c0_216 = arith.constant 0 : index
    %c0_217 = arith.constant 0 : index
    %208 = vector.load %arg2[%c20, %c0_216, %c0_217] : memref<27x8x16xbf16, #tpu.memory_space<vmem>>, vector<1x8x16xbf16>
    %209 = vector.shape_cast %208 : vector<1x8x16xbf16> to vector<8x16xbf16>
    %cst_218 = arith.constant dense<0.000000e+00> : vector<8x27xf32>
    %210 = tpu.matmul %209, %207, %cst_218 {dimension_numbers = #tpu.dot_dimension_numbers<[1], [0], [0], [1], [0, 0, 1, 1], [], []>} : vector<8x16xbf16>, vector<16x27xbf16>, vector<8x27xf32> -> vector<8x27xf32>
    %211 = arith.addf %205, %210 : vector<8x27xf32>
    %c0_219 = arith.constant 0 : index
    %c0_220 = arith.constant 0 : index
    %c0_221 = arith.constant 0 : index
    %c3_222 = arith.constant 3 : index
    %212 = vector.load %arg1[%c0_219, %c0_220, %c0_221, %c3_222] : memref<1x1x16x40xbf16, #tpu.memory_space<vmem>>, vector<1x1x16x27xbf16>
    %213 = vector.shape_cast %212 : vector<1x1x16x27xbf16> to vector<16x27xbf16>
    %c21 = arith.constant 21 : index
    %c0_223 = arith.constant 0 : index
    %c0_224 = arith.constant 0 : index
    %214 = vector.load %arg2[%c21, %c0_223, %c0_224] : memref<27x8x16xbf16, #tpu.memory_space<vmem>>, vector<1x8x16xbf16>
    %215 = vector.shape_cast %214 : vector<1x8x16xbf16> to vector<8x16xbf16>
    %cst_225 = arith.constant dense<0.000000e+00> : vector<8x27xf32>
    %216 = tpu.matmul %215, %213, %cst_225 {dimension_numbers = #tpu.dot_dimension_numbers<[1], [0], [0], [1], [0, 0, 1, 1], [], []>} : vector<8x16xbf16>, vector<16x27xbf16>, vector<8x27xf32> -> vector<8x27xf32>
    %217 = arith.addf %211, %216 : vector<8x27xf32>
    %c0_226 = arith.constant 0 : index
    %c0_227 = arith.constant 0 : index
    %c0_228 = arith.constant 0 : index
    %c4_229 = arith.constant 4 : index
    %218 = vector.load %arg1[%c0_226, %c0_227, %c0_228, %c4_229] : memref<1x1x16x40xbf16, #tpu.memory_space<vmem>>, vector<1x1x16x27xbf16>
    %219 = vector.shape_cast %218 : vector<1x1x16x27xbf16> to vector<16x27xbf16>
    %c22 = arith.constant 22 : index
    %c0_230 = arith.constant 0 : index
    %c0_231 = arith.constant 0 : index
    %220 = vector.load %arg2[%c22, %c0_230, %c0_231] : memref<27x8x16xbf16, #tpu.memory_space<vmem>>, vector<1x8x16xbf16>
    %221 = vector.shape_cast %220 : vector<1x8x16xbf16> to vector<8x16xbf16>
    %cst_232 = arith.constant dense<0.000000e+00> : vector<8x27xf32>
    %222 = tpu.matmul %221, %219, %cst_232 {dimension_numbers = #tpu.dot_dimension_numbers<[1], [0], [0], [1], [0, 0, 1, 1], [], []>} : vector<8x16xbf16>, vector<16x27xbf16>, vector<8x27xf32> -> vector<8x27xf32>
    %223 = arith.addf %217, %222 : vector<8x27xf32>
    %c0_233 = arith.constant 0 : index
    %c0_234 = arith.constant 0 : index
    %c0_235 = arith.constant 0 : index
    %c9_236 = arith.constant 9 : index
    %224 = vector.load %arg1[%c0_233, %c0_234, %c0_235, %c9_236] : memref<1x1x16x40xbf16, #tpu.memory_space<vmem>>, vector<1x1x16x27xbf16>
    %225 = vector.shape_cast %224 : vector<1x1x16x27xbf16> to vector<16x27xbf16>
    %c23 = arith.constant 23 : index
    %c0_237 = arith.constant 0 : index
    %c0_238 = arith.constant 0 : index
    %226 = vector.load %arg2[%c23, %c0_237, %c0_238] : memref<27x8x16xbf16, #tpu.memory_space<vmem>>, vector<1x8x16xbf16>
    %227 = vector.shape_cast %226 : vector<1x8x16xbf16> to vector<8x16xbf16>
    %cst_239 = arith.constant dense<0.000000e+00> : vector<8x27xf32>
    %228 = tpu.matmul %227, %225, %cst_239 {dimension_numbers = #tpu.dot_dimension_numbers<[1], [0], [0], [1], [0, 0, 1, 1], [], []>} : vector<8x16xbf16>, vector<16x27xbf16>, vector<8x27xf32> -> vector<8x27xf32>
    %229 = arith.addf %223, %228 : vector<8x27xf32>
    %c0_240 = arith.constant 0 : index
    %c0_241 = arith.constant 0 : index
    %c0_242 = arith.constant 0 : index
    %c10_243 = arith.constant 10 : index
    %230 = vector.load %arg1[%c0_240, %c0_241, %c0_242, %c10_243] : memref<1x1x16x40xbf16, #tpu.memory_space<vmem>>, vector<1x1x16x27xbf16>
    %231 = vector.shape_cast %230 : vector<1x1x16x27xbf16> to vector<16x27xbf16>
    %c24 = arith.constant 24 : index
    %c0_244 = arith.constant 0 : index
    %c0_245 = arith.constant 0 : index
    %232 = vector.load %arg2[%c24, %c0_244, %c0_245] : memref<27x8x16xbf16, #tpu.memory_space<vmem>>, vector<1x8x16xbf16>
    %233 = vector.shape_cast %232 : vector<1x8x16xbf16> to vector<8x16xbf16>
    %cst_246 = arith.constant dense<0.000000e+00> : vector<8x27xf32>
    %234 = tpu.matmul %233, %231, %cst_246 {dimension_numbers = #tpu.dot_dimension_numbers<[1], [0], [0], [1], [0, 0, 1, 1], [], []>} : vector<8x16xbf16>, vector<16x27xbf16>, vector<8x27xf32> -> vector<8x27xf32>
    %235 = arith.addf %229, %234 : vector<8x27xf32>
    %c0_247 = arith.constant 0 : index
    %c0_248 = arith.constant 0 : index
    %c0_249 = arith.constant 0 : index
    %c12_250 = arith.constant 12 : index
    %236 = vector.load %arg1[%c0_247, %c0_248, %c0_249, %c12_250] : memref<1x1x16x40xbf16, #tpu.memory_space<vmem>>, vector<1x1x16x27xbf16>
    %237 = vector.shape_cast %236 : vector<1x1x16x27xbf16> to vector<16x27xbf16>
    %c25 = arith.constant 25 : index
    %c0_251 = arith.constant 0 : index
    %c0_252 = arith.constant 0 : index
    %238 = vector.load %arg2[%c25, %c0_251, %c0_252] : memref<27x8x16xbf16, #tpu.memory_space<vmem>>, vector<1x8x16xbf16>
    %239 = vector.shape_cast %238 : vector<1x8x16xbf16> to vector<8x16xbf16>
    %cst_253 = arith.constant dense<0.000000e+00> : vector<8x27xf32>
    %240 = tpu.matmul %239, %237, %cst_253 {dimension_numbers = #tpu.dot_dimension_numbers<[1], [0], [0], [1], [0, 0, 1, 1], [], []>} : vector<8x16xbf16>, vector<16x27xbf16>, vector<8x27xf32> -> vector<8x27xf32>
    %241 = arith.addf %235, %240 : vector<8x27xf32>
    %c0_254 = arith.constant 0 : index
    %c0_255 = arith.constant 0 : index
    %c0_256 = arith.constant 0 : index
    %c13_257 = arith.constant 13 : index
    %242 = vector.load %arg1[%c0_254, %c0_255, %c0_256, %c13_257] : memref<1x1x16x40xbf16, #tpu.memory_space<vmem>>, vector<1x1x16x27xbf16>
    %243 = vector.shape_cast %242 : vector<1x1x16x27xbf16> to vector<16x27xbf16>
    %c26 = arith.constant 26 : index
    %c0_258 = arith.constant 0 : index
    %c0_259 = arith.constant 0 : index
    %244 = vector.load %arg2[%c26, %c0_258, %c0_259] : memref<27x8x16xbf16, #tpu.memory_space<vmem>>, vector<1x8x16xbf16>
    %245 = vector.shape_cast %244 : vector<1x8x16xbf16> to vector<8x16xbf16>
    %cst_260 = arith.constant dense<0.000000e+00> : vector<8x27xf32>
    %246 = tpu.matmul %245, %243, %cst_260 {dimension_numbers = #tpu.dot_dimension_numbers<[1], [0], [0], [1], [0, 0, 1, 1], [], []>} : vector<8x16xbf16>, vector<16x27xbf16>, vector<8x27xf32> -> vector<8x27xf32>
    %247 = arith.addf %241, %246 : vector<8x27xf32>
    %248 = vector.broadcast %0 : vector<8x1xf32> to vector<8x27xf32>
    %249 = arith.addf %247, %248 : vector<8x27xf32>
    %c0_261 = arith.constant 0 : index
    %c7_262 = arith.constant 7 : index
    %c0_263 = arith.constant 0 : index
    %c0_264 = arith.constant 0 : index
    %250 = vector.load %arg4[%c0_261, %c7_262, %c0_263, %c0_264] : memref<1x8x8x27xf32, #tpu.memory_space<vmem>>, vector<1x1x8x27xf32>
    %251 = vector.shape_cast %250 : vector<1x1x8x27xf32> to vector<8x27xf32>
    %252 = arith.addf %249, %251 : vector<8x27xf32>
    %cst_265 = arith.constant 0.000000e+00 : f32
    %253 = vector.broadcast %cst_265 : f32 to vector<8x27xf32>
    %254 = arith.maximumf %252, %253 : vector<8x27xf32>
    %255 = arith.truncf %254 : vector<8x27xf32> to vector<8x27xbf16>
    %c0_266 = arith.constant 0 : index
    %c7_267 = arith.constant 7 : index
    %c0_268 = arith.constant 0 : index
    %c0_269 = arith.constant 0 : index
    %256 = vector.load %arg5[%c0_266, %c7_267, %c0_268, %c0_269] : memref<1x8x8x27xbf16, #tpu.memory_space<vmem>>, vector<1x1x8x27xbf16>
    %257 = vector.shape_cast %256 : vector<1x1x8x27xbf16> to vector<8x27xbf16>
    %258 = vector.shape_cast %255 : vector<8x27xbf16> to vector<1x1x8x27xbf16>
    tpu.vector_store %arg5[%c0_266, %c7_267, %c0_268, %c0_269], %258 {strides = array<i32>} : memref<1x8x8x27xbf16, #tpu.memory_space<vmem>>, vector<1x1x8x27xbf16>,
    return
  }
  func.func @transform_0(%arg0: i32) -> (i32, i32, i32, i32) {
    %c0_i32 = arith.constant 0 : i32
    %c0_i32_0 = arith.constant 0 : i32
    %c0_i32_1 = arith.constant 0 : i32
    %c0_i32_2 = arith.constant 0 : i32
    return %arg0, %c0_i32, %c0_i32_0, %c0_i32_1 : i32, i32, i32, i32
  }
  func.func @transform_1(%arg0: i32) -> (i32, i32, i32) {
    %c0_i32 = arith.constant 0 : i32
    %c0_i32_0 = arith.constant 0 : i32
    %c0_i32_1 = arith.constant 0 : i32
    %c0_i32_2 = arith.constant 0 : i32
    return %c0_i32, %c0_i32_0, %c0_i32_1 : i32, i32, i32
  }
  func.func @transform_2(%arg0: i32) -> (i32, i32) {
    %c0_i32 = arith.constant 0 : i32
    %c0_i32_0 = arith.constant 0 : i32
    %c0_i32_1 = arith.constant 0 : i32
    return %c0_i32, %c0_i32_0 : i32, i32
  }
  func.func @transform_3(%arg0: i32) -> (i32, i32, i32, i32) {
    %c0_i32 = arith.constant 0 : i32
    %c0_i32_0 = arith.constant 0 : i32
    %c0_i32_1 = arith.constant 0 : i32
    %c0_i32_2 = arith.constant 0 : i32
    return %arg0, %c0_i32, %c0_i32_0, %c0_i32_1 : i32, i32, i32, i32
  }
  func.func @transform_4(%arg0: i32) -> (i32, i32, i32, i32) {
    %c0_i32 = arith.constant 0 : i32
    %c0_i32_0 = arith.constant 0 : i32
    %c0_i32_1 = arith.constant 0 : i32
    %c0_i32_2 = arith.constant 0 : i32
    return %arg0, %c0_i32, %c0_i32_0, %c0_i32_1 : i32, i32, i32, i32
  }
}

module attributes {stable_mosaic.version = 11 : i64} {
  func.func @_grouped_tap_conv_kernel(%arg0: i32, %arg1: memref<1x1x8x156xbf16, #tpu.memory_space<vmem>>, %arg2: memref<27x4x8xbf16, #tpu.memory_space<vmem>>, %arg3: memref<4x1xf32, #tpu.memory_space<vmem>>, %arg4: memref<1x8x4x125xf32, #tpu.memory_space<vmem>>, %arg5: memref<1x8x4x125xf32, #tpu.memory_space<vmem>>) attributes {dimension_semantics = [#tpu.dimension_semantics<parallel>], iteration_bounds = array<i64: 2>, scalar_prefetch = 0 : i64, scratch_operands = 0 : i64, tpu.core_type = #tpu.core_type<tc>, window_params = [{transform_indices = @transform_0, window_bounds = array<i64: 1, 1, 8, 156>}, {pipeline_mode = #tpu.pipeline_mode<synchronous>, transform_indices = @transform_1, window_bounds = array<i64: 27, 4, 8>}, {pipeline_mode = #tpu.pipeline_mode<synchronous>, transform_indices = @transform_2, window_bounds = array<i64: 4, 1>}, {transform_indices = @transform_3, window_bounds = array<i64: 1, 8, 4, 125>}, {transform_indices = @transform_4, window_bounds = array<i64: 1, 8, 4, 125>}]} {
    %c0 = arith.constant 0 : index
    %c0_0 = arith.constant 0 : index
    %0 = vector.load %arg3[%c0, %c0_0] : memref<4x1xf32, #tpu.memory_space<vmem>>, vector<4x1xf32>
    %cst = arith.constant 0.000000e+00 : f32
    %1 = vector.broadcast %cst : f32 to vector<4x125xf32>
    %c0_1 = arith.constant 0 : index
    %c0_2 = arith.constant 0 : index
    %c0_3 = arith.constant 0 : index
    %c0_4 = arith.constant 0 : index
    %2 = vector.load %arg1[%c0_1, %c0_2, %c0_3, %c0_4] : memref<1x1x8x156xbf16, #tpu.memory_space<vmem>>, vector<1x1x8x125xbf16>
    %3 = vector.shape_cast %2 : vector<1x1x8x125xbf16> to vector<8x125xbf16>
    %c0_5 = arith.constant 0 : index
    %c0_6 = arith.constant 0 : index
    %c0_7 = arith.constant 0 : index
    %4 = vector.load %arg2[%c0_5, %c0_6, %c0_7] : memref<27x4x8xbf16, #tpu.memory_space<vmem>>, vector<1x4x8xbf16>
    %5 = vector.shape_cast %4 : vector<1x4x8xbf16> to vector<4x8xbf16>
    %cst_8 = arith.constant dense<0.000000e+00> : vector<4x125xf32>
    %6 = tpu.matmul %5, %3, %cst_8 {dimension_numbers = #tpu.dot_dimension_numbers<[1], [0], [0], [1], [0, 0, 1, 1], [], []>} : vector<4x8xbf16>, vector<8x125xbf16>, vector<4x125xf32> -> vector<4x125xf32>
    %7 = arith.addf %1, %6 : vector<4x125xf32>
    %8 = vector.broadcast %0 : vector<4x1xf32> to vector<4x125xf32>
    %9 = arith.addf %7, %8 : vector<4x125xf32>
    %c0_9 = arith.constant 0 : index
    %c0_10 = arith.constant 0 : index
    %c0_11 = arith.constant 0 : index
    %c0_12 = arith.constant 0 : index
    %10 = vector.load %arg4[%c0_9, %c0_10, %c0_11, %c0_12] : memref<1x8x4x125xf32, #tpu.memory_space<vmem>>, vector<1x1x4x125xf32>
    %11 = vector.shape_cast %10 : vector<1x1x4x125xf32> to vector<4x125xf32>
    %12 = arith.addf %9, %11 : vector<4x125xf32>
    %cst_13 = arith.constant 0.000000e+00 : f32
    %13 = vector.broadcast %cst_13 : f32 to vector<4x125xf32>
    %14 = arith.maximumf %12, %13 : vector<4x125xf32>
    %c0_14 = arith.constant 0 : index
    %c0_15 = arith.constant 0 : index
    %c0_16 = arith.constant 0 : index
    %c0_17 = arith.constant 0 : index
    %15 = vector.load %arg5[%c0_14, %c0_15, %c0_16, %c0_17] : memref<1x8x4x125xf32, #tpu.memory_space<vmem>>, vector<1x1x4x125xf32>
    %16 = vector.shape_cast %15 : vector<1x1x4x125xf32> to vector<4x125xf32>
    %17 = vector.shape_cast %14 : vector<4x125xf32> to vector<1x1x4x125xf32>
    tpu.vector_store %arg5[%c0_14, %c0_15, %c0_16, %c0_17], %17 {strides = array<i32>} : memref<1x8x4x125xf32, #tpu.memory_space<vmem>>, vector<1x1x4x125xf32>,
    %cst_18 = arith.constant 0.000000e+00 : f32
    %18 = vector.broadcast %cst_18 : f32 to vector<4x125xf32>
    %c0_19 = arith.constant 0 : index
    %c0_20 = arith.constant 0 : index
    %c0_21 = arith.constant 0 : index
    %c0_22 = arith.constant 0 : index
    %19 = vector.load %arg1[%c0_19, %c0_20, %c0_21, %c0_22] : memref<1x1x8x156xbf16, #tpu.memory_space<vmem>>, vector<1x1x8x125xbf16>
    %20 = vector.shape_cast %19 : vector<1x1x8x125xbf16> to vector<8x125xbf16>
    %c1 = arith.constant 1 : index
    %c0_23 = arith.constant 0 : index
    %c0_24 = arith.constant 0 : index
    %21 = vector.load %arg2[%c1, %c0_23, %c0_24] : memref<27x4x8xbf16, #tpu.memory_space<vmem>>, vector<1x4x8xbf16>
    %22 = vector.shape_cast %21 : vector<1x4x8xbf16> to vector<4x8xbf16>
    %cst_25 = arith.constant dense<0.000000e+00> : vector<4x125xf32>
    %23 = tpu.matmul %22, %20, %cst_25 {dimension_numbers = #tpu.dot_dimension_numbers<[1], [0], [0], [1], [0, 0, 1, 1], [], []>} : vector<4x8xbf16>, vector<8x125xbf16>, vector<4x125xf32> -> vector<4x125xf32>
    %24 = arith.addf %18, %23 : vector<4x125xf32>
    %c0_26 = arith.constant 0 : index
    %c0_27 = arith.constant 0 : index
    %c0_28 = arith.constant 0 : index
    %c1_29 = arith.constant 1 : index
    %25 = vector.load %arg1[%c0_26, %c0_27, %c0_28, %c1_29] : memref<1x1x8x156xbf16, #tpu.memory_space<vmem>>, vector<1x1x8x125xbf16>
    %26 = vector.shape_cast %25 : vector<1x1x8x125xbf16> to vector<8x125xbf16>
    %c2 = arith.constant 2 : index
    %c0_30 = arith.constant 0 : index
    %c0_31 = arith.constant 0 : index
    %27 = vector.load %arg2[%c2, %c0_30, %c0_31] : memref<27x4x8xbf16, #tpu.memory_space<vmem>>, vector<1x4x8xbf16>
    %28 = vector.shape_cast %27 : vector<1x4x8xbf16> to vector<4x8xbf16>
    %cst_32 = arith.constant dense<0.000000e+00> : vector<4x125xf32>
    %29 = tpu.matmul %28, %26, %cst_32 {dimension_numbers = #tpu.dot_dimension_numbers<[1], [0], [0], [1], [0, 0, 1, 1], [], []>} : vector<4x8xbf16>, vector<8x125xbf16>, vector<4x125xf32> -> vector<4x125xf32>
    %30 = arith.addf %24, %29 : vector<4x125xf32>
    %31 = vector.broadcast %0 : vector<4x1xf32> to vector<4x125xf32>
    %32 = arith.addf %30, %31 : vector<4x125xf32>
    %c0_33 = arith.constant 0 : index
    %c1_34 = arith.constant 1 : index
    %c0_35 = arith.constant 0 : index
    %c0_36 = arith.constant 0 : index
    %33 = vector.load %arg4[%c0_33, %c1_34, %c0_35, %c0_36] : memref<1x8x4x125xf32, #tpu.memory_space<vmem>>, vector<1x1x4x125xf32>
    %34 = vector.shape_cast %33 : vector<1x1x4x125xf32> to vector<4x125xf32>
    %35 = arith.addf %32, %34 : vector<4x125xf32>
    %cst_37 = arith.constant 0.000000e+00 : f32
    %36 = vector.broadcast %cst_37 : f32 to vector<4x125xf32>
    %37 = arith.maximumf %35, %36 : vector<4x125xf32>
    %c0_38 = arith.constant 0 : index
    %c1_39 = arith.constant 1 : index
    %c0_40 = arith.constant 0 : index
    %c0_41 = arith.constant 0 : index
    %38 = vector.load %arg5[%c0_38, %c1_39, %c0_40, %c0_41] : memref<1x8x4x125xf32, #tpu.memory_space<vmem>>, vector<1x1x4x125xf32>
    %39 = vector.shape_cast %38 : vector<1x1x4x125xf32> to vector<4x125xf32>
    %40 = vector.shape_cast %37 : vector<4x125xf32> to vector<1x1x4x125xf32>
    tpu.vector_store %arg5[%c0_38, %c1_39, %c0_40, %c0_41], %40 {strides = array<i32>} : memref<1x8x4x125xf32, #tpu.memory_space<vmem>>, vector<1x1x4x125xf32>,
    %cst_42 = arith.constant 0.000000e+00 : f32
    %41 = vector.broadcast %cst_42 : f32 to vector<4x125xf32>
    %c0_43 = arith.constant 0 : index
    %c0_44 = arith.constant 0 : index
    %c0_45 = arith.constant 0 : index
    %c0_46 = arith.constant 0 : index
    %42 = vector.load %arg1[%c0_43, %c0_44, %c0_45, %c0_46] : memref<1x1x8x156xbf16, #tpu.memory_space<vmem>>, vector<1x1x8x125xbf16>
    %43 = vector.shape_cast %42 : vector<1x1x8x125xbf16> to vector<8x125xbf16>
    %c3 = arith.constant 3 : index
    %c0_47 = arith.constant 0 : index
    %c0_48 = arith.constant 0 : index
    %44 = vector.load %arg2[%c3, %c0_47, %c0_48] : memref<27x4x8xbf16, #tpu.memory_space<vmem>>, vector<1x4x8xbf16>
    %45 = vector.shape_cast %44 : vector<1x4x8xbf16> to vector<4x8xbf16>
    %cst_49 = arith.constant dense<0.000000e+00> : vector<4x125xf32>
    %46 = tpu.matmul %45, %43, %cst_49 {dimension_numbers = #tpu.dot_dimension_numbers<[1], [0], [0], [1], [0, 0, 1, 1], [], []>} : vector<4x8xbf16>, vector<8x125xbf16>, vector<4x125xf32> -> vector<4x125xf32>
    %47 = arith.addf %41, %46 : vector<4x125xf32>
    %c0_50 = arith.constant 0 : index
    %c0_51 = arith.constant 0 : index
    %c0_52 = arith.constant 0 : index
    %c5 = arith.constant 5 : index
    %48 = vector.load %arg1[%c0_50, %c0_51, %c0_52, %c5] : memref<1x1x8x156xbf16, #tpu.memory_space<vmem>>, vector<1x1x8x125xbf16>
    %49 = vector.shape_cast %48 : vector<1x1x8x125xbf16> to vector<8x125xbf16>
    %c4 = arith.constant 4 : index
    %c0_53 = arith.constant 0 : index
    %c0_54 = arith.constant 0 : index
    %50 = vector.load %arg2[%c4, %c0_53, %c0_54] : memref<27x4x8xbf16, #tpu.memory_space<vmem>>, vector<1x4x8xbf16>
    %51 = vector.shape_cast %50 : vector<1x4x8xbf16> to vector<4x8xbf16>
    %cst_55 = arith.constant dense<0.000000e+00> : vector<4x125xf32>
    %52 = tpu.matmul %51, %49, %cst_55 {dimension_numbers = #tpu.dot_dimension_numbers<[1], [0], [0], [1], [0, 0, 1, 1], [], []>} : vector<4x8xbf16>, vector<8x125xbf16>, vector<4x125xf32> -> vector<4x125xf32>
    %53 = arith.addf %47, %52 : vector<4x125xf32>
    %54 = vector.broadcast %0 : vector<4x1xf32> to vector<4x125xf32>
    %55 = arith.addf %53, %54 : vector<4x125xf32>
    %c0_56 = arith.constant 0 : index
    %c2_57 = arith.constant 2 : index
    %c0_58 = arith.constant 0 : index
    %c0_59 = arith.constant 0 : index
    %56 = vector.load %arg4[%c0_56, %c2_57, %c0_58, %c0_59] : memref<1x8x4x125xf32, #tpu.memory_space<vmem>>, vector<1x1x4x125xf32>
    %57 = vector.shape_cast %56 : vector<1x1x4x125xf32> to vector<4x125xf32>
    %58 = arith.addf %55, %57 : vector<4x125xf32>
    %cst_60 = arith.constant 0.000000e+00 : f32
    %59 = vector.broadcast %cst_60 : f32 to vector<4x125xf32>
    %60 = arith.maximumf %58, %59 : vector<4x125xf32>
    %c0_61 = arith.constant 0 : index
    %c2_62 = arith.constant 2 : index
    %c0_63 = arith.constant 0 : index
    %c0_64 = arith.constant 0 : index
    %61 = vector.load %arg5[%c0_61, %c2_62, %c0_63, %c0_64] : memref<1x8x4x125xf32, #tpu.memory_space<vmem>>, vector<1x1x4x125xf32>
    %62 = vector.shape_cast %61 : vector<1x1x4x125xf32> to vector<4x125xf32>
    %63 = vector.shape_cast %60 : vector<4x125xf32> to vector<1x1x4x125xf32>
    tpu.vector_store %arg5[%c0_61, %c2_62, %c0_63, %c0_64], %63 {strides = array<i32>} : memref<1x8x4x125xf32, #tpu.memory_space<vmem>>, vector<1x1x4x125xf32>,
    %cst_65 = arith.constant 0.000000e+00 : f32
    %64 = vector.broadcast %cst_65 : f32 to vector<4x125xf32>
    %c0_66 = arith.constant 0 : index
    %c0_67 = arith.constant 0 : index
    %c0_68 = arith.constant 0 : index
    %c0_69 = arith.constant 0 : index
    %65 = vector.load %arg1[%c0_66, %c0_67, %c0_68, %c0_69] : memref<1x1x8x156xbf16, #tpu.memory_space<vmem>>, vector<1x1x8x125xbf16>
    %66 = vector.shape_cast %65 : vector<1x1x8x125xbf16> to vector<8x125xbf16>
    %c5_70 = arith.constant 5 : index
    %c0_71 = arith.constant 0 : index
    %c0_72 = arith.constant 0 : index
    %67 = vector.load %arg2[%c5_70, %c0_71, %c0_72] : memref<27x4x8xbf16, #tpu.memory_space<vmem>>, vector<1x4x8xbf16>
    %68 = vector.shape_cast %67 : vector<1x4x8xbf16> to vector<4x8xbf16>
    %cst_73 = arith.constant dense<0.000000e+00> : vector<4x125xf32>
    %69 = tpu.matmul %68, %66, %cst_73 {dimension_numbers = #tpu.dot_dimension_numbers<[1], [0], [0], [1], [0, 0, 1, 1], [], []>} : vector<4x8xbf16>, vector<8x125xbf16>, vector<4x125xf32> -> vector<4x125xf32>
    %70 = arith.addf %64, %69 : vector<4x125xf32>
    %c0_74 = arith.constant 0 : index
    %c0_75 = arith.constant 0 : index
    %c0_76 = arith.constant 0 : index
    %c1_77 = arith.constant 1 : index
    %71 = vector.load %arg1[%c0_74, %c0_75, %c0_76, %c1_77] : memref<1x1x8x156xbf16, #tpu.memory_space<vmem>>, vector<1x1x8x125xbf16>
    %72 = vector.shape_cast %71 : vector<1x1x8x125xbf16> to vector<8x125xbf16>
    %c6 = arith.constant 6 : index
    %c0_78 = arith.constant 0 : index
    %c0_79 = arith.constant 0 : index
    %73 = vector.load %arg2[%c6, %c0_78, %c0_79] : memref<27x4x8xbf16, #tpu.memory_space<vmem>>, vector<1x4x8xbf16>
    %74 = vector.shape_cast %73 : vector<1x4x8xbf16> to vector<4x8xbf16>
    %cst_80 = arith.constant dense<0.000000e+00> : vector<4x125xf32>
    %75 = tpu.matmul %74, %72, %cst_80 {dimension_numbers = #tpu.dot_dimension_numbers<[1], [0], [0], [1], [0, 0, 1, 1], [], []>} : vector<4x8xbf16>, vector<8x125xbf16>, vector<4x125xf32> -> vector<4x125xf32>
    %76 = arith.addf %70, %75 : vector<4x125xf32>
    %c0_81 = arith.constant 0 : index
    %c0_82 = arith.constant 0 : index
    %c0_83 = arith.constant 0 : index
    %c5_84 = arith.constant 5 : index
    %77 = vector.load %arg1[%c0_81, %c0_82, %c0_83, %c5_84] : memref<1x1x8x156xbf16, #tpu.memory_space<vmem>>, vector<1x1x8x125xbf16>
    %78 = vector.shape_cast %77 : vector<1x1x8x125xbf16> to vector<8x125xbf16>
    %c7 = arith.constant 7 : index
    %c0_85 = arith.constant 0 : index
    %c0_86 = arith.constant 0 : index
    %79 = vector.load %arg2[%c7, %c0_85, %c0_86] : memref<27x4x8xbf16, #tpu.memory_space<vmem>>, vector<1x4x8xbf16>
    %80 = vector.shape_cast %79 : vector<1x4x8xbf16> to vector<4x8xbf16>
    %cst_87 = arith.constant dense<0.000000e+00> : vector<4x125xf32>
    %81 = tpu.matmul %80, %78, %cst_87 {dimension_numbers = #tpu.dot_dimension_numbers<[1], [0], [0], [1], [0, 0, 1, 1], [], []>} : vector<4x8xbf16>, vector<8x125xbf16>, vector<4x125xf32> -> vector<4x125xf32>
    %82 = arith.addf %76, %81 : vector<4x125xf32>
    %c0_88 = arith.constant 0 : index
    %c0_89 = arith.constant 0 : index
    %c0_90 = arith.constant 0 : index
    %c6_91 = arith.constant 6 : index
    %83 = vector.load %arg1[%c0_88, %c0_89, %c0_90, %c6_91] : memref<1x1x8x156xbf16, #tpu.memory_space<vmem>>, vector<1x1x8x125xbf16>
    %84 = vector.shape_cast %83 : vector<1x1x8x125xbf16> to vector<8x125xbf16>
    %c8 = arith.constant 8 : index
    %c0_92 = arith.constant 0 : index
    %c0_93 = arith.constant 0 : index
    %85 = vector.load %arg2[%c8, %c0_92, %c0_93] : memref<27x4x8xbf16, #tpu.memory_space<vmem>>, vector<1x4x8xbf16>
    %86 = vector.shape_cast %85 : vector<1x4x8xbf16> to vector<4x8xbf16>
    %cst_94 = arith.constant dense<0.000000e+00> : vector<4x125xf32>
    %87 = tpu.matmul %86, %84, %cst_94 {dimension_numbers = #tpu.dot_dimension_numbers<[1], [0], [0], [1], [0, 0, 1, 1], [], []>} : vector<4x8xbf16>, vector<8x125xbf16>, vector<4x125xf32> -> vector<4x125xf32>
    %88 = arith.addf %82, %87 : vector<4x125xf32>
    %89 = vector.broadcast %0 : vector<4x1xf32> to vector<4x125xf32>
    %90 = arith.addf %88, %89 : vector<4x125xf32>
    %c0_95 = arith.constant 0 : index
    %c3_96 = arith.constant 3 : index
    %c0_97 = arith.constant 0 : index
    %c0_98 = arith.constant 0 : index
    %91 = vector.load %arg4[%c0_95, %c3_96, %c0_97, %c0_98] : memref<1x8x4x125xf32, #tpu.memory_space<vmem>>, vector<1x1x4x125xf32>
    %92 = vector.shape_cast %91 : vector<1x1x4x125xf32> to vector<4x125xf32>
    %93 = arith.addf %90, %92 : vector<4x125xf32>
    %cst_99 = arith.constant 0.000000e+00 : f32
    %94 = vector.broadcast %cst_99 : f32 to vector<4x125xf32>
    %95 = arith.maximumf %93, %94 : vector<4x125xf32>
    %c0_100 = arith.constant 0 : index
    %c3_101 = arith.constant 3 : index
    %c0_102 = arith.constant 0 : index
    %c0_103 = arith.constant 0 : index
    %96 = vector.load %arg5[%c0_100, %c3_101, %c0_102, %c0_103] : memref<1x8x4x125xf32, #tpu.memory_space<vmem>>, vector<1x1x4x125xf32>
    %97 = vector.shape_cast %96 : vector<1x1x4x125xf32> to vector<4x125xf32>
    %98 = vector.shape_cast %95 : vector<4x125xf32> to vector<1x1x4x125xf32>
    tpu.vector_store %arg5[%c0_100, %c3_101, %c0_102, %c0_103], %98 {strides = array<i32>} : memref<1x8x4x125xf32, #tpu.memory_space<vmem>>, vector<1x1x4x125xf32>,
    %cst_104 = arith.constant 0.000000e+00 : f32
    %99 = vector.broadcast %cst_104 : f32 to vector<4x125xf32>
    %c0_105 = arith.constant 0 : index
    %c0_106 = arith.constant 0 : index
    %c0_107 = arith.constant 0 : index
    %c0_108 = arith.constant 0 : index
    %100 = vector.load %arg1[%c0_105, %c0_106, %c0_107, %c0_108] : memref<1x1x8x156xbf16, #tpu.memory_space<vmem>>, vector<1x1x8x125xbf16>
    %101 = vector.shape_cast %100 : vector<1x1x8x125xbf16> to vector<8x125xbf16>
    %c9 = arith.constant 9 : index
    %c0_109 = arith.constant 0 : index
    %c0_110 = arith.constant 0 : index
    %102 = vector.load %arg2[%c9, %c0_109, %c0_110] : memref<27x4x8xbf16, #tpu.memory_space<vmem>>, vector<1x4x8xbf16>
    %103 = vector.shape_cast %102 : vector<1x4x8xbf16> to vector<4x8xbf16>
    %cst_111 = arith.constant dense<0.000000e+00> : vector<4x125xf32>
    %104 = tpu.matmul %103, %101, %cst_111 {dimension_numbers = #tpu.dot_dimension_numbers<[1], [0], [0], [1], [0, 0, 1, 1], [], []>} : vector<4x8xbf16>, vector<8x125xbf16>, vector<4x125xf32> -> vector<4x125xf32>
    %105 = arith.addf %99, %104 : vector<4x125xf32>
    %c0_112 = arith.constant 0 : index
    %c0_113 = arith.constant 0 : index
    %c0_114 = arith.constant 0 : index
    %c25 = arith.constant 25 : index
    %106 = vector.load %arg1[%c0_112, %c0_113, %c0_114, %c25] : memref<1x1x8x156xbf16, #tpu.memory_space<vmem>>, vector<1x1x8x125xbf16>
    %107 = vector.shape_cast %106 : vector<1x1x8x125xbf16> to vector<8x125xbf16>
    %c10 = arith.constant 10 : index
    %c0_115 = arith.constant 0 : index
    %c0_116 = arith.constant 0 : index
    %108 = vector.load %arg2[%c10, %c0_115, %c0_116] : memref<27x4x8xbf16, #tpu.memory_space<vmem>>, vector<1x4x8xbf16>
    %109 = vector.shape_cast %108 : vector<1x4x8xbf16> to vector<4x8xbf16>
    %cst_117 = arith.constant dense<0.000000e+00> : vector<4x125xf32>
    %110 = tpu.matmul %109, %107, %cst_117 {dimension_numbers = #tpu.dot_dimension_numbers<[1], [0], [0], [1], [0, 0, 1, 1], [], []>} : vector<4x8xbf16>, vector<8x125xbf16>, vector<4x125xf32> -> vector<4x125xf32>
    %111 = arith.addf %105, %110 : vector<4x125xf32>
    %112 = vector.broadcast %0 : vector<4x1xf32> to vector<4x125xf32>
    %113 = arith.addf %111, %112 : vector<4x125xf32>
    %c0_118 = arith.constant 0 : index
    %c4_119 = arith.constant 4 : index
    %c0_120 = arith.constant 0 : index
    %c0_121 = arith.constant 0 : index
    %114 = vector.load %arg4[%c0_118, %c4_119, %c0_120, %c0_121] : memref<1x8x4x125xf32, #tpu.memory_space<vmem>>, vector<1x1x4x125xf32>
    %115 = vector.shape_cast %114 : vector<1x1x4x125xf32> to vector<4x125xf32>
    %116 = arith.addf %113, %115 : vector<4x125xf32>
    %cst_122 = arith.constant 0.000000e+00 : f32
    %117 = vector.broadcast %cst_122 : f32 to vector<4x125xf32>
    %118 = arith.maximumf %116, %117 : vector<4x125xf32>
    %c0_123 = arith.constant 0 : index
    %c4_124 = arith.constant 4 : index
    %c0_125 = arith.constant 0 : index
    %c0_126 = arith.constant 0 : index
    %119 = vector.load %arg5[%c0_123, %c4_124, %c0_125, %c0_126] : memref<1x8x4x125xf32, #tpu.memory_space<vmem>>, vector<1x1x4x125xf32>
    %120 = vector.shape_cast %119 : vector<1x1x4x125xf32> to vector<4x125xf32>
    %121 = vector.shape_cast %118 : vector<4x125xf32> to vector<1x1x4x125xf32>
    tpu.vector_store %arg5[%c0_123, %c4_124, %c0_125, %c0_126], %121 {strides = array<i32>} : memref<1x8x4x125xf32, #tpu.memory_space<vmem>>, vector<1x1x4x125xf32>,
    %cst_127 = arith.constant 0.000000e+00 : f32
    %122 = vector.broadcast %cst_127 : f32 to vector<4x125xf32>
    %c0_128 = arith.constant 0 : index
    %c0_129 = arith.constant 0 : index
    %c0_130 = arith.constant 0 : index
    %c0_131 = arith.constant 0 : index
    %123 = vector.load %arg1[%c0_128, %c0_129, %c0_130, %c0_131] : memref<1x1x8x156xbf16, #tpu.memory_space<vmem>>, vector<1x1x8x125xbf16>
    %124 = vector.shape_cast %123 : vector<1x1x8x125xbf16> to vector<8x125xbf16>
    %c11 = arith.constant 11 : index
    %c0_132 = arith.constant 0 : index
    %c0_133 = arith.constant 0 : index
    %125 = vector.load %arg2[%c11, %c0_132, %c0_133] : memref<27x4x8xbf16, #tpu.memory_space<vmem>>, vector<1x4x8xbf16>
    %126 = vector.shape_cast %125 : vector<1x4x8xbf16> to vector<4x8xbf16>
    %cst_134 = arith.constant dense<0.000000e+00> : vector<4x125xf32>
    %127 = tpu.matmul %126, %124, %cst_134 {dimension_numbers = #tpu.dot_dimension_numbers<[1], [0], [0], [1], [0, 0, 1, 1], [], []>} : vector<4x8xbf16>, vector<8x125xbf16>, vector<4x125xf32> -> vector<4x125xf32>
    %128 = arith.addf %122, %127 : vector<4x125xf32>
    %c0_135 = arith.constant 0 : index
    %c0_136 = arith.constant 0 : index
    %c0_137 = arith.constant 0 : index
    %c1_138 = arith.constant 1 : index
    %129 = vector.load %arg1[%c0_135, %c0_136, %c0_137, %c1_138] : memref<1x1x8x156xbf16, #tpu.memory_space<vmem>>, vector<1x1x8x125xbf16>
    %130 = vector.shape_cast %129 : vector<1x1x8x125xbf16> to vector<8x125xbf16>
    %c12 = arith.constant 12 : index
    %c0_139 = arith.constant 0 : index
    %c0_140 = arith.constant 0 : index
    %131 = vector.load %arg2[%c12, %c0_139, %c0_140] : memref<27x4x8xbf16, #tpu.memory_space<vmem>>, vector<1x4x8xbf16>
    %132 = vector.shape_cast %131 : vector<1x4x8xbf16> to vector<4x8xbf16>
    %cst_141 = arith.constant dense<0.000000e+00> : vector<4x125xf32>
    %133 = tpu.matmul %132, %130, %cst_141 {dimension_numbers = #tpu.dot_dimension_numbers<[1], [0], [0], [1], [0, 0, 1, 1], [], []>} : vector<4x8xbf16>, vector<8x125xbf16>, vector<4x125xf32> -> vector<4x125xf32>
    %134 = arith.addf %128, %133 : vector<4x125xf32>
    %c0_142 = arith.constant 0 : index
    %c0_143 = arith.constant 0 : index
    %c0_144 = arith.constant 0 : index
    %c25_145 = arith.constant 25 : index
    %135 = vector.load %arg1[%c0_142, %c0_143, %c0_144, %c25_145] : memref<1x1x8x156xbf16, #tpu.memory_space<vmem>>, vector<1x1x8x125xbf16>
    %136 = vector.shape_cast %135 : vector<1x1x8x125xbf16> to vector<8x125xbf16>
    %c13 = arith.constant 13 : index
    %c0_146 = arith.constant 0 : index
    %c0_147 = arith.constant 0 : index
    %137 = vector.load %arg2[%c13, %c0_146, %c0_147] : memref<27x4x8xbf16, #tpu.memory_space<vmem>>, vector<1x4x8xbf16>
    %138 = vector.shape_cast %137 : vector<1x4x8xbf16> to vector<4x8xbf16>
    %cst_148 = arith.constant dense<0.000000e+00> : vector<4x125xf32>
    %139 = tpu.matmul %138, %136, %cst_148 {dimension_numbers = #tpu.dot_dimension_numbers<[1], [0], [0], [1], [0, 0, 1, 1], [], []>} : vector<4x8xbf16>, vector<8x125xbf16>, vector<4x125xf32> -> vector<4x125xf32>
    %140 = arith.addf %134, %139 : vector<4x125xf32>
    %c0_149 = arith.constant 0 : index
    %c0_150 = arith.constant 0 : index
    %c0_151 = arith.constant 0 : index
    %c26 = arith.constant 26 : index
    %141 = vector.load %arg1[%c0_149, %c0_150, %c0_151, %c26] : memref<1x1x8x156xbf16, #tpu.memory_space<vmem>>, vector<1x1x8x125xbf16>
    %142 = vector.shape_cast %141 : vector<1x1x8x125xbf16> to vector<8x125xbf16>
    %c14 = arith.constant 14 : index
    %c0_152 = arith.constant 0 : index
    %c0_153 = arith.constant 0 : index
    %143 = vector.load %arg2[%c14, %c0_152, %c0_153] : memref<27x4x8xbf16, #tpu.memory_space<vmem>>, vector<1x4x8xbf16>
    %144 = vector.shape_cast %143 : vector<1x4x8xbf16> to vector<4x8xbf16>
    %cst_154 = arith.constant dense<0.000000e+00> : vector<4x125xf32>
    %145 = tpu.matmul %144, %142, %cst_154 {dimension_numbers = #tpu.dot_dimension_numbers<[1], [0], [0], [1], [0, 0, 1, 1], [], []>} : vector<4x8xbf16>, vector<8x125xbf16>, vector<4x125xf32> -> vector<4x125xf32>
    %146 = arith.addf %140, %145 : vector<4x125xf32>
    %147 = vector.broadcast %0 : vector<4x1xf32> to vector<4x125xf32>
    %148 = arith.addf %146, %147 : vector<4x125xf32>
    %c0_155 = arith.constant 0 : index
    %c5_156 = arith.constant 5 : index
    %c0_157 = arith.constant 0 : index
    %c0_158 = arith.constant 0 : index
    %149 = vector.load %arg4[%c0_155, %c5_156, %c0_157, %c0_158] : memref<1x8x4x125xf32, #tpu.memory_space<vmem>>, vector<1x1x4x125xf32>
    %150 = vector.shape_cast %149 : vector<1x1x4x125xf32> to vector<4x125xf32>
    %151 = arith.addf %148, %150 : vector<4x125xf32>
    %cst_159 = arith.constant 0.000000e+00 : f32
    %152 = vector.broadcast %cst_159 : f32 to vector<4x125xf32>
    %153 = arith.maximumf %151, %152 : vector<4x125xf32>
    %c0_160 = arith.constant 0 : index
    %c5_161 = arith.constant 5 : index
    %c0_162 = arith.constant 0 : index
    %c0_163 = arith.constant 0 : index
    %154 = vector.load %arg5[%c0_160, %c5_161, %c0_162, %c0_163] : memref<1x8x4x125xf32, #tpu.memory_space<vmem>>, vector<1x1x4x125xf32>
    %155 = vector.shape_cast %154 : vector<1x1x4x125xf32> to vector<4x125xf32>
    %156 = vector.shape_cast %153 : vector<4x125xf32> to vector<1x1x4x125xf32>
    tpu.vector_store %arg5[%c0_160, %c5_161, %c0_162, %c0_163], %156 {strides = array<i32>} : memref<1x8x4x125xf32, #tpu.memory_space<vmem>>, vector<1x1x4x125xf32>,
    %cst_164 = arith.constant 0.000000e+00 : f32
    %157 = vector.broadcast %cst_164 : f32 to vector<4x125xf32>
    %c0_165 = arith.constant 0 : index
    %c0_166 = arith.constant 0 : index
    %c0_167 = arith.constant 0 : index
    %c0_168 = arith.constant 0 : index
    %158 = vector.load %arg1[%c0_165, %c0_166, %c0_167, %c0_168] : memref<1x1x8x156xbf16, #tpu.memory_space<vmem>>, vector<1x1x8x125xbf16>
    %159 = vector.shape_cast %158 : vector<1x1x8x125xbf16> to vector<8x125xbf16>
    %c15 = arith.constant 15 : index
    %c0_169 = arith.constant 0 : index
    %c0_170 = arith.constant 0 : index
    %160 = vector.load %arg2[%c15, %c0_169, %c0_170] : memref<27x4x8xbf16, #tpu.memory_space<vmem>>, vector<1x4x8xbf16>
    %161 = vector.shape_cast %160 : vector<1x4x8xbf16> to vector<4x8xbf16>
    %cst_171 = arith.constant dense<0.000000e+00> : vector<4x125xf32>
    %162 = tpu.matmul %161, %159, %cst_171 {dimension_numbers = #tpu.dot_dimension_numbers<[1], [0], [0], [1], [0, 0, 1, 1], [], []>} : vector<4x8xbf16>, vector<8x125xbf16>, vector<4x125xf32> -> vector<4x125xf32>
    %163 = arith.addf %157, %162 : vector<4x125xf32>
    %c0_172 = arith.constant 0 : index
    %c0_173 = arith.constant 0 : index
    %c0_174 = arith.constant 0 : index
    %c5_175 = arith.constant 5 : index
    %164 = vector.load %arg1[%c0_172, %c0_173, %c0_174, %c5_175] : memref<1x1x8x156xbf16, #tpu.memory_space<vmem>>, vector<1x1x8x125xbf16>
    %165 = vector.shape_cast %164 : vector<1x1x8x125xbf16> to vector<8x125xbf16>
    %c16 = arith.constant 16 : index
    %c0_176 = arith.constant 0 : index
    %c0_177 = arith.constant 0 : index
    %166 = vector.load %arg2[%c16, %c0_176, %c0_177] : memref<27x4x8xbf16, #tpu.memory_space<vmem>>, vector<1x4x8xbf16>
    %167 = vector.shape_cast %166 : vector<1x4x8xbf16> to vector<4x8xbf16>
    %cst_178 = arith.constant dense<0.000000e+00> : vector<4x125xf32>
    %168 = tpu.matmul %167, %165, %cst_178 {dimension_numbers = #tpu.dot_dimension_numbers<[1], [0], [0], [1], [0, 0, 1, 1], [], []>} : vector<4x8xbf16>, vector<8x125xbf16>, vector<4x125xf32> -> vector<4x125xf32>
    %169 = arith.addf %163, %168 : vector<4x125xf32>
    %c0_179 = arith.constant 0 : index
    %c0_180 = arith.constant 0 : index
    %c0_181 = arith.constant 0 : index
    %c25_182 = arith.constant 25 : index
    %170 = vector.load %arg1[%c0_179, %c0_180, %c0_181, %c25_182] : memref<1x1x8x156xbf16, #tpu.memory_space<vmem>>, vector<1x1x8x125xbf16>
    %171 = vector.shape_cast %170 : vector<1x1x8x125xbf16> to vector<8x125xbf16>
    %c17 = arith.constant 17 : index
    %c0_183 = arith.constant 0 : index
    %c0_184 = arith.constant 0 : index
    %172 = vector.load %arg2[%c17, %c0_183, %c0_184] : memref<27x4x8xbf16, #tpu.memory_space<vmem>>, vector<1x4x8xbf16>
    %173 = vector.shape_cast %172 : vector<1x4x8xbf16> to vector<4x8xbf16>
    %cst_185 = arith.constant dense<0.000000e+00> : vector<4x125xf32>
    %174 = tpu.matmul %173, %171, %cst_185 {dimension_numbers = #tpu.dot_dimension_numbers<[1], [0], [0], [1], [0, 0, 1, 1], [], []>} : vector<4x8xbf16>, vector<8x125xbf16>, vector<4x125xf32> -> vector<4x125xf32>
    %175 = arith.addf %169, %174 : vector<4x125xf32>
    %c0_186 = arith.constant 0 : index
    %c0_187 = arith.constant 0 : index
    %c0_188 = arith.constant 0 : index
    %c30 = arith.constant 30 : index
    %176 = vector.load %arg1[%c0_186, %c0_187, %c0_188, %c30] : memref<1x1x8x156xbf16, #tpu.memory_space<vmem>>, vector<1x1x8x125xbf16>
    %177 = vector.shape_cast %176 : vector<1x1x8x125xbf16> to vector<8x125xbf16>
    %c18 = arith.constant 18 : index
    %c0_189 = arith.constant 0 : index
    %c0_190 = arith.constant 0 : index
    %178 = vector.load %arg2[%c18, %c0_189, %c0_190] : memref<27x4x8xbf16, #tpu.memory_space<vmem>>, vector<1x4x8xbf16>
    %179 = vector.shape_cast %178 : vector<1x4x8xbf16> to vector<4x8xbf16>
    %cst_191 = arith.constant dense<0.000000e+00> : vector<4x125xf32>
    %180 = tpu.matmul %179, %177, %cst_191 {dimension_numbers = #tpu.dot_dimension_numbers<[1], [0], [0], [1], [0, 0, 1, 1], [], []>} : vector<4x8xbf16>, vector<8x125xbf16>, vector<4x125xf32> -> vector<4x125xf32>
    %181 = arith.addf %175, %180 : vector<4x125xf32>
    %182 = vector.broadcast %0 : vector<4x1xf32> to vector<4x125xf32>
    %183 = arith.addf %181, %182 : vector<4x125xf32>
    %c0_192 = arith.constant 0 : index
    %c6_193 = arith.constant 6 : index
    %c0_194 = arith.constant 0 : index
    %c0_195 = arith.constant 0 : index
    %184 = vector.load %arg4[%c0_192, %c6_193, %c0_194, %c0_195] : memref<1x8x4x125xf32, #tpu.memory_space<vmem>>, vector<1x1x4x125xf32>
    %185 = vector.shape_cast %184 : vector<1x1x4x125xf32> to vector<4x125xf32>
    %186 = arith.addf %183, %185 : vector<4x125xf32>
    %cst_196 = arith.constant 0.000000e+00 : f32
    %187 = vector.broadcast %cst_196 : f32 to vector<4x125xf32>
    %188 = arith.maximumf %186, %187 : vector<4x125xf32>
    %c0_197 = arith.constant 0 : index
    %c6_198 = arith.constant 6 : index
    %c0_199 = arith.constant 0 : index
    %c0_200 = arith.constant 0 : index
    %189 = vector.load %arg5[%c0_197, %c6_198, %c0_199, %c0_200] : memref<1x8x4x125xf32, #tpu.memory_space<vmem>>, vector<1x1x4x125xf32>
    %190 = vector.shape_cast %189 : vector<1x1x4x125xf32> to vector<4x125xf32>
    %191 = vector.shape_cast %188 : vector<4x125xf32> to vector<1x1x4x125xf32>
    tpu.vector_store %arg5[%c0_197, %c6_198, %c0_199, %c0_200], %191 {strides = array<i32>} : memref<1x8x4x125xf32, #tpu.memory_space<vmem>>, vector<1x1x4x125xf32>,
    %cst_201 = arith.constant 0.000000e+00 : f32
    %192 = vector.broadcast %cst_201 : f32 to vector<4x125xf32>
    %c0_202 = arith.constant 0 : index
    %c0_203 = arith.constant 0 : index
    %c0_204 = arith.constant 0 : index
    %c0_205 = arith.constant 0 : index
    %193 = vector.load %arg1[%c0_202, %c0_203, %c0_204, %c0_205] : memref<1x1x8x156xbf16, #tpu.memory_space<vmem>>, vector<1x1x8x125xbf16>
    %194 = vector.shape_cast %193 : vector<1x1x8x125xbf16> to vector<8x125xbf16>
    %c19 = arith.constant 19 : index
    %c0_206 = arith.constant 0 : index
    %c0_207 = arith.constant 0 : index
    %195 = vector.load %arg2[%c19, %c0_206, %c0_207] : memref<27x4x8xbf16, #tpu.memory_space<vmem>>, vector<1x4x8xbf16>
    %196 = vector.shape_cast %195 : vector<1x4x8xbf16> to vector<4x8xbf16>
    %cst_208 = arith.constant dense<0.000000e+00> : vector<4x125xf32>
    %197 = tpu.matmul %196, %194, %cst_208 {dimension_numbers = #tpu.dot_dimension_numbers<[1], [0], [0], [1], [0, 0, 1, 1], [], []>} : vector<4x8xbf16>, vector<8x125xbf16>, vector<4x125xf32> -> vector<4x125xf32>
    %198 = arith.addf %192, %197 : vector<4x125xf32>
    %c0_209 = arith.constant 0 : index
    %c0_210 = arith.constant 0 : index
    %c0_211 = arith.constant 0 : index
    %c1_212 = arith.constant 1 : index
    %199 = vector.load %arg1[%c0_209, %c0_210, %c0_211, %c1_212] : memref<1x1x8x156xbf16, #tpu.memory_space<vmem>>, vector<1x1x8x125xbf16>
    %200 = vector.shape_cast %199 : vector<1x1x8x125xbf16> to vector<8x125xbf16>
    %c20 = arith.constant 20 : index
    %c0_213 = arith.constant 0 : index
    %c0_214 = arith.constant 0 : index
    %201 = vector.load %arg2[%c20, %c0_213, %c0_214] : memref<27x4x8xbf16, #tpu.memory_space<vmem>>, vector<1x4x8xbf16>
    %202 = vector.shape_cast %201 : vector<1x4x8xbf16> to vector<4x8xbf16>
    %cst_215 = arith.constant dense<0.000000e+00> : vector<4x125xf32>
    %203 = tpu.matmul %202, %200, %cst_215 {dimension_numbers = #tpu.dot_dimension_numbers<[1], [0], [0], [1], [0, 0, 1, 1], [], []>} : vector<4x8xbf16>, vector<8x125xbf16>, vector<4x125xf32> -> vector<4x125xf32>
    %204 = arith.addf %198, %203 : vector<4x125xf32>
    %c0_216 = arith.constant 0 : index
    %c0_217 = arith.constant 0 : index
    %c0_218 = arith.constant 0 : index
    %c5_219 = arith.constant 5 : index
    %205 = vector.load %arg1[%c0_216, %c0_217, %c0_218, %c5_219] : memref<1x1x8x156xbf16, #tpu.memory_space<vmem>>, vector<1x1x8x125xbf16>
    %206 = vector.shape_cast %205 : vector<1x1x8x125xbf16> to vector<8x125xbf16>
    %c21 = arith.constant 21 : index
    %c0_220 = arith.constant 0 : index
    %c0_221 = arith.constant 0 : index
    %207 = vector.load %arg2[%c21, %c0_220, %c0_221] : memref<27x4x8xbf16, #tpu.memory_space<vmem>>, vector<1x4x8xbf16>
    %208 = vector.shape_cast %207 : vector<1x4x8xbf16> to vector<4x8xbf16>
    %cst_222 = arith.constant dense<0.000000e+00> : vector<4x125xf32>
    %209 = tpu.matmul %208, %206, %cst_222 {dimension_numbers = #tpu.dot_dimension_numbers<[1], [0], [0], [1], [0, 0, 1, 1], [], []>} : vector<4x8xbf16>, vector<8x125xbf16>, vector<4x125xf32> -> vector<4x125xf32>
    %210 = arith.addf %204, %209 : vector<4x125xf32>
    %c0_223 = arith.constant 0 : index
    %c0_224 = arith.constant 0 : index
    %c0_225 = arith.constant 0 : index
    %c6_226 = arith.constant 6 : index
    %211 = vector.load %arg1[%c0_223, %c0_224, %c0_225, %c6_226] : memref<1x1x8x156xbf16, #tpu.memory_space<vmem>>, vector<1x1x8x125xbf16>
    %212 = vector.shape_cast %211 : vector<1x1x8x125xbf16> to vector<8x125xbf16>
    %c22 = arith.constant 22 : index
    %c0_227 = arith.constant 0 : index
    %c0_228 = arith.constant 0 : index
    %213 = vector.load %arg2[%c22, %c0_227, %c0_228] : memref<27x4x8xbf16, #tpu.memory_space<vmem>>, vector<1x4x8xbf16>
    %214 = vector.shape_cast %213 : vector<1x4x8xbf16> to vector<4x8xbf16>
    %cst_229 = arith.constant dense<0.000000e+00> : vector<4x125xf32>
    %215 = tpu.matmul %214, %212, %cst_229 {dimension_numbers = #tpu.dot_dimension_numbers<[1], [0], [0], [1], [0, 0, 1, 1], [], []>} : vector<4x8xbf16>, vector<8x125xbf16>, vector<4x125xf32> -> vector<4x125xf32>
    %216 = arith.addf %210, %215 : vector<4x125xf32>
    %c0_230 = arith.constant 0 : index
    %c0_231 = arith.constant 0 : index
    %c0_232 = arith.constant 0 : index
    %c25_233 = arith.constant 25 : index
    %217 = vector.load %arg1[%c0_230, %c0_231, %c0_232, %c25_233] : memref<1x1x8x156xbf16, #tpu.memory_space<vmem>>, vector<1x1x8x125xbf16>
    %218 = vector.shape_cast %217 : vector<1x1x8x125xbf16> to vector<8x125xbf16>
    %c23 = arith.constant 23 : index
    %c0_234 = arith.constant 0 : index
    %c0_235 = arith.constant 0 : index
    %219 = vector.load %arg2[%c23, %c0_234, %c0_235] : memref<27x4x8xbf16, #tpu.memory_space<vmem>>, vector<1x4x8xbf16>
    %220 = vector.shape_cast %219 : vector<1x4x8xbf16> to vector<4x8xbf16>
    %cst_236 = arith.constant dense<0.000000e+00> : vector<4x125xf32>
    %221 = tpu.matmul %220, %218, %cst_236 {dimension_numbers = #tpu.dot_dimension_numbers<[1], [0], [0], [1], [0, 0, 1, 1], [], []>} : vector<4x8xbf16>, vector<8x125xbf16>, vector<4x125xf32> -> vector<4x125xf32>
    %222 = arith.addf %216, %221 : vector<4x125xf32>
    %c0_237 = arith.constant 0 : index
    %c0_238 = arith.constant 0 : index
    %c0_239 = arith.constant 0 : index
    %c26_240 = arith.constant 26 : index
    %223 = vector.load %arg1[%c0_237, %c0_238, %c0_239, %c26_240] : memref<1x1x8x156xbf16, #tpu.memory_space<vmem>>, vector<1x1x8x125xbf16>
    %224 = vector.shape_cast %223 : vector<1x1x8x125xbf16> to vector<8x125xbf16>
    %c24 = arith.constant 24 : index
    %c0_241 = arith.constant 0 : index
    %c0_242 = arith.constant 0 : index
    %225 = vector.load %arg2[%c24, %c0_241, %c0_242] : memref<27x4x8xbf16, #tpu.memory_space<vmem>>, vector<1x4x8xbf16>
    %226 = vector.shape_cast %225 : vector<1x4x8xbf16> to vector<4x8xbf16>
    %cst_243 = arith.constant dense<0.000000e+00> : vector<4x125xf32>
    %227 = tpu.matmul %226, %224, %cst_243 {dimension_numbers = #tpu.dot_dimension_numbers<[1], [0], [0], [1], [0, 0, 1, 1], [], []>} : vector<4x8xbf16>, vector<8x125xbf16>, vector<4x125xf32> -> vector<4x125xf32>
    %228 = arith.addf %222, %227 : vector<4x125xf32>
    %c0_244 = arith.constant 0 : index
    %c0_245 = arith.constant 0 : index
    %c0_246 = arith.constant 0 : index
    %c30_247 = arith.constant 30 : index
    %229 = vector.load %arg1[%c0_244, %c0_245, %c0_246, %c30_247] : memref<1x1x8x156xbf16, #tpu.memory_space<vmem>>, vector<1x1x8x125xbf16>
    %230 = vector.shape_cast %229 : vector<1x1x8x125xbf16> to vector<8x125xbf16>
    %c25_248 = arith.constant 25 : index
    %c0_249 = arith.constant 0 : index
    %c0_250 = arith.constant 0 : index
    %231 = vector.load %arg2[%c25_248, %c0_249, %c0_250] : memref<27x4x8xbf16, #tpu.memory_space<vmem>>, vector<1x4x8xbf16>
    %232 = vector.shape_cast %231 : vector<1x4x8xbf16> to vector<4x8xbf16>
    %cst_251 = arith.constant dense<0.000000e+00> : vector<4x125xf32>
    %233 = tpu.matmul %232, %230, %cst_251 {dimension_numbers = #tpu.dot_dimension_numbers<[1], [0], [0], [1], [0, 0, 1, 1], [], []>} : vector<4x8xbf16>, vector<8x125xbf16>, vector<4x125xf32> -> vector<4x125xf32>
    %234 = arith.addf %228, %233 : vector<4x125xf32>
    %c0_252 = arith.constant 0 : index
    %c0_253 = arith.constant 0 : index
    %c0_254 = arith.constant 0 : index
    %c31 = arith.constant 31 : index
    %235 = vector.load %arg1[%c0_252, %c0_253, %c0_254, %c31] : memref<1x1x8x156xbf16, #tpu.memory_space<vmem>>, vector<1x1x8x125xbf16>
    %236 = vector.shape_cast %235 : vector<1x1x8x125xbf16> to vector<8x125xbf16>
    %c26_255 = arith.constant 26 : index
    %c0_256 = arith.constant 0 : index
    %c0_257 = arith.constant 0 : index
    %237 = vector.load %arg2[%c26_255, %c0_256, %c0_257] : memref<27x4x8xbf16, #tpu.memory_space<vmem>>, vector<1x4x8xbf16>
    %238 = vector.shape_cast %237 : vector<1x4x8xbf16> to vector<4x8xbf16>
    %cst_258 = arith.constant dense<0.000000e+00> : vector<4x125xf32>
    %239 = tpu.matmul %238, %236, %cst_258 {dimension_numbers = #tpu.dot_dimension_numbers<[1], [0], [0], [1], [0, 0, 1, 1], [], []>} : vector<4x8xbf16>, vector<8x125xbf16>, vector<4x125xf32> -> vector<4x125xf32>
    %240 = arith.addf %234, %239 : vector<4x125xf32>
    %241 = vector.broadcast %0 : vector<4x1xf32> to vector<4x125xf32>
    %242 = arith.addf %240, %241 : vector<4x125xf32>
    %c0_259 = arith.constant 0 : index
    %c7_260 = arith.constant 7 : index
    %c0_261 = arith.constant 0 : index
    %c0_262 = arith.constant 0 : index
    %243 = vector.load %arg4[%c0_259, %c7_260, %c0_261, %c0_262] : memref<1x8x4x125xf32, #tpu.memory_space<vmem>>, vector<1x1x4x125xf32>
    %244 = vector.shape_cast %243 : vector<1x1x4x125xf32> to vector<4x125xf32>
    %245 = arith.addf %242, %244 : vector<4x125xf32>
    %cst_263 = arith.constant 0.000000e+00 : f32
    %246 = vector.broadcast %cst_263 : f32 to vector<4x125xf32>
    %247 = arith.maximumf %245, %246 : vector<4x125xf32>
    %c0_264 = arith.constant 0 : index
    %c7_265 = arith.constant 7 : index
    %c0_266 = arith.constant 0 : index
    %c0_267 = arith.constant 0 : index
    %248 = vector.load %arg5[%c0_264, %c7_265, %c0_266, %c0_267] : memref<1x8x4x125xf32, #tpu.memory_space<vmem>>, vector<1x1x4x125xf32>
    %249 = vector.shape_cast %248 : vector<1x1x4x125xf32> to vector<4x125xf32>
    %250 = vector.shape_cast %247 : vector<4x125xf32> to vector<1x1x4x125xf32>
    tpu.vector_store %arg5[%c0_264, %c7_265, %c0_266, %c0_267], %250 {strides = array<i32>} : memref<1x8x4x125xf32, #tpu.memory_space<vmem>>, vector<1x1x4x125xf32>,
    return
  }
  func.func @transform_0(%arg0: i32) -> (i32, i32, i32, i32) {
    %c0_i32 = arith.constant 0 : i32
    %c0_i32_0 = arith.constant 0 : i32
    %c0_i32_1 = arith.constant 0 : i32
    %c0_i32_2 = arith.constant 0 : i32
    return %arg0, %c0_i32, %c0_i32_0, %c0_i32_1 : i32, i32, i32, i32
  }
  func.func @transform_1(%arg0: i32) -> (i32, i32, i32) {
    %c0_i32 = arith.constant 0 : i32
    %c0_i32_0 = arith.constant 0 : i32
    %c0_i32_1 = arith.constant 0 : i32
    %c0_i32_2 = arith.constant 0 : i32
    return %c0_i32, %c0_i32_0, %c0_i32_1 : i32, i32, i32
  }
  func.func @transform_2(%arg0: i32) -> (i32, i32) {
    %c0_i32 = arith.constant 0 : i32
    %c0_i32_0 = arith.constant 0 : i32
    %c0_i32_1 = arith.constant 0 : i32
    return %c0_i32, %c0_i32_0 : i32, i32
  }
  func.func @transform_3(%arg0: i32) -> (i32, i32, i32, i32) {
    %c0_i32 = arith.constant 0 : i32
    %c0_i32_0 = arith.constant 0 : i32
    %c0_i32_1 = arith.constant 0 : i32
    %c0_i32_2 = arith.constant 0 : i32
    return %arg0, %c0_i32, %c0_i32_0, %c0_i32_1 : i32, i32, i32, i32
  }
  func.func @transform_4(%arg0: i32) -> (i32, i32, i32, i32) {
    %c0_i32 = arith.constant 0 : i32
    %c0_i32_0 = arith.constant 0 : i32
    %c0_i32_1 = arith.constant 0 : i32
    %c0_i32_2 = arith.constant 0 : i32
    return %arg0, %c0_i32, %c0_i32_0, %c0_i32_1 : i32, i32, i32, i32
  }
}

</mosaic_0001>

<bundles_post_ra>
// kernel: hourglass_forward.14
= control target key start
LH: loop header
LB: loop body
LE: loop exit
PB: predicated region body
PF: predicated region fallthrough
CT: control target
= control target key end

     0   :  { %s375_s12 = smov 0   ;;  %s402_s0 = inlined_call_operand.vmem [shape: bf16[2,1,4,512], index: 0, kind: input, shape index: {}]   ;;  %s403_s1 = inlined_call_operand.vmem [shape: bf16[1,4,4], index: 1, kind: input, shape index: {}]   ;;  %s404_s2 = inlined_call_operand.vmem [shape: f32[4,1], index: 2, kind: input, shape index: {}]   ;;  %s405_s3 = inlined_call_operand.vmem [shape: f32[2,1,4,512], index: 3, kind: output, shape index: {}]  }
   0x1 LB: > { %s319_s13 = sadd.s32 4294967295, %s352_s12   ;;  %p323_p0 = scmp.ge.s32.totalorder %s352_s12, 1  ;;  %s352_s12 = sphi %s375_s12, %s13_s12  }
   0x2   : > { %p137_p1 = scmp.lt.s32.totalorder %s352_s12, 3 }
   0x4   : > { %p138_p2 = pnand %p323_p0, %p137_p1 }
   0x5   : > { %p161_p3 = scmp.lt.s32.totalorder (!%p138_p2), %s319_s13, 1 }
   0x6   : > { %141 = sbr.rel (%p138_p2) target bundleno = 169 (0xa9), region = 32 }
   0xb   : > { %v354_v0 = vmov 0   ;;  %v172_v1 = vld [vmem:[%s404_s2] sm:$0xf]  ;;  %s407_s13 = smov (!%p161_p3, %s319_s13), 1  ;;  %vm190_vm0 = vcmask 1041408   ;;  %vm186_vm1 = vcmask 31744  }
   0xc   : > { %345 = vset.pattern.permute.xlu0 %v354_v0  ;;  %s334_s16 = sshll.u32 %s407_s13, 3  ;;  %v174_v5 = vld [vmem:[%s403_s1] sm:$0x3]  ;;  %s335_s22 = sshll.u32 %s407_s13, 4  ;;  %vm257_vm2 = vcmask 1043456  }
   0xd   : > { %177 = vperm.xlu0 %345, %v172_v1   ;;  %s165_s19 = scalar_lea.vmem %s402_s0, %s334_s16  ;;  %s170_s25 = scalar_lea.vmem %s405_s3, %s335_s22 }
   0xe   : > { %v173_v2 = vld [vmem:[%s165_s19] sm:$0xff] }
   0xf   : > { %181 = vst [vmem:[#allocation1] ss:$4 sm:$0xff] %v173_v2 }
  0x16   : > { %v182_v3 = vld.sshfl [vmem:[#allocation1] sm:$0xff pattern:$0x73625140]  ;;  %v183_v4 = vld.sshfl [vmem:[#allocation1 + $0x8] sm:$0xff pattern:$0x73625140] }
  0x17   : > { %v191_v6 = vsel %vm190_vm0, %v182_v3, 0  ;;  %v193_v7 = vsel %vm190_vm0, %v183_v4, 0  ;;  %v184_v8 = vld.sshfl [vmem:[#allocation1 + $0x10] sm:$0xff pattern:$0x73625140] }
  0x18   : > { %206 = vmatpush.bf16.msra.mxu0 %v191_v6  ;;  %219 = vmatpush.bf16.msra.mxu1 %v193_v7  ;;  %v195_v9 = vsel %vm190_vm0, %v184_v8, 0  ;;  %v185_v10 = vld.sshfl [vmem:[#allocation1 + $0x18] sm:$0xff pattern:$0x73625140] }
  0x19   : > { %232 = vmatpush.bf16.msra.mxu2 %v195_v9  ;;  %v197_v11 = vsel %vm190_vm0, %v185_v10, 0 }
  0x1a   : > { %245 = vmatpush.bf16.msra.mxu3 %v197_v11 }
  0x1b   : > { %328 = vmatmul.msk.bf16.vlgmr.msra.gmra.mxu0 %vm186_vm1, %v174_v5  ;;  %329 = vmatmul.msk.bf16.vlgmr.msra.gmra.mxu1 %vm186_vm1, %v174_v5 }
  0x1c   : > { %330 = vmatmul.msk.bf16.vlgmr.msra.gmra.mxu2 %vm186_vm1, %v174_v5 }
  0x1d   : > { %331 = vmatmul.msk.bf16.vlgmr.msra.gmra.mxu3 %vm186_vm1, %v174_v5 }
  0x7f   : > { %v178_v12 = vpop.permute.xlu0 %177 }
  0x98   : > { %v208_v13 = vpop.f32.mrf.mxu0  ;;  %v221_v14 = vpop.f32.mrf.mxu1 }
  0x99   : > { %v209_v15 = vadd.f32 %v208_v13, %v178_v12  ;;  %v222_v16 = vadd.f32 %v221_v14, %v178_v12 }
  0x9b   : > { %v255_v17 = vrot.slane %v222_v16, 4 }
  0x9d   : > { %v258_v18 = vsel %vm257_vm2, %v209_v15, %v255_v17 }
  0x9e   : > { %262 = vst [vmem:[%s170_s25] sm:$0xff] %v258_v18 }
  0x9f   : > { %v234_v19 = vpop.f32.mrf.mxu2 }
  0xa0   : > { %v247_v20 = vpop.f32.mrf.mxu3  ;;  %v210_v21 = vpop.f32.mrf.mxu0  ;;  %v235_v24 = vadd.f32 %v234_v19, %v178_v12 }
  0xa1   : > { %v248_v22 = vadd.f32 %v247_v20, %v178_v12  ;;  %v223_v23 = vpop.f32.mrf.mxu1 }
  0xa3   : > { %v256_v25 = vrot.slane %v248_v22, 4 }
  0xa5   : > { %v259_v26 = vsel %vm257_vm2, %v235_v24, %v256_v25 }
  0xa6   : > { %263 = vst [vmem:[%s170_s25 + $0x8] sm:$0xff] %v259_v26 }
  0xa7   : > { %v236_v27 = vpop.f32.mrf.mxu2 }
  0xa8   : > { %v249_v28 = vpop.f32.mrf.mxu3 }
  0xa9 PF: > { %s13_s12 = sadd.s32 1, %s352_s12  }
  0xaa   : > { %p10_p4 = scmp.ge.s32.totalorder %s13_s12, 4  }
  0xac   :  { %12 = sbr.rel (!%p10_p4) target bundleno = 1 (0x1), region = 62 }

// kernel: squeeze.225
= control target key start
LH: loop header
LB: loop body
LE: loop exit
PB: predicated region body
PF: predicated region fallthrough
CT: control target
= control target key end

     0   :  { %s2271_s10 = smov 110   ;;  %s2272_s11 = smov 118   ;;  %vm946_vm0 = vcmask 1031168   ;;  %vm63_vm1 = vcmask 48128   ;;  %vm950_vm2 = vcmask 15360   ;;  %vm959_vm3 = vcmask 48144   ;;  %s2815_s0 = inlined_call_operand.vmem [shape: bf16[2,1,8,216], index: 0, kind: input, shape index: {}]   ;;  %s2816_s1 = inlined_call_operand.vmem [shape: bf16[2,8,6,6,6], index: 1, kind: output, shape index: {}]  }
   0x1   :  { %v2012_v0 = vld [vmem:[%s2815_s0 + $0x8] sm:$0xff]   ;;  %v1769_v1 = vld [vmem:[%s2815_s0] sm:$0xff]   ;;  %s2270_s0 = smov 112   ;;  %s2273_s12 = smov 124  }
   0x2   :  { %v1767_v2 = vunpack.c.h.bf16 %v2012_v0  ;;  %v1771_v3 = vunpack.c.h.bf16 %v1769_v1  ;;  %v2321_v4 = vunpack.c.l.bf16 %v2012_v0  ;;  %v2325_v6 = vunpack.c.l.bf16 %v1769_v1  ;;  %s2274_s13 = smov 100   ;;  %s2275_s14 = smov 116  }
   0x3   :  { %s2276_s15 = smov 122   ;;  %s2277_s16 = smov 92  }
   0x4   :  { %18 = vst [vmem:[#allocation1 + $0x18] sm:$0xff] %v1767_v2  ;;  %v2323_v5 = vpack.i.bf16 %v1767_v2, %v1771_v3  ;;  %v2110_v9 = vpack.i.bf16 %v2321_v4, %v2325_v6  ;;  %s2278_s17 = smov 104   ;;  %s2279_s18 = smov 106  }
   0x5   :  { %48 = vst [vmem:[#allocation1 + $0x8] sm:$0xff] %v1771_v3  ;;  %s2280_s19 = smov 82   ;;  %s2281_s20 = smov 94  }
   0x6   :  { %33 = vst [vmem:[#allocation1 + $0x10] sm:$0xff] %v2321_v4  ;;  %2116 = vrot.lane.b32.xlu2 %v2323_v5, %s2270_s0  ;;  %s2282_s21 = smov 98   ;;  %s2283_s22 = smov 74  }
   0x7   :  { %61 = vst [vmem:[#allocation1] sm:$0xff] %v2325_v6  ;;  %s2284_s23 = smov 86   ;;  %s2285_s24 = smov 88  }
   0x8   :  { %s2286_s25 = smov 64   ;;  %s2287_s26 = smov 76   ;;  %67 = vst.msk [vmem:[#allocation0] ss:$48 sm:$0xc0] %vm63_vm1, %v2325_v6  }
   0x9   :  { %s2288_s27 = smov 80   ;;  %s2289_s28 = smov 56   ;;  %64 = vst.msk [vmem:[#allocation0] ss:$48 sm:$0x3] %vm63_vm1, %v2325_v6  }
   0xa   :  { %s2290_s29 = smov 68   ;;  %s2291_s30 = smov 70   ;;  %65 = vst.msk [vmem:[#allocation0] ss:$48 sm:$0xc] %vm63_vm1, %v2325_v6  }
   0xb   :  { %v144_v7 = vld.sshfl [vmem:[#allocation1 + $0x18] sm:$0xff pattern:$0x67452301]   ;;  %s2292_s2 = smov 46   ;;  %s2293_s3 = smov 58  }
   0xc   :  { %v131_v8 = vld.sshfl [vmem:[#allocation1 + $0x8] sm:$0xff pattern:$0x67452301]   ;;  %s2294_s4 = smov 62   ;;  %s2295_s5 = smov 38  }
   0xd   :  { %v2105_v10 = vpack.i.bf16 %v144_v7, %v131_v8  ;;  %v730_v12 = vld.sshfl [vmem:[#allocation1 + $0x10] sm:$0xff pattern:$0x67452301]   ;;  %66 = vst.msk [vmem:[#allocation0] ss:$48 sm:$0x30] %vm63_vm1, %v2325_v6  }
   0xe   :  { %2121 = vrot.lane.b32.xlu2 %v2110_v9, %s2271_s10  ;;  %v717_v11 = vld.sshfl [vmem:[#allocation1] sm:$0xff pattern:$0x67452301]   ;;  %v973_v14 = vsel %vm946_vm0, %v144_v7, %v730_v12  ;;  %78 = vst.msk [vmem:[#allocation0 + $0x180] ss:$48 sm:$0xc0] %vm63_vm1, %v2321_v4  }
   0xf   :  { %2106 = vrot.lane.b32.xlu1 %v2105_v10, %s2272_s11  ;;  %2096 = vrot.lane.b32.xlu0 %v2105_v10, %s2273_s12  ;;  %v947_v13 = vsel %vm946_vm0, %v131_v8, %v717_v11  ;;  %v2220_v16 = vpack.i.bf16 %v730_v12, %v717_v11  ;;  %72 = vst.msk [vmem:[#allocation0 + $0x180] ss:$48 sm:$0x3] %vm63_vm1, %v2321_v4   ;;  %s2296_s6 = smov 50   ;;  %s2297_s7 = smov 52  }
  0x10   :  { %v2230_v15 = vpack.i.bf16 %v973_v14, %v947_v13  ;;  %74 = vst.msk [vmem:[#allocation0 + $0x180] ss:$48 sm:$0xc] %vm63_vm1, %v2321_v4   ;;  %s2298_s8 = smov 20   ;;  %s2299_s9 = smov 44  }
  0x11   :  { %76 = vst.msk [vmem:[#allocation0 + $0x180] ss:$48 sm:$0x30] %vm63_vm1, %v2321_v4   ;;  %s2300_s0 = smov 2   ;;  %s2301_s10 = smov 26  }
  0x12   :  { %s2302_s11 = smov 32   ;;  %s2303_s12 = smov 8  }
  0x16   :  { %2136 = vrot.lane.b32.xlu2 %v2323_v5, %s2274_s13  ;;  %s2304_s13 = smov 14  }
  0x17   :  { %2111 = vrot.lane.b32.xlu1 %v2110_v9, %s2275_s14  ;;  %2101 = vrot.lane.b32.xlu0 %v2110_v9, %s2276_s15 }
  0x1e   :  { %2151 = vrot.lane.b32.xlu2 %v2110_v9, %s2277_s16 }
  0x1f   :  { %2131 = vrot.lane.b32.xlu1 %v2110_v9, %s2278_s17  ;;  %2126 = vrot.lane.b32.xlu0 %v2323_v5, %s2279_s18 }
  0x26   :  { %2166 = vrot.lane.b32.xlu2 %v2323_v5, %s2280_s19 }
  0x27   :  { %2146 = vrot.lane.b32.xlu1 %v2323_v5, %s2281_s20  ;;  %2141 = vrot.lane.b32.xlu0 %v2110_v9, %s2282_s21 }
  0x2e   :  { %2181 = vrot.lane.b32.xlu2 %v2110_v9, %s2283_s22 }
  0x2f   :  { %2161 = vrot.lane.b32.xlu1 %v2110_v9, %s2284_s23  ;;  %2156 = vrot.lane.b32.xlu0 %v2323_v5, %s2285_s24 }
  0x36   :  { %2196 = vrot.lane.b32.xlu2 %v2323_v5, %s2286_s25 }
  0x37   :  { %2176 = vrot.lane.b32.xlu1 %v2323_v5, %s2287_s26  ;;  %2171 = vrot.lane.b32.xlu0 %v2110_v9, %s2288_s27 }
  0x3e   :  { %2211 = vrot.lane.b32.xlu2 %v2220_v16, %s2289_s28 }
  0x3f   :  { %2191 = vrot.lane.b32.xlu1 %v2110_v9, %s2290_s29  ;;  %2186 = vrot.lane.b32.xlu0 %v2323_v5, %s2291_s30 }
  0x46   :  { %2226 = vrot.lane.b32.xlu2 %v2323_v5, %s2292_s2 }
  0x47   :  { %2206 = vrot.lane.b32.xlu1 %v2323_v5, %s2293_s3  ;;  %2201 = vrot.lane.b32.xlu0 %v2110_v9, %s2294_s4 }
  0x4e   :  { %2241 = vrot.lane.b32.xlu2 %v2220_v16, %s2295_s5 }
  0x4f   :  { %2221 = vrot.lane.b32.xlu1 %v2220_v16, %s2296_s6  ;;  %2216 = vrot.lane.b32.xlu0 %v2323_v5, %s2297_s7 }
  0x56   :  { %2256 = vrot.lane.b32.xlu2 %v2220_v16, %s2298_s8 }
  0x57   :  { %2236 = vrot.lane.b32.xlu1 %v2220_v16, %s2299_s9  ;;  %2231 = vrot.lane.b32.xlu0 %v2230_v15, %s2300_s0 }
  0x5f   :  { %2251 = vrot.lane.b32.xlu1 %v2220_v16, %s2301_s10  ;;  %2246 = vrot.lane.b32.xlu0 %v2220_v16, %s2302_s11 }
  0x60   :  { %v2117_v17 = vpop.permute.xlu2 %2116 }
  0x61   :  { %v2119_v18 = vunpack.i.h.bf16 %v2117_v17  ;;  %v2118_v19 = vunpack.i.l.bf16 %v2117_v17 }
  0x63   :  { %200 = vst.msk [vmem:[#allocation0 + $0x1a0] ss:$48 sm:$0x3] %vm63_vm1, %v2119_v18  }
  0x64   :  { %202 = vst.msk [vmem:[#allocation0 + $0x1a0] ss:$48 sm:$0xc] %vm63_vm1, %v2119_v18  }
  0x65   :  { %204 = vst.msk [vmem:[#allocation0 + $0x1a0] ss:$48 sm:$0x30] %vm63_vm1, %v2119_v18  }
  0x66   :  { %206 = vst.msk [vmem:[#allocation0 + $0x1a0] ss:$48 sm:$0xc0] %vm63_vm1, %v2119_v18  }
  0x67   :  { %2266 = vrot.lane.b32.xlu1 %v2220_v16, %s2303_s12  ;;  %2261 = vrot.lane.b32.xlu0 %v2220_v16, %s2304_s13  ;;  %187 = vst.msk [vmem:[#allocation0 + $0x20] ss:$48 sm:$0x3] %vm63_vm1, %v2118_v19  }
  0x68   :  { %189 = vst.msk [vmem:[#allocation0 + $0x20] ss:$48 sm:$0xc] %vm63_vm1, %v2118_v19   ;;  %v2122_v20 = vpop.permute.xlu2 %2121 }
  0x69   :  { %191 = vst.msk [vmem:[#allocation0 + $0x20] ss:$48 sm:$0x30] %vm63_vm1, %v2118_v19   ;;  %v2124_v21 = vunpack.i.h.bf16 %v2122_v20  ;;  %v2123_v22 = vunpack.i.l.bf16 %v2122_v20 }
  0x6a   :  { %193 = vst.msk [vmem:[#allocation0 + $0x20] ss:$48 sm:$0xc0] %vm63_vm1, %v2118_v19  }
  0x6b   :  { %225 = vst.msk [vmem:[#allocation0 + $0x183] ss:$48 sm:$0x3] %vm63_vm1, %v2124_v21  }
  0x6c   :  { %227 = vst.msk [vmem:[#allocation0 + $0x183] ss:$48 sm:$0xc] %vm63_vm1, %v2124_v21  }
  0x6d   :  { %229 = vst.msk [vmem:[#allocation0 + $0x183] ss:$48 sm:$0x30] %vm63_vm1, %v2124_v21  }
  0x6e   :  { %231 = vst.msk [vmem:[#allocation0 + $0x183] ss:$48 sm:$0xc0] %vm63_vm1, %v2124_v21  }
  0x6f   :  { %212 = vst.msk [vmem:[#allocation0 + $0x3] ss:$48 sm:$0x3] %vm63_vm1, %v2123_v22  }
  0x70   :  { %214 = vst.msk [vmem:[#allocation0 + $0x3] ss:$48 sm:$0xc] %vm63_vm1, %v2123_v22   ;;  %v2137_v26 = vpop.permute.xlu2 %2136 }
  0x71   :  { %216 = vst.msk [vmem:[#allocation0 + $0x3] ss:$48 sm:$0x30] %vm63_vm1, %v2123_v22   ;;  %v2139_v39 = vunpack.i.h.bf16 %v2137_v26  ;;  %v2138_v41 = vunpack.i.l.bf16 %v2137_v26 }
  0x72   :  { %218 = vst.msk [vmem:[#allocation0 + $0x3] ss:$48 sm:$0xc0] %vm63_vm1, %v2123_v22  }
  0x73   :  { %302 = vst.msk [vmem:[#allocation0 + $0x1a2] ss:$48 sm:$0x3] %vm63_vm1, %v2139_v39  }
  0x74   :  { %304 = vst.msk [vmem:[#allocation0 + $0x1a2] ss:$48 sm:$0xc] %vm63_vm1, %v2139_v39  }
  0x75   :  { %306 = vst.msk [vmem:[#allocation0 + $0x1a2] ss:$48 sm:$0x30] %vm63_vm1, %v2139_v39  }
  0x76   :  { %308 = vst.msk [vmem:[#allocation0 + $0x1a2] ss:$48 sm:$0xc0] %vm63_vm1, %v2139_v39  }
  0x77   :  { %289 = vst.msk [vmem:[#allocation0 + $0x22] ss:$48 sm:$0x3] %vm63_vm1, %v2138_v41  }
  0x78   :  { %v2152_v37 = vpop.permute.xlu2 %2151  ;;  %291 = vst.msk [vmem:[#allocation0 + $0x22] ss:$48 sm:$0xc] %vm63_vm1, %v2138_v41  }
  0x79   :  { %293 = vst.msk [vmem:[#allocation0 + $0x22] ss:$48 sm:$0x30] %vm63_vm1, %v2138_v41   ;;  %v2154_v47 = vunpack.i.h.bf16 %v2152_v37  ;;  %v2153_v50 = vunpack.i.l.bf16 %v2152_v37 }
  0x7a   :  { %295 = vst.msk [vmem:[#allocation0 + $0x22] ss:$48 sm:$0xc0] %vm63_vm1, %v2138_v41  }
  0x7b   :  { %378 = vst.msk [vmem:[#allocation0 + $0x188] ss:$48 sm:$0x3] %vm63_vm1, %v2154_v47  }
  0x7c   :  { %380 = vst.msk [vmem:[#allocation0 + $0x188] ss:$48 sm:$0xc] %vm63_vm1, %v2154_v47  }
  0x7d   :  { %382 = vst.msk [vmem:[#allocation0 + $0x188] ss:$48 sm:$0x30] %vm63_vm1, %v2154_v47  }
  0x7e   :  { %384 = vst.msk [vmem:[#allocation0 + $0x188] ss:$48 sm:$0xc0] %vm63_vm1, %v2154_v47  }
  0x7f   :  { %365 = vst.msk [vmem:[#allocation0 + $0x8] ss:$48 sm:$0x3] %vm63_vm1, %v2153_v50  }
  0x80   :  { %v2167_v48 = vpop.permute.xlu2 %2166  ;;  %367 = vst.msk [vmem:[#allocation0 + $0x8] ss:$48 sm:$0xc] %vm63_vm1, %v2153_v50  }
  0x81   :  { %v2107_v23 = vpop.permute.xlu1 %2106  ;;  %v2097_v24 = vpop.permute.xlu0 %2096  ;;  %369 = vst.msk [vmem:[#allocation0 + $0x8] ss:$48 sm:$0x30] %vm63_vm1, %v2153_v50   ;;  %v2169_v56 = vunpack.i.h.bf16 %v2167_v48  ;;  %v2168_v59 = vunpack.i.l.bf16 %v2167_v48 }
  0x82   :  { %v2109_v25 = vunpack.i.h.bf16 %v2107_v23  ;;  %v2108_v27 = vunpack.i.l.bf16 %v2107_v23  ;;  %v2099_v28 = vunpack.i.h.bf16 %v2097_v24  ;;  %v2098_v31 = vunpack.i.l.bf16 %v2097_v24  ;;  %371 = vst.msk [vmem:[#allocation0 + $0x8] ss:$48 sm:$0xc0] %vm63_vm1, %v2153_v50  }
  0x83   :  { %455 = vst.msk [vmem:[#allocation0 + $0x1a5] ss:$48 sm:$0x3] %vm63_vm1, %v2169_v56  }
  0x84   :  { %149 = vst.msk [vmem:[#allocation0 + $0x1cd] ss:$-48 sm:$0x3] %vm63_vm1, %v2109_v25  }
  0x85   :  { %151 = vst.msk [vmem:[#allocation0 + $0x28d] ss:$-48 sm:$0xc] %vm63_vm1, %v2109_v25  }
  0x86   :  { %153 = vst.msk [vmem:[#allocation0 + $0x34d] ss:$-48 sm:$0x30] %vm63_vm1, %v2109_v25  }
  0x87   :  { %155 = vst.msk [vmem:[#allocation0 + $0x40d] ss:$-48 sm:$0xc0] %vm63_vm1, %v2109_v25  }
  0x88   :  { %136 = vst.msk [vmem:[#allocation0 + $0x4d] ss:$-48 sm:$0x3] %vm63_vm1, %v2108_v27   ;;  %v2182_v57 = vpop.permute.xlu2 %2181 }
  0x89   :  { %138 = vst.msk [vmem:[#allocation0 + $0x10d] ss:$-48 sm:$0xc] %vm63_vm1, %v2108_v27   ;;  %v2112_v29 = vpop.permute.xlu1 %2111  ;;  %v2102_v30 = vpop.permute.xlu0 %2101  ;;  %v2184_v2 = vunpack.i.h.bf16 %v2182_v57  ;;  %v2183_v4 = vunpack.i.l.bf16 %v2182_v57 }
  0x8a   :  { %140 = vst.msk [vmem:[#allocation0 + $0x1cd] ss:$-48 sm:$0x30] %vm63_vm1, %v2108_v27   ;;  %v2114_v32 = vunpack.i.h.bf16 %v2112_v29  ;;  %v2113_v35 = vunpack.i.l.bf16 %v2112_v29  ;;  %v2104_v36 = vunpack.i.h.bf16 %v2102_v30  ;;  %v2103_v38 = vunpack.i.l.bf16 %v2102_v30 }
  0x8b   :  { %142 = vst.msk [vmem:[#allocation0 + $0x28d] ss:$-48 sm:$0xc0] %vm63_vm1, %v2108_v27  }
  0x8c   :  { %98 = vst.msk [vmem:[#allocation0 + $0x1cc] ss:$-48 sm:$0x3] %vm63_vm1, %v2099_v28  }
  0x8d   :  { %100 = vst.msk [vmem:[#allocation0 + $0x28c] ss:$-48 sm:$0xc] %vm63_vm1, %v2099_v28  }
  0x8e   :  { %102 = vst.msk [vmem:[#allocation0 + $0x34c] ss:$-48 sm:$0x30] %vm63_vm1, %v2099_v28  }
  0x8f   :  { %104 = vst.msk [vmem:[#allocation0 + $0x40c] ss:$-48 sm:$0xc0] %vm63_vm1, %v2099_v28  }
  0x90   :  { %85 = vst.msk [vmem:[#allocation0 + $0x4c] ss:$-48 sm:$0x3] %vm63_vm1, %v2098_v31   ;;  %v2197_v0 = vpop.permute.xlu2 %2196 }
  0x91   :  { %87 = vst.msk [vmem:[#allocation0 + $0x10c] ss:$-48 sm:$0xc] %vm63_vm1, %v2098_v31   ;;  %v2132_v33 = vpop.permute.xlu1 %2131  ;;  %v2127_v34 = vpop.permute.xlu0 %2126  ;;  %v2199_v11 = vunpack.i.h.bf16 %v2197_v0  ;;  %v2198_v13 = vunpack.i.l.bf16 %v2197_v0 }
  0x92   :  { %89 = vst.msk [vmem:[#allocation0 + $0x1cc] ss:$-48 sm:$0x30] %vm63_vm1, %v2098_v31   ;;  %v2134_v42 = vunpack.i.h.bf16 %v2132_v33  ;;  %v2133_v44 = vunpack.i.l.bf16 %v2132_v33  ;;  %v2129_v45 = vunpack.i.h.bf16 %v2127_v34  ;;  %v2128_v46 = vunpack.i.l.bf16 %v2127_v34 }
  0x93   :  { %91 = vst.msk [vmem:[#allocation0 + $0x28c] ss:$-48 sm:$0xc0] %vm63_vm1, %v2098_v31  }
  0x94   :  { %174 = vst.msk [vmem:[#allocation0 + $0x182] ss:$48 sm:$0x3] %vm63_vm1, %v2114_v32  }
  0x95   :  { %176 = vst.msk [vmem:[#allocation0 + $0x182] ss:$48 sm:$0xc] %vm63_vm1, %v2114_v32  }
  0x96   :  { %178 = vst.msk [vmem:[#allocation0 + $0x182] ss:$48 sm:$0x30] %vm63_vm1, %v2114_v32  }
  0x97   :  { %180 = vst.msk [vmem:[#allocation0 + $0x182] ss:$48 sm:$0xc0] %vm63_vm1, %v2114_v32  }
  0x98   :  { %161 = vst.msk [vmem:[#allocation0 + $0x2] ss:$48 sm:$0x3] %vm63_vm1, %v2113_v35   ;;  %v2212_v9 = vpop.permute.xlu2 %2211 }
  0x99   :  { %163 = vst.msk [vmem:[#allocation0 + $0x2] ss:$48 sm:$0xc] %vm63_vm1, %v2113_v35   ;;  %v2147_v40 = vpop.permute.xlu1 %2146  ;;  %v2142_v43 = vpop.permute.xlu0 %2141  ;;  %v2214_v19 = vunpack.i.h.bf16 %v2212_v9  ;;  %v2213_v22 = vunpack.i.l.bf16 %v2212_v9 }
  0x9a   :  { %165 = vst.msk [vmem:[#allocation0 + $0x2] ss:$48 sm:$0x30] %vm63_vm1, %v2113_v35   ;;  %v2149_v51 = vunpack.i.h.bf16 %v2147_v40  ;;  %v2148_v53 = vunpack.i.l.bf16 %v2147_v40  ;;  %v2144_v54 = vunpack.i.h.bf16 %v2142_v43  ;;  %v2143_v55 = vunpack.i.l.bf16 %v2142_v43 }
  0x9b   :  { %167 = vst.msk [vmem:[#allocation0 + $0x2] ss:$48 sm:$0xc0] %vm63_vm1, %v2113_v35  }
  0x9c   :  { %123 = vst.msk [vmem:[#allocation0 + $0x181] ss:$48 sm:$0x3] %vm63_vm1, %v2104_v36  }
  0x9d   :  { %125 = vst.msk [vmem:[#allocation0 + $0x181] ss:$48 sm:$0xc] %vm63_vm1, %v2104_v36  }
  0x9e   :  { %127 = vst.msk [vmem:[#allocation0 + $0x181] ss:$48 sm:$0x30] %vm63_vm1, %v2104_v36  }
  0x9f   :  { %129 = vst.msk [vmem:[#allocation0 + $0x181] ss:$48 sm:$0xc0] %vm63_vm1, %v2104_v36  }
  0xa0   :  { %110 = vst.msk [vmem:[#allocation0 + $0x1] ss:$48 sm:$0x3] %vm63_vm1, %v2103_v38   ;;  %v2227_v20 = vpop.permute.xlu2 %2226 }
  0xa1   :  { %112 = vst.msk [vmem:[#allocation0 + $0x1] ss:$48 sm:$0xc] %vm63_vm1, %v2103_v38   ;;  %v2162_v49 = vpop.permute.xlu1 %2161  ;;  %v2157_v52 = vpop.permute.xlu0 %2156  ;;  %v2229_v28 = vunpack.i.h.bf16 %v2227_v20  ;;  %v2228_v35 = vunpack.i.l.bf16 %v2227_v20 }
  0xa2   :  { %114 = vst.msk [vmem:[#allocation0 + $0x1] ss:$48 sm:$0x30] %vm63_vm1, %v2103_v38   ;;  %v2164_v60 = vunpack.i.h.bf16 %v2162_v49  ;;  %v2163_v62 = vunpack.i.l.bf16 %v2162_v49  ;;  %v2159_v63 = vunpack.i.h.bf16 %v2157_v52  ;;  %v2158_v1 = vunpack.i.l.bf16 %v2157_v52 }
  0xa3   :  { %116 = vst.msk [vmem:[#allocation0 + $0x1] ss:$48 sm:$0xc0] %vm63_vm1, %v2103_v38  }
  0xa4   :  { %276 = vst.msk [vmem:[#allocation0 + $0x184] ss:$48 sm:$0x3] %vm63_vm1, %v2134_v42  }
  0xa5   :  { %278 = vst.msk [vmem:[#allocation0 + $0x184] ss:$48 sm:$0xc] %vm63_vm1, %v2134_v42  }
  0xa6   :  { %280 = vst.msk [vmem:[#allocation0 + $0x184] ss:$48 sm:$0x30] %vm63_vm1, %v2134_v42  }
  0xa7   :  { %282 = vst.msk [vmem:[#allocation0 + $0x184] ss:$48 sm:$0xc0] %vm63_vm1, %v2134_v42  }
  0xa8   :  { %263 = vst.msk [vmem:[#allocation0 + $0x4] ss:$48 sm:$0x3] %vm63_vm1, %v2133_v44  }
  0xa9   :  { %265 = vst.msk [vmem:[#allocation0 + $0x4] ss:$48 sm:$0xc] %vm63_vm1, %v2133_v44   ;;  %v2177_v58 = vpop.permute.xlu1 %2176  ;;  %v2172_v61 = vpop.permute.xlu0 %2171 }
  0xaa   :  { %267 = vst.msk [vmem:[#allocation0 + $0x4] ss:$48 sm:$0x30] %vm63_vm1, %v2133_v44   ;;  %v2179_v5 = vunpack.i.h.bf16 %v2177_v58  ;;  %v2178_v7 = vunpack.i.l.bf16 %v2177_v58  ;;  %v2174_v8 = vunpack.i.h.bf16 %v2172_v61  ;;  %v2173_v10 = vunpack.i.l.bf16 %v2172_v61 }
  0xab   :  { %269 = vst.msk [vmem:[#allocation0 + $0x4] ss:$48 sm:$0xc0] %vm63_vm1, %v2133_v44  }
  0xac   :  { %251 = vst.msk [vmem:[#allocation0 + $0x1a1] ss:$48 sm:$0x3] %vm63_vm1, %v2129_v45  }
  0xad   :  { %253 = vst.msk [vmem:[#allocation0 + $0x1a1] ss:$48 sm:$0xc] %vm63_vm1, %v2129_v45  }
  0xae   :  { %255 = vst.msk [vmem:[#allocation0 + $0x1a1] ss:$48 sm:$0x30] %vm63_vm1, %v2129_v45  }
  0xaf   :  { %257 = vst.msk [vmem:[#allocation0 + $0x1a1] ss:$48 sm:$0xc0] %vm63_vm1, %v2129_v45  }
  0xb0   :  { %238 = vst.msk [vmem:[#allocation0 + $0x21] ss:$48 sm:$0x3] %vm63_vm1, %v2128_v46  }
  0xb1   :  { %240 = vst.msk [vmem:[#allocation0 + $0x21] ss:$48 sm:$0xc] %vm63_vm1, %v2128_v46   ;;  %v2192_v3 = vpop.permute.xlu1 %2191  ;;  %v2187_v6 = vpop.permute.xlu0 %2186 }
  0xb2   :  { %242 = vst.msk [vmem:[#allocation0 + $0x21] ss:$48 sm:$0x30] %vm63_vm1, %v2128_v46   ;;  %v2194_v14 = vunpack.i.h.bf16 %v2192_v3  ;;  %v2193_v16 = vunpack.i.l.bf16 %v2192_v3  ;;  %v2189_v17 = vunpack.i.h.bf16 %v2187_v6  ;;  %v2188_v18 = vunpack.i.l.bf16 %v2187_v6 }
  0xb3   :  { %244 = vst.msk [vmem:[#allocation0 + $0x21] ss:$48 sm:$0xc0] %vm63_vm1, %v2128_v46  }
  0xb4   :  { %353 = vst.msk [vmem:[#allocation0 + $0x1a3] ss:$48 sm:$0x3] %vm63_vm1, %v2149_v51  }
  0xb5   :  { %355 = vst.msk [vmem:[#allocation0 + $0x1a3] ss:$48 sm:$0xc] %vm63_vm1, %v2149_v51  }
  0xb6   :  { %357 = vst.msk [vmem:[#allocation0 + $0x1a3] ss:$48 sm:$0x30] %vm63_vm1, %v2149_v51  }
  0xb7   :  { %359 = vst.msk [vmem:[#allocation0 + $0x1a3] ss:$48 sm:$0xc0] %vm63_vm1, %v2149_v51  }
  0xb8   :  { %340 = vst.msk [vmem:[#allocation0 + $0x23] ss:$48 sm:$0x3] %vm63_vm1, %v2148_v53  }
  0xb9   :  { %342 = vst.msk [vmem:[#allocation0 + $0x23] ss:$48 sm:$0xc] %vm63_vm1, %v2148_v53   ;;  %v2207_v12 = vpop.permute.xlu1 %2206  ;;  %v2202_v15 = vpop.permute.xlu0 %2201 }
  0xba   :  { %344 = vst.msk [vmem:[#allocation0 + $0x23] ss:$48 sm:$0x30] %vm63_vm1, %v2148_v53   ;;  %v2209_v23 = vunpack.i.h.bf16 %v2207_v12  ;;  %v2208_v24 = vunpack.i.l.bf16 %v2207_v12  ;;  %v2204_v25 = vunpack.i.h.bf16 %v2202_v15  ;;  %v2203_v26 = vunpack.i.l.bf16 %v2202_v15 }
  0xbb   :  { %346 = vst.msk [vmem:[#allocation0 + $0x23] ss:$48 sm:$0xc0] %vm63_vm1, %v2148_v53  }
  0xbc   :  { %327 = vst.msk [vmem:[#allocation0 + $0x185] ss:$48 sm:$0x3] %vm63_vm1, %v2144_v54  }
  0xbd   :  { %329 = vst.msk [vmem:[#allocation0 + $0x185] ss:$48 sm:$0xc] %vm63_vm1, %v2144_v54  }
  0xbe   :  { %331 = vst.msk [vmem:[#allocation0 + $0x185] ss:$48 sm:$0x30] %vm63_vm1, %v2144_v54  }
  0xbf   :  { %333 = vst.msk [vmem:[#allocation0 + $0x185] ss:$48 sm:$0xc0] %vm63_vm1, %v2144_v54  }
  0xc0   :  { %314 = vst.msk [vmem:[#allocation0 + $0x5] ss:$48 sm:$0x3] %vm63_vm1, %v2143_v55  }
  0xc1   :  { %316 = vst.msk [vmem:[#allocation0 + $0x5] ss:$48 sm:$0xc] %vm63_vm1, %v2143_v55   ;;  %v2222_v21 = vpop.permute.xlu1 %2221  ;;  %v2546_v27 = vpop.permute.xlu0 %2216 }
  0xc2   :  { %318 = vst.msk [vmem:[#allocation0 + $0x5] ss:$48 sm:$0x30] %vm63_vm1, %v2143_v55   ;;  %v2224_v42 = vunpack.i.h.bf16 %v2222_v21  ;;  %v2223_v43 = vunpack.i.l.bf16 %v2222_v21 }
  0xc3   :  { %320 = vst.msk [vmem:[#allocation0 + $0x5] ss:$48 sm:$0xc0] %vm63_vm1, %v2143_v55  }
  0xc4   :  { %457 = vst.msk [vmem:[#allocation0 + $0x1a5] ss:$48 sm:$0xc] %vm63_vm1, %v2169_v56  }
  0xc5   :  { %459 = vst.msk [vmem:[#allocation0 + $0x1a5] ss:$48 sm:$0x30] %vm63_vm1, %v2169_v56   ;;  %v1499_v29 = vld [vmem:[#allocation0 + $0x240] sm:$0xff]  ;;  %v1541_v30 = vld [vmem:[#allocation0 + $0x270] sm:$0xff] }
  0xc6   :  { %461 = vst.msk [vmem:[#allocation0 + $0x1a5] ss:$48 sm:$0xc0] %vm63_vm1, %v2169_v56   ;;  %v1625_v15 = vld [vmem:[#allocation0 + $0x2d0] sm:$0xff] }
  0xc7   :  { %442 = vst.msk [vmem:[#allocation0 + $0x25] ss:$48 sm:$0x3] %vm63_vm1, %v2168_v59   ;;  %v996_v48 = vld [vmem:[#allocation0] sm:$0xff]  ;;  %v1037_v50 = vld [vmem:[#allocation0 + $0x30] sm:$0xff] }
  0xc8   :  { %444 = vst.msk [vmem:[#allocation0 + $0x25] ss:$48 sm:$0xc] %vm63_vm1, %v2168_v59   ;;  %v1079_v53 = vld [vmem:[#allocation0 + $0x60] sm:$0xff]  ;;  %v1121_v56 = vld [vmem:[#allocation0 + $0x90] sm:$0xff] }
  0xc9   :  { %446 = vst.msk [vmem:[#allocation0 + $0x25] ss:$48 sm:$0x30] %vm63_vm1, %v2168_v59   ;;  %v2574_v44 = vpop.permute.xlu1 %2236  ;;  %v2576_v45 = vpop.permute.xlu0 %2231 }
  0xca   :  { %448 = vst.msk [vmem:[#allocation0 + $0x25] ss:$48 sm:$0xc0] %vm63_vm1, %v2168_v59   ;;  %v1247_v36 = vld [vmem:[#allocation0 + $0x120] sm:$0xff]  ;;  %v1289_v37 = vld [vmem:[#allocation0 + $0x150] sm:$0xff]  ;;  %v2239_v20 = vunpack.i.h.bf16 %v2574_v44  ;;  %v2238_v21 = vunpack.i.l.bf16 %v2574_v44 }
  0xcb   :  { %429 = vst.msk [vmem:[#allocation0 + $0x189] ss:$48 sm:$0x3] %vm63_vm1, %v2164_v60   ;;  %v1163_v59 = vld [vmem:[#allocation0 + $0xc0] sm:$0xff] }
  0xcc   :  { %431 = vst.msk [vmem:[#allocation0 + $0x189] ss:$48 sm:$0xc] %vm63_vm1, %v2164_v60  }
  0xcd   :  { %433 = vst.msk [vmem:[#allocation0 + $0x189] ss:$48 sm:$0x30] %vm63_vm1, %v2164_v60  }
  0xce   :  { %435 = vst.msk [vmem:[#allocation0 + $0x189] ss:$48 sm:$0xc0] %vm63_vm1, %v2164_v60  }
  0xcf   :  { %416 = vst.msk [vmem:[#allocation0 + $0x9] ss:$48 sm:$0x3] %vm63_vm1, %v2163_v62  }
  0xd0   :  { %418 = vst.msk [vmem:[#allocation0 + $0x9] ss:$48 sm:$0xc] %vm63_vm1, %v2163_v62  }
  0xd1   :  { %420 = vst.msk [vmem:[#allocation0 + $0x9] ss:$48 sm:$0x30] %vm63_vm1, %v2163_v62  }
  0xd2   :  { %422 = vst.msk [vmem:[#allocation0 + $0x9] ss:$48 sm:$0xc0] %vm63_vm1, %v2163_v62   ;;  %v1205_v62 = vld [vmem:[#allocation0 + $0xf0] sm:$0xff] }
  0xd3   :  { %404 = vst.msk [vmem:[#allocation0 + $0x1a4] ss:$48 sm:$0x3] %vm63_vm1, %v2159_v63  }
  0xd4   :  { %406 = vst.msk [vmem:[#allocation0 + $0x1a4] ss:$48 sm:$0xc] %vm63_vm1, %v2159_v63  }
  0xd5   :  { %408 = vst.msk [vmem:[#allocation0 + $0x1a4] ss:$48 sm:$0x30] %vm63_vm1, %v2159_v63  }
  0xd6   :  { %410 = vst.msk [vmem:[#allocation0 + $0x1a4] ss:$48 sm:$0xc0] %vm63_vm1, %v2159_v63  }
  0xd7   :  { %391 = vst.msk [vmem:[#allocation0 + $0x24] ss:$48 sm:$0x3] %vm63_vm1, %v2158_v1  }
  0xd8   :  { %393 = vst.msk [vmem:[#allocation0 + $0x24] ss:$48 sm:$0xc] %vm63_vm1, %v2158_v1  }
  0xd9   :  { %395 = vst.msk [vmem:[#allocation0 + $0x24] ss:$48 sm:$0x30] %vm63_vm1, %v2158_v1  }
  0xda   :  { %397 = vst.msk [vmem:[#allocation0 + $0x24] ss:$48 sm:$0xc0] %vm63_vm1, %v2158_v1   ;;  %v1331_v1 = vld [vmem:[#allocation0 + $0x180] sm:$0xff] }
  0xdb   :  { %531 = vst.msk [vmem:[#allocation0 + $0x18b] ss:$48 sm:$0x3] %vm63_vm1, %v2184_v2  }
  0xdc   :  { %533 = vst.msk [vmem:[#allocation0 + $0x18b] ss:$48 sm:$0xc] %vm63_vm1, %v2184_v2  }
  0xdd   :  { %535 = vst.msk [vmem:[#allocation0 + $0x18b] ss:$48 sm:$0x30] %vm63_vm1, %v2184_v2  }
  0xde   :  { %537 = vst.msk [vmem:[#allocation0 + $0x18b] ss:$48 sm:$0xc0] %vm63_vm1, %v2184_v2  }
  0xdf   :  { %518 = vst.msk [vmem:[#allocation0 + $0xb] ss:$48 sm:$0x3] %vm63_vm1, %v2183_v4  }
  0xe0   :  { %520 = vst.msk [vmem:[#allocation0 + $0xb] ss:$48 sm:$0xc] %vm63_vm1, %v2183_v4  }
  0xe1   :  { %522 = vst.msk [vmem:[#allocation0 + $0xb] ss:$48 sm:$0x30] %vm63_vm1, %v2183_v4  }
  0xe2   :  { %524 = vst.msk [vmem:[#allocation0 + $0xb] ss:$48 sm:$0xc0] %vm63_vm1, %v2183_v4   ;;  %v1373_v4 = vld [vmem:[#allocation0 + $0x1b0] sm:$0xff] }
  0xe3   :  { %506 = vst.msk [vmem:[#allocation0 + $0x1a8] ss:$48 sm:$0x3] %vm63_vm1, %v2179_v5  }
  0xe4   :  { %508 = vst.msk [vmem:[#allocation0 + $0x1a8] ss:$48 sm:$0xc] %vm63_vm1, %v2179_v5  }
  0xe5   :  { %510 = vst.msk [vmem:[#allocation0 + $0x1a8] ss:$48 sm:$0x30] %vm63_vm1, %v2179_v5  }
  0xe6   :  { %512 = vst.msk [vmem:[#allocation0 + $0x1a8] ss:$48 sm:$0xc0] %vm63_vm1, %v2179_v5  }
  0xe7   :  { %493 = vst.msk [vmem:[#allocation0 + $0x28] ss:$48 sm:$0x3] %vm63_vm1, %v2178_v7  }
  0xe8   :  { %495 = vst.msk [vmem:[#allocation0 + $0x28] ss:$48 sm:$0xc] %vm63_vm1, %v2178_v7  }
  0xe9   :  { %497 = vst.msk [vmem:[#allocation0 + $0x28] ss:$48 sm:$0x30] %vm63_vm1, %v2178_v7  }
  0xea   :  { %499 = vst.msk [vmem:[#allocation0 + $0x28] ss:$48 sm:$0xc0] %vm63_vm1, %v2178_v7   ;;  %v1415_v7 = vld [vmem:[#allocation0 + $0x1e0] sm:$0xff] }
  0xeb   :  { %480 = vst.msk [vmem:[#allocation0 + $0x18a] ss:$48 sm:$0x3] %vm63_vm1, %v2174_v8  }
  0xec   :  { %482 = vst.msk [vmem:[#allocation0 + $0x18a] ss:$48 sm:$0xc] %vm63_vm1, %v2174_v8  }
  0xed   :  { %484 = vst.msk [vmem:[#allocation0 + $0x18a] ss:$48 sm:$0x30] %vm63_vm1, %v2174_v8  }
  0xee   :  { %486 = vst.msk [vmem:[#allocation0 + $0x18a] ss:$48 sm:$0xc0] %vm63_vm1, %v2174_v8  }
  0xef   :  { %467 = vst.msk [vmem:[#allocation0 + $0xa] ss:$48 sm:$0x3] %vm63_vm1, %v2173_v10  }
  0xf0   :  { %469 = vst.msk [vmem:[#allocation0 + $0xa] ss:$48 sm:$0xc] %vm63_vm1, %v2173_v10  }
  0xf1   :  { %471 = vst.msk [vmem:[#allocation0 + $0xa] ss:$48 sm:$0x30] %vm63_vm1, %v2173_v10  }
  0xf2   :  { %473 = vst.msk [vmem:[#allocation0 + $0xa] ss:$48 sm:$0xc0] %vm63_vm1, %v2173_v10   ;;  %v1457_v10 = vld [vmem:[#allocation0 + $0x210] sm:$0xff] }
  0xf3   :  { %608 = vst.msk [vmem:[#allocation0 + $0x1aa] ss:$48 sm:$0x3] %vm63_vm1, %v2199_v11  }
  0xf4   :  { %610 = vst.msk [vmem:[#allocation0 + $0x1aa] ss:$48 sm:$0xc] %vm63_vm1, %v2199_v11  }
  0xf5   :  { %612 = vst.msk [vmem:[#allocation0 + $0x1aa] ss:$48 sm:$0x30] %vm63_vm1, %v2199_v11  }
  0xf6   :  { %614 = vst.msk [vmem:[#allocation0 + $0x1aa] ss:$48 sm:$0xc0] %vm63_vm1, %v2199_v11  }
  0xf7   :  { %595 = vst.msk [vmem:[#allocation0 + $0x2a] ss:$48 sm:$0x3] %vm63_vm1, %v2198_v13  }
  0xf8   :  { %597 = vst.msk [vmem:[#allocation0 + $0x2a] ss:$48 sm:$0xc] %vm63_vm1, %v2198_v13  }
  0xf9   :  { %599 = vst.msk [vmem:[#allocation0 + $0x2a] ss:$48 sm:$0x30] %vm63_vm1, %v2198_v13  }
  0xfa   :  { %601 = vst.msk [vmem:[#allocation0 + $0x2a] ss:$48 sm:$0xc0] %vm63_vm1, %v2198_v13   ;;  %v1583_v13 = vld [vmem:[#allocation0 + $0x2a0] sm:$0xff] }
  0xfb   :  { %582 = vst.msk [vmem:[#allocation0 + $0x18c] ss:$48 sm:$0x3] %vm63_vm1, %v2194_v14  }
  0xfc   :  { %584 = vst.msk [vmem:[#allocation0 + $0x18c] ss:$48 sm:$0xc] %vm63_vm1, %v2194_v14  }
  0xfd   :  { %586 = vst.msk [vmem:[#allocation0 + $0x18c] ss:$48 sm:$0x30] %vm63_vm1, %v2194_v14  }
  0xfe   :  { %588 = vst.msk [vmem:[#allocation0 + $0x18c] ss:$48 sm:$0xc0] %vm63_vm1, %v2194_v14  }
  0xff   :  { %569 = vst.msk [vmem:[#allocation0 + $0xc] ss:$48 sm:$0x3] %vm63_vm1, %v2193_v16  }
 0x100   :  { %571 = vst.msk [vmem:[#allocation0 + $0xc] ss:$48 sm:$0xc] %vm63_vm1, %v2193_v16  }
 0x101   :  { %573 = vst.msk [vmem:[#allocation0 + $0xc] ss:$48 sm:$0x30] %vm63_vm1, %v2193_v16  }
 0x102   :  { %575 = vst.msk [vmem:[#allocation0 + $0xc] ss:$48 sm:$0xc0] %vm63_vm1, %v2193_v16  }
 0x103   :  { %557 = vst.msk [vmem:[#allocation0 + $0x1a9] ss:$48 sm:$0x3] %vm63_vm1, %v2189_v17  }
 0x104   :  { %559 = vst.msk [vmem:[#allocation0 + $0x1a9] ss:$48 sm:$0xc] %vm63_vm1, %v2189_v17  }
 0x105   :  { %561 = vst.msk [vmem:[#allocation0 + $0x1a9] ss:$48 sm:$0x30] %vm63_vm1, %v2189_v17  }
 0x106   :  { %563 = vst.msk [vmem:[#allocation0 + $0x1a9] ss:$48 sm:$0xc0] %vm63_vm1, %v2189_v17  }
 0x107   :  { %544 = vst.msk [vmem:[#allocation0 + $0x29] ss:$48 sm:$0x3] %vm63_vm1, %v2188_v18  }
 0x108   :  { %546 = vst.msk [vmem:[#allocation0 + $0x29] ss:$48 sm:$0xc] %vm63_vm1, %v2188_v18  }
 0x109   :  { %548 = vst.msk [vmem:[#allocation0 + $0x29] ss:$48 sm:$0x30] %vm63_vm1, %v2188_v18  }
 0x10a   :  { %550 = vst.msk [vmem:[#allocation0 + $0x29] ss:$48 sm:$0xc0] %vm63_vm1, %v2188_v18   ;;  %v2219_v18 = vunpack.i.h.bf16 %v2546_v27 }
 0x10b   :  { %684 = vst.msk [vmem:[#allocation0 + $0x1c0] ss:$-48 sm:$0x3] %vm63_vm1, %v2214_v19  }
 0x10c   :  { %686 = vst.msk [vmem:[#allocation0 + $0x280] ss:$-48 sm:$0xc] %vm63_vm1, %v2214_v19  }
 0x10d   :  { %688 = vst.msk [vmem:[#allocation0 + $0x340] ss:$-48 sm:$0x30] %vm63_vm1, %v2214_v19  }
 0x10e   :  { %690 = vst.msk [vmem:[#allocation0 + $0x400] ss:$-48 sm:$0xc0] %vm63_vm1, %v2214_v19   ;;  %v2218_v19 = vunpack.i.l.bf16 %v2546_v27 }
 0x10f   :  { %671 = vst.msk [vmem:[#allocation0 + $0x40] ss:$-48 sm:$0x3] %vm63_vm1, %v2213_v22  }
 0x110   :  { %673 = vst.msk [vmem:[#allocation0 + $0x100] ss:$-48 sm:$0xc] %vm63_vm1, %v2213_v22  }
 0x111   :  { %675 = vst.msk [vmem:[#allocation0 + $0x1c0] ss:$-48 sm:$0x30] %vm63_vm1, %v2213_v22  }
 0x112   :  { %677 = vst.msk [vmem:[#allocation0 + $0x280] ss:$-48 sm:$0xc0] %vm63_vm1, %v2213_v22   ;;  %v2234_v22 = vunpack.i.h.bf16 %v2576_v45 }
 0x113   :  { %659 = vst.msk [vmem:[#allocation0 + $0x1ab] ss:$48 sm:$0x3] %vm63_vm1, %v2209_v23  }
 0x114   :  { %661 = vst.msk [vmem:[#allocation0 + $0x1ab] ss:$48 sm:$0xc] %vm63_vm1, %v2209_v23  }
 0x115   :  { %663 = vst.msk [vmem:[#allocation0 + $0x1ab] ss:$48 sm:$0x30] %vm63_vm1, %v2209_v23  }
 0x116   :  { %665 = vst.msk [vmem:[#allocation0 + $0x1ab] ss:$48 sm:$0xc0] %vm63_vm1, %v2209_v23   ;;  %v2642_v23 = vpop.permute.xlu2 %2241 }
 0x117   :  { %646 = vst.msk [vmem:[#allocation0 + $0x2b] ss:$48 sm:$0x3] %vm63_vm1, %v2208_v24  }
 0x118   :  { %648 = vst.msk [vmem:[#allocation0 + $0x2b] ss:$48 sm:$0xc] %vm63_vm1, %v2208_v24  }
 0x119   :  { %650 = vst.msk [vmem:[#allocation0 + $0x2b] ss:$48 sm:$0x30] %vm63_vm1, %v2208_v24  }
 0x11a   :  { %652 = vst.msk [vmem:[#allocation0 + $0x2b] ss:$48 sm:$0xc0] %vm63_vm1, %v2208_v24   ;;  %v2233_v24 = vunpack.i.l.bf16 %v2576_v45 }
 0x11b   :  { %633 = vst.msk [vmem:[#allocation0 + $0x18d] ss:$48 sm:$0x3] %vm63_vm1, %v2204_v25  }
 0x11c   :  { %635 = vst.msk [vmem:[#allocation0 + $0x18d] ss:$48 sm:$0xc] %vm63_vm1, %v2204_v25  }
 0x11d   :  { %637 = vst.msk [vmem:[#allocation0 + $0x18d] ss:$48 sm:$0x30] %vm63_vm1, %v2204_v25  }
 0x11e   :  { %639 = vst.msk [vmem:[#allocation0 + $0x18d] ss:$48 sm:$0xc0] %vm63_vm1, %v2204_v25   ;;  %v2650_v25 = vpop.permute.xlu1 %2251 }
 0x11f   :  { %620 = vst.msk [vmem:[#allocation0 + $0xd] ss:$48 sm:$0x3] %vm63_vm1, %v2203_v26  }
 0x120   :  { %622 = vst.msk [vmem:[#allocation0 + $0xd] ss:$48 sm:$0xc] %vm63_vm1, %v2203_v26  }
 0x121   :  { %624 = vst.msk [vmem:[#allocation0 + $0xd] ss:$48 sm:$0x30] %vm63_vm1, %v2203_v26  }
 0x122   :  { %626 = vst.msk [vmem:[#allocation0 + $0xd] ss:$48 sm:$0xc0] %vm63_vm1, %v2203_v26   ;;  %v1338_v60 = vld [vmem:[#allocation0 + $0x188] sm:$0xff]  ;;  %v1380_v63 = vld [vmem:[#allocation0 + $0x1b8] sm:$0xff] }
 0x123   :  { %761 = vst.msk [vmem:[#allocation0 + $0x1ad] ss:$48 sm:$0x3] %vm63_vm1, %v2229_v28   ;;  %v1422_v2 = vld [vmem:[#allocation0 + $0x1e8] sm:$0xff]  ;;  %v1464_v5 = vld [vmem:[#allocation0 + $0x218] sm:$0xff]  ;;  %v1895_v6 = vpack.c.bf16 %v1338_v60, %v1331_v1  ;;  %v1910_v9 = vpack.c.bf16 %v1380_v63, %v1373_v4 }
 0x124   :  { %v1506_v31 = vld [vmem:[#allocation0 + $0x248] sm:$0xff]  ;;  %v1548_v32 = vld [vmem:[#allocation0 + $0x278] sm:$0xff]  ;;  %763 = vst.msk [vmem:[#allocation0 + $0x1ad] ss:$48 sm:$0xc] %vm63_vm1, %v2229_v28   ;;  %v1925_v12 = vpack.c.bf16 %v1422_v2, %v1415_v7  ;;  %v1940_v14 = vpack.c.bf16 %v1464_v5, %v1457_v10 }
 0x125   :  { %v1955_v33 = vpack.c.bf16 %v1506_v31, %v1499_v29  ;;  %v1970_v34 = vpack.c.bf16 %v1548_v32, %v1541_v30  ;;  %765 = vst.msk [vmem:[#allocation0 + $0x1ad] ss:$48 sm:$0x30] %vm63_vm1, %v2229_v28   ;;  %v1590_v8 = vld [vmem:[#allocation0 + $0x2a8] sm:$0xff]  ;;  %v1632_v11 = vld [vmem:[#allocation0 + $0x2d8] sm:$0xff]  ;;  %v1065_v30 = vld [vmem:[#allocation0 + $0x50] sm:$0xff] }
 0x126   :  { %767 = vst.msk [vmem:[#allocation0 + $0x1ad] ss:$48 sm:$0xc0] %vm63_vm1, %v2229_v28   ;;  %v1002_v46 = vld [vmem:[#allocation0 + $0x8] sm:$0xff]  ;;  %v1044_v47 = vld [vmem:[#allocation0 + $0x38] sm:$0xff]  ;;  %v1985_v16 = vpack.c.bf16 %v1590_v8, %v1583_v13  ;;  %v2000_v17 = vpack.c.bf16 %v1632_v11, %v1625_v15  ;;  %v1023_v28 = vld [vmem:[#allocation0 + $0x20] sm:$0xff]  ;;  %v2244_v11 = vunpack.i.h.bf16 %v2642_v23  ;;  %v2267_v13 = vpop.permute.xlu1 %2266  ;;  %v2254_v15 = vunpack.i.h.bf16 %v2650_v25 }
 0x127   :  { %2048 = vst [vmem:[%s2816_s1 + $0x120] sm:$0xff] %v1955_v33   ;;  %v1086_v49 = vld [vmem:[#allocation0 + $0x68] sm:$0xff]  ;;  %v1128_v51 = vld [vmem:[#allocation0 + $0x98] sm:$0xff]  ;;  %v1775_v52 = vpack.c.bf16 %v1002_v46, %v996_v48  ;;  %v1790_v55 = vpack.c.bf16 %v1044_v47, %v1037_v50  ;;  %v2660_v33 = vpop.permute.xlu0 %2246  ;;  %v1275_v46 = vld [vmem:[#allocation0 + $0x140] sm:$0xff] }
 0x128   :  { %2051 = vst [vmem:[%s2816_s1 + $0x138] sm:$0xff] %v1970_v34   ;;  %v1170_v54 = vld [vmem:[#allocation0 + $0xc8] sm:$0xff]  ;;  %v1212_v57 = vld [vmem:[#allocation0 + $0xf8] sm:$0xff]  ;;  %v1805_v58 = vpack.c.bf16 %v1086_v49, %v1079_v53  ;;  %v1820_v61 = vpack.c.bf16 %v1128_v51, %v1121_v56  ;;  %v1107_v34 = vld [vmem:[#allocation0 + $0x80] sm:$0xff] }
 0x129   :  { %v1254_v38 = vld [vmem:[#allocation0 + $0x128] sm:$0xff]  ;;  %v1296_v39 = vld [vmem:[#allocation0 + $0x158] sm:$0xff]  ;;  %748 = vst.msk [vmem:[#allocation0 + $0x2d] ss:$48 sm:$0x3] %vm63_vm1, %v2228_v35   ;;  %v1835_v0 = vpack.c.bf16 %v1170_v54, %v1163_v59  ;;  %v1850_v3 = vpack.c.bf16 %v1212_v57, %v1205_v62  ;;  %v1317_v49 = vld [vmem:[#allocation0 + $0x170] sm:$0xff] }
 0x12a   :  { %v1880_v40 = vpack.c.bf16 %v1296_v39, %v1289_v37  ;;  %v1865_v41 = vpack.c.bf16 %v1254_v38, %v1247_v36  ;;  %750 = vst.msk [vmem:[#allocation0 + $0x2d] ss:$48 sm:$0xc] %vm63_vm1, %v2228_v35   ;;  %v1149_v37 = vld [vmem:[#allocation0 + $0xb0] sm:$0xff] }
 0x12b   :  { %752 = vst.msk [vmem:[#allocation0 + $0x2d] ss:$48 sm:$0x30] %vm63_vm1, %v2228_v35   ;;  %v1653_v8 = vld [vmem:[#allocation0 + $0x2f0] sm:$0xff] }
 0x12c   :  { %2033 = vst [vmem:[%s2816_s1 + $0xa8] sm:$0xff] %v1880_v40   ;;  %v1191_v40 = vld [vmem:[#allocation0 + $0xe0] sm:$0xff] }
 0x12d   :  { %754 = vst.msk [vmem:[#allocation0 + $0x2d] ss:$48 sm:$0xc0] %vm63_vm1, %v2228_v35  }
 0x12e   :  { %2030 = vst [vmem:[%s2816_s1 + $0x90] sm:$0xff] %v1865_v41  }
 0x12f   :  { %735 = vst.msk [vmem:[#allocation0 + $0x1c1] ss:$-48 sm:$0x3] %vm63_vm1, %v2224_v42  }
 0x130   :  { %737 = vst.msk [vmem:[#allocation0 + $0x281] ss:$-48 sm:$0xc] %vm63_vm1, %v2224_v42  }
 0x131   :  { %739 = vst.msk [vmem:[#allocation0 + $0x341] ss:$-48 sm:$0x30] %vm63_vm1, %v2224_v42  }
 0x132   :  { %741 = vst.msk [vmem:[#allocation0 + $0x401] ss:$-48 sm:$0xc0] %vm63_vm1, %v2224_v42  }
 0x133   :  { %722 = vst.msk [vmem:[#allocation0 + $0x41] ss:$-48 sm:$0x3] %vm63_vm1, %v2223_v43  }
 0x134   :  { %724 = vst.msk [vmem:[#allocation0 + $0x101] ss:$-48 sm:$0xc] %vm63_vm1, %v2223_v43  }
 0x135   :  { %726 = vst.msk [vmem:[#allocation0 + $0x1c1] ss:$-48 sm:$0x30] %vm63_vm1, %v2223_v43  }
 0x136   :  { %728 = vst.msk [vmem:[#allocation0 + $0x281] ss:$-48 sm:$0xc0] %vm63_vm1, %v2223_v43   ;;  %v1233_v43 = vld [vmem:[#allocation0 + $0x110] sm:$0xff] }
 0x137   :  { %1776 = vst [vmem:[%s2816_s1] sm:$0xff] %v1775_v52   ;;  %v1359_v52 = vld [vmem:[#allocation0 + $0x1a0] sm:$0xff] }
 0x138   :  { %2015 = vst [vmem:[%s2816_s1 + $0x18] sm:$0xff] %v1790_v55   ;;  %v1401_v55 = vld [vmem:[#allocation0 + $0x1d0] sm:$0xff] }
 0x139   :  { %2018 = vst [vmem:[%s2816_s1 + $0x30] sm:$0xff] %v1805_v58   ;;  %v1443_v58 = vld [vmem:[#allocation0 + $0x200] sm:$0xff] }
 0x13a   :  { %2021 = vst [vmem:[%s2816_s1 + $0x48] sm:$0xff] %v1820_v61   ;;  %v1485_v61 = vld [vmem:[#allocation0 + $0x230] sm:$0xff] }
 0x13b   :  { %2024 = vst [vmem:[%s2816_s1 + $0x60] sm:$0xff] %v1835_v0   ;;  %v1527_v0 = vld [vmem:[#allocation0 + $0x260] sm:$0xff] }
 0x13c   :  { %2027 = vst [vmem:[%s2816_s1 + $0x78] sm:$0xff] %v1850_v3   ;;  %v1569_v3 = vld [vmem:[#allocation0 + $0x290] sm:$0xff] }
 0x13d   :  { %2036 = vst [vmem:[%s2816_s1 + $0xc0] sm:$0xff] %v1895_v6   ;;  %v1611_v6 = vld [vmem:[#allocation0 + $0x2c0] sm:$0xff] }
 0x13e   :  { %2039 = vst [vmem:[%s2816_s1 + $0xd8] sm:$0xff] %v1910_v9  }
 0x13f   :  { %2042 = vst [vmem:[%s2816_s1 + $0xf0] sm:$0xff] %v1925_v12   ;;  %v2257_v12 = vpop.permute.xlu2 %2256 }
 0x140   :  { %2045 = vst [vmem:[%s2816_s1 + $0x108] sm:$0xff] %v1940_v14   ;;  %v2243_v14 = vunpack.i.l.bf16 %v2642_v23  ;;  %v2268_v23 = vunpack.i.l.bf16 %v2267_v13 }
 0x141   :  { %2054 = vst [vmem:[%s2816_s1 + $0x150] sm:$0xff] %v1985_v16   ;;  %v2262_v16 = vpop.permute.xlu0 %2261 }
 0x142   :  { %2057 = vst [vmem:[%s2816_s1 + $0x168] sm:$0xff] %v2000_v17   ;;  %v2253_v17 = vunpack.i.l.bf16 %v2650_v25  ;;  %v2263_v25 = vunpack.i.l.bf16 %v2262_v16 }
 0x143   :  { %710 = vst.msk [vmem:[#allocation0 + $0x1ac] ss:$48 sm:$0x3] %vm63_vm1, %v2219_v18  }
 0x144   :  { %712 = vst.msk [vmem:[#allocation0 + $0x1ac] ss:$48 sm:$0xc] %vm63_vm1, %v2219_v18  }
 0x145   :  { %714 = vst.msk [vmem:[#allocation0 + $0x1ac] ss:$48 sm:$0x30] %vm63_vm1, %v2219_v18  }
 0x146   :  { %716 = vst.msk [vmem:[#allocation0 + $0x1ac] ss:$48 sm:$0xc0] %vm63_vm1, %v2219_v18   ;;  %v2249_v18 = vunpack.i.h.bf16 %v2660_v33 }
 0x147   :  { %697 = vst.msk [vmem:[#allocation0 + $0x2c] ss:$48 sm:$0x3] %vm63_vm1, %v2218_v19  }
 0x148   :  { %699 = vst.msk [vmem:[#allocation0 + $0x2c] ss:$48 sm:$0xc] %vm63_vm1, %v2218_v19  }
 0x149   :  { %701 = vst.msk [vmem:[#allocation0 + $0x2c] ss:$48 sm:$0x30] %vm63_vm1, %v2218_v19  }
 0x14a   :  { %703 = vst.msk [vmem:[#allocation0 + $0x2c] ss:$48 sm:$0xc0] %vm63_vm1, %v2218_v19   ;;  %v1366_v47 = vld [vmem:[#allocation0 + $0x1a8] sm:$0xff]  ;;  %v1408_v50 = vld [vmem:[#allocation0 + $0x1d8] sm:$0xff]  ;;  %v2248_v19 = vunpack.i.l.bf16 %v2660_v33 }
 0x14b   :  { %786 = vst.msk [vmem:[#allocation0 + $0x1c2] ss:$-48 sm:$0x3] %vm63_vm1, %v2239_v20   ;;  %v1450_v53 = vld [vmem:[#allocation0 + $0x208] sm:$0xff]  ;;  %v1492_v56 = vld [vmem:[#allocation0 + $0x238] sm:$0xff]  ;;  %v1905_v57 = vpack.c.bf16 %v1366_v47, %v1359_v52  ;;  %v1920_v60 = vpack.c.bf16 %v1408_v50, %v1401_v55 }
 0x14c   :  { %788 = vst.msk [vmem:[#allocation0 + $0x282] ss:$-48 sm:$0xc] %vm63_vm1, %v2239_v20   ;;  %v1534_v59 = vld [vmem:[#allocation0 + $0x268] sm:$0xff]  ;;  %v1576_v62 = vld [vmem:[#allocation0 + $0x298] sm:$0xff]  ;;  %v1935_v63 = vpack.c.bf16 %v1450_v53, %v1443_v58  ;;  %v1950_v2 = vpack.c.bf16 %v1492_v56, %v1485_v61 }
 0x14d   :  { %790 = vst.msk [vmem:[#allocation0 + $0x342] ss:$-48 sm:$0x30] %vm63_vm1, %v2239_v20   ;;  %v1618_v1 = vld [vmem:[#allocation0 + $0x2c8] sm:$0xff]  ;;  %v1660_v4 = vld [vmem:[#allocation0 + $0x2f8] sm:$0xff]  ;;  %v1965_v5 = vpack.c.bf16 %v1534_v59, %v1527_v0  ;;  %v1980_v7 = vpack.c.bf16 %v1576_v62, %v1569_v3 }
 0x14e   :  { %792 = vst.msk [vmem:[#allocation0 + $0x402] ss:$-48 sm:$0xc0] %vm63_vm1, %v2239_v20   ;;  %v1030_v26 = vld [vmem:[#allocation0 + $0x28] sm:$0xff]  ;;  %v1072_v27 = vld [vmem:[#allocation0 + $0x58] sm:$0xff]  ;;  %v1995_v9 = vpack.c.bf16 %v1618_v1, %v1611_v6  ;;  %v2010_v10 = vpack.c.bf16 %v1660_v4, %v1653_v8  ;;  %v2259_v20 = vunpack.i.h.bf16 %v2257_v12 }
 0x14f   :  { %773 = vst.msk [vmem:[#allocation0 + $0x42] ss:$-48 sm:$0x3] %vm63_vm1, %v2238_v21   ;;  %v1114_v29 = vld [vmem:[#allocation0 + $0x88] sm:$0xff]  ;;  %v1156_v31 = vld [vmem:[#allocation0 + $0xb8] sm:$0xff]  ;;  %v1785_v32 = vpack.c.bf16 %v1030_v26, %v1023_v28  ;;  %v1800_v36 = vpack.c.bf16 %v1072_v27, %v1065_v30 }
 0x150   :  { %775 = vst.msk [vmem:[#allocation0 + $0x102] ss:$-48 sm:$0xc] %vm63_vm1, %v2238_v21   ;;  %v1198_v35 = vld [vmem:[#allocation0 + $0xe8] sm:$0xff]  ;;  %v1240_v38 = vld [vmem:[#allocation0 + $0x118] sm:$0xff]  ;;  %v1815_v39 = vpack.c.bf16 %v1114_v29, %v1107_v34  ;;  %v1830_v42 = vpack.c.bf16 %v1156_v31, %v1149_v37 }
 0x151   :  { %777 = vst.msk [vmem:[#allocation0 + $0x1c2] ss:$-48 sm:$0x30] %vm63_vm1, %v2238_v21   ;;  %v1282_v41 = vld [vmem:[#allocation0 + $0x148] sm:$0xff]  ;;  %v1324_v44 = vld [vmem:[#allocation0 + $0x178] sm:$0xff]  ;;  %v1845_v45 = vpack.c.bf16 %v1198_v35, %v1191_v40  ;;  %v1860_v48 = vpack.c.bf16 %v1240_v38, %v1233_v43 }
 0x152   :  { %779 = vst.msk [vmem:[#allocation0 + $0x282] ss:$-48 sm:$0xc0] %vm63_vm1, %v2238_v21   ;;  %v1875_v51 = vpack.c.bf16 %v1282_v41, %v1275_v46  ;;  %v1890_v54 = vpack.c.bf16 %v1324_v44, %v1317_v49  ;;  %v2258_v21 = vunpack.i.l.bf16 %v2257_v12 }
 0x153   :  { %978 = vst.msk [vmem:[#allocation0 + $0x1cb] ss:$-48 sm:$0x3] %vm950_vm2, %v2234_v22  }
 0x154   :  { %980 = vst.msk [vmem:[#allocation0 + $0x28b] ss:$-48 sm:$0xc] %vm950_vm2, %v2234_v22  }
 0x155   :  { %982 = vst.msk [vmem:[#allocation0 + $0x34b] ss:$-48 sm:$0x30] %vm950_vm2, %v2234_v22  }
 0x156   :  { %984 = vst.msk [vmem:[#allocation0 + $0x40b] ss:$-48 sm:$0xc0] %vm950_vm2, %v2234_v22  }
 0x157   :  { %987 = vst.msk [vmem:[#allocation0 + $0x1cb] ss:$-48 sm:$0x3] %vm959_vm3, %v2234_v22  }
 0x158   :  { %989 = vst.msk [vmem:[#allocation0 + $0x28b] ss:$-48 sm:$0xc] %vm959_vm3, %v2234_v22  }
 0x159   :  { %991 = vst.msk [vmem:[#allocation0 + $0x34b] ss:$-48 sm:$0x30] %vm959_vm3, %v2234_v22  }
 0x15a   :  { %993 = vst.msk [vmem:[#allocation0 + $0x40b] ss:$-48 sm:$0xc0] %vm959_vm3, %v2234_v22   ;;  %v2269_v22 = vunpack.i.h.bf16 %v2267_v13 }
 0x15b   :  { %952 = vst.msk [vmem:[#allocation0 + $0x4b] ss:$-48 sm:$0x3] %vm950_vm2, %v2233_v24  }
 0x15c   :  { %954 = vst.msk [vmem:[#allocation0 + $0x10b] ss:$-48 sm:$0xc] %vm950_vm2, %v2233_v24  }
 0x15d   :  { %956 = vst.msk [vmem:[#allocation0 + $0x1cb] ss:$-48 sm:$0x30] %vm950_vm2, %v2233_v24  }
 0x15e   :  { %958 = vst.msk [vmem:[#allocation0 + $0x28b] ss:$-48 sm:$0xc0] %vm950_vm2, %v2233_v24  }
 0x15f   :  { %961 = vst.msk [vmem:[#allocation0 + $0x4b] ss:$-48 sm:$0x3] %vm959_vm3, %v2233_v24  }
 0x160   :  { %963 = vst.msk [vmem:[#allocation0 + $0x10b] ss:$-48 sm:$0xc] %vm959_vm3, %v2233_v24  }
 0x161   :  { %965 = vst.msk [vmem:[#allocation0 + $0x1cb] ss:$-48 sm:$0x30] %vm959_vm3, %v2233_v24  }
 0x162   :  { %967 = vst.msk [vmem:[#allocation0 + $0x28b] ss:$-48 sm:$0xc0] %vm959_vm3, %v2233_v24   ;;  %v2264_v24 = vunpack.i.h.bf16 %v2262_v16 }
 0x163   :  { %2014 = vst [vmem:[%s2816_s1 + $0x10] sm:$0xff] %v1785_v32  }
 0x164   :  { %2017 = vst [vmem:[%s2816_s1 + $0x28] sm:$0xff] %v1800_v36  }
 0x165   :  { %2020 = vst [vmem:[%s2816_s1 + $0x40] sm:$0xff] %v1815_v39  }
 0x166   :  { %2023 = vst [vmem:[%s2816_s1 + $0x58] sm:$0xff] %v1830_v42  }
 0x167   :  { %2026 = vst [vmem:[%s2816_s1 + $0x70] sm:$0xff] %v1845_v45  }
 0x168   :  { %2029 = vst [vmem:[%s2816_s1 + $0x88] sm:$0xff] %v1860_v48  }
 0x169   :  { %2032 = vst [vmem:[%s2816_s1 + $0xa0] sm:$0xff] %v1875_v51  }
 0x16a   :  { %2035 = vst [vmem:[%s2816_s1 + $0xb8] sm:$0xff] %v1890_v54  }
 0x16b   :  { %2038 = vst [vmem:[%s2816_s1 + $0xd0] sm:$0xff] %v1905_v57  }
 0x16c   :  { %2041 = vst [vmem:[%s2816_s1 + $0xe8] sm:$0xff] %v1920_v60  }
 0x16d   :  { %2044 = vst [vmem:[%s2816_s1 + $0x100] sm:$0xff] %v1935_v63  }
 0x16e   :  { %2047 = vst [vmem:[%s2816_s1 + $0x118] sm:$0xff] %v1950_v2  }
 0x16f   :  { %2050 = vst [vmem:[%s2816_s1 + $0x130] sm:$0xff] %v1965_v5  }
 0x170   :  { %2053 = vst [vmem:[%s2816_s1 + $0x148] sm:$0xff] %v1980_v7  }
 0x171   :  { %2056 = vst [vmem:[%s2816_s1 + $0x160] sm:$0xff] %v1995_v9  }
 0x172   :  { %2059 = vst [vmem:[%s2816_s1 + $0x178] sm:$0xff] %v2010_v10  }
 0x173   :  { %811 = vst.msk [vmem:[#allocation0 + $0x1c3] ss:$-48 sm:$0x3] %vm63_vm1, %v2244_v11  }
 0x174   :  { %813 = vst.msk [vmem:[#allocation0 + $0x283] ss:$-48 sm:$0xc] %vm63_vm1, %v2244_v11  }
 0x175   :  { %815 = vst.msk [vmem:[#allocation0 + $0x343] ss:$-48 sm:$0x30] %vm63_vm1, %v2244_v11  }
 0x176   :  { %817 = vst.msk [vmem:[#allocation0 + $0x403] ss:$-48 sm:$0xc0] %vm63_vm1, %v2244_v11  }
 0x177   :  { %798 = vst.msk [vmem:[#allocation0 + $0x43] ss:$-48 sm:$0x3] %vm63_vm1, %v2243_v14  }
 0x178   :  { %800 = vst.msk [vmem:[#allocation0 + $0x103] ss:$-48 sm:$0xc] %vm63_vm1, %v2243_v14  }
 0x179   :  { %802 = vst.msk [vmem:[#allocation0 + $0x1c3] ss:$-48 sm:$0x30] %vm63_vm1, %v2243_v14  }
 0x17a   :  { %804 = vst.msk [vmem:[#allocation0 + $0x283] ss:$-48 sm:$0xc0] %vm63_vm1, %v2243_v14  }
 0x17b   :  { %861 = vst.msk [vmem:[#allocation0 + $0x1c5] ss:$-48 sm:$0x3] %vm63_vm1, %v2254_v15  }
 0x17c   :  { %863 = vst.msk [vmem:[#allocation0 + $0x285] ss:$-48 sm:$0xc] %vm63_vm1, %v2254_v15  }
 0x17d   :  { %865 = vst.msk [vmem:[#allocation0 + $0x345] ss:$-48 sm:$0x30] %vm63_vm1, %v2254_v15  }
 0x17e   :  { %867 = vst.msk [vmem:[#allocation0 + $0x405] ss:$-48 sm:$0xc0] %vm63_vm1, %v2254_v15  }
 0x17f   :  { %848 = vst.msk [vmem:[#allocation0 + $0x45] ss:$-48 sm:$0x3] %vm63_vm1, %v2253_v17  }
 0x180   :  { %850 = vst.msk [vmem:[#allocation0 + $0x105] ss:$-48 sm:$0xc] %vm63_vm1, %v2253_v17  }
 0x181   :  { %852 = vst.msk [vmem:[#allocation0 + $0x1c5] ss:$-48 sm:$0x30] %vm63_vm1, %v2253_v17  }
 0x182   :  { %854 = vst.msk [vmem:[#allocation0 + $0x285] ss:$-48 sm:$0xc0] %vm63_vm1, %v2253_v17  }
 0x183   :  { %836 = vst.msk [vmem:[#allocation0 + $0x1c4] ss:$-48 sm:$0x3] %vm63_vm1, %v2249_v18  }
 0x184   :  { %838 = vst.msk [vmem:[#allocation0 + $0x284] ss:$-48 sm:$0xc] %vm63_vm1, %v2249_v18  }
 0x185   :  { %840 = vst.msk [vmem:[#allocation0 + $0x344] ss:$-48 sm:$0x30] %vm63_vm1, %v2249_v18  }
 0x186   :  { %842 = vst.msk [vmem:[#allocation0 + $0x404] ss:$-48 sm:$0xc0] %vm63_vm1, %v2249_v18  }
 0x187   :  { %823 = vst.msk [vmem:[#allocation0 + $0x44] ss:$-48 sm:$0x3] %vm63_vm1, %v2248_v19  }
 0x188   :  { %825 = vst.msk [vmem:[#allocation0 + $0x104] ss:$-48 sm:$0xc] %vm63_vm1, %v2248_v19  }
 0x189   :  { %827 = vst.msk [vmem:[#allocation0 + $0x1c4] ss:$-48 sm:$0x30] %vm63_vm1, %v2248_v19  }
 0x18a   :  { %829 = vst.msk [vmem:[#allocation0 + $0x284] ss:$-48 sm:$0xc0] %vm63_vm1, %v2248_v19   ;;  %v1345_v26 = vld [vmem:[#allocation0 + $0x190] sm:$0xff]  ;;  %v1387_v27 = vld [vmem:[#allocation0 + $0x1c0] sm:$0xff] }
 0x18b   :  { %886 = vst.msk [vmem:[#allocation0 + $0x1c8] ss:$-48 sm:$0x3] %vm63_vm1, %v2259_v20   ;;  %v1429_v28 = vld [vmem:[#allocation0 + $0x1f0] sm:$0xff]  ;;  %v1471_v31 = vld [vmem:[#allocation0 + $0x220] sm:$0xff] }
 0x18c   :  { %888 = vst.msk [vmem:[#allocation0 + $0x288] ss:$-48 sm:$0xc] %vm63_vm1, %v2259_v20   ;;  %v1513_v63 = vld [vmem:[#allocation0 + $0x250] sm:$0xff]  ;;  %v1555_v2 = vld [vmem:[#allocation0 + $0x280] sm:$0xff] }
 0x18d   :  { %890 = vst.msk [vmem:[#allocation0 + $0x348] ss:$-48 sm:$0x30] %vm63_vm1, %v2259_v20   ;;  %v1597_v5 = vld [vmem:[#allocation0 + $0x2b0] sm:$0xff]  ;;  %v1639_v7 = vld [vmem:[#allocation0 + $0x2e0] sm:$0xff] }
 0x18e   :  { %892 = vst.msk [vmem:[#allocation0 + $0x408] ss:$-48 sm:$0xc0] %vm63_vm1, %v2259_v20   ;;  %v1009_v38 = vld [vmem:[#allocation0 + $0x10] sm:$0xff]  ;;  %v1051_v39 = vld [vmem:[#allocation0 + $0x40] sm:$0xff] }
 0x18f   :  { %873 = vst.msk [vmem:[#allocation0 + $0x48] ss:$-48 sm:$0x3] %vm63_vm1, %v2258_v21   ;;  %v1093_v40 = vld [vmem:[#allocation0 + $0x70] sm:$0xff]  ;;  %v1135_v43 = vld [vmem:[#allocation0 + $0xa0] sm:$0xff] }
 0x190   :  { %875 = vst.msk [vmem:[#allocation0 + $0x108] ss:$-48 sm:$0xc] %vm63_vm1, %v2258_v21   ;;  %v1177_v55 = vld [vmem:[#allocation0 + $0xd0] sm:$0xff]  ;;  %v1219_v60 = vld [vmem:[#allocation0 + $0x100] sm:$0xff] }
 0x191   :  { %877 = vst.msk [vmem:[#allocation0 + $0x1c8] ss:$-48 sm:$0x30] %vm63_vm1, %v2258_v21   ;;  %v1261_v48 = vld [vmem:[#allocation0 + $0x130] sm:$0xff]  ;;  %v1303_v49 = vld [vmem:[#allocation0 + $0x160] sm:$0xff] }
 0x192   :  { %879 = vst.msk [vmem:[#allocation0 + $0x288] ss:$-48 sm:$0xc0] %vm63_vm1, %v2258_v21  }
 0x193   :  { %936 = vst.msk [vmem:[#allocation0 + $0x1ca] ss:$-48 sm:$0x3] %vm63_vm1, %v2269_v22  }
 0x194   :  { %938 = vst.msk [vmem:[#allocation0 + $0x28a] ss:$-48 sm:$0xc] %vm63_vm1, %v2269_v22  }
 0x195   :  { %940 = vst.msk [vmem:[#allocation0 + $0x34a] ss:$-48 sm:$0x30] %vm63_vm1, %v2269_v22  }
 0x196   :  { %942 = vst.msk [vmem:[#allocation0 + $0x40a] ss:$-48 sm:$0xc0] %vm63_vm1, %v2269_v22  }
 0x197   :  { %923 = vst.msk [vmem:[#allocation0 + $0x4a] ss:$-48 sm:$0x3] %vm63_vm1, %v2268_v23  }
 0x198   :  { %925 = vst.msk [vmem:[#allocation0 + $0x10a] ss:$-48 sm:$0xc] %vm63_vm1, %v2268_v23  }
 0x199   :  { %927 = vst.msk [vmem:[#allocation0 + $0x1ca] ss:$-48 sm:$0x30] %vm63_vm1, %v2268_v23  }
 0x19a   :  { %929 = vst.msk [vmem:[#allocation0 + $0x28a] ss:$-48 sm:$0xc0] %vm63_vm1, %v2268_v23  }
 0x19b   :  { %911 = vst.msk [vmem:[#allocation0 + $0x1c9] ss:$-48 sm:$0x3] %vm63_vm1, %v2264_v24  }
 0x19c   :  { %913 = vst.msk [vmem:[#allocation0 + $0x289] ss:$-48 sm:$0xc] %vm63_vm1, %v2264_v24  }
 0x19d   :  { %915 = vst.msk [vmem:[#allocation0 + $0x349] ss:$-48 sm:$0x30] %vm63_vm1, %v2264_v24  }
 0x19e   :  { %917 = vst.msk [vmem:[#allocation0 + $0x409] ss:$-48 sm:$0xc0] %vm63_vm1, %v2264_v24  }
 0x19f   :  { %898 = vst.msk [vmem:[#allocation0 + $0x49] ss:$-48 sm:$0x3] %vm63_vm1, %v2263_v25  }
 0x1a0   :  { %900 = vst.msk [vmem:[#allocation0 + $0x109] ss:$-48 sm:$0xc] %vm63_vm1, %v2263_v25  }
 0x1a1   :  { %902 = vst.msk [vmem:[#allocation0 + $0x1c9] ss:$-48 sm:$0x30] %vm63_vm1, %v2263_v25  }
 0x1a2   :  { %904 = vst.msk [vmem:[#allocation0 + $0x289] ss:$-48 sm:$0xc0] %vm63_vm1, %v2263_v25   ;;  %v1352_v29 = vld [vmem:[#allocation0 + $0x198] sm:$0xff]  ;;  %v1394_v30 = vld [vmem:[#allocation0 + $0x1c8] sm:$0xff] }
 0x1a3   :  { %v1900_v32 = vpack.c.bf16 %v1352_v29, %v1345_v26  ;;  %v1915_v33 = vpack.c.bf16 %v1394_v30, %v1387_v27  ;;  %v1436_v34 = vld [vmem:[#allocation0 + $0x1f8] sm:$0xff]  ;;  %v1478_v35 = vld [vmem:[#allocation0 + $0x228] sm:$0xff] }
 0x1a4   :  { %v1930_v36 = vpack.c.bf16 %v1436_v34, %v1429_v28  ;;  %v1945_v37 = vpack.c.bf16 %v1478_v35, %v1471_v31  ;;  %v1520_v59 = vld [vmem:[#allocation0 + $0x258] sm:$0xff]  ;;  %v1562_v62 = vld [vmem:[#allocation0 + $0x288] sm:$0xff] }
 0x1a5   :  { %2037 = vst [vmem:[%s2816_s1 + $0xc8] sm:$0xff] %v1900_v32   ;;  %v1604_v1 = vld [vmem:[#allocation0 + $0x2b8] sm:$0xff]  ;;  %v1960_v3 = vpack.c.bf16 %v1520_v59, %v1513_v63  ;;  %v1646_v4 = vld [vmem:[#allocation0 + $0x2e8] sm:$0xff]  ;;  %v1975_v6 = vpack.c.bf16 %v1562_v62, %v1555_v2 }
 0x1a6   :  { %v1016_v41 = vld [vmem:[#allocation0 + $0x18] sm:$0xff]  ;;  %v1058_v42 = vld [vmem:[#allocation0 + $0x48] sm:$0xff]  ;;  %2040 = vst [vmem:[%s2816_s1 + $0xe0] sm:$0xff] %v1915_v33   ;;  %v1990_v8 = vpack.c.bf16 %v1604_v1, %v1597_v5  ;;  %v2005_v9 = vpack.c.bf16 %v1646_v4, %v1639_v7 }
 0x1a7   :  { %v1780_v44 = vpack.c.bf16 %v1016_v41, %v1009_v38  ;;  %v1795_v45 = vpack.c.bf16 %v1058_v42, %v1051_v39  ;;  %v1100_v46 = vld [vmem:[#allocation0 + $0x78] sm:$0xff]  ;;  %v1142_v47 = vld [vmem:[#allocation0 + $0xa8] sm:$0xff]  ;;  %2043 = vst [vmem:[%s2816_s1 + $0xf8] sm:$0xff] %v1930_v36  }
 0x1a8   :  { %v1810_v50 = vpack.c.bf16 %v1100_v46, %v1093_v40  ;;  %v1184_v51 = vld [vmem:[#allocation0 + $0xd8] sm:$0xff]  ;;  %2046 = vst [vmem:[%s2816_s1 + $0x110] sm:$0xff] %v1945_v37   ;;  %v1226_v54 = vld [vmem:[#allocation0 + $0x108] sm:$0xff]  ;;  %v1825_v58 = vpack.c.bf16 %v1142_v47, %v1135_v43 }
 0x1a9   :  { %v1268_v52 = vld [vmem:[#allocation0 + $0x138] sm:$0xff]  ;;  %v1310_v53 = vld [vmem:[#allocation0 + $0x168] sm:$0xff]  ;;  %2013 = vst [vmem:[%s2816_s1 + $0x8] sm:$0xff] %v1780_v44   ;;  %v1840_v61 = vpack.c.bf16 %v1184_v51, %v1177_v55  ;;  %v1855_v0 = vpack.c.bf16 %v1226_v54, %v1219_v60 }
 0x1aa   :  { %v1870_v56 = vpack.c.bf16 %v1268_v52, %v1261_v48  ;;  %v1885_v57 = vpack.c.bf16 %v1310_v53, %v1303_v49  ;;  %2016 = vst [vmem:[%s2816_s1 + $0x20] sm:$0xff] %v1795_v45  }
 0x1ab   :  { %2019 = vst [vmem:[%s2816_s1 + $0x38] sm:$0xff] %v1810_v50  }
 0x1ac   :  { %2031 = vst [vmem:[%s2816_s1 + $0x98] sm:$0xff] %v1870_v56  }
 0x1ad   :  { %2034 = vst [vmem:[%s2816_s1 + $0xb0] sm:$0xff] %v1885_v57  }
 0x1ae   :  { %2022 = vst [vmem:[%s2816_s1 + $0x50] sm:$0xff] %v1825_v58  }
 0x1af   :  { %2025 = vst [vmem:[%s2816_s1 + $0x68] sm:$0xff] %v1840_v61  }
 0x1b0   :  { %2028 = vst [vmem:[%s2816_s1 + $0x80] sm:$0xff] %v1855_v0  }
 0x1b1   :  { %2049 = vst [vmem:[%s2816_s1 + $0x128] sm:$0xff] %v1960_v3  }
 0x1b2   :  { %2052 = vst [vmem:[%s2816_s1 + $0x140] sm:$0xff] %v1975_v6  }
 0x1b3   :  { %2055 = vst [vmem:[%s2816_s1 + $0x158] sm:$0xff] %v1990_v8  }
 0x1b4   :  { %2058 = vst [vmem:[%s2816_s1 + $0x170] sm:$0xff] %v2005_v9  }

// kernel: hourglass_forward.8
= control target key start
LH: loop header
LB: loop body
LE: loop exit
PB: predicated region body
PF: predicated region fallthrough
CT: control target
= control target key end

     0   :  { %s1188_s12 = smov 0   ;;  %s1434_s0 = inlined_call_operand.vmem [shape: bf16[2,8,4,156], index: 0, kind: input, shape index: {}]   ;;  %s1435_s1 = inlined_call_operand.vmem [shape: bf16[27,8,4], index: 1, kind: input, shape index: {}]   ;;  %s1436_s2 = inlined_call_operand.vmem [shape: f32[8,1], index: 2, kind: input, shape index: {}]   ;;  %s1437_s3 = inlined_call_operand.vmem [shape: bf16[2,1,8,125], index: 3, kind: output, shape index: {}]  }
   0x1 LB: > { %s1048_s13 = sadd.s32 4294967295, %s1158_s12   ;;  %p1052_p0 = scmp.ge.s32.totalorder %s1158_s12, 1  ;;  %s1158_s12 = sphi %s1188_s12, %s13_s12  }
   0x2   : > { %p137_p1 = scmp.lt.s32.totalorder %s1158_s12, 3 }
   0x4   : > { %p138_p2 = pnand %p1052_p0, %p137_p1 }
   0x5   : > { %p160_p3 = scmp.lt.s32.totalorder (!%p138_p2), %s1048_s13, 1  ;;  %s1160_s18 = smov (!%p138_p2), 127  }
   0x6   : > { %141 = sbr.rel (%p138_p2) target bundleno = 434 (0x1b2), region = 32  ;;  %s1161_s19 = smov (!%p138_p2), 123  }
   0x7   : > { %s1162_s20 = smov (!%p138_p2), 103   ;;  %s1163_s21 = smov (!%p138_p2), 122  }
   0x8   : > { %s1164_s22 = smov (!%p138_p2), 102   ;;  %s1165_s23 = smov (!%p138_p2), 98  }
   0x9   : > { %s1166_s15 = smov (!%p138_p2), 97  }
   0xb   : > { %s1439_s13 = smov (!%p160_p3, %s1048_s13), 1  ;;  %vm181_vm0 = vcmask 1041408   ;;  %v1057_v41 = vld [vmem:[%s1435_s1 + $0x4] sm:$0xf]  ;;  %vm177_vm1 = vcmask 31744   ;;  %vm281_vm2 = vcmask 1006592  }
   0xc   : > { %s1133_s14 = sshll.u32 %s1439_s13, 5  ;;  %v1060_v49 = vld [vmem:[%s1435_s1 + $0x8] sm:$0xf]  ;;  %v1063_v52 = vld [vmem:[%s1435_s1 + $0xc] sm:$0xf]  ;;  %vm460_vm3 = vcmask 842752  }
   0xd   : > { %s1202_s17 = scalar_lea.vmem %s1434_s0, %s1133_s14  ;;  %v172_v56 = vld [vmem:[%s1435_s1] sm:$0xf]  ;;  %vm401_vm4 = vcmask 998400   ;;  %vm580_vm5 = vcmask 834560   ;;  %vm707_vm6 = vcmask 801792   ;;  %vm963_vm7 = vcmask 793600  }
   0xe   : > { %v1205_v0 = vld [vmem:[%s1202_s17 + $0x4] sm:$0x3]  ;;  %v1065_v1 = vld [vmem:[%s1202_s17 + $0x8] sm:$0xf]  ;;  %v1211_v3 = vld [vmem:[%s1202_s17 + $0xc] sm:$0x3] }
   0xf   : > { %219 = vst [vmem:[#allocation1] ss:$4 sm:$0xff] %v1205_v0  ;;  %v1073_v6 = vld [vmem:[%s1202_s17 + $0xc] sm:$0xf]  ;;  %v1082_v11 = vld [vmem:[%s1202_s17 + $0x10] sm:$0xf] }
  0x10   : > { %v1076_v8 = vld [vmem:[%s1202_s17 + $0xc] sm:$0xf]  ;;  %v1223_v14 = vld [vmem:[%s1202_s17 + $0x14] sm:$0x3]  ;;  %v1099_v22 = vld [vmem:[%s1202_s17 + $0x18] sm:$0xf] }
  0x11   : > { %v1090_v17 = vld [vmem:[%s1202_s17 + $0x14] sm:$0xf]  ;;  %v1102_v25 = vld [vmem:[%s1202_s17 + $0x18] sm:$0xf]  ;;  %v1243_v31 = vld [vmem:[%s1202_s17 + $0x1c] sm:$0x3] }
  0x12   : > { %v1093_v19 = vld [vmem:[%s1202_s17 + $0x14] sm:$0xf]  ;;  %v1105_v28 = vld [vmem:[%s1202_s17 + $0x18] sm:$0xf]  ;;  %v1113_v34 = vld [vmem:[%s1202_s17 + $0x1c] sm:$0xf] }
  0x13   : > { %v1116_v36 = vld [vmem:[%s1202_s17 + $0x1c] sm:$0xf]  ;;  %v183_v39 = vsel %vm181_vm0, %v1205_v0, 0  ;;  %v1062_v44 = vld [vmem:[%s1202_s17 + $0x8] sm:$0x3]  ;;  %v311_v58 = vsel %vm181_vm0, %v1211_v3, 0 }
  0x14   : > { %192 = vmatpush.bf16.msra.mxu0 %v183_v39  ;;  %v1119_v40 = vld [vmem:[%s1202_s17 + $0x1c] sm:$0xf]  ;;  %v252_v45 = vsel %vm181_vm0, %v1062_v44, 0  ;;  %v171_v48 = vld [vmem:[%s1202_s17] sm:$0x3]  ;;  %s1055_s4 = sshll.u32 %s1439_s13, 2 }
  0x15   : > { %261 = vmatpush.bf16.msra.mxu3 %v252_v45  ;;  %v202_v50 = vsel %vm181_vm0, %v171_v48, 0  ;;  %v1122_v51 = vld [vmem:[%s1202_s17 + $0x1c] sm:$0xf]  ;;  %v1088_v44 = vld [vmem:[%s1435_s1 + $0x30] sm:$0xf]  ;;  %s168_s7 = scalar_lea.vmem %s1437_s3, %s1055_s4  ;;  %vm993_vm8 = vcmask 1018880  }
  0x16   : > { %v220_v2 = vld.sshfl [vmem:[#allocation1] sm:$0xff pattern:$0x73625140]  ;;  %211 = vmatpush.bf16.msra.mxu1 %v202_v50  ;;  %v1125_v59 = vld [vmem:[%s1202_s17 + $0x1c] sm:$0xf] }
  0x17   : > { %222 = vrot.lane.b32.xlu0 %v220_v2, %s1160_s18  ;;  %272 = vst [vmem:[#allocation1] ss:$4 sm:$0xff] %v1065_v1  ;;  %1058 = vmatmul.msk.bf16.vlgmr.msra.gmra.mxu0 %vm177_vm1, %v1057_v41  ;;  %v1094_v45 = vld [vmem:[%s1435_s1 + $0x38] sm:$0xf] }
  0x18   : > { %1064 = vmatmul.msk.bf16.vlgmr.msra.gmra.mxu3 %vm177_vm1, %v1063_v52 }
  0x19   : > { %1059 = vmatmul.msk.bf16.vlgmr.msra.gmra.mxu1 %vm177_vm1, %v172_v56 }
  0x1a   : > { %320 = vmatpush.bf16.msrb.mxu1 %v311_v58 }
  0x1e   : > { %v273_v4 = vld.sshfl [vmem:[#allocation1] sm:$0xff pattern:$0x73625140]  ;;  %v275_v5 = vld.sshfl [vmem:[#allocation1 + $0x8] sm:$0xff pattern:$0x73625140] }
  0x1f   : > { %277 = vrot.lane.b32.xlu1 %v273_v4, %s1161_s19  ;;  %329 = vst [vmem:[#allocation1] ss:$4 sm:$0xff] %v1211_v3 }
  0x26   : > { %v330_v7 = vld.sshfl [vmem:[#allocation1] sm:$0xff pattern:$0x73625140] }
  0x27   : > { %279 = vrot.lane.b32.xlu1 %v275_v5, %s1161_s19  ;;  %332 = vrot.lane.b32.xlu0 %v330_v7, %s1160_s18  ;;  %358 = vst [vmem:[#allocation1] ss:$4 sm:$0xff] %v1073_v6  ;;  %v1074_v5 = vld [vmem:[%s1435_s1 + $0x1c] sm:$0xf]  ;;  %v1071_v7 = vld [vmem:[%s1435_s1 + $0x18] sm:$0xf] }
  0x2e   : > { %v359_v9 = vld.sshfl [vmem:[#allocation1] sm:$0xff pattern:$0x73625140]  ;;  %v361_v10 = vld.sshfl [vmem:[#allocation1 + $0x8] sm:$0xff pattern:$0x73625140] }
  0x2f   : > { %392 = vst [vmem:[#allocation1] ss:$4 sm:$0xff] %v1076_v8  ;;  %363 = vrot.lane.b32.xlu2 %v359_v9, %s1161_s19  ;;  %v1128_v8 = vld [vmem:[%s1202_s17 + $0x1c] sm:$0xf]  ;;  %v1066_v9 = vld [vmem:[%s1435_s1 + $0x10] sm:$0xf] }
  0x36   : > { %v393_v12 = vld.sshfl [vmem:[#allocation1] sm:$0xff pattern:$0x73625140]  ;;  %v395_v13 = vld.sshfl [vmem:[#allocation1 + $0x8] sm:$0xff pattern:$0x73625140] }
  0x37   : > { %451 = vst [vmem:[#allocation1] ss:$4 sm:$0xff] %v1082_v11  ;;  %365 = vrot.lane.b32.xlu2 %v361_v10, %s1161_s19  ;;  %v1069_v10 = vld [vmem:[%s1435_s1 + $0x14] sm:$0xf] }
  0x38   : > { %1070 = vmatmul.msk.bf16.vlgmr.msrb.gmra.mxu1 %vm177_vm1, %v1069_v10 }
  0x3e   : > { %v452_v15 = vld.sshfl [vmem:[#allocation1] sm:$0xff pattern:$0x73625140]  ;;  %v454_v16 = vld.sshfl [vmem:[#allocation1 + $0x8] sm:$0xff pattern:$0x73625140] }
  0x3f   : > { %456 = vrot.lane.b32.xlu0 %v452_v15, %s1162_s20  ;;  %458 = vrot.lane.b32.xlu1 %v454_v16, %s1162_s20  ;;  %508 = vst [vmem:[#allocation1] ss:$4 sm:$0xff] %v1223_v14  ;;  %v1079_v15 = vld [vmem:[%s1202_s17 + $0x10] sm:$0x3] }
  0x40   : > { %397 = vrot.lane.b32.xlu2 %v393_v12, %s1163_s21  ;;  %v431_v16 = vsel %vm181_vm0, %v1079_v15, 0 }
  0x41   : > { %440 = vmatpush.bf16.msra.mxu1 %v431_v16 }
  0x46   : > { %v509_v18 = vld.sshfl [vmem:[#allocation1] sm:$0xff pattern:$0x73625140] }
  0x47   : > { %399 = vrot.lane.b32.xlu0 %v395_v13, %s1163_s21  ;;  %537 = vst [vmem:[#allocation1] ss:$4 sm:$0xff] %v1090_v17  ;;  %v490_v13 = vsel %vm181_vm0, %v1223_v14, 0  ;;  %v1080_v14 = vld [vmem:[%s1435_s1 + $0x24] sm:$0xf] }
  0x48   : > { %1081 = vmatmul.msk.bf16.vlgmr.msra.gmra.mxu1 %vm177_vm1, %v1080_v14  ;;  %v1167_v14 = vmov 0  }
  0x49   : > { %1150 = vset.pattern.permute.xlu1 %v1167_v14  ;;  %1151 = vset.pattern.permute.xlu0 %v1167_v14 }
  0x4e   : > { %v538_v20 = vld.sshfl [vmem:[#allocation1] sm:$0xff pattern:$0x73625140]  ;;  %v540_v21 = vld.sshfl [vmem:[#allocation1 + $0x8] sm:$0xff pattern:$0x73625140] }
  0x4f   : > { %511 = vrot.lane.b32.xlu0 %v509_v18, %s1160_s18  ;;  %571 = vst [vmem:[#allocation1] ss:$4 sm:$0xff] %v1093_v19 }
  0x56   : > { %v572_v23 = vld.sshfl [vmem:[#allocation1] sm:$0xff pattern:$0x73625140]  ;;  %v574_v24 = vld.sshfl [vmem:[#allocation1 + $0x8] sm:$0xff pattern:$0x73625140] }
  0x57   : > { %576 = vrot.lane.b32.xlu1 %v572_v23, %s1164_s22  ;;  %630 = vst [vmem:[#allocation1] ss:$4 sm:$0xff] %v1099_v22  ;;  %578 = vrot.lane.b32.xlu2 %v574_v24, %s1164_s22 }
  0x5e   : > { %v633_v26 = vld.sshfl [vmem:[#allocation1 + $0x8] sm:$0xff pattern:$0x73625140]  ;;  %v631_v27 = vld.sshfl [vmem:[#allocation1] sm:$0xff pattern:$0x73625140] }
  0x5f   : > { %542 = vrot.lane.b32.xlu1 %v538_v20, %s1162_s20  ;;  %637 = vrot.lane.b32.xlu0 %v633_v26, %s1161_s19  ;;  %664 = vst [vmem:[#allocation1] ss:$4 sm:$0xff] %v1102_v25  ;;  %v1086_v20 = vld [vmem:[%s1435_s1 + $0x2c] sm:$0xf]  ;;  %v1096_v26 = vld [vmem:[%s1202_s17 + $0x18] sm:$0x3] }
  0x60   : > { %544 = vrot.lane.b32.xlu2 %v540_v21, %s1162_s20 }
  0x66   : > { %v665_v29 = vld.sshfl [vmem:[#allocation1] sm:$0xff pattern:$0x73625140]  ;;  %v667_v30 = vld.sshfl [vmem:[#allocation1 + $0x8] sm:$0xff pattern:$0x73625140] }
  0x67   : > { %698 = vst [vmem:[#allocation1] ss:$4 sm:$0xff] %v1105_v28  ;;  %v610_v28 = vsel %vm181_vm0, %v1096_v26, 0 }
  0x68   : > { %635 = vrot.lane.b32.xlu2 %v631_v27, %s1161_s19  ;;  %v1083_v27 = vld [vmem:[%s1435_s1 + $0x28] sm:$0xf] }
  0x6e   : > { %v701_v32 = vld.sshfl [vmem:[#allocation1 + $0x8] sm:$0xff pattern:$0x73625140]  ;;  %v699_v33 = vld.sshfl [vmem:[#allocation1] sm:$0xff pattern:$0x73625140] }
  0x6f   : > { %705 = vrot.lane.b32.xlu1 %v701_v32, %s1165_s23  ;;  %703 = vrot.lane.b32.xlu0 %v699_v33, %s1165_s23  ;;  %755 = vst [vmem:[#allocation1] ss:$4 sm:$0xff] %v1243_v31  ;;  %v1097_v33 = vld [vmem:[%s1435_s1 + $0x3c] sm:$0xf] }
  0x70   : > { %671 = vrot.lane.b32.xlu2 %v667_v30, %s1162_s20 }
  0x76   : > { %v756_v35 = vld.sshfl [vmem:[#allocation1] sm:$0xff pattern:$0x73625140] }
  0x77   : > { %669 = vrot.lane.b32.xlu1 %v665_v29, %s1162_s20  ;;  %784 = vst [vmem:[#allocation1] ss:$4 sm:$0xff] %v1113_v34 }
  0x78   : > { %758 = vrot.lane.b32.xlu2 %v756_v35, %s1160_s18  ;;  %v1077_v35 = vld [vmem:[%s1435_s1 + $0x20] sm:$0xf] }
  0x7e   : > { %v785_v37 = vld.sshfl [vmem:[#allocation1] sm:$0xff pattern:$0x73625140]  ;;  %v787_v38 = vld.sshfl [vmem:[#allocation1 + $0x8] sm:$0xff pattern:$0x73625140] }
  0x7f   : > { %789 = vrot.lane.b32.xlu0 %v785_v37, %s1161_s19  ;;  %818 = vst [vmem:[#allocation1] ss:$4 sm:$0xff] %v1116_v36 }
  0x86   : > { %v821_v42 = vld.sshfl [vmem:[#allocation1 + $0x8] sm:$0xff pattern:$0x73625140]  ;;  %v819_v43 = vld.sshfl [vmem:[#allocation1] sm:$0xff pattern:$0x73625140] }
  0x87   : > { %825 = vrot.lane.b32.xlu1 %v821_v42, %s1163_s21  ;;  %823 = vrot.lane.b32.xlu0 %v819_v43, %s1163_s21  ;;  %852 = vst [vmem:[#allocation1] ss:$4 sm:$0xff] %v1119_v40  ;;  %v737_v40 = vsel %vm181_vm0, %v1243_v31, 0 }
  0x89   : > { %v223_v46 = vpop.permute.xlu0 %222  ;;  %v364_v55 = vpop.permute.xlu2 %363 }
  0x8a   : > { %v228_v47 = vsel %vm181_vm0, %v223_v46, 0  ;;  %v1109_v46 = vld [vmem:[%s1435_s1 + $0x4c] sm:$0xf] }
  0x8b   : > { %237 = vmatpush.bf16.msra.mxu2 %v228_v47 }
  0x8e   : > { %v855_v53 = vld.sshfl [vmem:[#allocation1 + $0x8] sm:$0xff pattern:$0x73625140]  ;;  %v853_v54 = vld.sshfl [vmem:[#allocation1] sm:$0xff pattern:$0x73625140]  ;;  %1061 = vmatmul.msk.bf16.vlgmr.msra.gmra.mxu2 %vm177_vm1, %v1060_v49 }
  0x8f   : > { %791 = vrot.lane.b32.xlu1 %v787_v38, %s1161_s19  ;;  %859 = vrot.lane.b32.xlu0 %v855_v53, %s1162_s20  ;;  %886 = vst [vmem:[#allocation1] ss:$4 sm:$0xff] %v1122_v51 }
  0x90   : > { %857 = vrot.lane.b32.xlu2 %v853_v54, %s1162_s20  ;;  %v1091_v54 = vld [vmem:[%s1435_s1 + $0x34] sm:$0xf] }
  0x91   : > { %v278_v57 = vpop.permute.xlu1 %277  ;;  %v366_v62 = vpop.permute.xlu2 %365 }
  0x92   : > { %v367_v63 = vsel %vm281_vm2, %v364_v55, %v366_v62  ;;  %v1100_v55 = vld [vmem:[%s1435_s1 + $0x40] sm:$0xf] }
  0x93   : > { %v372_v2 = vsel %vm181_vm0, %v367_v63, 0 }
  0x94   : > { %381 = vmatpush.bf16.msrb.mxu3 %v372_v2 }
  0x96   : > { %v887_v60 = vld.sshfl [vmem:[#allocation1] sm:$0xff pattern:$0x73625140]  ;;  %v889_v61 = vld.sshfl [vmem:[#allocation1 + $0x8] sm:$0xff pattern:$0x73625140] }
  0x97   : > { %920 = vst [vmem:[#allocation1] ss:$4 sm:$0xff] %v1125_v59  ;;  %891 = vrot.lane.b32.xlu0 %v887_v60, %s1164_s22  ;;  %1075 = vmatmul.msk.bf16.vlgmr.msrb.gmra.mxu3 %vm177_vm1, %v1074_v5  ;;  %v1106_v60 = vld [vmem:[%s1435_s1 + $0x48] sm:$0xf] }
  0x98   : > { %499 = vmatpush.bf16.msra.mxu3 %v490_v13  ;;  %v194_v13 = vpop.f32.mrf.mxu0 }
  0x99   : > { %v280_v0 = vpop.permute.xlu1 %279  ;;  %v333_v1 = vpop.permute.xlu0 %332 }
  0x9a   : > { %v282_v4 = vsel %vm281_vm2, %v278_v57, %v280_v0  ;;  %v338_v3 = vsel %vm181_vm0, %v333_v1, 0  ;;  %v398_v19 = vpop.permute.xlu2 %397  ;;  %v1103_v0 = vld [vmem:[%s1435_s1 + $0x44] sm:$0xf]  ;;  %v1111_v1 = vld [vmem:[%s1435_s1 + $0x50] sm:$0xf] }
  0x9b   : > { %v287_v6 = vsel %vm181_vm0, %v282_v4, 0  ;;  %347 = vmatpush.bf16.msrb.mxu2 %v338_v3  ;;  %v263_v26 = vpop.f32.mrf.mxu3 }
  0x9c   : > { %296 = vmatpush.bf16.msrb.mxu0 %v287_v6  ;;  %619 = vmatpush.bf16.msrb.mxu3 %v610_v28 }
  0x9e   : > { %v921_v11 = vld.sshfl [vmem:[#allocation1] sm:$0xff pattern:$0x73625140]  ;;  %v923_v12 = vld.sshfl [vmem:[#allocation1 + $0x8] sm:$0xff pattern:$0x73625140]  ;;  %1072 = vmatmul.msk.bf16.vlgmr.msrb.gmra.mxu2 %vm177_vm1, %v1071_v7 }
  0x9f   : > { %954 = vst [vmem:[#allocation1] ss:$4 sm:$0xff] %v1128_v8  ;;  %927 = vrot.lane.b32.xlu0 %v923_v12, %s1165_s23  ;;  %1067 = vmatmul.msk.bf16.vlgmr.msrb.gmra.mxu0 %vm177_vm1, %v1066_v9  ;;  %v1117_v7 = vld [vmem:[%s1435_s1 + $0x58] sm:$0xf] }
  0xa6   : > { %v955_v17 = vld.sshfl [vmem:[#allocation1] sm:$0xff pattern:$0x73625140]  ;;  %v957_v18 = vld.sshfl [vmem:[#allocation1 + $0x8] sm:$0xff pattern:$0x73625140] }
  0xa7   : > { %959 = vrot.lane.b32.xlu1 %v955_v17, %s1166_s15  ;;  %961 = vrot.lane.b32.xlu2 %v957_v18, %s1166_s15  ;;  %v1114_v17 = vld [vmem:[%s1435_s1 + $0x54] sm:$0xf]  ;;  %v1120_v18 = vld [vmem:[%s1435_s1 + $0x5c] sm:$0xf] }
  0xa8   : > { %1087 = vmatmul.msk.bf16.vlgmr.msra.gmra.mxu3 %vm177_vm1, %v1086_v20  ;;  %v170_v20 = vld [vmem:[%s1436_s2] sm:$0xff] }
  0xa9   : > { %746 = vmatpush.bf16.msra.mxu3 %v737_v40 }
  0xaf   : > { %893 = vrot.lane.b32.xlu1 %v889_v61, %s1164_s22  ;;  %925 = vrot.lane.b32.xlu2 %v921_v11, %s1165_s23 }
  0xb1   : > { %v457_v21 = vpop.permute.xlu0 %456  ;;  %v459_v22 = vpop.permute.xlu1 %458 }
  0xb2   : > { %v461_v23 = vsel %vm460_vm3, %v457_v21, %v459_v22  ;;  %v579_v24 = vpop.permute.xlu2 %578  ;;  %v196_v22 = vpop.f32.mrf.mxu0 }
  0xb3   : > { %v466_v25 = vsel %vm181_vm0, %v461_v23, 0  ;;  %v213_v23 = vpop.f32.mrf.mxu1 }
  0xb4   : > { %475 = vmatpush.bf16.msra.mxu2 %v466_v25 }
  0xb7   : > { %1084 = vmatmul.msk.bf16.vlgmr.msra.gmra.mxu2 %vm177_vm1, %v1083_v27  ;;  %987 = vperm.xlu1 %1150, %v170_v20  }
  0xb8   : > { %1098 = vmatmul.msk.bf16.vlgmr.msrb.gmra.mxu3 %vm177_vm1, %v1097_v33  ;;  %v1126_v33 = vld [vmem:[%s1435_s1 + $0x64] sm:$0xf] }
  0xb9   : > { %v400_v29 = vpop.permute.xlu0 %399 }
  0xba   : > { %v402_v30 = vsel %vm401_vm4, %v398_v19, %v400_v29  ;;  %v545_v32 = vpop.permute.xlu2 %544 }
  0xbb   : > { %v407_v34 = vsel %vm181_vm0, %v402_v30, 0 }
  0xbc   : > { %416 = vmatpush.bf16.msra.mxu0 %v407_v34 }
  0xbf   : > { %1078 = vmatmul.msk.bf16.vlgmr.msra.gmra.mxu0 %vm177_vm1, %v1077_v35  ;;  %v215_v35 = vpop.f32.mrf.mxu1 }
  0xc1   : > { %v512_v36 = vpop.permute.xlu0 %511 }
  0xc2   : > { %v517_v37 = vsel %vm181_vm0, %v512_v36, 0  ;;  %v636_v38 = vpop.permute.xlu2 %635  ;;  %v265_v36 = vpop.f32.mrf.mxu3 }
  0xc3   : > { %526 = vmatpush.bf16.msrb.mxu0 %v517_v37 }
  0xc8   : > { %1110 = vmatmul.msk.bf16.vlgmr.msra.gmra.mxu3 %vm177_vm1, %v1109_v46 }
  0xc9   : > { %v577_v39 = vpop.permute.xlu1 %576 }
  0xca   : > { %v581_v41 = vsel %vm580_vm5, %v577_v39, %v579_v24  ;;  %v672_v42 = vpop.permute.xlu2 %671  ;;  %v214_v24 = vadd.f32 %v213_v23, %v194_v13 }
  0xcb   : > { %v586_v43 = vsel %vm181_vm0, %v581_v41, 0  ;;  %v1129_v41 = vld [vmem:[%s1435_s1 + $0x68] sm:$0xf] }
  0xcc   : > { %595 = vmatpush.bf16.msrb.mxu2 %v586_v43 }
  0xcf   : > { %1089 = vmatmul.msk.bf16.vlgmr.msrb.gmra.mxu0 %vm177_vm1, %v1088_v44  ;;  %1095 = vmatmul.msk.bf16.vlgmr.msrb.gmra.mxu2 %vm177_vm1, %v1094_v45  ;;  %v322_v44 = vpop.f32.mrf.mxu1 }
  0xd1   : > { %v543_v31 = vpop.permute.xlu1 %542  ;;  %v638_v47 = vpop.permute.xlu0 %637 }
  0xd2   : > { %v546_v48 = vsel %vm460_vm3, %v543_v31, %v545_v32  ;;  %v639_v49 = vsel %vm281_vm2, %v636_v38, %v638_v47  ;;  %v759_v50 = vpop.permute.xlu2 %758 }
  0xd3   : > { %v551_v51 = vsel %vm181_vm0, %v546_v48, 0  ;;  %v644_v52 = vsel %vm181_vm0, %v639_v49, 0  ;;  %v764_v53 = vsel %vm181_vm0, %v759_v50, 0 }
  0xd4   : > { %560 = vmatpush.bf16.msrb.mxu1 %v551_v51  ;;  %653 = vmatpush.bf16.msra.mxu0 %v644_v52  ;;  %v1123_v51 = vld [vmem:[%s1435_s1 + $0x60] sm:$0xf] }
  0xd7   : > { %1092 = vmatmul.msk.bf16.vlgmr.msrb.gmra.mxu1 %vm177_vm1, %v1091_v54  ;;  %v324_v54 = vpop.f32.mrf.mxu1 }
  0xd8   : > { %773 = vmatpush.bf16.msrb.mxu0 %v764_v53 }
  0xdf   : > { %1101 = vmatmul.msk.bf16.vlgmr.msra.gmra.mxu0 %vm177_vm1, %v1100_v55 }
  0xe1   : > { %v706_v56 = vpop.permute.xlu1 %705  ;;  %v704_v57 = vpop.permute.xlu0 %703 }
  0xe2   : > { %v708_v58 = vsel %vm707_vm6, %v704_v57, %v706_v56  ;;  %v442_v57 = vpop.f32.mrf.mxu1 }
  0xe3   : > { %v713_v59 = vsel %vm181_vm0, %v708_v58, 0 }
  0xe4   : > { %722 = vmatpush.bf16.msra.mxu2 %v713_v59 }
  0xe7   : > { %1107 = vmatmul.msk.bf16.vlgmr.msra.gmra.mxu2 %vm177_vm1, %v1106_v60 }
  0xe9   : > { %v670_v61 = vpop.permute.xlu1 %669 }
  0xea   : > { %v673_v62 = vsel %vm460_vm3, %v670_v61, %v672_v42  ;;  %v858_v8 = vpop.permute.xlu2 %857  ;;  %v444_v59 = vpop.f32.mrf.mxu1 }
  0xeb   : > { %v678_v63 = vsel %vm181_vm0, %v673_v62, 0 }
  0xec   : > { %687 = vmatpush.bf16.msra.mxu1 %v678_v63 }
  0xef   : > { %1104 = vmatmul.msk.bf16.vlgmr.msra.gmra.mxu1 %vm177_vm1, %v1103_v0  ;;  %1112 = vmatmul.msk.bf16.vlgmr.msrb.gmra.mxu0 %vm177_vm1, %v1111_v1 }
  0xf1   : > { %v790_v2 = vpop.permute.xlu0 %789 }
  0xf9   : > { %v826_v4 = vpop.permute.xlu1 %825  ;;  %v824_v3 = vpop.permute.xlu0 %823 }
  0xfa   : > { %v827_v5 = vsel %vm401_vm4, %v824_v3, %v826_v4 }
  0xfb   : > { %v832_v6 = vsel %vm181_vm0, %v827_v5, 0 }
  0xfc   : > { %841 = vmatpush.bf16.msrb.mxu2 %v832_v6 }
  0xff   : > { %1118 = vmatmul.msk.bf16.vlgmr.msrb.gmra.mxu2 %vm177_vm1, %v1117_v7 }
 0x101   : > { %v792_v9 = vpop.permute.xlu1 %791  ;;  %v860_v10 = vpop.permute.xlu0 %859 }
 0x102   : > { %v793_v11 = vsel %vm281_vm2, %v790_v2, %v792_v9  ;;  %v861_v12 = vsel %vm460_vm3, %v858_v8, %v860_v10  ;;  %v962_v19 = vpop.permute.xlu2 %961 }
 0x103   : > { %v798_v15 = vsel %vm181_vm0, %v793_v11, 0  ;;  %v866_v16 = vsel %vm181_vm0, %v861_v12, 0 }
 0x104   : > { %807 = vmatpush.bf16.msrb.mxu1 %v798_v15  ;;  %875 = vmatpush.bf16.msrb.mxu3 %v866_v16 }
 0x107   : > { %1115 = vmatmul.msk.bf16.vlgmr.msrb.gmra.mxu1 %vm177_vm1, %v1114_v17  ;;  %1121 = vmatmul.msk.bf16.vlgmr.msrb.gmra.mxu3 %vm177_vm1, %v1120_v18 }
 0x109   : > { %v892_v21 = vpop.permute.xlu0 %891 }
 0x10a   : > { %v926_v25 = vpop.permute.xlu2 %925 }
 0x111   : > { %v928_v27 = vpop.permute.xlu0 %927  ;;  %v239_v28 = vpop.f32.mrf.mxu2 }
 0x112   : > { %v929_v29 = vsel %vm707_vm6, %v926_v25, %v928_v27  ;;  %v243_v30 = vadd.f32 %v239_v28, %v214_v24 }
 0x113   : > { %v934_v32 = vsel %vm181_vm0, %v929_v29, 0 }
 0x114   : > { %943 = vmatpush.bf16.msra.mxu1 %v934_v32  ;;  %v267_v34 = vadd.f32 %v263_v26, %v243_v30 }
 0x117   : > { %1127 = vmatmul.msk.bf16.vlgmr.msra.gmra.mxu1 %vm177_vm1, %v1126_v33 }
 0x119   : > { %v960_v37 = vpop.permute.xlu1 %959  ;;  %v241_v38 = vpop.f32.mrf.mxu2 }
 0x11a   : > { %v964_v39 = vsel %vm963_vm7, %v960_v37, %v962_v19  ;;  %v383_v46 = vpop.f32.mrf.mxu3 }
 0x11b   : > { %v969_v40 = vsel %vm181_vm0, %v964_v39, 0 }
 0x11c   : > { %978 = vmatpush.bf16.msra.mxu2 %v969_v40  ;;  %v298_v42 = vpop.f32.mrf.mxu0 }
 0x11d   : > { %v302_v43 = vadd.f32 %v298_v42, %v267_v34 }
 0x11f   : > { %1130 = vmatmul.msk.bf16.vlgmr.msra.gmra.mxu2 %vm177_vm1, %v1129_v41  ;;  %v326_v45 = vadd.f32 %v322_v44, %v302_v43 }
 0x121   : > { %v894_v31 = vpop.permute.xlu1 %893  ;;  %v349_v47 = vpop.f32.mrf.mxu2 }
 0x122   : > { %v895_v48 = vsel %vm580_vm5, %v892_v21, %v894_v31  ;;  %v353_v49 = vadd.f32 %v349_v47, %v326_v45  ;;  %v385_v55 = vpop.f32.mrf.mxu3 }
 0x123   : > { %v900_v50 = vsel %vm181_vm0, %v895_v48, 0 }
 0x124   : > { %909 = vmatpush.bf16.msra.mxu0 %v900_v50  ;;  %v300_v52 = vpop.f32.mrf.mxu0  ;;  %v387_v53 = vadd.f32 %v383_v46, %v353_v49 }
 0x127   : > { %1124 = vmatmul.msk.bf16.vlgmr.msra.gmra.mxu0 %vm177_vm1, %v1123_v51 }
 0x129   : > { %v351_v56 = vpop.f32.mrf.mxu2  ;;  %v988_v47 = vpop.permute.xlu1 %987 }
 0x12b   : > { %v501_v58 = vpop.f32.mrf.mxu3 }
 0x133   : > { %v503_v60 = vpop.f32.mrf.mxu3 }
 0x13a   : > { %v477_v61 = vpop.f32.mrf.mxu2 }
 0x13b   : > { %v621_v1 = vpop.f32.mrf.mxu3 }
 0x13c   : > { %v418_v62 = vpop.f32.mrf.mxu0 }
 0x13d   : > { %v422_v63 = vadd.f32 %v418_v62, %v387_v53 }
 0x13f   : > { %v446_v0 = vadd.f32 %v442_v57, %v422_v63 }
 0x141   : > { %v481_v2 = vadd.f32 %v477_v61, %v446_v0 }
 0x142   : > { %v479_v4 = vpop.f32.mrf.mxu2 }
 0x143   : > { %v505_v3 = vadd.f32 %v501_v58, %v481_v2  ;;  %v623_v6 = vpop.f32.mrf.mxu3 }
 0x144   : > { %v420_v5 = vpop.f32.mrf.mxu0 }
 0x14b   : > { %v748_v9 = vpop.f32.mrf.mxu3 }
 0x14c   : > { %v528_v7 = vpop.f32.mrf.mxu0 }
 0x14d   : > { %v532_v8 = vadd.f32 %v528_v7, %v505_v3 }
 0x152   : > { %v597_v10 = vpop.f32.mrf.mxu2 }
 0x153   : > { %v750_v16 = vpop.f32.mrf.mxu3 }
 0x154   : > { %v530_v11 = vpop.f32.mrf.mxu0  ;;  %v562_v12 = vpop.f32.mrf.mxu1 }
 0x155   : > { %v566_v13 = vadd.f32 %v562_v12, %v532_v8 }
 0x157   : > { %v601_v15 = vadd.f32 %v597_v10, %v566_v13 }
 0x159   : > { %v625_v17 = vadd.f32 %v621_v1, %v601_v15 }
 0x15a   : > { %v599_v18 = vpop.f32.mrf.mxu2 }
 0x15c   : > { %v655_v19 = vpop.f32.mrf.mxu0  ;;  %v564_v20 = vpop.f32.mrf.mxu1 }
 0x15d   : > { %v659_v22 = vadd.f32 %v655_v19, %v625_v17 }
 0x164   : > { %v657_v14 = vpop.f32.mrf.mxu0 }
 0x16a   : > { %v724_v21 = vpop.f32.mrf.mxu2 }
 0x16c   : > { %v689_v23 = vpop.f32.mrf.mxu1  ;;  %v775_v24 = vpop.f32.mrf.mxu0 }
 0x16d   : > { %v693_v25 = vadd.f32 %v689_v23, %v659_v22 }
 0x16f   : > { %v728_v26 = vadd.f32 %v724_v21, %v693_v25 }
 0x171   : > { %v752_v27 = vadd.f32 %v748_v9, %v728_v26 }
 0x172   : > { %v726_v28 = vpop.f32.mrf.mxu2 }
 0x173   : > { %v779_v39 = vadd.f32 %v775_v24, %v752_v27 }
 0x174   : > { %v691_v29 = vpop.f32.mrf.mxu1  ;;  %v777_v30 = vpop.f32.mrf.mxu0 }
 0x182   : > { %v843_v32 = vpop.f32.mrf.mxu2 }
 0x184   : > { %v809_v33 = vpop.f32.mrf.mxu1 }
 0x185   : > { %v813_v41 = vadd.f32 %v809_v33, %v779_v39 }
 0x187   : > { %v847_v42 = vadd.f32 %v843_v32, %v813_v41 }
 0x18a   : > { %v877_v34 = vpop.f32.mrf.mxu3  ;;  %v845_v35 = vpop.f32.mrf.mxu2 }
 0x18b   : > { %v881_v44 = vadd.f32 %v877_v34, %v847_v42 }
 0x18c   : > { %v811_v36 = vpop.f32.mrf.mxu1 }
 0x192   : > { %v879_v37 = vpop.f32.mrf.mxu3 }
 0x194   : > { %v945_v38 = vpop.f32.mrf.mxu1 }
 0x19c   : > { %v947_v40 = vpop.f32.mrf.mxu1 }
 0x1a2   : > { %v980_v43 = vpop.f32.mrf.mxu2 }
 0x1a4   : > { %v911_v45 = vpop.f32.mrf.mxu0 }
 0x1a5   : > { %v915_v46 = vadd.f32 %v911_v45, %v881_v44 }
 0x1a7   : > { %v949_v31 = vadd.f32 %v945_v38, %v915_v46 }
 0x1a9   : > { %v984_v48 = vadd.f32 %v980_v43, %v949_v31 }
 0x1aa   : > { %v982_v49 = vpop.f32.mrf.mxu2 }
 0x1ab   : > { %v990_v50 = vadd.f32 %v988_v47, %v984_v48 }
 0x1ac   : > { %v913_v51 = vpop.f32.mrf.mxu0 }
 0x1ad   : > { %v991_v52 = vmax.f32 %v990_v50, 0.0 }
 0x1af   : > { %v992_v53 = vpack.c.bf16 %v991_v52, %v991_v52 }
 0x1b1   : > { %994 = vst.msk [vmem:[%s168_s7] sm:$0xf] %vm993_vm8, %v992_v53 }
 0x1b2 PF: > { %s13_s12 = sadd.s32 1, %s1158_s12  }
 0x1b3   : > { %p10_p4 = scmp.ge.s32.totalorder %s13_s12, 4  }
 0x1b5   :  { %12 = sbr.rel (!%p10_p4) target bundleno = 1 (0x1), region = 95 }

// kernel: hourglass_forward.9
= control target key start
LH: loop header
LB: loop body
LE: loop exit
PB: predicated region body
PF: predicated region fallthrough
CT: control target
= control target key end

     0   :  { %s1692_s12 = smov 0   ;;  %s1995_s0 = inlined_call_operand.vmem [shape: bf16[2,1,8,302], index: 0, kind: input, shape index: {}]   ;;  %s1996_s1 = inlined_call_operand.vmem [shape: bf16[27,8,8], index: 1, kind: input, shape index: {}]   ;;  %s1997_s2 = inlined_call_operand.vmem [shape: f32[8,1], index: 2, kind: input, shape index: {}]   ;;  %s1998_s3 = inlined_call_operand.vmem [shape: bf16[2,1,8,216], index: 3, kind: output, shape index: {}]  }
   0x1 LB: > { %s1508_s13 = sadd.s32 4294967295, %s1643_s12   ;;  %p1512_p0 = scmp.ge.s32.totalorder %s1643_s12, 1  ;;  %s1643_s12 = sphi %s1692_s12, %s13_s12  }
   0x2   : > { %p137_p1 = scmp.lt.s32.totalorder %s1643_s12, 3 }
   0x4   : > { %p138_p2 = pnand %p1512_p0, %p137_p1 }
   0x5   : > { %p161_p3 = scmp.lt.s32.totalorder (!%p138_p2), %s1508_s13, 1  ;;  %s1645_s18 = smov (!%p138_p2), 126  }
   0x6   : > { %141 = sbr.rel (%p138_p2) target bundleno = 491 (0x1eb), region = 32  ;;  %s1646_s19 = smov (!%p138_p2), 127  }
   0x7   : > { %s1647_s20 = smov (!%p138_p2), 122   ;;  %s1648_s21 = smov (!%p138_p2), 121  }
   0x8   : > { %s1649_s22 = smov (!%p138_p2), 120   ;;  %s1650_s23 = smov (!%p138_p2), 116  }
   0x9   : > { %s1651_s24 = smov (!%p138_p2), 115   ;;  %s1652_s25 = smov (!%p138_p2), 114  }
   0xa   : > { %s1653_s26 = smov (!%p138_p2), 92   ;;  %s1654_s27 = smov (!%p138_p2), 91  }
   0xb   : > { %s2000_s13 = smov (!%p161_p3, %s1508_s13), 1  ;;  %s1655_s28 = smov 90   ;;  %vm192_vm0 = vcmask 1043456   ;;  %v174_v10 = vld [vmem:[%s1996_s1] sm:$0xf]  ;;  %vm188_vm1 = vcmask 64512  }
   0xc   : > { %s1599_s14 = smul.u32 12, %s2000_s13  ;;  %s1656_s29 = smov 86   ;;  %vm311_vm2 = vcmask 998400   ;;  %v1524_v16 = vld [vmem:[%s1996_s1 + $0xc] sm:$0xf]  ;;  %vm186_vm3 = vcmask 1039360  }
   0xd   : > { %s1657_s30 = smov 85   ;;  %s1658_s4 = smov 84   ;;  %vm266_vm4 = vcmask 1031168   ;;  %v1516_v28 = vld [vmem:[%s1996_s1 + $0x4] sm:$0xf]  ;;  %vm356_vm5 = vcmask 990208  }
   0xe   : > { %s1706_s17 = scalar_lea.vmem %s1995_s0, %s1599_s14  ;;  %s1659_s5 = smov 80   ;;  %vm401_vm6 = vcmask 982016   ;;  %vm446_vm7 = vcmask 949248   ;;  %v1521_v41 = vld [vmem:[%s1996_s1 + $0x8] sm:$0xf]  ;;  %vm491_vm8 = vcmask 941056  }
   0xf   : > { %v173_v0 = vld [vmem:[%s1706_s17] sm:$0xff]  ;;  %v711_v5 = vld [vmem:[%s1706_s17 + $0x8] sm:$0xf]  ;;  %s1660_s8 = smov 79   ;;  %s1661_s9 = smov 78   ;;  %vm536_vm9 = vcmask 932864  }
  0x10   : > { %v178_v1 = vunpack.c.l.b16 %v173_v0  ;;  %v717_v3 = vunpack.c.h.b16 %v173_v0  ;;  %v718_v6 = vunpack.c.l.b16 %v711_v5  ;;  %s1662_s14 = smov 56   ;;  %s1663_s15 = smov 55   ;;  %v1530_v43 = vld [vmem:[%s1996_s1 + $0x14] sm:$0xf]  ;;  %vm581_vm10 = vcmask 752640  }
  0x11   : > { %s1664_s16 = smov 54   ;;  %v1527_v57 = vld [vmem:[%s1996_s1 + $0x10] sm:$0xf]  ;;  %v1536_v58 = vld [vmem:[%s1996_s1 + $0x1c] sm:$0xf]  ;;  %vm626_vm11 = vcmask 744448  }
  0x12   : > { %v1709_v2 = vpack.c.b16 %v178_v1, %v178_v1  ;;  %v1714_v4 = vpack.c.b16 %v717_v3, %v717_v3  ;;  %v1738_v7 = vpack.c.b16 %v718_v6, %v718_v6  ;;  %vm671_vm12 = vcmask 736256  }
  0x13   : > { %vm776_vm13 = vcmask 695296   ;;  %vm728_vm14 = vcmask 703488   ;;  %vm872_vm15 = vcmask 654336  }
  0x14   : > { %262 = vrot.lane.b32.xlu1 %v1709_v2, %s1645_s18  ;;  %182 = vrot.lane.b32.xlu0 %v1709_v2, %s1646_s19  ;;  %v229_v8 = vsel %vm192_vm0, %v1709_v2, 0  ;;  %v232_v9 = vsel %vm192_vm0, %v1714_v4, 0 }
  0x15   : > { %307 = vrot.lane.b32.xlu2 %v1709_v2, %s1647_s20  ;;  %241 = vmatpush.bf16.msra.mxu2 %v229_v8 }
  0x16   : > { %254 = vmatpush.bf16.msra.mxu3 %v232_v9 }
  0x18   : > { %1519 = vmatmul.msk.bf16.vlgmr.msra.gmra.mxu2 %vm188_vm1, %v174_v10 }
  0x19   : > { %1520 = vmatmul.msk.bf16.vlgmr.msra.gmra.mxu3 %vm188_vm1, %v174_v10  ;;  %v1533_v10 = vld [vmem:[%s1996_s1 + $0x18] sm:$0xf] }
  0x1c   : > { %264 = vrot.lane.b32.xlu1 %v1714_v4, %s1645_s18  ;;  %184 = vrot.lane.b32.xlu0 %v1714_v4, %s1646_s19  ;;  %s1665_s19 = smov 50  }
  0x1d   : > { %309 = vrot.lane.b32.xlu2 %v1714_v4, %s1647_s20  ;;  %s1666_s20 = smov 49  }
  0x24   : > { %354 = vrot.lane.b32.xlu1 %v1714_v4, %s1648_s21  ;;  %352 = vrot.lane.b32.xlu0 %v1709_v2, %s1648_s21 }
  0x25   : > { %397 = vrot.lane.b32.xlu2 %v1709_v2, %s1649_s22 }
  0x2c   : > { %399 = vrot.lane.b32.xlu0 %v1714_v4, %s1649_s22  ;;  %442 = vrot.lane.b32.xlu1 %v1709_v2, %s1650_s23 }
  0x2d   : > { %444 = vrot.lane.b32.xlu2 %v1714_v4, %s1650_s23 }
  0x34   : > { %489 = vrot.lane.b32.xlu1 %v1714_v4, %s1651_s24  ;;  %487 = vrot.lane.b32.xlu0 %v1709_v2, %s1651_s24 }
  0x35   : > { %532 = vrot.lane.b32.xlu2 %v1709_v2, %s1652_s25 }
  0x3c   : > { %534 = vrot.lane.b32.xlu0 %v1714_v4, %s1652_s25  ;;  %577 = vrot.lane.b32.xlu1 %v1709_v2, %s1653_s26  ;;  %s1667_s25 = smov 48  }
  0x3d   : > { %579 = vrot.lane.b32.xlu2 %v1714_v4, %s1653_s26  ;;  %s1668_s26 = smov 44  }
  0x44   : > { %624 = vrot.lane.b32.xlu1 %v1714_v4, %s1654_s27  ;;  %622 = vrot.lane.b32.xlu0 %v1709_v2, %s1654_s27 }
  0x45   : > { %667 = vrot.lane.b32.xlu2 %v1709_v2, %s1655_s28 }
  0x4c   : > { %669 = vrot.lane.b32.xlu0 %v1714_v4, %s1655_s28  ;;  %722 = vrot.lane.b32.xlu1 %v1709_v2, %s1656_s29 }
  0x4d   : > { %724 = vrot.lane.b32.xlu2 %v1714_v4, %s1656_s29 }
  0x54   : > { %726 = vrot.lane.b32.xlu0 %v1738_v7, %s1656_s29  ;;  %770 = vrot.lane.b32.xlu1 %v1709_v2, %s1657_s30 }
  0x55   : > { %772 = vrot.lane.b32.xlu2 %v1714_v4, %s1657_s30 }
  0x5c   : > { %774 = vrot.lane.b32.xlu0 %v1738_v7, %s1657_s30  ;;  %818 = vrot.lane.b32.xlu1 %v1709_v2, %s1658_s4 }
  0x5d   : > { %820 = vrot.lane.b32.xlu2 %v1714_v4, %s1658_s4 }
  0x64   : > { %822 = vrot.lane.b32.xlu0 %v1738_v7, %s1658_s4  ;;  %866 = vrot.lane.b32.xlu1 %v1709_v2, %s1659_s5  ;;  %s1669_s4 = smov 43  }
  0x65   : > { %868 = vrot.lane.b32.xlu2 %v1714_v4, %s1659_s5 }
  0x6c   : > { %870 = vrot.lane.b32.xlu0 %v1738_v7, %s1659_s5  ;;  %914 = vrot.lane.b32.xlu1 %v1709_v2, %s1660_s8  ;;  %s1670_s5 = smov 42  }
  0x6d   : > { %916 = vrot.lane.b32.xlu2 %v1714_v4, %s1660_s8 }
  0x6f   : > { %v308_v11 = vpop.permute.xlu2 %307 }
  0x74   : > { %918 = vrot.lane.b32.xlu0 %v1738_v7, %s1660_s8  ;;  %962 = vrot.lane.b32.xlu1 %v1709_v2, %s1661_s9 }
  0x75   : > { %964 = vrot.lane.b32.xlu2 %v1714_v4, %s1661_s9 }
  0x77   : > { %v310_v12 = vpop.permute.xlu2 %309 }
  0x78   : > { %v312_v13 = vsel %vm311_vm2, %v308_v11, %v310_v12  ;;  %v320_v14 = vsel %vm192_vm0, %v310_v12, 0  ;;  %v1542_v11 = vld [vmem:[%s1996_s1 + $0x24] sm:$0xf]  ;;  %vm824_vm2 = vcmask 687104  }
  0x79   : > { %v317_v15 = vsel %vm192_vm0, %v312_v13, 0  ;;  %342 = vmatpush.bf16.msrb.mxu3 %v320_v14 }
  0x7a   : > { %329 = vmatpush.bf16.msrb.mxu2 %v317_v15 }
  0x7c   : > { %966 = vrot.lane.b32.xlu0 %v1738_v7, %s1661_s9  ;;  %1526 = vmatmul.msk.bf16.vlgmr.msrb.gmra.mxu3 %vm188_vm1, %v1524_v16 }
  0x7d   : > { %1010 = vrot.lane.b32.xlu1 %v1709_v2, %s1662_s14  ;;  %1525 = vmatmul.msk.bf16.vlgmr.msrb.gmra.mxu2 %vm188_vm1, %v1524_v16 }
  0x7e   : > { %1012 = vrot.lane.b32.xlu2 %v1714_v4, %s1662_s14 }
  0x7f   : > { %v398_v19 = vpop.permute.xlu2 %397 }
  0x84   : > { %1014 = vrot.lane.b32.xlu0 %v1738_v7, %s1662_s14 }
  0x85   : > { %1058 = vrot.lane.b32.xlu1 %v1709_v2, %s1663_s15 }
  0x86   : > { %v263_v17 = vpop.permute.xlu1 %262  ;;  %v183_v18 = vpop.permute.xlu0 %182  ;;  %1060 = vrot.lane.b32.xlu2 %v1714_v4, %s1663_s15 }
  0x87   : > { %v445_v29 = vpop.permute.xlu2 %444 }
  0x88   : > { %v455_v44 = vsel %vm192_vm0, %v445_v29, 0 }
  0x8c   : > { %1062 = vrot.lane.b32.xlu0 %v1738_v7, %s1663_s15 }
  0x8d   : > { %1106 = vrot.lane.b32.xlu1 %v1709_v2, %s1664_s16 }
  0x8e   : > { %v265_v20 = vpop.permute.xlu1 %264  ;;  %v185_v21 = vpop.permute.xlu0 %184  ;;  %1108 = vrot.lane.b32.xlu2 %v1714_v4, %s1664_s16 }
  0x8f   : > { %v197_v22 = vsel %vm192_vm0, %v185_v21, 0  ;;  %v187_v23 = vsel %vm186_vm3, %v183_v18, %v185_v21  ;;  %v267_v24 = vsel %vm266_vm4, %v263_v17, %v265_v20  ;;  %v275_v25 = vsel %vm192_vm0, %v265_v20, 0  ;;  %v533_v35 = vpop.permute.xlu2 %532 }
  0x90   : > { %219 = vmatpush.bf16.msra.mxu1 %v197_v22  ;;  %v194_v26 = vsel %vm192_vm0, %v187_v23, 0  ;;  %v272_v27 = vsel %vm192_vm0, %v267_v24, 0  ;;  %v1539_v24 = vld [vmem:[%s1996_s1 + $0x20] sm:$0xf]  ;;  %vm968_vm3 = vcmask 637952   ;;  %vm920_vm4 = vcmask 646144  }
  0x91   : > { %206 = vmatpush.bf16.msra.mxu0 %v194_v26 }
  0x93   : > { %1518 = vmatmul.msk.bf16.vlgmr.msra.gmra.mxu1 %vm188_vm1, %v1516_v28 }
  0x94   : > { %297 = vmatpush.bf16.msrb.mxu1 %v275_v25  ;;  %1517 = vmatmul.msk.bf16.vlgmr.msra.gmra.mxu0 %vm188_vm1, %v1516_v28 }
  0x95   : > { %284 = vmatpush.bf16.msrb.mxu0 %v272_v27  ;;  %1110 = vrot.lane.b32.xlu0 %v1738_v7, %s1664_s16 }
  0x96   : > { %1154 = vrot.lane.b32.xlu1 %v1709_v2, %s1665_s19  ;;  %v355_v30 = vpop.permute.xlu1 %354  ;;  %v353_v31 = vpop.permute.xlu0 %352  ;;  %1156 = vrot.lane.b32.xlu2 %v1714_v4, %s1665_s19 }
  0x97   : > { %v365_v32 = vsel %vm192_vm0, %v355_v30, 0  ;;  %v357_v33 = vsel %vm356_vm5, %v353_v31, %v355_v30  ;;  %v580_v46 = vpop.permute.xlu2 %579  ;;  %vm1064_vm5 = vcmask 449536  }
  0x98   : > { %v362_v34 = vsel %vm192_vm0, %v357_v33, 0  ;;  %387 = vmatpush.bf16.msra.mxu1 %v365_v32  ;;  %v590_v49 = vsel %vm192_vm0, %v580_v46, 0 }
  0x99   : > { %374 = vmatpush.bf16.msra.mxu0 %v362_v34 }
  0x9d   : > { %1158 = vrot.lane.b32.xlu0 %v1738_v7, %s1665_s19 }
  0x9e   : > { %1202 = vrot.lane.b32.xlu1 %v1709_v2, %s1666_s20  ;;  %v400_v36 = vpop.permute.xlu0 %399  ;;  %v443_v37 = vpop.permute.xlu1 %442  ;;  %1204 = vrot.lane.b32.xlu2 %v1714_v4, %s1666_s20 }
  0x9f   : > { %v402_v38 = vsel %vm401_vm6, %v398_v19, %v400_v36  ;;  %v410_v39 = vsel %vm192_vm0, %v400_v36, 0  ;;  %v447_v40 = vsel %vm446_vm7, %v443_v37, %v445_v29  ;;  %v668_v62 = vpop.permute.xlu2 %667  ;;  %vm1016_vm6 = vcmask 457728  }
  0xa0   : > { %v407_v42 = vsel %vm192_vm0, %v402_v38, 0  ;;  %432 = vmatpush.bf16.msra.mxu3 %v410_v39  ;;  %v452_v45 = vsel %vm192_vm0, %v447_v40, 0  ;;  %v1545_v39 = vld [vmem:[%s1996_s1 + $0x28] sm:$0xf]  ;;  %v1554_v40 = vld [vmem:[%s1996_s1 + $0x34] sm:$0xf] }
  0xa1   : > { %419 = vmatpush.bf16.msra.mxu2 %v407_v42  ;;  %vm1160_vm7 = vcmask 408576  }
  0xa3   : > { %1523 = vmatmul.msk.bf16.vlgmr.msrb.gmra.mxu1 %vm188_vm1, %v1521_v41  ;;  %1532 = vmatmul.msk.bf16.vlgmr.msra.gmra.mxu3 %vm188_vm1, %v1530_v43 }
  0xa4   : > { %1522 = vmatmul.msk.bf16.vlgmr.msrb.gmra.mxu0 %vm188_vm1, %v1521_v41  ;;  %1531 = vmatmul.msk.bf16.vlgmr.msra.gmra.mxu2 %vm188_vm1, %v1530_v43 }
  0xa5   : > { %477 = vmatpush.bf16.msrb.mxu1 %v455_v44  ;;  %464 = vmatpush.bf16.msrb.mxu0 %v452_v45 }
  0xa6   : > { %v490_v47 = vpop.permute.xlu1 %489  ;;  %v488_v48 = vpop.permute.xlu0 %487  ;;  %1206 = vrot.lane.b32.xlu0 %v1738_v7, %s1666_s20  ;;  %1250 = vrot.lane.b32.xlu1 %v1709_v2, %s1667_s25 }
  0xa7   : > { %v500_v50 = vsel %vm192_vm0, %v490_v47, 0  ;;  %v492_v51 = vsel %vm491_vm8, %v488_v48, %v490_v47  ;;  %1252 = vrot.lane.b32.xlu2 %v1714_v4, %s1667_s25  ;;  %v725_v1 = vpop.permute.xlu2 %724  ;;  %vm1112_vm8 = vcmask 441344  }
  0xa8   : > { %v497_v52 = vsel %vm192_vm0, %v492_v51, 0  ;;  %522 = vmatpush.bf16.msrb.mxu3 %v500_v50 }
  0xa9   : > { %509 = vmatpush.bf16.msrb.mxu2 %v497_v52 }
  0xac   : > { %612 = vmatpush.bf16.msra.mxu3 %v590_v49 }
  0xae   : > { %v535_v53 = vpop.permute.xlu0 %534  ;;  %1254 = vrot.lane.b32.xlu0 %v1738_v7, %s1667_s25  ;;  %v578_v54 = vpop.permute.xlu1 %577  ;;  %1298 = vrot.lane.b32.xlu1 %v1709_v2, %s1668_s26  ;;  %s1598_s25 = sshll.u32 %s2000_s13, 3 }
  0xaf   : > { %v537_v55 = vsel %vm536_vm9, %v533_v35, %v535_v53  ;;  %v582_v56 = vsel %vm581_vm10, %v578_v54, %v580_v46  ;;  %1300 = vrot.lane.b32.xlu2 %v1714_v4, %s1668_s26  ;;  %v545_v61 = vsel %vm192_vm0, %v535_v53, 0  ;;  %v1551_v53 = vld [vmem:[%s1996_s1 + $0x30] sm:$0xf]  ;;  %v1560_v54 = vld [vmem:[%s1996_s1 + $0x3c] sm:$0xf]  ;;  %vm1256_vm9 = vcmask 392192   ;;  %s170_s28 = scalar_lea.vmem %s1998_s3, %s1598_s25 }
  0xb0   : > { %v587_v59 = vsel %vm192_vm0, %v582_v56, 0  ;;  %v542_v60 = vsel %vm192_vm0, %v537_v55, 0  ;;  %v256_v56 = vpop.f32.mrf.mxu3  ;;  %vm1208_vm10 = vcmask 400384  }
  0xb1   : > { %599 = vmatpush.bf16.msra.mxu2 %v587_v59 }
  0xb3   : > { %1529 = vmatmul.msk.bf16.vlgmr.msra.gmra.mxu1 %vm188_vm1, %v1527_v57  ;;  %1538 = vmatmul.msk.bf16.vlgmr.msrb.gmra.mxu3 %vm188_vm1, %v1536_v58 }
  0xb4   : > { %1528 = vmatmul.msk.bf16.vlgmr.msra.gmra.mxu0 %vm188_vm1, %v1527_v57  ;;  %1537 = vmatmul.msk.bf16.vlgmr.msrb.gmra.mxu2 %vm188_vm1, %v1536_v58 }
  0xb5   : > { %567 = vmatpush.bf16.msra.mxu1 %v545_v61  ;;  %554 = vmatpush.bf16.msra.mxu0 %v542_v60  ;;  %v243_v61 = vpop.f32.mrf.mxu2 }
  0xb6   : > { %1302 = vrot.lane.b32.xlu0 %v1738_v7, %s1668_s26  ;;  %v625_v63 = vpop.permute.xlu1 %624  ;;  %v623_v0 = vpop.permute.xlu0 %622  ;;  %1346 = vrot.lane.b32.xlu1 %v1709_v2, %s1669_s4 }
  0xb7   : > { %1348 = vrot.lane.b32.xlu2 %v1714_v4, %s1669_s4  ;;  %v627_v6 = vsel %vm626_vm11, %v623_v0, %v625_v63  ;;  %vm1352_vm11 = vcmask 351232  }
  0xb8   : > { %v632_v13 = vsel %vm192_vm0, %v627_v6, 0 }
  0xbe   : > { %1350 = vrot.lane.b32.xlu0 %v1738_v7, %s1669_s4  ;;  %v670_v3 = vpop.permute.xlu0 %669  ;;  %1394 = vrot.lane.b32.xlu1 %v1709_v2, %s1670_s5  ;;  %v723_v5 = vpop.permute.xlu1 %722  ;;  %v635_v2 = vsel %vm192_vm0, %v625_v63, 0 }
  0xbf   : > { %v672_v8 = vsel %vm671_vm12, %v668_v62, %v670_v3  ;;  %v680_v9 = vsel %vm192_vm0, %v670_v3, 0  ;;  %1396 = vrot.lane.b32.xlu2 %v1714_v4, %s1670_s5  ;;  %v773_v4 = vpop.permute.xlu2 %772  ;;  %v729_v21 = vsel %vm728_vm14, %v723_v5, %v725_v1  ;;  %v258_v63 = vpop.f32.mrf.mxu3  ;;  %vm1304_vm12 = vcmask 359424  }
  0xc0   : > { %v677_v12 = vsel %vm192_vm0, %v672_v8, 0  ;;  %702 = vmatpush.bf16.msrb.mxu3 %v680_v9  ;;  %v735_v26 = vsel %vm192_vm0, %v729_v21, 0  ;;  %v245_v5 = vpop.f32.mrf.mxu2 }
  0xc1   : > { %689 = vmatpush.bf16.msrb.mxu2 %v677_v12  ;;  %v1557_v12 = vld [vmem:[%s1996_s1 + $0x38] sm:$0xf] }
  0xc3   : > { %1535 = vmatmul.msk.bf16.vlgmr.msrb.gmra.mxu1 %vm188_vm1, %v1533_v10  ;;  %1544 = vmatmul.msk.bf16.vlgmr.msra.gmra.mxu3 %vm188_vm1, %v1542_v11 }
  0xc4   : > { %1534 = vmatmul.msk.bf16.vlgmr.msrb.gmra.mxu0 %vm188_vm1, %v1533_v10  ;;  %1543 = vmatmul.msk.bf16.vlgmr.msra.gmra.mxu2 %vm188_vm1, %v1542_v11 }
  0xc5   : > { %657 = vmatpush.bf16.msrb.mxu1 %v635_v2  ;;  %644 = vmatpush.bf16.msrb.mxu0 %v632_v13  ;;  %v1566_v2 = vld [vmem:[%s1996_s1 + $0x44] sm:$0xf] }
  0xc6   : > { %1398 = vrot.lane.b32.xlu0 %v1738_v7, %s1670_s5  ;;  %v727_v14 = vpop.permute.xlu0 %726  ;;  %v771_v15 = vpop.permute.xlu1 %770  ;;  %v1548_v7 = vld [vmem:[%s1996_s1 + $0x2c] sm:$0xf] }
  0xc7   : > { %v777_v16 = vsel %vm776_vm13, %v771_v15, %v773_v4  ;;  %v821_v18 = vpop.permute.xlu2 %820  ;;  %v730_v22 = vsel %vm728_vm14, %v725_v1, %v727_v14 }
  0xc8   : > { %v783_v17 = vsel %vm192_vm0, %v777_v16, 0  ;;  %v738_v27 = vsel %vm192_vm0, %v730_v22, 0 }
  0xc9   : > { %795 = vmatpush.bf16.msra.mxu2 %v783_v17 }
  0xce   : > { %v775_v19 = vpop.permute.xlu0 %774  ;;  %v819_v20 = vpop.permute.xlu1 %818 }
  0xcf   : > { %v778_v23 = vsel %vm776_vm13, %v773_v4, %v775_v19  ;;  %v869_v28 = vpop.permute.xlu2 %868  ;;  %v825_v36 = vsel %vm824_vm2, %v819_v20, %v821_v18  ;;  %vm1400_vm13 = vcmask 343040  }
  0xd0   : > { %v786_v25 = vsel %vm192_vm0, %v778_v23, 0  ;;  %v831_v42 = vsel %vm192_vm0, %v825_v36, 0 }
  0xd1   : > { %808 = vmatpush.bf16.msra.mxu3 %v786_v25 }
  0xd3   : > { %1541 = vmatmul.msk.bf16.vlgmr.msra.gmra.mxu1 %vm188_vm1, %v1539_v24  ;;  %1550 = vmatmul.msk.bf16.vlgmr.msrb.gmra.mxu3 %vm188_vm1, %v1548_v7 }
  0xd4   : > { %1540 = vmatmul.msk.bf16.vlgmr.msra.gmra.mxu0 %vm188_vm1, %v1539_v24  ;;  %1549 = vmatmul.msk.bf16.vlgmr.msrb.gmra.mxu2 %vm188_vm1, %v1548_v7 }
  0xd5   : > { %747 = vmatpush.bf16.msra.mxu0 %v735_v26  ;;  %760 = vmatpush.bf16.msra.mxu1 %v738_v27 }
  0xd6   : > { %v823_v29 = vpop.permute.xlu0 %822  ;;  %v867_v30 = vpop.permute.xlu1 %866 }
  0xd7   : > { %v873_v31 = vsel %vm872_vm15, %v867_v30, %v869_v28  ;;  %v917_v33 = vpop.permute.xlu2 %916  ;;  %v826_v37 = vsel %vm824_vm2, %v821_v18, %v823_v29  ;;  %v1563_v30 = vld [vmem:[%s1996_s1 + $0x40] sm:$0xf] }
  0xd8   : > { %v879_v32 = vsel %vm192_vm0, %v873_v31, 0  ;;  %v834_v43 = vsel %vm192_vm0, %v826_v37, 0  ;;  %v1572_v31 = vld [vmem:[%s1996_s1 + $0x4c] sm:$0xf] }
  0xd9   : > { %891 = vmatpush.bf16.msrb.mxu2 %v879_v32 }
  0xde   : > { %v871_v34 = vpop.permute.xlu0 %870  ;;  %v915_v35 = vpop.permute.xlu1 %914 }
  0xdf   : > { %v874_v38 = vsel %vm872_vm15, %v869_v28, %v871_v34  ;;  %v965_v44 = vpop.permute.xlu2 %964  ;;  %v921_v50 = vsel %vm920_vm4, %v915_v35, %v917_v33 }
  0xe0   : > { %v882_v41 = vsel %vm192_vm0, %v874_v38, 0  ;;  %v927_v59 = vsel %vm192_vm0, %v921_v50, 0  ;;  %v1569_v50 = vld [vmem:[%s1996_s1 + $0x48] sm:$0xf] }
  0xe1   : > { %904 = vmatpush.bf16.msrb.mxu3 %v882_v41 }
  0xe3   : > { %1547 = vmatmul.msk.bf16.vlgmr.msrb.gmra.mxu1 %vm188_vm1, %v1545_v39  ;;  %1556 = vmatmul.msk.bf16.vlgmr.msra.gmra.mxu3 %vm188_vm1, %v1554_v40 }
  0xe4   : > { %1546 = vmatmul.msk.bf16.vlgmr.msrb.gmra.mxu0 %vm188_vm1, %v1545_v39  ;;  %1555 = vmatmul.msk.bf16.vlgmr.msra.gmra.mxu2 %vm188_vm1, %v1554_v40 }
  0xe5   : > { %843 = vmatpush.bf16.msrb.mxu0 %v831_v42  ;;  %856 = vmatpush.bf16.msrb.mxu1 %v834_v43 }
  0xe6   : > { %v919_v45 = vpop.permute.xlu0 %918  ;;  %v963_v46 = vpop.permute.xlu1 %962 }
  0xe7   : > { %v969_v47 = vsel %vm968_vm3, %v963_v46, %v965_v44  ;;  %v922_v51 = vsel %vm920_vm4, %v917_v33, %v919_v45  ;;  %v1013_v57 = vpop.permute.xlu2 %1012 }
  0xe8   : > { %v975_v48 = vsel %vm192_vm0, %v969_v47, 0  ;;  %v930_v60 = vsel %vm192_vm0, %v922_v51, 0  ;;  %v1578_v51 = vld [vmem:[%s1996_s1 + $0x54] sm:$0xf] }
  0xe9   : > { %987 = vmatpush.bf16.msra.mxu2 %v975_v48 }
  0xee   : > { %v967_v49 = vpop.permute.xlu0 %966 }
  0xef   : > { %v970_v52 = vsel %vm968_vm3, %v965_v44, %v967_v49  ;;  %v1011_v58 = vpop.permute.xlu1 %1010  ;;  %v1061_v0 = vpop.permute.xlu2 %1060 }
  0xf0   : > { %v978_v55 = vsel %vm192_vm0, %v970_v52, 0  ;;  %v1017_v9 = vsel %vm1016_vm6, %v1011_v58, %v1013_v57 }
  0xf1   : > { %1000 = vmatpush.bf16.msra.mxu3 %v978_v55  ;;  %v1023_v15 = vsel %vm192_vm0, %v1017_v9, 0 }
  0xf3   : > { %1553 = vmatmul.msk.bf16.vlgmr.msra.gmra.mxu1 %vm188_vm1, %v1551_v53  ;;  %1562 = vmatmul.msk.bf16.vlgmr.msrb.gmra.mxu3 %vm188_vm1, %v1560_v54 }
  0xf4   : > { %1552 = vmatmul.msk.bf16.vlgmr.msra.gmra.mxu0 %vm188_vm1, %v1551_v53  ;;  %1561 = vmatmul.msk.bf16.vlgmr.msrb.gmra.mxu2 %vm188_vm1, %v1560_v54 }
  0xf5   : > { %939 = vmatpush.bf16.msra.mxu0 %v927_v59  ;;  %952 = vmatpush.bf16.msra.mxu1 %v930_v60 }
  0xf6   : > { %v1015_v62 = vpop.permute.xlu0 %1014 }
  0xf7   : > { %v1059_v1 = vpop.permute.xlu1 %1058  ;;  %v1018_v10 = vsel %vm1016_vm6, %v1013_v57, %v1015_v62  ;;  %v1109_v4 = vpop.permute.xlu2 %1108 }
  0xf8   : > { %v1065_v3 = vsel %vm1064_vm5, %v1059_v1, %v1061_v0  ;;  %v1026_v16 = vsel %vm192_vm0, %v1018_v10, 0 }
  0xf9   : > { %v1071_v6 = vsel %vm192_vm0, %v1065_v3, 0 }
  0xfa   : > { %1083 = vmatpush.bf16.msrb.mxu2 %v1071_v6 }
  0xfe   : > { %v1063_v8 = vpop.permute.xlu0 %1062 }
  0xff   : > { %v1066_v11 = vsel %vm1064_vm5, %v1061_v0, %v1063_v8  ;;  %v1107_v14 = vpop.permute.xlu1 %1106  ;;  %v1906_v17 = vpop.f32.mrf.mxu3 }
 0x100   : > { %v1074_v13 = vsel %vm192_vm0, %v1066_v11, 0  ;;  %v1910_v18 = vpop.f32.mrf.mxu2  ;;  %v1157_v20 = vpop.permute.xlu2 %1156  ;;  %v1113_v26 = vsel %vm1112_vm8, %v1107_v14, %v1109_v4 }
 0x101   : > { %1096 = vmatpush.bf16.msrb.mxu3 %v1074_v13  ;;  %v1119_v37 = vsel %vm192_vm0, %v1113_v26, 0 }
 0x103   : > { %1559 = vmatmul.msk.bf16.vlgmr.msrb.gmra.mxu1 %vm188_vm1, %v1557_v12  ;;  %1568 = vmatmul.msk.bf16.vlgmr.msra.gmra.mxu3 %vm188_vm1, %v1566_v2 }
 0x104   : > { %1558 = vmatmul.msk.bf16.vlgmr.msrb.gmra.mxu0 %vm188_vm1, %v1557_v12  ;;  %1567 = vmatmul.msk.bf16.vlgmr.msra.gmra.mxu2 %vm188_vm1, %v1566_v2 }
 0x105   : > { %1035 = vmatpush.bf16.msrb.mxu0 %v1023_v15  ;;  %1048 = vmatpush.bf16.msrb.mxu1 %v1026_v16  ;;  %v1575_v15 = vld [vmem:[%s1996_s1 + $0x50] sm:$0xf]  ;;  %v1584_v16 = vld [vmem:[%s1996_s1 + $0x5c] sm:$0xf] }
 0x107   : > { %v1111_v19 = vpop.permute.xlu0 %1110  ;;  %v346_v23 = vpop.f32.mrf.mxu3 }
 0x108   : > { %v1155_v21 = vpop.permute.xlu1 %1154  ;;  %v333_v7 = vpop.f32.mrf.mxu2  ;;  %v1114_v27 = vsel %vm1112_vm8, %v1109_v4, %v1111_v19 }
 0x109   : > { %v1161_v22 = vsel %vm1160_vm7, %v1155_v21, %v1157_v20  ;;  %v1205_v35 = vpop.permute.xlu2 %1204  ;;  %v1122_v38 = vsel %vm192_vm0, %v1114_v27, 0 }
 0x10a   : > { %v1167_v24 = vsel %vm192_vm0, %v1161_v22, 0 }
 0x10b   : > { %1179 = vmatpush.bf16.msra.mxu2 %v1167_v24 }
 0x10f   : > { %v1159_v25 = vpop.permute.xlu0 %1158 }
 0x110   : > { %v1162_v28 = vsel %vm1160_vm7, %v1157_v20, %v1159_v25  ;;  %v221_v29 = vpop.f32.mrf.mxu1  ;;  %v1203_v39 = vpop.permute.xlu1 %1202 }
 0x111   : > { %v1170_v32 = vsel %vm192_vm0, %v1162_v28, 0  ;;  %v257_v33 = vadd.f32 %v256_v56, %v221_v29  ;;  %v208_v34 = vpop.f32.mrf.mxu0  ;;  %v1253_v43 = vpop.permute.xlu2 %1252  ;;  %v1209_v47 = vsel %vm1208_vm10, %v1203_v39, %v1205_v35  ;;  %v1590_v39 = vld [vmem:[%s1996_s1 + $0x64] sm:$0xf] }
 0x112   : > { %1192 = vmatpush.bf16.msra.mxu3 %v1170_v32  ;;  %v244_v36 = vadd.f32 %v243_v61, %v208_v34  ;;  %v1215_v58 = vsel %vm192_vm0, %v1209_v47, 0 }
 0x113   : > { %1565 = vmatmul.msk.bf16.vlgmr.msra.gmra.mxu1 %vm188_vm1, %v1563_v30  ;;  %1574 = vmatmul.msk.bf16.vlgmr.msrb.gmra.mxu3 %vm188_vm1, %v1572_v31 }
 0x114   : > { %1564 = vmatmul.msk.bf16.vlgmr.msra.gmra.mxu0 %vm188_vm1, %v1563_v30  ;;  %1573 = vmatmul.msk.bf16.vlgmr.msrb.gmra.mxu2 %vm188_vm1, %v1572_v31 }
 0x115   : > { %1131 = vmatpush.bf16.msra.mxu0 %v1119_v37  ;;  %1144 = vmatpush.bf16.msra.mxu1 %v1122_v38  ;;  %v1581_v38 = vld [vmem:[%s1996_s1 + $0x58] sm:$0xf] }
 0x118   : > { %v223_v40 = vpop.f32.mrf.mxu1  ;;  %v1207_v41 = vpop.permute.xlu0 %1206 }
 0x119   : > { %v210_v42 = vpop.f32.mrf.mxu0  ;;  %v1251_v44 = vpop.permute.xlu1 %1250  ;;  %v1210_v48 = vsel %vm1208_vm10, %v1205_v35, %v1207_v41 }
 0x11a   : > { %v1257_v45 = vsel %vm1256_vm9, %v1251_v44, %v1253_v43  ;;  %v1301_v56 = vpop.permute.xlu2 %1300  ;;  %v1218_v59 = vsel %vm192_vm0, %v1210_v48, 0 }
 0x11b   : > { %v1263_v46 = vsel %vm192_vm0, %v1257_v45, 0 }
 0x11c   : > { %1275 = vmatpush.bf16.msrb.mxu2 %v1263_v46 }
 0x120   : > { %v299_v49 = vpop.f32.mrf.mxu1  ;;  %v1255_v52 = vpop.permute.xlu0 %1254 }
 0x121   : > { %v304_v53 = vadd.f32 %v299_v49, %v257_v33  ;;  %v286_v54 = vpop.f32.mrf.mxu0  ;;  %v1258_v55 = vsel %vm1256_vm9, %v1253_v43, %v1255_v52  ;;  %v1299_v60 = vpop.permute.xlu1 %1298  ;;  %v1671_v52 = vmov 0  }
 0x122   : > { %v303_v57 = vadd.f32 %v286_v54, %v244_v36  ;;  %v1266_v62 = vsel %vm192_vm0, %v1258_v55, 0  ;;  %v1349_v8 = vpop.permute.xlu2 %1348  ;;  %v1305_v13 = vsel %vm1304_vm12, %v1299_v60, %v1301_v56  ;;  %1635 = vset.pattern.permute.xlu1 %v1671_v52  ;;  %1636 = vset.pattern.permute.xlu0 %v1671_v52 }
 0x123   : > { %v349_v61 = vadd.f32 %v1906_v17, %v304_v53  ;;  %1571 = vmatmul.msk.bf16.vlgmr.msrb.gmra.mxu1 %vm188_vm1, %v1569_v50  ;;  %1580 = vmatmul.msk.bf16.vlgmr.msra.gmra.mxu3 %vm188_vm1, %v1578_v51  ;;  %v1311_v22 = vsel %vm192_vm0, %v1305_v13, 0 }
 0x124   : > { %v348_v63 = vadd.f32 %v1910_v18, %v303_v57  ;;  %1570 = vmatmul.msk.bf16.vlgmr.msrb.gmra.mxu0 %vm188_vm1, %v1569_v50  ;;  %1579 = vmatmul.msk.bf16.vlgmr.msra.gmra.mxu2 %vm188_vm1, %v1578_v51  ;;  %v172_v51 = vld [vmem:[%s1997_s2] sm:$0xff] }
 0x125   : > { %1227 = vmatpush.bf16.msrb.mxu0 %v1215_v58  ;;  %1240 = vmatpush.bf16.msrb.mxu1 %v1218_v59 }
 0x126   : > { %v434_v0 = vpop.f32.mrf.mxu3  ;;  %1288 = vmatpush.bf16.msrb.mxu3 %v1266_v62  ;;  %1442 = vperm.xlu1 %1635, %v172_v51  }
 0x127   : > { %v421_v1 = vpop.f32.mrf.mxu2 }
 0x128   : > { %v301_v3 = vpop.f32.mrf.mxu1  ;;  %v1303_v5 = vpop.permute.xlu0 %1302 }
 0x129   : > { %v288_v6 = vpop.f32.mrf.mxu0  ;;  %v1347_v9 = vpop.permute.xlu1 %1346  ;;  %v1306_v4 = vsel %vm1304_vm12, %v1301_v56, %v1303_v5  ;;  %v1587_v56 = vld [vmem:[%s1996_s1 + $0x60] sm:$0xf] }
 0x12a   : > { %v1353_v10 = vsel %vm1352_vm11, %v1347_v9, %v1349_v8  ;;  %v1314_v23 = vsel %vm192_vm0, %v1306_v4, 0  ;;  %v1397_v30 = vpop.permute.xlu2 %1396 }
 0x12b   : > { %v1359_v11 = vsel %vm192_vm0, %v1353_v10, 0 }
 0x12c   : > { %1371 = vmatpush.bf16.msra.mxu2 %v1359_v11 }
 0x12e   : > { %v436_v12 = vpop.f32.mrf.mxu3 }
 0x12f   : > { %v423_v2 = vpop.f32.mrf.mxu2 }
 0x130   : > { %v389_v14 = vpop.f32.mrf.mxu1  ;;  %v1351_v17 = vpop.permute.xlu0 %1350 }
 0x131   : > { %v394_v18 = vadd.f32 %v389_v14, %v349_v61  ;;  %v376_v19 = vpop.f32.mrf.mxu0  ;;  %v1354_v20 = vsel %vm1352_vm11, %v1349_v8, %v1351_v17  ;;  %v1395_v31 = vpop.permute.xlu1 %1394  ;;  %v1593_v8 = vld [vmem:[%s1996_s1 + $0x68] sm:$0xf] }
 0x132   : > { %v393_v21 = vadd.f32 %v376_v19, %v348_v63  ;;  %v1362_v7 = vsel %vm192_vm0, %v1354_v20, 0  ;;  %v1401_v35 = vsel %vm1400_vm13, %v1395_v31, %v1397_v30 }
 0x133   : > { %v439_v24 = vadd.f32 %v434_v0, %v394_v18  ;;  %1577 = vmatmul.msk.bf16.vlgmr.msra.gmra.mxu1 %vm188_vm1, %v1575_v15  ;;  %1586 = vmatmul.msk.bf16.vlgmr.msrb.gmra.mxu3 %vm188_vm1, %v1584_v16  ;;  %v1407_v43 = vsel %vm192_vm0, %v1401_v35, 0 }
 0x134   : > { %v438_v25 = vadd.f32 %v421_v1, %v393_v21  ;;  %1576 = vmatmul.msk.bf16.vlgmr.msra.gmra.mxu0 %vm188_vm1, %v1575_v15  ;;  %1585 = vmatmul.msk.bf16.vlgmr.msrb.gmra.mxu2 %vm188_vm1, %v1584_v16 }
 0x135   : > { %1323 = vmatpush.bf16.msra.mxu0 %v1311_v22  ;;  %1336 = vmatpush.bf16.msra.mxu1 %v1314_v23 }
 0x136   : > { %v524_v26 = vpop.f32.mrf.mxu3  ;;  %1384 = vmatpush.bf16.msra.mxu3 %v1362_v7 }
 0x137   : > { %v511_v27 = vpop.f32.mrf.mxu2 }
 0x138   : > { %v391_v28 = vpop.f32.mrf.mxu1  ;;  %v1399_v32 = vpop.permute.xlu0 %1398 }
 0x139   : > { %v378_v29 = vpop.f32.mrf.mxu0  ;;  %v1402_v36 = vsel %vm1400_vm13, %v1397_v30, %v1399_v32 }
 0x13a   : > { %v1410_v44 = vsel %vm192_vm0, %v1402_v36, 0 }
 0x13e   : > { %v526_v33 = vpop.f32.mrf.mxu3 }
 0x13f   : > { %v513_v34 = vpop.f32.mrf.mxu2 }
 0x140   : > { %v479_v37 = vpop.f32.mrf.mxu1 }
 0x141   : > { %v484_v40 = vadd.f32 %v479_v37, %v439_v24  ;;  %v466_v41 = vpop.f32.mrf.mxu0 }
 0x142   : > { %v483_v42 = vadd.f32 %v466_v41, %v438_v25 }
 0x143   : > { %v529_v45 = vadd.f32 %v524_v26, %v484_v40  ;;  %1583 = vmatmul.msk.bf16.vlgmr.msrb.gmra.mxu1 %vm188_vm1, %v1581_v38  ;;  %1592 = vmatmul.msk.bf16.vlgmr.msra.gmra.mxu3 %vm188_vm1, %v1590_v39 }
 0x144   : > { %v528_v46 = vadd.f32 %v511_v27, %v483_v42  ;;  %1582 = vmatmul.msk.bf16.vlgmr.msrb.gmra.mxu0 %vm188_vm1, %v1581_v38  ;;  %1591 = vmatmul.msk.bf16.vlgmr.msra.gmra.mxu2 %vm188_vm1, %v1590_v39 }
 0x145   : > { %1419 = vmatpush.bf16.msrb.mxu0 %v1407_v43  ;;  %1432 = vmatpush.bf16.msrb.mxu1 %v1410_v44 }
 0x146   : > { %v614_v47 = vpop.f32.mrf.mxu3 }
 0x147   : > { %v601_v48 = vpop.f32.mrf.mxu2 }
 0x148   : > { %v481_v49 = vpop.f32.mrf.mxu1 }
 0x149   : > { %v468_v50 = vpop.f32.mrf.mxu0 }
 0x14e   : > { %v616_v53 = vpop.f32.mrf.mxu3 }
 0x14f   : > { %v603_v54 = vpop.f32.mrf.mxu2 }
 0x150   : > { %v569_v55 = vpop.f32.mrf.mxu1 }
 0x151   : > { %v574_v57 = vadd.f32 %v569_v55, %v529_v45  ;;  %v556_v58 = vpop.f32.mrf.mxu0 }
 0x152   : > { %v573_v59 = vadd.f32 %v556_v58, %v528_v46 }
 0x153   : > { %v619_v60 = vadd.f32 %v614_v47, %v574_v57  ;;  %1589 = vmatmul.msk.bf16.vlgmr.msra.gmra.mxu1 %vm188_vm1, %v1587_v56 }
 0x154   : > { %v618_v61 = vadd.f32 %v601_v48, %v573_v59  ;;  %1588 = vmatmul.msk.bf16.vlgmr.msra.gmra.mxu0 %vm188_vm1, %v1587_v56 }
 0x156   : > { %v704_v62 = vpop.f32.mrf.mxu3 }
 0x157   : > { %v691_v63 = vpop.f32.mrf.mxu2 }
 0x158   : > { %v571_v0 = vpop.f32.mrf.mxu1 }
 0x159   : > { %v558_v1 = vpop.f32.mrf.mxu0 }
 0x15e   : > { %v706_v3 = vpop.f32.mrf.mxu3 }
 0x15f   : > { %v693_v5 = vpop.f32.mrf.mxu2 }
 0x160   : > { %v659_v6 = vpop.f32.mrf.mxu1 }
 0x161   : > { %v664_v9 = vadd.f32 %v659_v6, %v619_v60  ;;  %v646_v10 = vpop.f32.mrf.mxu0 }
 0x162   : > { %v663_v11 = vadd.f32 %v646_v10, %v618_v61 }
 0x163   : > { %v709_v12 = vadd.f32 %v704_v62, %v664_v9  ;;  %1595 = vmatmul.msk.bf16.vlgmr.msrb.gmra.mxu1 %vm188_vm1, %v1593_v8 }
 0x164   : > { %v708_v2 = vadd.f32 %v691_v63, %v663_v11  ;;  %1594 = vmatmul.msk.bf16.vlgmr.msrb.gmra.mxu0 %vm188_vm1, %v1593_v8  ;;  %vm1450_vm1 = vcmask 719876  }
 0x165   : > { %vm1451_vm14 = vmor %vm1450_vm1, %vm192_vm0 }
 0x166   : > { %v810_v13 = vpop.f32.mrf.mxu3 }
 0x167   : > { %v797_v4 = vpop.f32.mrf.mxu2 }
 0x168   : > { %v661_v14 = vpop.f32.mrf.mxu1 }
 0x169   : > { %v648_v15 = vpop.f32.mrf.mxu0 }
 0x16e   : > { %v812_v16 = vpop.f32.mrf.mxu3 }
 0x16f   : > { %v799_v17 = vpop.f32.mrf.mxu2 }
 0x170   : > { %v762_v18 = vpop.f32.mrf.mxu1 }
 0x171   : > { %v767_v19 = vadd.f32 %v762_v18, %v709_v12  ;;  %v749_v20 = vpop.f32.mrf.mxu0 }
 0x172   : > { %v766_v21 = vadd.f32 %v749_v20, %v708_v2 }
 0x173   : > { %v815_v22 = vadd.f32 %v810_v13, %v767_v19 }
 0x174   : > { %v814_v23 = vadd.f32 %v797_v4, %v766_v21 }
 0x176   : > { %v906_v24 = vpop.f32.mrf.mxu3 }
 0x177   : > { %v893_v7 = vpop.f32.mrf.mxu2 }
 0x178   : > { %v764_v25 = vpop.f32.mrf.mxu1 }
 0x179   : > { %v751_v26 = vpop.f32.mrf.mxu0 }
 0x17e   : > { %v908_v27 = vpop.f32.mrf.mxu3 }
 0x17f   : > { %v895_v28 = vpop.f32.mrf.mxu2 }
 0x180   : > { %v858_v29 = vpop.f32.mrf.mxu1 }
 0x181   : > { %v863_v30 = vadd.f32 %v858_v29, %v815_v22  ;;  %v845_v31 = vpop.f32.mrf.mxu0 }
 0x182   : > { %v862_v32 = vadd.f32 %v845_v31, %v814_v23 }
 0x183   : > { %v911_v33 = vadd.f32 %v906_v24, %v863_v30 }
 0x184   : > { %v910_v34 = vadd.f32 %v893_v7, %v862_v32 }
 0x186   : > { %v1002_v35 = vpop.f32.mrf.mxu3 }
 0x187   : > { %v989_v36 = vpop.f32.mrf.mxu2 }
 0x188   : > { %v860_v37 = vpop.f32.mrf.mxu1 }
 0x189   : > { %v847_v38 = vpop.f32.mrf.mxu0 }
 0x18e   : > { %v1004_v39 = vpop.f32.mrf.mxu3 }
 0x18f   : > { %v991_v40 = vpop.f32.mrf.mxu2 }
 0x190   : > { %v954_v41 = vpop.f32.mrf.mxu1 }
 0x191   : > { %v959_v42 = vadd.f32 %v954_v41, %v911_v33  ;;  %v941_v43 = vpop.f32.mrf.mxu0 }
 0x192   : > { %v958_v44 = vadd.f32 %v941_v43, %v910_v34 }
 0x193   : > { %v1007_v45 = vadd.f32 %v1002_v35, %v959_v42 }
 0x194   : > { %v1006_v46 = vadd.f32 %v989_v36, %v958_v44 }
 0x196   : > { %v1098_v47 = vpop.f32.mrf.mxu3 }
 0x197   : > { %v1085_v48 = vpop.f32.mrf.mxu2 }
 0x198   : > { %v956_v49 = vpop.f32.mrf.mxu1  ;;  %v1443_v34 = vpop.permute.xlu1 %1442 }
 0x199   : > { %v943_v50 = vpop.f32.mrf.mxu0 }
 0x19e   : > { %v1100_v51 = vpop.f32.mrf.mxu3 }
 0x19f   : > { %v1087_v52 = vpop.f32.mrf.mxu2 }
 0x1a0   : > { %v1050_v53 = vpop.f32.mrf.mxu1 }
 0x1a1   : > { %v1037_v54 = vpop.f32.mrf.mxu0  ;;  %v1055_v2 = vadd.f32 %v1050_v53, %v1007_v45 }
 0x1a2   : > { %v1054_v4 = vadd.f32 %v1037_v54, %v1006_v46 }
 0x1a3   : > { %v1103_v14 = vadd.f32 %v1098_v47, %v1055_v2 }
 0x1a4   : > { %v1102_v15 = vadd.f32 %v1085_v48, %v1054_v4 }
 0x1a6   : > { %v1194_v55 = vpop.f32.mrf.mxu3 }
 0x1a7   : > { %v1181_v56 = vpop.f32.mrf.mxu2 }
 0x1a8   : > { %v1052_v57 = vpop.f32.mrf.mxu1 }
 0x1a9   : > { %v1039_v58 = vpop.f32.mrf.mxu0 }
 0x1ae   : > { %v1196_v59 = vpop.f32.mrf.mxu3 }
 0x1af   : > { %v1183_v60 = vpop.f32.mrf.mxu2 }
 0x1b0   : > { %v1146_v61 = vpop.f32.mrf.mxu1 }
 0x1b1   : > { %v1133_v62 = vpop.f32.mrf.mxu0  ;;  %v1151_v17 = vadd.f32 %v1146_v61, %v1103_v14 }
 0x1b2   : > { %v1150_v19 = vadd.f32 %v1133_v62, %v1102_v15 }
 0x1b3   : > { %v1199_v22 = vadd.f32 %v1194_v55, %v1151_v17 }
 0x1b4   : > { %v1198_v23 = vadd.f32 %v1181_v56, %v1150_v19 }
 0x1b6   : > { %v1290_v63 = vpop.f32.mrf.mxu3 }
 0x1b7   : > { %v1277_v0 = vpop.f32.mrf.mxu2 }
 0x1b8   : > { %v1148_v1 = vpop.f32.mrf.mxu1 }
 0x1b9   : > { %v1135_v3 = vpop.f32.mrf.mxu0 }
 0x1be   : > { %v1292_v5 = vpop.f32.mrf.mxu3 }
 0x1bf   : > { %v1279_v6 = vpop.f32.mrf.mxu2 }
 0x1c0   : > { %v1242_v8 = vpop.f32.mrf.mxu1 }
 0x1c1   : > { %v1229_v9 = vpop.f32.mrf.mxu0  ;;  %v1247_v24 = vadd.f32 %v1242_v8, %v1199_v22 }
 0x1c2   : > { %v1246_v7 = vadd.f32 %v1229_v9, %v1198_v23 }
 0x1c3   : > { %v1295_v26 = vadd.f32 %v1290_v63, %v1247_v24 }
 0x1c4   : > { %v1294_v28 = vadd.f32 %v1277_v0, %v1246_v7 }
 0x1c6   : > { %v1386_v10 = vpop.f32.mrf.mxu3 }
 0x1c7   : > { %v1373_v11 = vpop.f32.mrf.mxu2 }
 0x1c8   : > { %v1244_v12 = vpop.f32.mrf.mxu1 }
 0x1c9   : > { %v1231_v13 = vpop.f32.mrf.mxu0 }
 0x1ce   : > { %v1388_v16 = vpop.f32.mrf.mxu3 }
 0x1cf   : > { %v1375_v18 = vpop.f32.mrf.mxu2 }
 0x1d0   : > { %v1338_v20 = vpop.f32.mrf.mxu1 }
 0x1d1   : > { %v1325_v21 = vpop.f32.mrf.mxu0  ;;  %v1343_v29 = vadd.f32 %v1338_v20, %v1295_v26 }
 0x1d2   : > { %v1342_v30 = vadd.f32 %v1325_v21, %v1294_v28 }
 0x1d3   : > { %v1391_v31 = vadd.f32 %v1386_v10, %v1343_v29 }
 0x1d4   : > { %v1390_v32 = vadd.f32 %v1373_v11, %v1342_v30 }
 0x1d8   : > { %v1340_v25 = vpop.f32.mrf.mxu1 }
 0x1d9   : > { %v1327_v27 = vpop.f32.mrf.mxu0 }
 0x1e0   : > { %v1434_v33 = vpop.f32.mrf.mxu1 }
 0x1e1   : > { %v1439_v35 = vadd.f32 %v1434_v33, %v1391_v31  ;;  %v1421_v36 = vpop.f32.mrf.mxu0 }
 0x1e2   : > { %v1438_v37 = vadd.f32 %v1421_v36, %v1390_v32 }
 0x1e3   : > { %v1446_v38 = vadd.f32 %v1443_v34, %v1439_v35 }
 0x1e4   : > { %v1445_v39 = vadd.f32 %v1443_v34, %v1438_v37 }
 0x1e5   : > { %v1448_v40 = vmax.f32 %v1446_v38, 0.0 }
 0x1e6   : > { %v1447_v41 = vmax.f32 %v1445_v39, 0.0 }
 0x1e8   : > { %v1449_v42 = vpack.c.bf16 %v1448_v40, %v1447_v41  ;;  %v1436_v43 = vpop.f32.mrf.mxu1 }
 0x1e9   : > { %v1423_v44 = vpop.f32.mrf.mxu0 }
 0x1ea   : > { %1452 = vst.msk [vmem:[%s170_s28] sm:$0xff] %vm1451_vm14, %v1449_v42 }
 0x1eb PF: > { %s13_s12 = sadd.s32 1, %s1643_s12  }
 0x1ec   : > { %p10_p4 = scmp.ge.s32.totalorder %s13_s12, 4  }
 0x1ee   :  { %12 = sbr.rel (!%p10_p4) target bundleno = 1 (0x1), region = 88 }

// kernel: hourglass_forward.12
= control target key start
LH: loop header
LB: loop body
LE: loop exit
PB: predicated region body
PF: predicated region fallthrough
CT: control target
= control target key end

     0   :  { %s300_s12 = smov 0   ;;  %s323_s0 = inlined_call_operand.vmem [shape: bf16[2,1,8,64], index: 0, kind: input, shape index: {}]   ;;  %s324_s1 = inlined_call_operand.vmem [shape: bf16[1,8,8], index: 1, kind: input, shape index: {}]   ;;  %s325_s2 = inlined_call_operand.vmem [shape: f32[8,1], index: 2, kind: input, shape index: {}]   ;;  %s326_s3 = inlined_call_operand.vmem [shape: f32[2,1,8,64], index: 3, kind: output, shape index: {}]  }
   0x1 LB: > { %s251_s13 = sadd.s32 4294967295, %s277_s12   ;;  %p255_p0 = scmp.ge.s32.totalorder %s277_s12, 1  ;;  %s277_s12 = sphi %s300_s12, %s13_s12  }
   0x2   : > { %p136_p1 = scmp.lt.s32.totalorder %s277_s12, 3 }
   0x4   : > { %p137_p2 = pnand %p255_p0, %p136_p1 }
   0x5   : > { %p158_p3 = scmp.lt.s32.totalorder (!%p137_p2), %s251_s13, 1 }
   0x6   : > { %140 = sbr.rel (%p137_p2) target bundleno = 153 (0x99), region = 32 }
   0xb   : > { %v279_v0 = vmov 0   ;;  %v167_v1 = vld [vmem:[%s325_s2] sm:$0xff]  ;;  %s328_s13 = smov (!%p158_p3, %s251_s13), 1  ;;  %vm179_vm0 = vcmask 1043456   ;;  %vm175_vm1 = vcmask 64512   ;;  %vm196_vm2 = vcmask 523264  }
   0xc   : > { %270 = vset.pattern.permute.xlu0 %v279_v0  ;;  %s256_s16 = sshll.u32 %s328_s13, 2  ;;  %v169_v4 = vld [vmem:[%s324_s1] sm:$0xf]  ;;  %s257_s22 = sshll.u32 %s328_s13, 3 }
   0xd   : > { %172 = vperm.xlu0 %270, %v167_v1   ;;  %s161_s19 = scalar_lea.vmem %s323_s0, %s256_s16  ;;  %s165_s25 = scalar_lea.vmem %s326_s3, %s257_s22 }
   0xe   : > { %v168_v2 = vld [vmem:[%s161_s19] sm:$0xf] }
   0xf   : > { %v181_v3 = vsel %vm179_vm0, %v168_v2, 0 }
  0x10   : > { %190 = vmatpush.bf16.msra.mxu0 %v181_v3 }
  0x13   : > { %258 = vmatmul.msk.bf16.vlgmr.msra.gmra.mxu0 %vm175_vm1, %v169_v4 }
  0x7f   : > { %v173_v5 = vpop.permute.xlu0 %172 }
  0x90   : > { %v192_v6 = vpop.f32.mrf.mxu0 }
  0x91   : > { %v193_v7 = vadd.f32 %v192_v6, %v173_v5 }
  0x93   : > { %197 = vst.msk [vmem:[%s165_s25] sm:$0xff] %vm196_vm2, %v193_v7 }
  0x98   : > { %v194_v8 = vpop.f32.mrf.mxu0 }
  0x99 PF: > { %s13_s12 = sadd.s32 1, %s277_s12  }
  0x9a   : > { %p10_p4 = scmp.ge.s32.totalorder %s13_s12, 4  }
  0x9c   :  { %12 = sbr.rel (!%p10_p4) target bundleno = 1 (0x1), region = 62 }

// kernel: hourglass_forward.10
= control target key start
LH: loop header
LB: loop body
LE: loop exit
PB: predicated region body
PF: predicated region fallthrough
CT: control target
= control target key end

     0   :  { %s1418_s12 = smov 0   ;;  %s1618_s0 = inlined_call_operand.vmem [shape: bf16[2,8,8,40], index: 0, kind: input, shape index: {}]   ;;  %s1619_s1 = inlined_call_operand.vmem [shape: bf16[27,16,8], index: 1, kind: input, shape index: {}]   ;;  %s1620_s2 = inlined_call_operand.vmem [shape: f32[16,1], index: 2, kind: input, shape index: {}]   ;;  %s1621_s3 = inlined_call_operand.vmem [shape: bf16[2,1,16,27], index: 3, kind: output, shape index: {}]  }
   0x1 LB: > { %s1129_s13 = sadd.s32 4294967295, %s1388_s12   ;;  %p1133_p0 = scmp.ge.s32.totalorder %s1388_s12, 1  ;;  %s1388_s12 = sphi %s1418_s12, %s13_s12  }
   0x2   : > { %p137_p1 = scmp.lt.s32.totalorder %s1388_s12, 3 }
   0x4   : > { %p138_p2 = pnand %p1133_p0, %p137_p1 }
   0x5   : > { %p161_p3 = scmp.lt.s32.totalorder (!%p138_p2), %s1129_s13, 1  ;;  %s1390_s18 = smov (!%p138_p2), 127  }
   0x6   : > { %141 = sbr.rel (%p138_p2) target bundleno = 383 (0x17f), region = 32  ;;  %s1391_s19 = smov (!%p138_p2), 125  }
   0x7   : > { %s1392_s20 = smov (!%p138_p2), 119   ;;  %s1393_s21 = smov (!%p138_p2), 124  }
   0x8   : > { %s1394_s22 = smov (!%p138_p2), 118   ;;  %s1395_s25 = smov (!%p138_p2), 116  }
   0x9   : > { %s1396_s26 = smov (!%p138_p2), 115  }
   0xb   : > { %s1623_s13 = smov (!%p161_p3, %s1129_s13), 1  ;;  %vm191_vm0 = vcmask 1043456   ;;  %v1337_v20 = vld [vmem:[%s1619_s1 + $0x8] sm:$0xff]  ;;  %vm187_vm1 = vcmask 64512   ;;  %v1336_v25 = vld [vmem:[%s1619_s1] sm:$0xff]  ;;  %v1339_v27 = vld [vmem:[%s1619_s1 + $0x18] sm:$0xff] }
   0xc   : > { %s1334_s14 = sshll.u32 %s1623_s13, 5  ;;  %v1341_v29 = vld [vmem:[%s1619_s1 + $0x28] sm:$0xff]  ;;  %v1338_v38 = vld [vmem:[%s1619_s1 + $0x10] sm:$0xff]  ;;  %v1340_v40 = vld [vmem:[%s1619_s1 + $0x20] sm:$0xff]  ;;  %s1335_s6 = sshll.u32 %s1623_s13, 3  ;;  %vm1071_vm2 = vcmask 216064  }
   0xd   : > { %s1432_s17 = scalar_lea.vmem %s1618_s0, %s1334_s14  ;;  %v1345_v32 = vld [vmem:[%s1619_s1 + $0x48] sm:$0xff]  ;;  %v1343_v49 = vld [vmem:[%s1619_s1 + $0x38] sm:$0xff]  ;;  %v1342_v54 = vld [vmem:[%s1619_s1 + $0x30] sm:$0xff]  ;;  %s170_s9 = scalar_lea.vmem %s1621_s3, %s1335_s6 }
   0xe   : > { %v1138_v0 = vld [vmem:[%s1432_s17 + $0x4] sm:$0xf]  ;;  %v1158_v1 = vld [vmem:[%s1432_s17 + $0x8] sm:$0xf]  ;;  %v1437_v4 = vld [vmem:[%s1432_s17 + $0x10] sm:$0xf] }
   0xf   : > { %v243_v2 = vunpack.c.l.b16 %v1138_v0  ;;  %v310_v3 = vunpack.c.l.b16 %v1158_v1  ;;  %v1173_v5 = vld [vmem:[%s1432_s17 + $0xc] sm:$0xf]  ;;  %v508_v6 = vunpack.c.l.b16 %v1437_v4  ;;  %v1445_v12 = vld [vmem:[%s1432_s17 + $0x14] sm:$0xf]  ;;  %v1451_v15 = vld [vmem:[%s1432_s17 + $0x18] sm:$0xf] }
  0x10   : > { %v377_v10 = vunpack.c.l.b16 %v1173_v5  ;;  %v575_v13 = vunpack.c.l.b16 %v1445_v12  ;;  %v706_v16 = vunpack.c.l.b16 %v1451_v15  ;;  %v174_v17 = vld [vmem:[%s1432_s17] sm:$0xf]  ;;  %v193_v18 = vsel %vm191_vm0, %v1138_v0, 0  ;;  %v1463_v22 = vld [vmem:[%s1432_s17 + $0x1c] sm:$0xf]  ;;  %v1349_v50 = vld [vmem:[%s1619_s1 + $0x68] sm:$0xff] }
  0x11   : > { %v244_v7 = vpack.c.b16 %v243_v2, %v243_v2  ;;  %v311_v8 = vpack.c.b16 %v310_v3, %v310_v3  ;;  %v509_v9 = vpack.c.b16 %v508_v6, %v508_v6  ;;  %v218_v19 = vsel %vm191_vm0, %v174_v17, 0  ;;  %202 = vmatpush.bf16.msra.mxu0 %v193_v18  ;;  %v1344_v55 = vld [vmem:[%s1619_s1 + $0x40] sm:$0xff]  ;;  %v1347_v61 = vld [vmem:[%s1619_s1 + $0x58] sm:$0xff]  ;;  %v1353_v63 = vld [vmem:[%s1619_s1 + $0x88] sm:$0xff] }
  0x12   : > { %v378_v11 = vpack.c.b16 %v377_v10, %v377_v10  ;;  %v576_v14 = vpack.c.b16 %v575_v13, %v575_v13  ;;  %227 = vmatpush.bf16.msra.mxu1 %v218_v19  ;;  %v707_v21 = vpack.c.b16 %v706_v16, %v706_v16  ;;  %v837_v23 = vunpack.c.l.b16 %v1463_v22  ;;  %v1346_v2 = vld [vmem:[%s1619_s1 + $0x50] sm:$0xff]  ;;  %v1348_v3 = vld [vmem:[%s1619_s1 + $0x60] sm:$0xff]  ;;  %v1351_v10 = vld [vmem:[%s1619_s1 + $0x78] sm:$0xff] }
  0x13   : > { %245 = vrot.lane.b32.xlu0 %v244_v7, %s1390_s18  ;;  %312 = vrot.lane.b32.xlu1 %v311_v8, %s1391_s19  ;;  %v283_v26 = vsel %vm191_vm0, %v1158_v1, 0  ;;  %v350_v28 = vsel %vm191_vm0, %v1173_v5, 0  ;;  %v481_v31 = vsel %vm191_vm0, %v1437_v4, 0  ;;  %v548_v46 = vsel %vm191_vm0, %v1445_v12, 0 }
  0x14   : > { %510 = vrot.lane.b32.xlu2 %v509_v9, %s1392_s20  ;;  %1145 = vmatmul.msk.bf16.vlgmr.msra.gmra.mxu0 %vm187_vm1, %v1337_v20  ;;  %v838_v24 = vpack.c.b16 %v837_v23, %v837_v23  ;;  %v679_v51 = vsel %vm191_vm0, %v1451_v15, 0  ;;  %v810_v0 = vsel %vm191_vm0, %v1463_v22, 0  ;;  %v1352_v15 = vld [vmem:[%s1619_s1 + $0x80] sm:$0xff]  ;;  %v1361_v22 = vld [vmem:[%s1619_s1 + $0xc8] sm:$0xff] }
  0x15   : > { %1150 = vmatmul.msk.bf16.vlgmr.msra.gmra.mxu1 %vm187_vm1, %v1336_v25  ;;  %292 = vmatpush.bf16.msra.mxu3 %v283_v26  ;;  %v1356_v25 = vld [vmem:[%s1619_s1 + $0xa0] sm:$0xff] }
  0x16   : > { %359 = vmatpush.bf16.msrb.mxu1 %v350_v28  ;;  %v1397_v28 = vmov 0  }
  0x17   : > { %1379 = vset.pattern.permute.xlu1 %v1397_v28  ;;  %1380 = vset.pattern.permute.xlu2 %v1397_v28 }
  0x18   : > { %1165 = vmatmul.msk.bf16.vlgmr.msra.gmra.mxu3 %vm187_vm1, %v1339_v27  ;;  %v172_v27 = vld [vmem:[%s1620_s2] sm:$0xff]  ;;  %1381 = vset.pattern.permute.xlu0 %v1397_v28 }
  0x1a   : > { %490 = vmatpush.bf16.msra.mxu1 %v481_v31  ;;  %v1360_v31 = vld [vmem:[%s1619_s1 + $0xc0] sm:$0xff] }
  0x1b   : > { %379 = vrot.lane.b32.xlu0 %v378_v11, %s1390_s18  ;;  %411 = vrot.lane.b32.xlu1 %v378_v11, %s1391_s19 }
  0x1c   : > { %443 = vrot.lane.b32.xlu2 %v378_v11, %s1393_s21  ;;  %v1357_v11 = vld [vmem:[%s1619_s1 + $0xa8] sm:$0xff] }
  0x23   : > { %641 = vrot.lane.b32.xlu0 %v576_v14, %s1394_s22  ;;  %577 = vrot.lane.b32.xlu1 %v576_v14, %s1390_s18 }
  0x24   : > { %609 = vrot.lane.b32.xlu2 %v576_v14, %s1392_s20  ;;  %v1350_v14 = vld [vmem:[%s1619_s1 + $0x70] sm:$0xff] }
  0x25   : > { %1180 = vmatmul.msk.bf16.vlgmr.msrb.gmra.mxu1 %vm187_vm1, %v1341_v29  ;;  %v1359_v29 = vld [vmem:[%s1619_s1 + $0xb8] sm:$0xff] }
  0x2b   : > { %772 = vrot.lane.b32.xlu0 %v707_v21, %s1395_s25  ;;  %708 = vrot.lane.b32.xlu1 %v707_v21, %s1391_s19 }
  0x2c   : > { %740 = vrot.lane.b32.xlu2 %v707_v21, %s1392_s20  ;;  %v1355_v21 = vld [vmem:[%s1619_s1 + $0x98] sm:$0xff] }
  0x33   : > { %903 = vrot.lane.b32.xlu0 %v838_v24, %s1393_s21  ;;  %839 = vrot.lane.b32.xlu1 %v838_v24, %s1390_s18 }
  0x34   : > { %871 = vrot.lane.b32.xlu2 %v838_v24, %s1391_s19 }
  0x35   : > { %1209 = vmatmul.msk.bf16.vlgmr.msra.gmra.mxu1 %vm187_vm1, %v1345_v32  ;;  %v1362_v32 = vld [vmem:[%s1619_s1 + $0xd0] sm:$0xff] }
  0x3b   : > { %935 = vrot.lane.b32.xlu0 %v838_v24, %s1392_s20  ;;  %1031 = vrot.lane.b32.xlu1 %v838_v24, %s1396_s26 }
  0x3c   : > { %967 = vrot.lane.b32.xlu2 %v838_v24, %s1394_s22 }
  0x43   : > { %999 = vrot.lane.b32.xlu0 %v838_v24, %s1395_s25  ;;  %v1354_v24 = vld [vmem:[%s1619_s1 + $0x90] sm:$0xff]  ;;  %1057 = vperm.xlu1 %1379, %v172_v27  }
  0x6e   : > { %v511_v30 = vpop.permute.xlu2 %510 }
  0x6f   : > { %v516_v44 = vsel %vm191_vm0, %v511_v30, 0  ;;  %v1358_v30 = vld [vmem:[%s1619_s1 + $0xb0] sm:$0xff] }
  0x76   : > { %v444_v33 = vpop.permute.xlu2 %443 }
  0x77   : > { %v449_v36 = vsel %vm191_vm0, %v444_v33, 0 }
  0x7e   : > { %v610_v41 = vpop.permute.xlu2 %609 }
  0x7f   : > { %v615_v42 = vsel %vm191_vm0, %v610_v41, 0 }
  0x80   : > { %624 = vmatpush.bf16.msrb.mxu1 %v615_v42 }
  0x83   : > { %1238 = vmatmul.msk.bf16.vlgmr.msrb.gmra.mxu1 %vm187_vm1, %v1349_v50 }
  0x85   : > { %v246_v34 = vpop.permute.xlu0 %245  ;;  %v313_v35 = vpop.permute.xlu1 %312 }
  0x86   : > { %v251_v37 = vsel %vm191_vm0, %v246_v34, 0  ;;  %v318_v39 = vsel %vm191_vm0, %v313_v35, 0  ;;  %v741_v58 = vpop.permute.xlu2 %740 }
  0x87   : > { %260 = vmatpush.bf16.msra.mxu2 %v251_v37  ;;  %327 = vmatpush.bf16.msrb.mxu0 %v318_v39  ;;  %v746_v59 = vsel %vm191_vm0, %v741_v58, 0 }
  0x88   : > { %755 = vmatpush.bf16.msra.mxu1 %v746_v59 }
  0x8a   : > { %1157 = vmatmul.msk.bf16.vlgmr.msra.gmra.mxu2 %vm187_vm1, %v1338_v38  ;;  %1172 = vmatmul.msk.bf16.vlgmr.msrb.gmra.mxu0 %vm187_vm1, %v1340_v40 }
  0x8b   : > { %458 = vmatpush.bf16.msra.mxu0 %v449_v36  ;;  %v173_v36 = vld [vmem:[%s1620_s2 + $0x8] sm:$0xff] }
  0x8c   : > { %1062 = vperm.xlu2 %1380, %v173_v36  }
  0x8d   : > { %v380_v43 = vpop.permute.xlu0 %379  ;;  %v412_v45 = vpop.permute.xlu1 %411 }
  0x8e   : > { %v385_v47 = vsel %vm191_vm0, %v380_v43, 0  ;;  %v417_v48 = vsel %vm191_vm0, %v412_v45, 0  ;;  %v872_v8 = vpop.permute.xlu2 %871 }
  0x8f   : > { %394 = vmatpush.bf16.msrb.mxu2 %v385_v47  ;;  %426 = vmatpush.bf16.msrb.mxu3 %v417_v48  ;;  %v877_v9 = vsel %vm191_vm0, %v872_v8, 0 }
  0x90   : > { %886 = vmatpush.bf16.msrb.mxu1 %v877_v9 }
  0x91   : > { %v204_v34 = vpop.f32.mrf.mxu0 }
  0x92   : > { %1194 = vmatmul.msk.bf16.vlgmr.msrb.gmra.mxu3 %vm187_vm1, %v1343_v49  ;;  %v229_v33 = vpop.f32.mrf.mxu1 }
  0x93   : > { %525 = vmatpush.bf16.msra.mxu2 %v516_v44  ;;  %557 = vmatpush.bf16.msra.mxu3 %v548_v46  ;;  %v230_v49 = vadd.f32 %v229_v33, %v204_v34 }
  0x94   : > { %1267 = vmatmul.msk.bf16.vlgmr.msra.gmra.mxu1 %vm187_vm1, %v1353_v63 }
  0x95   : > { %v642_v52 = vpop.permute.xlu0 %641  ;;  %v578_v53 = vpop.permute.xlu1 %577 }
  0x96   : > { %v583_v56 = vsel %vm191_vm0, %v578_v53, 0  ;;  %v647_v57 = vsel %vm191_vm0, %v642_v52, 0  ;;  %v968_v17 = vpop.permute.xlu2 %967 }
  0x97   : > { %688 = vmatpush.bf16.msrb.mxu3 %v679_v51  ;;  %592 = vmatpush.bf16.msrb.mxu0 %v583_v56  ;;  %v973_v18 = vsel %vm191_vm0, %v968_v17, 0 }
  0x99   : > { %v206_v37 = vpop.f32.mrf.mxu0 }
  0x9a   : > { %1187 = vmatmul.msk.bf16.vlgmr.msrb.gmra.mxu2 %vm187_vm1, %v1342_v54  ;;  %1201 = vmatmul.msk.bf16.vlgmr.msra.gmra.mxu0 %vm187_vm1, %v1344_v55  ;;  %v231_v35 = vpop.f32.mrf.mxu1 }
  0x9b   : > { %656 = vmatpush.bf16.msrb.mxu2 %v647_v57  ;;  %v294_v38 = vpop.f32.mrf.mxu3  ;;  %v232_v55 = vadd.f32 %v231_v35, %v206_v37 }
  0x9d   : > { %v709_v60 = vpop.permute.xlu1 %708  ;;  %v773_v1 = vpop.permute.xlu0 %772 }
  0x9e   : > { %v714_v62 = vsel %vm191_vm0, %v709_v60, 0  ;;  %v778_v4 = vsel %vm191_vm0, %v773_v1, 0 }
  0x9f   : > { %723 = vmatpush.bf16.msra.mxu0 %v714_v62 }
  0xa2   : > { %1224 = vmatmul.msk.bf16.vlgmr.msra.gmra.mxu3 %vm187_vm1, %v1347_v61  ;;  %v361_v39 = vpop.f32.mrf.mxu1 }
  0xa3   : > { %819 = vmatpush.bf16.msra.mxu3 %v810_v0  ;;  %v296_v41 = vpop.f32.mrf.mxu3 }
  0xa4   : > { %1296 = vmatmul.msk.bf16.vlgmr.msrb.gmra.mxu1 %vm187_vm1, %v1357_v11 }
  0xa5   : > { %v904_v5 = vpop.permute.xlu0 %903  ;;  %v840_v6 = vpop.permute.xlu1 %839 }
  0xa6   : > { %v845_v7 = vsel %vm191_vm0, %v840_v6, 0  ;;  %v909_v16 = vsel %vm191_vm0, %v904_v5, 0 }
  0xaa   : > { %1216 = vmatmul.msk.bf16.vlgmr.msra.gmra.mxu2 %vm187_vm1, %v1346_v2  ;;  %1231 = vmatmul.msk.bf16.vlgmr.msrb.gmra.mxu0 %vm187_vm1, %v1348_v3  ;;  %v363_v43 = vpop.f32.mrf.mxu1 }
  0xab   : > { %787 = vmatpush.bf16.msra.mxu2 %v778_v4  ;;  %854 = vmatpush.bf16.msrb.mxu0 %v845_v7 }
  0xad   : > { %v936_v12 = vpop.permute.xlu0 %935  ;;  %v1032_v23 = vpop.permute.xlu1 %1031 }
  0xae   : > { %v941_v13 = vsel %vm191_vm0, %v936_v12, 0  ;;  %v1037_v26 = vsel %vm191_vm0, %v1032_v23, 0 }
  0xb2   : > { %1253 = vmatmul.msk.bf16.vlgmr.msrb.gmra.mxu3 %vm187_vm1, %v1351_v10  ;;  %v492_v48 = vpop.f32.mrf.mxu1 }
  0xb3   : > { %950 = vmatpush.bf16.msrb.mxu3 %v941_v13 }
  0xb5   : > { %v1000_v19 = vpop.permute.xlu0 %999 }
  0xb6   : > { %v1005_v20 = vsel %vm191_vm0, %v1000_v19, 0 }
  0xb7   : > { %1014 = vmatpush.bf16.msra.mxu1 %v1005_v20 }
  0xba   : > { %1245 = vmatmul.msk.bf16.vlgmr.msrb.gmra.mxu2 %vm187_vm1, %v1350_v14  ;;  %1260 = vmatmul.msk.bf16.vlgmr.msra.gmra.mxu0 %vm187_vm1, %v1352_v15  ;;  %v494_v56 = vpop.f32.mrf.mxu1 }
  0xbb   : > { %918 = vmatpush.bf16.msrb.mxu2 %v909_v16  ;;  %982 = vmatpush.bf16.msra.mxu0 %v973_v18 }
  0xbc   : > { %1324 = vmatmul.msk.bf16.vlgmr.msra.gmra.mxu1 %vm187_vm1, %v1361_v22 }
  0xc2   : > { %1282 = vmatmul.msk.bf16.vlgmr.msra.gmra.mxu3 %vm187_vm1, %v1355_v21 }
  0xca   : > { %1274 = vmatmul.msk.bf16.vlgmr.msra.gmra.mxu2 %vm187_vm1, %v1354_v24  ;;  %1289 = vmatmul.msk.bf16.vlgmr.msrb.gmra.mxu0 %vm187_vm1, %v1356_v25 }
  0xcb   : > { %1046 = vmatpush.bf16.msra.mxu2 %v1037_v26 }
  0xd2   : > { %1310 = vmatmul.msk.bf16.vlgmr.msrb.gmra.mxu3 %vm187_vm1, %v1359_v29 }
  0xda   : > { %1303 = vmatmul.msk.bf16.vlgmr.msrb.gmra.mxu2 %vm187_vm1, %v1358_v30  ;;  %1317 = vmatmul.msk.bf16.vlgmr.msra.gmra.mxu0 %vm187_vm1, %v1360_v31 }
  0xea   : > { %1331 = vmatmul.msk.bf16.vlgmr.msra.gmra.mxu2 %vm187_vm1, %v1362_v32 }
 0x100   : > { %v626_v2 = vpop.f32.mrf.mxu1 }
 0x107   : > { %v329_v40 = vpop.f32.mrf.mxu0 }
 0x108   : > { %v628_v13 = vpop.f32.mrf.mxu1 }
 0x10d   : > { %v262_v42 = vpop.f32.mrf.mxu2 }
 0x10e   : > { %v267_v50 = vadd.f32 %v262_v42, %v230_v49 }
 0x10f   : > { %v331_v44 = vpop.f32.mrf.mxu0 }
 0x110   : > { %v299_v53 = vadd.f32 %v294_v38, %v267_v50 }
 0x111   : > { %v757_v23 = vpop.f32.mrf.mxu1 }
 0x112   : > { %v334_v57 = vadd.f32 %v329_v40, %v299_v53 }
 0x114   : > { %v366_v61 = vadd.f32 %v361_v39, %v334_v57 }
 0x115   : > { %v264_v45 = vpop.f32.mrf.mxu2  ;;  %v428_v46 = vpop.f32.mrf.mxu3 }
 0x116   : > { %v268_v58 = vadd.f32 %v264_v45, %v232_v55 }
 0x117   : > { %v460_v47 = vpop.f32.mrf.mxu0 }
 0x118   : > { %v300_v62 = vadd.f32 %v296_v41, %v268_v58 }
 0x119   : > { %v759_v32 = vpop.f32.mrf.mxu1 }
 0x11a   : > { %v335_v1 = vadd.f32 %v331_v44, %v300_v62 }
 0x11c   : > { %v367_v6 = vadd.f32 %v363_v43, %v335_v1 }
 0x11d   : > { %v396_v51 = vpop.f32.mrf.mxu2  ;;  %v430_v52 = vpop.f32.mrf.mxu3 }
 0x11e   : > { %v401_v0 = vadd.f32 %v396_v51, %v366_v61 }
 0x11f   : > { %v462_v54 = vpop.f32.mrf.mxu0 }
 0x120   : > { %v433_v3 = vadd.f32 %v428_v46, %v401_v0 }
 0x121   : > { %v888_v42 = vpop.f32.mrf.mxu1 }
 0x122   : > { %v465_v7 = vadd.f32 %v460_v47, %v433_v3 }
 0x124   : > { %v497_v10 = vadd.f32 %v492_v48, %v465_v7 }
 0x125   : > { %v398_v59 = vpop.f32.mrf.mxu2  ;;  %v559_v60 = vpop.f32.mrf.mxu3 }
 0x126   : > { %v402_v8 = vadd.f32 %v398_v59, %v367_v6 }
 0x127   : > { %v594_v63 = vpop.f32.mrf.mxu0 }
 0x128   : > { %v434_v11 = vadd.f32 %v430_v52, %v402_v8 }
 0x129   : > { %v890_v51 = vpop.f32.mrf.mxu1 }
 0x12a   : > { %v466_v16 = vadd.f32 %v462_v54, %v434_v11 }
 0x12c   : > { %v498_v19 = vadd.f32 %v494_v56, %v466_v16 }
 0x12d   : > { %v527_v4 = vpop.f32.mrf.mxu2  ;;  %v561_v5 = vpop.f32.mrf.mxu3 }
 0x12e   : > { %v532_v14 = vadd.f32 %v527_v4, %v497_v10  ;;  %v1058_v4 = vpop.permute.xlu1 %1057 }
 0x12f   : > { %v596_v9 = vpop.f32.mrf.mxu0 }
 0x130   : > { %v564_v17 = vadd.f32 %v559_v60, %v532_v14 }
 0x132   : > { %v599_v21 = vadd.f32 %v594_v63, %v564_v17 }
 0x134   : > { %v631_v25 = vadd.f32 %v626_v2, %v599_v21 }
 0x135   : > { %v529_v12 = vpop.f32.mrf.mxu2  ;;  %v690_v15 = vpop.f32.mrf.mxu3 }
 0x136   : > { %v533_v22 = vadd.f32 %v529_v12, %v498_v19 }
 0x137   : > { %v725_v18 = vpop.f32.mrf.mxu0 }
 0x138   : > { %v565_v26 = vadd.f32 %v561_v5, %v533_v22 }
 0x139   : > { %v1016_v62 = vpop.f32.mrf.mxu1 }
 0x13a   : > { %v600_v30 = vadd.f32 %v596_v9, %v565_v26 }
 0x13c   : > { %v632_v33 = vadd.f32 %v628_v13, %v600_v30 }
 0x13d   : > { %v658_v20 = vpop.f32.mrf.mxu2  ;;  %v692_v24 = vpop.f32.mrf.mxu3 }
 0x13e   : > { %v663_v27 = vadd.f32 %v658_v20, %v631_v25 }
 0x13f   : > { %v727_v29 = vpop.f32.mrf.mxu0 }
 0x140   : > { %v695_v31 = vadd.f32 %v690_v15, %v663_v27  ;;  %v1063_v15 = vpop.permute.xlu2 %1062 }
 0x141   : > { %v1018_v10 = vpop.f32.mrf.mxu1 }
 0x142   : > { %v730_v35 = vadd.f32 %v725_v18, %v695_v31 }
 0x144   : > { %v762_v39 = vadd.f32 %v757_v23, %v730_v35 }
 0x145   : > { %v660_v28 = vpop.f32.mrf.mxu2  ;;  %v821_v34 = vpop.f32.mrf.mxu3 }
 0x146   : > { %v664_v36 = vadd.f32 %v660_v28, %v632_v33 }
 0x147   : > { %v856_v38 = vpop.f32.mrf.mxu0 }
 0x148   : > { %v696_v40 = vadd.f32 %v692_v24, %v664_v36 }
 0x14a   : > { %v731_v43 = vadd.f32 %v727_v29, %v696_v40 }
 0x14c   : > { %v763_v47 = vadd.f32 %v759_v32, %v731_v43 }
 0x14d   : > { %v789_v37 = vpop.f32.mrf.mxu2  ;;  %v823_v45 = vpop.f32.mrf.mxu3 }
 0x14e   : > { %v794_v41 = vadd.f32 %v789_v37, %v762_v39 }
 0x14f   : > { %v858_v48 = vpop.f32.mrf.mxu0 }
 0x150   : > { %v826_v46 = vadd.f32 %v821_v34, %v794_v41 }
 0x152   : > { %v861_v49 = vadd.f32 %v856_v38, %v826_v46 }
 0x154   : > { %v893_v53 = vadd.f32 %v888_v42, %v861_v49 }
 0x155   : > { %v791_v44 = vpop.f32.mrf.mxu2  ;;  %v952_v55 = vpop.f32.mrf.mxu3 }
 0x156   : > { %v795_v50 = vadd.f32 %v791_v44, %v763_v47 }
 0x157   : > { %v984_v58 = vpop.f32.mrf.mxu0 }
 0x158   : > { %v827_v54 = vadd.f32 %v823_v45, %v795_v50 }
 0x15a   : > { %v862_v57 = vadd.f32 %v858_v48, %v827_v54 }
 0x15c   : > { %v894_v61 = vadd.f32 %v890_v51, %v862_v57 }
 0x15d   : > { %v920_v52 = vpop.f32.mrf.mxu2  ;;  %v954_v1 = vpop.f32.mrf.mxu3 }
 0x15e   : > { %v925_v56 = vadd.f32 %v920_v52, %v893_v53 }
 0x15f   : > { %v986_v5 = vpop.f32.mrf.mxu0 }
 0x160   : > { %v957_v59 = vadd.f32 %v952_v55, %v925_v56 }
 0x162   : > { %v989_v63 = vadd.f32 %v984_v58, %v957_v59 }
 0x164   : > { %v1021_v2 = vadd.f32 %v1016_v62, %v989_v63 }
 0x165   : > { %v922_v60 = vpop.f32.mrf.mxu2 }
 0x166   : > { %v926_v0 = vadd.f32 %v922_v60, %v894_v61 }
 0x168   : > { %v958_v3 = vadd.f32 %v954_v1, %v926_v0 }
 0x16a   : > { %v990_v8 = vadd.f32 %v986_v5, %v958_v3 }
 0x16c   : > { %v1022_v12 = vadd.f32 %v1018_v10, %v990_v8 }
 0x16d   : > { %v1048_v6 = vpop.f32.mrf.mxu2 }
 0x16e   : > { %v1053_v7 = vadd.f32 %v1048_v6, %v1021_v2 }
 0x170   : > { %v1065_v9 = vadd.f32 %v1058_v4, %v1053_v7 }
 0x172   : > { %v1067_v11 = vmax.f32 %v1065_v9, 0.0 }
 0x174   : > { %v1069_v13 = vpack.c.bf16 %v1067_v11, %v1067_v11 }
 0x175   : > { %v1050_v14 = vpop.f32.mrf.mxu2 }
 0x176   : > { %1072 = vst.msk [vmem:[%s170_s9] sm:$0xf] %vm1071_vm2, %v1069_v13  ;;  %v1054_v16 = vadd.f32 %v1050_v14, %v1022_v12 }
 0x178   : > { %v1066_v17 = vadd.f32 %v1063_v15, %v1054_v16 }
 0x17a   : > { %v1068_v18 = vmax.f32 %v1066_v17, 0.0 }
 0x17c   : > { %v1070_v19 = vpack.c.bf16 %v1068_v18, %v1068_v18 }
 0x17e   : > { %1073 = vst.msk [vmem:[%s170_s9 + $0x4] sm:$0xf] %vm1071_vm2, %v1070_v19 }
 0x17f PF: > { %s13_s12 = sadd.s32 1, %s1388_s12  }
 0x180   : > { %p10_p4 = scmp.ge.s32.totalorder %s13_s12, 4  }
 0x182   :  { %12 = sbr.rel (!%p10_p4) target bundleno = 1 (0x1), region = 95 }

// kernel: hourglass_forward.11
= control target key start
LH: loop header
LB: loop body
LE: loop exit
PB: predicated region body
PF: predicated region fallthrough
CT: control target
= control target key end

     0   :  { %s1383_s12 = smov 0   ;;  %s1521_s0 = inlined_call_operand.vmem [shape: bf16[2,1,16,106], index: 0, kind: input, shape index: {}]   ;;  %s1522_s1 = inlined_call_operand.vmem [shape: bf16[27,16,16], index: 1, kind: input, shape index: {}]   ;;  %s1523_s2 = inlined_call_operand.vmem [shape: f32[16,1], index: 2, kind: input, shape index: {}]   ;;  %s1524_s3 = inlined_call_operand.vmem [shape: bf16[2,1,16,64], index: 3, kind: output, shape index: {}]  }
   0x1 LB: > { %s1059_s13 = sadd.s32 4294967295, %s1334_s12   ;;  %p1063_p0 = scmp.ge.s32.totalorder %s1334_s12, 1  ;;  %s1334_s12 = sphi %s1383_s12, %s13_s12  }
   0x2   : > { %p137_p1 = scmp.lt.s32.totalorder %s1334_s12, 3 }
   0x4   : > { %p138_p2 = pnand %p1063_p0, %p137_p1 }
   0x5   : > { %p161_p3 = scmp.lt.s32.totalorder (!%p138_p2), %s1059_s13, 1  ;;  %s1336_s18 = smov (!%p138_p2), 126  }
   0x6   : > { %141 = sbr.rel (%p138_p2) target bundleno = 384 (0x180), region = 32  ;;  %s1337_s19 = smov (!%p138_p2), 124  }
   0x7   : > { %s1338_s20 = smov (!%p138_p2), 123   ;;  %s1339_s21 = smov (!%p138_p2), 127  }
   0x8   : > { %s1340_s22 = smov (!%p138_p2), 120   ;;  %s1341_s23 = smov (!%p138_p2), 122  }
   0x9   : > { %s1342_s24 = smov (!%p138_p2), 119   ;;  %s1343_s25 = smov (!%p138_p2), 111  }
   0xa   : > { %s1344_s26 = smov (!%p138_p2), 118   ;;  %s1345_s27 = smov (!%p138_p2), 112  }
   0xb   : > { %s1526_s13 = smov (!%p161_p3, %s1059_s13), 1  ;;  %s1346_s28 = smov 110   ;;  %v1264_v1 = vld [vmem:[%s1522_s1] sm:$0xff]  ;;  %vm194_vm0 = vcmask 130048   ;;  %v1269_v4 = vld [vmem:[%s1522_s1 + $0x28] sm:$0xff]  ;;  %v1266_v7 = vld [vmem:[%s1522_s1 + $0x10] sm:$0xff] }
   0xc   : > { %s1261_s14 = sshll.u32 %s1526_s13, 3  ;;  %s1347_s29 = smov 106   ;;  %v1267_v8 = vld [vmem:[%s1522_s1 + $0x18] sm:$0xff]  ;;  %v1265_v12 = vld [vmem:[%s1522_s1 + $0x8] sm:$0xff]  ;;  %v1270_v15 = vld [vmem:[%s1522_s1 + $0x30] sm:$0xff]  ;;  %v1362_v49 = vmov 0  }
   0xd   : > { %s165_s17 = scalar_lea.vmem %s1521_s0, %s1261_s14  ;;  %s1348_s30 = smov 108   ;;  %v1271_v17 = vld [vmem:[%s1522_s1 + $0x38] sm:$0xff]  ;;  %v1268_v19 = vld [vmem:[%s1522_s1 + $0x20] sm:$0xff]  ;;  %v1273_v22 = vld [vmem:[%s1522_s1 + $0x48] sm:$0xff]  ;;  %1327 = vset.pattern.permute.xlu0 %v1362_v49  ;;  %1326 = vset.pattern.permute.xlu2 %v1362_v49  ;;  %vm1001_vm1 = vcmask 519168  }
   0xe   : > { %v1263_v0 = vld [vmem:[%s165_s17] sm:$0xff]  ;;  %s1349_s4 = smov 107   ;;  %s1350_s5 = smov 104   ;;  %v1274_v24 = vld [vmem:[%s1522_s1 + $0x50] sm:$0xff]  ;;  %v1275_v26 = vld [vmem:[%s1522_s1 + $0x58] sm:$0xff] }
   0xf   : > { %243 = vrot.lane.b32.xlu0 %v1263_v0, %s1336_s18  ;;  %273 = vrot.lane.b32.xlu1 %v1263_v0, %s1337_s19  ;;  %s1351_s6 = smov 96   ;;  %s1352_s7 = smov 103   ;;  %v1272_v28 = vld [vmem:[%s1522_s1 + $0x40] sm:$0xff]  ;;  %v1277_v29 = vld [vmem:[%s1522_s1 + $0x68] sm:$0xff] }
  0x10   : > { %303 = vrot.lane.b32.xlu2 %v1263_v0, %s1338_s20  ;;  %228 = vmatpush.bf16.msra.mxu1 %v1263_v0  ;;  %s1353_s8 = smov 102   ;;  %s1354_s9 = smov 95   ;;  %v1278_v32 = vld [vmem:[%s1522_s1 + $0x70] sm:$0xff]  ;;  %v1279_v33 = vld [vmem:[%s1522_s1 + $0x78] sm:$0xff]  ;;  %v1276_v37 = vld [vmem:[%s1522_s1 + $0x60] sm:$0xff] }
  0x11   : > { %s1355_s10 = smov 91   ;;  %s1356_s11 = smov 94   ;;  %v1281_v38 = vld [vmem:[%s1522_s1 + $0x88] sm:$0xff]  ;;  %v1282_v41 = vld [vmem:[%s1522_s1 + $0x90] sm:$0xff]  ;;  %v1283_v42 = vld [vmem:[%s1522_s1 + $0x98] sm:$0xff] }
  0x12   : > { %s1357_s15 = smov 92   ;;  %s1358_s16 = smov 90   ;;  %v1280_v45 = vld [vmem:[%s1522_s1 + $0x80] sm:$0xff]  ;;  %v1285_v46 = vld [vmem:[%s1522_s1 + $0xa8] sm:$0xff]  ;;  %v1286_v50 = vld [vmem:[%s1522_s1 + $0xb0] sm:$0xff] }
  0x13   : > { %s1359_s17 = smov 86   ;;  %s1360_s18 = smov 88   ;;  %1083 = vmatmul.msk.bf16.vlgmr.msra.gmra.mxu1 %vm194_vm0, %v1264_v1  ;;  %v173_v48 = vld [vmem:[%s1523_s2 + $0x8] sm:$0xff]  ;;  %v1287_v51 = vld [vmem:[%s1522_s1 + $0xb8] sm:$0xff]  ;;  %v1284_v52 = vld [vmem:[%s1522_s1 + $0xa0] sm:$0xff] }
  0x14   : > { %s1361_s19 = smov 87   ;;  %v1289_v53 = vld [vmem:[%s1522_s1 + $0xc8] sm:$0xff]  ;;  %v1290_v54 = vld [vmem:[%s1522_s1 + $0xd0] sm:$0xff]  ;;  %v1288_v55 = vld [vmem:[%s1522_s1 + $0xc0] sm:$0xff] }
  0x15   : > { %v172_v57 = vld [vmem:[%s1523_s2] sm:$0xff] }
  0x17   : > { %191 = vrot.lane.b32.xlu0 %v1263_v0, %s1339_s21  ;;  %363 = vrot.lane.b32.xlu1 %v1263_v0, %s1340_s22 }
  0x18   : > { %333 = vrot.lane.b32.xlu2 %v1263_v0, %s1341_s23 }
  0x1f   : > { %393 = vrot.lane.b32.xlu0 %v1263_v0, %s1342_s24  ;;  %483 = vrot.lane.b32.xlu1 %v1263_v0, %s1343_s25 }
  0x20   : > { %423 = vrot.lane.b32.xlu2 %v1263_v0, %s1344_s26 }
  0x27   : > { %453 = vrot.lane.b32.xlu0 %v1263_v0, %s1345_s27  ;;  %513 = vrot.lane.b32.xlu1 %v1263_v0, %s1346_s28 }
  0x28   : > { %603 = vrot.lane.b32.xlu2 %v1263_v0, %s1347_s29 }
  0x2f   : > { %543 = vrot.lane.b32.xlu0 %v1263_v0, %s1348_s30  ;;  %573 = vrot.lane.b32.xlu1 %v1263_v0, %s1349_s4 }
  0x30   : > { %633 = vrot.lane.b32.xlu2 %v1263_v0, %s1350_s5  ;;  %s170_s5 = scalar_lea.vmem %s1524_s3, %s1261_s14 }
  0x37   : > { %723 = vrot.lane.b32.xlu0 %v1263_v0, %s1351_s6  ;;  %663 = vrot.lane.b32.xlu1 %v1263_v0, %s1352_s7 }
  0x38   : > { %693 = vrot.lane.b32.xlu2 %v1263_v0, %s1353_s8 }
  0x3f   : > { %753 = vrot.lane.b32.xlu0 %v1263_v0, %s1354_s9  ;;  %843 = vrot.lane.b32.xlu1 %v1263_v0, %s1355_s10 }
  0x40   : > { %783 = vrot.lane.b32.xlu2 %v1263_v0, %s1356_s11 }
  0x47   : > { %813 = vrot.lane.b32.xlu0 %v1263_v0, %s1357_s15  ;;  %873 = vrot.lane.b32.xlu1 %v1263_v0, %s1358_s16 }
  0x48   : > { %963 = vrot.lane.b32.xlu2 %v1263_v0, %s1359_s17 }
  0x4f   : > { %903 = vrot.lane.b32.xlu0 %v1263_v0, %s1360_s18  ;;  %933 = vrot.lane.b32.xlu1 %v1263_v0, %s1361_s19 }
  0x50   : > { %987 = vperm.xlu2 %1326, %v172_v57  }
  0x57   : > { %992 = vperm.xlu0 %1327, %v173_v48  }
  0x6a   : > { %v304_v2 = vpop.permute.xlu2 %303 }
  0x72   : > { %v334_v3 = vpop.permute.xlu2 %333 }
  0x73   : > { %346 = vmatpush.bf16.msrb.mxu1 %v334_v3 }
  0x76   : > { %1111 = vmatmul.msk.bf16.vlgmr.msrb.gmra.mxu1 %vm194_vm0, %v1269_v4 }
  0x7a   : > { %v424_v9 = vpop.permute.xlu2 %423 }
  0x81   : > { %v244_v5 = vpop.permute.xlu0 %243  ;;  %v274_v6 = vpop.permute.xlu1 %273 }
  0x82   : > { %256 = vmatpush.bf16.msra.mxu2 %v244_v5  ;;  %286 = vmatpush.bf16.msra.mxu3 %v274_v6  ;;  %v604_v13 = vpop.permute.xlu2 %603 }
  0x85   : > { %1090 = vmatmul.msk.bf16.vlgmr.msra.gmra.mxu2 %vm194_vm0, %v1266_v7  ;;  %1097 = vmatmul.msk.bf16.vlgmr.msra.gmra.mxu3 %vm194_vm0, %v1267_v8 }
  0x89   : > { %v192_v10 = vpop.permute.xlu0 %191  ;;  %v364_v11 = vpop.permute.xlu1 %363 }
  0x8a   : > { %205 = vmatpush.bf16.msra.mxu0 %v192_v10  ;;  %376 = vmatpush.bf16.msrb.mxu2 %v364_v11  ;;  %v634_v18 = vpop.permute.xlu2 %633 }
  0x8d   : > { %1078 = vmatmul.msk.bf16.vlgmr.msra.gmra.mxu0 %vm194_vm0, %v1265_v12 }
  0x8e   : > { %316 = vmatpush.bf16.msrb.mxu0 %v304_v2 }
  0x90   : > { %v230_v56 = vpop.f32.mrf.mxu1 }
  0x91   : > { %v394_v14 = vpop.permute.xlu0 %393  ;;  %v484_v16 = vpop.permute.xlu1 %483 }
  0x92   : > { %436 = vmatpush.bf16.msra.mxu0 %v424_v9  ;;  %406 = vmatpush.bf16.msrb.mxu3 %v394_v14  ;;  %v694_v23 = vpop.permute.xlu2 %693 }
  0x93   : > { %496 = vmatpush.bf16.msra.mxu2 %v484_v16 }
  0x95   : > { %1118 = vmatmul.msk.bf16.vlgmr.msrb.gmra.mxu2 %vm194_vm0, %v1270_v15  ;;  %1125 = vmatmul.msk.bf16.vlgmr.msrb.gmra.mxu3 %vm194_vm0, %v1271_v17 }
  0x97   : > { %616 = vmatpush.bf16.msrb.mxu2 %v604_v13 }
  0x98   : > { %v232_v58 = vpop.f32.mrf.mxu1 }
  0x99   : > { %v454_v20 = vpop.permute.xlu0 %453  ;;  %v514_v21 = vpop.permute.xlu1 %513 }
  0x9a   : > { %466 = vmatpush.bf16.msra.mxu1 %v454_v20  ;;  %526 = vmatpush.bf16.msra.mxu3 %v514_v21  ;;  %v784_v36 = vpop.permute.xlu2 %783 }
  0x9d   : > { %1104 = vmatmul.msk.bf16.vlgmr.msrb.gmra.mxu0 %vm194_vm0, %v1268_v19  ;;  %1139 = vmatmul.msk.bf16.vlgmr.msra.gmra.mxu1 %vm194_vm0, %v1273_v22 }
  0x9e   : > { %646 = vmatpush.bf16.msrb.mxu3 %v634_v18 }
  0xa1   : > { %v544_v25 = vpop.permute.xlu0 %543  ;;  %v574_v27 = vpop.permute.xlu1 %573 }
  0xa2   : > { %556 = vmatpush.bf16.msrb.mxu0 %v544_v25  ;;  %586 = vmatpush.bf16.msrb.mxu1 %v574_v27  ;;  %v964_v44 = vpop.permute.xlu2 %963 }
  0xa5   : > { %1146 = vmatmul.msk.bf16.vlgmr.msra.gmra.mxu2 %vm194_vm0, %v1274_v24  ;;  %1153 = vmatmul.msk.bf16.vlgmr.msra.gmra.mxu3 %vm194_vm0, %v1275_v26 }
  0xa6   : > { %706 = vmatpush.bf16.msra.mxu1 %v694_v23 }
  0xa9   : > { %v724_v30 = vpop.permute.xlu0 %723  ;;  %v664_v31 = vpop.permute.xlu1 %663 }
  0xaa   : > { %736 = vmatpush.bf16.msra.mxu2 %v724_v30 }
  0xad   : > { %1132 = vmatmul.msk.bf16.vlgmr.msra.gmra.mxu0 %vm194_vm0, %v1272_v28  ;;  %1167 = vmatmul.msk.bf16.vlgmr.msrb.gmra.mxu1 %vm194_vm0, %v1277_v29 }
  0xae   : > { %676 = vmatpush.bf16.msra.mxu0 %v664_v31 }
  0xb1   : > { %v754_v34 = vpop.permute.xlu0 %753  ;;  %v844_v35 = vpop.permute.xlu1 %843 }
  0xb2   : > { %766 = vmatpush.bf16.msra.mxu3 %v754_v34 }
  0xb5   : > { %1174 = vmatmul.msk.bf16.vlgmr.msrb.gmra.mxu2 %vm194_vm0, %v1278_v32  ;;  %1181 = vmatmul.msk.bf16.vlgmr.msrb.gmra.mxu3 %vm194_vm0, %v1279_v33 }
  0xb6   : > { %856 = vmatpush.bf16.msrb.mxu2 %v844_v35 }
  0xb9   : > { %v814_v39 = vpop.permute.xlu0 %813  ;;  %v874_v40 = vpop.permute.xlu1 %873 }
  0xba   : > { %826 = vmatpush.bf16.msrb.mxu1 %v814_v39  ;;  %886 = vmatpush.bf16.msrb.mxu3 %v874_v40 }
  0xbd   : > { %1160 = vmatmul.msk.bf16.vlgmr.msrb.gmra.mxu0 %vm194_vm0, %v1276_v37  ;;  %1195 = vmatmul.msk.bf16.vlgmr.msra.gmra.mxu1 %vm194_vm0, %v1281_v38 }
  0xbe   : > { %796 = vmatpush.bf16.msrb.mxu0 %v784_v36 }
  0xc1   : > { %v934_v43 = vpop.permute.xlu1 %933  ;;  %v904_v47 = vpop.permute.xlu0 %903 }
  0xc2   : > { %946 = vmatpush.bf16.msra.mxu1 %v934_v43 }
  0xc5   : > { %1202 = vmatmul.msk.bf16.vlgmr.msra.gmra.mxu2 %vm194_vm0, %v1282_v41  ;;  %1209 = vmatmul.msk.bf16.vlgmr.msra.gmra.mxu3 %vm194_vm0, %v1283_v42 }
  0xc6   : > { %976 = vmatpush.bf16.msra.mxu2 %v964_v44 }
  0xcd   : > { %1188 = vmatmul.msk.bf16.vlgmr.msra.gmra.mxu0 %vm194_vm0, %v1280_v45  ;;  %1223 = vmatmul.msk.bf16.vlgmr.msrb.gmra.mxu1 %vm194_vm0, %v1285_v46 }
  0xce   : > { %916 = vmatpush.bf16.msra.mxu0 %v904_v47 }
  0xd5   : > { %1230 = vmatmul.msk.bf16.vlgmr.msrb.gmra.mxu2 %vm194_vm0, %v1286_v50  ;;  %1237 = vmatmul.msk.bf16.vlgmr.msrb.gmra.mxu3 %vm194_vm0, %v1287_v51 }
  0xdd   : > { %1216 = vmatmul.msk.bf16.vlgmr.msrb.gmra.mxu0 %vm194_vm0, %v1284_v52  ;;  %1251 = vmatmul.msk.bf16.vlgmr.msra.gmra.mxu1 %vm194_vm0, %v1289_v53 }
  0xe5   : > { %1258 = vmatmul.msk.bf16.vlgmr.msra.gmra.mxu2 %vm194_vm0, %v1290_v54 }
  0xed   : > { %1244 = vmatmul.msk.bf16.vlgmr.msra.gmra.mxu0 %vm194_vm0, %v1288_v55 }
  0xf3   : > { %v348_v59 = vpop.f32.mrf.mxu1 }
  0xfb   : > { %v350_v63 = vpop.f32.mrf.mxu1 }
 0x108   : > { %v258_v60 = vpop.f32.mrf.mxu2  ;;  %v288_v61 = vpop.f32.mrf.mxu3 }
 0x10a   : > { %v207_v62 = vpop.f32.mrf.mxu0 }
 0x10b   : > { %v231_v7 = vadd.f32 %v230_v56, %v207_v62 }
 0x10d   : > { %v263_v8 = vadd.f32 %v258_v60, %v231_v7 }
 0x10f   : > { %v293_v12 = vadd.f32 %v288_v61, %v263_v8 }
 0x110   : > { %v260_v0 = vpop.f32.mrf.mxu2  ;;  %v290_v1 = vpop.f32.mrf.mxu3 }
 0x112   : > { %v209_v2 = vpop.f32.mrf.mxu0 }
 0x113   : > { %v233_v13 = vadd.f32 %v232_v58, %v209_v2 }
 0x115   : > { %v264_v16 = vadd.f32 %v260_v0, %v233_v13 }
 0x117   : > { %v294_v21 = vadd.f32 %v290_v1, %v264_v16 }
 0x118   : > { %v378_v3 = vpop.f32.mrf.mxu2  ;;  %v408_v4 = vpop.f32.mrf.mxu3 }
 0x11a   : > { %v318_v5 = vpop.f32.mrf.mxu0  ;;  %v468_v6 = vpop.f32.mrf.mxu1 }
 0x11b   : > { %v323_v15 = vadd.f32 %v318_v5, %v293_v12 }
 0x11d   : > { %v353_v19 = vadd.f32 %v348_v59, %v323_v15 }
 0x11f   : > { %v383_v22 = vadd.f32 %v378_v3, %v353_v19 }
 0x120   : > { %v380_v9 = vpop.f32.mrf.mxu2  ;;  %v410_v10 = vpop.f32.mrf.mxu3 }
 0x121   : > { %v413_v26 = vadd.f32 %v408_v4, %v383_v22 }
 0x122   : > { %v320_v11 = vpop.f32.mrf.mxu0  ;;  %v470_v14 = vpop.f32.mrf.mxu1 }
 0x123   : > { %v324_v23 = vadd.f32 %v320_v11, %v294_v21 }
 0x125   : > { %v354_v27 = vadd.f32 %v350_v63, %v324_v23 }
 0x127   : > { %v384_v31 = vadd.f32 %v380_v9, %v354_v27  ;;  %v988_v27 = vpop.permute.xlu2 %987 }
 0x128   : > { %v498_v17 = vpop.f32.mrf.mxu2  ;;  %v528_v18 = vpop.f32.mrf.mxu3 }
 0x129   : > { %v414_v35 = vadd.f32 %v410_v10, %v384_v31 }
 0x12a   : > { %v438_v20 = vpop.f32.mrf.mxu0  ;;  %v588_v24 = vpop.f32.mrf.mxu1 }
 0x12b   : > { %v443_v30 = vadd.f32 %v438_v20, %v413_v26 }
 0x12d   : > { %v473_v32 = vadd.f32 %v468_v6, %v443_v30 }
 0x12f   : > { %v503_v37 = vadd.f32 %v498_v17, %v473_v32 }
 0x130   : > { %v500_v25 = vpop.f32.mrf.mxu2  ;;  %v530_v29 = vpop.f32.mrf.mxu3 }
 0x131   : > { %v533_v40 = vadd.f32 %v528_v18, %v503_v37 }
 0x132   : > { %v440_v28 = vpop.f32.mrf.mxu0  ;;  %v590_v34 = vpop.f32.mrf.mxu1 }
 0x133   : > { %v444_v38 = vadd.f32 %v440_v28, %v414_v35 }
 0x135   : > { %v474_v41 = vadd.f32 %v470_v14, %v444_v38  ;;  %v993_v38 = vpop.permute.xlu0 %992 }
 0x137   : > { %v504_v46 = vadd.f32 %v500_v25, %v474_v41 }
 0x138   : > { %v618_v33 = vpop.f32.mrf.mxu2  ;;  %v648_v39 = vpop.f32.mrf.mxu3 }
 0x139   : > { %v534_v49 = vadd.f32 %v530_v29, %v504_v46 }
 0x13a   : > { %v558_v36 = vpop.f32.mrf.mxu0  ;;  %v708_v45 = vpop.f32.mrf.mxu1 }
 0x13b   : > { %v563_v43 = vadd.f32 %v558_v36, %v533_v40 }
 0x13d   : > { %v593_v47 = vadd.f32 %v588_v24, %v563_v43 }
 0x13f   : > { %v623_v51 = vadd.f32 %v618_v33, %v593_v47 }
 0x140   : > { %v620_v42 = vpop.f32.mrf.mxu2  ;;  %v650_v48 = vpop.f32.mrf.mxu3 }
 0x141   : > { %v653_v55 = vadd.f32 %v648_v39, %v623_v51 }
 0x142   : > { %v560_v44 = vpop.f32.mrf.mxu0  ;;  %v710_v54 = vpop.f32.mrf.mxu1 }
 0x143   : > { %v564_v52 = vadd.f32 %v560_v44, %v534_v49 }
 0x145   : > { %v594_v56 = vadd.f32 %v590_v34, %v564_v52 }
 0x147   : > { %v624_v60 = vadd.f32 %v620_v42, %v594_v56 }
 0x148   : > { %v738_v50 = vpop.f32.mrf.mxu2  ;;  %v768_v59 = vpop.f32.mrf.mxu3 }
 0x149   : > { %v654_v63 = vadd.f32 %v650_v48, %v624_v60 }
 0x14a   : > { %v678_v53 = vpop.f32.mrf.mxu0  ;;  %v828_v0 = vpop.f32.mrf.mxu1 }
 0x14b   : > { %v683_v57 = vadd.f32 %v678_v53, %v653_v55 }
 0x14d   : > { %v713_v62 = vadd.f32 %v708_v45, %v683_v57 }
 0x14f   : > { %v743_v1 = vadd.f32 %v738_v50, %v713_v62 }
 0x150   : > { %v740_v58 = vpop.f32.mrf.mxu2  ;;  %v770_v4 = vpop.f32.mrf.mxu3 }
 0x151   : > { %v773_v6 = vadd.f32 %v768_v59, %v743_v1 }
 0x152   : > { %v680_v61 = vpop.f32.mrf.mxu0  ;;  %v830_v10 = vpop.f32.mrf.mxu1 }
 0x153   : > { %v684_v2 = vadd.f32 %v680_v61, %v654_v63 }
 0x155   : > { %v714_v7 = vadd.f32 %v710_v54, %v684_v2 }
 0x157   : > { %v744_v9 = vadd.f32 %v740_v58, %v714_v7 }
 0x158   : > { %v858_v3 = vpop.f32.mrf.mxu2  ;;  %v888_v15 = vpop.f32.mrf.mxu3 }
 0x159   : > { %v774_v14 = vadd.f32 %v770_v4, %v744_v9 }
 0x15a   : > { %v798_v5 = vpop.f32.mrf.mxu0  ;;  %v948_v20 = vpop.f32.mrf.mxu1 }
 0x15b   : > { %v803_v8 = vadd.f32 %v798_v5, %v773_v6 }
 0x15d   : > { %v833_v11 = vadd.f32 %v828_v0, %v803_v8 }
 0x15f   : > { %v863_v16 = vadd.f32 %v858_v3, %v833_v11 }
 0x160   : > { %v860_v12 = vpop.f32.mrf.mxu2  ;;  %v890_v26 = vpop.f32.mrf.mxu3 }
 0x161   : > { %v893_v18 = vadd.f32 %v888_v15, %v863_v16 }
 0x162   : > { %v800_v13 = vpop.f32.mrf.mxu0  ;;  %v950_v34 = vpop.f32.mrf.mxu1 }
 0x163   : > { %v804_v17 = vadd.f32 %v800_v13, %v774_v14 }
 0x165   : > { %v834_v19 = vadd.f32 %v830_v10, %v804_v17 }
 0x167   : > { %v864_v24 = vadd.f32 %v860_v12, %v834_v19 }
 0x168   : > { %v978_v23 = vpop.f32.mrf.mxu2 }
 0x169   : > { %v894_v29 = vadd.f32 %v890_v26, %v864_v24 }
 0x16a   : > { %v918_v21 = vpop.f32.mrf.mxu0 }
 0x16b   : > { %v923_v22 = vadd.f32 %v918_v21, %v893_v18 }
 0x16d   : > { %v953_v25 = vadd.f32 %v948_v20, %v923_v22 }
 0x16f   : > { %v983_v28 = vadd.f32 %v978_v23, %v953_v25 }
 0x170   : > { %v980_v37 = vpop.f32.mrf.mxu2 }
 0x171   : > { %v995_v30 = vadd.f32 %v988_v27, %v983_v28 }
 0x172   : > { %v920_v31 = vpop.f32.mrf.mxu0 }
 0x173   : > { %v997_v32 = vmax.f32 %v995_v30, 0.0  ;;  %v924_v33 = vadd.f32 %v920_v31, %v894_v29 }
 0x175   : > { %v999_v35 = vpack.c.bf16 %v997_v32, %v997_v32  ;;  %v954_v36 = vadd.f32 %v950_v34, %v924_v33 }
 0x177   : > { %1002 = vst.msk [vmem:[%s170_s5] sm:$0xf] %vm1001_vm1, %v999_v35  ;;  %v984_v39 = vadd.f32 %v980_v37, %v954_v36 }
 0x179   : > { %v996_v40 = vadd.f32 %v993_v38, %v984_v39 }
 0x17b   : > { %v998_v41 = vmax.f32 %v996_v40, 0.0 }
 0x17d   : > { %v1000_v42 = vpack.c.bf16 %v998_v41, %v998_v41 }
 0x17f   : > { %1003 = vst.msk [vmem:[%s170_s5 + $0x4] sm:$0xf] %vm1001_vm1, %v1000_v42 }
 0x180 PF: > { %s13_s12 = sadd.s32 1, %s1334_s12  }
 0x181   : > { %p10_p4 = scmp.ge.s32.totalorder %s13_s12, 4  }
 0x183   :  { %12 = sbr.rel (!%p10_p4) target bundleno = 1 (0x1), region = 88 }

// kernel: squeeze.312
= control target key start
LH: loop header
LB: loop body
LE: loop exit
PB: predicated region body
PF: predicated region fallthrough
CT: control target
= control target key end

     0   :  { %s1179_s22 = smov 112   ;;  %s1180_s23 = smov 104   ;;  %vm35_vm0 = vcmask 64512   ;;  %s2383_s0 = inlined_call_operand.vmem [shape: f32[2,1,4,512], index: 0, kind: input, shape index: {}]   ;;  %s2384_s1 = inlined_call_operand.vmem [shape: f32[2,4,8,8,8], index: 1, kind: output, shape index: {}]  }
   0x1   :  { %v891_v0 = vld [vmem:[%s2383_s0 + $0x4] sm:$0xf]  ;;  %v32_v1 = vld [vmem:[%s2383_s0] sm:$0xf]  ;;  %v887_v2 = vld [vmem:[%s2383_s0 + $0x14] sm:$0xf] }
   0x2   :  { %31 = vst [vmem:[#allocation0 + $0x8] sm:$0xf] %v891_v0  ;;  %v888_v3 = vld [vmem:[%s2383_s0 + $0x10] sm:$0xf]  ;;  %v889_v4 = vld [vmem:[%s2383_s0 + $0xc] sm:$0xf] }
   0x3   :  { %33 = vst [vmem:[#allocation0] sm:$0xf] %v32_v1  ;;  %v890_v5 = vld [vmem:[%s2383_s0 + $0x8] sm:$0xf]  ;;  %v885_v6 = vld [vmem:[%s2383_s0 + $0x1c] sm:$0xf] }
   0x4   :  { %15 = vst [vmem:[#allocation0 + $0x28] sm:$0xf] %v887_v2  ;;  %v886_v7 = vld [vmem:[%s2383_s0 + $0x18] sm:$0xf]  ;;  %s1178_s0 = smov 120   ;;  %s1181_s24 = smov 96  }
   0x5   :  { %19 = vst [vmem:[#allocation0 + $0x20] sm:$0xf] %v888_v3  ;;  %s1182_s25 = smov 88   ;;  %s1183_s26 = smov 80  }
   0x6   :  { %23 = vst [vmem:[#allocation0 + $0x18] sm:$0xf] %v889_v4  ;;  %s1184_s27 = smov 72   ;;  %s1185_s28 = smov 64  }
   0x7   :  { %27 = vst [vmem:[#allocation0 + $0x10] sm:$0xf] %v890_v5  ;;  %s1186_s29 = smov 56   ;;  %s1187_s9 = smov 48  }
   0x8   :  { %7 = vst [vmem:[#allocation0 + $0x38] sm:$0xf] %v885_v6  ;;  %s1188_s18 = smov 40   ;;  %s1191_s13 = smov 16  }
   0x9   :  { %11 = vst [vmem:[#allocation0 + $0x30] sm:$0xf] %v886_v7 }
   0xa   :  { %v1227_v8 = vld.sshfl [vmem:[#allocation0] sm:$0xff pattern:$0xb3a29180]  }
   0xb   :  { %121 = vrot.lane.b32.xlu0 %v1227_v8, %s1178_s0  ;;  %172 = vrot.lane.b32.xlu2 %v1227_v8, %s1179_s22 }
   0xc   :  { %v1231_v9 = vld.sshfl [vmem:[#allocation0 + $0x20] sm:$0xff pattern:$0xb3a29180]  }
   0xd   :  { %147 = vrot.lane.b32.xlu1 %v1231_v9, %s1178_s0 }
   0xe   :  { %v1234_v10 = vld.sshfl [vmem:[#allocation0 + $0x10] sm:$0xff pattern:$0xb3a29180]  }
  0x10   :  { %v1236_v11 = vld.sshfl [vmem:[#allocation0 + $0x30] sm:$0xff pattern:$0xb3a29180]  }
  0x13   :  { %134 = vrot.lane.b32.xlu0 %v1234_v10, %s1178_s0  ;;  %185 = vrot.lane.b32.xlu2 %v1234_v10, %s1179_s22 }
  0x15   :  { %160 = vrot.lane.b32.xlu1 %v1236_v11, %s1178_s0 }
  0x1b   :  { %198 = vrot.lane.b32.xlu0 %v1231_v9, %s1179_s22  ;;  %223 = vrot.lane.b32.xlu2 %v1227_v8, %s1180_s23 }
  0x1d   :  { %211 = vrot.lane.b32.xlu1 %v1236_v11, %s1179_s22 }
  0x23   :  { %236 = vrot.lane.b32.xlu0 %v1234_v10, %s1180_s23  ;;  %262 = vrot.lane.b32.xlu2 %v1236_v11, %s1180_s23 }
  0x25   :  { %249 = vrot.lane.b32.xlu1 %v1231_v9, %s1180_s23 }
  0x2b   :  { %274 = vrot.lane.b32.xlu0 %v1227_v8, %s1181_s24  ;;  %300 = vrot.lane.b32.xlu2 %v1231_v9, %s1181_s24 }
  0x2d   :  { %287 = vrot.lane.b32.xlu1 %v1234_v10, %s1181_s24 }
  0x33   :  { %313 = vrot.lane.b32.xlu0 %v1236_v11, %s1181_s24  ;;  %338 = vrot.lane.b32.xlu2 %v1234_v10, %s1182_s25 }
  0x35   :  { %325 = vrot.lane.b32.xlu1 %v1227_v8, %s1182_s25 }
  0x3b   :  { %351 = vrot.lane.b32.xlu0 %v1231_v9, %s1182_s25  ;;  %376 = vrot.lane.b32.xlu2 %v1227_v8, %s1183_s26 }
  0x3d   :  { %364 = vrot.lane.b32.xlu1 %v1236_v11, %s1182_s25  ;;  %s1190_s25 = smov 24  }
  0x43   :  { %389 = vrot.lane.b32.xlu0 %v1234_v10, %s1183_s26  ;;  %415 = vrot.lane.b32.xlu2 %v1236_v11, %s1183_s26 }
  0x45   :  { %402 = vrot.lane.b32.xlu1 %v1231_v9, %s1183_s26  ;;  %s1189_s26 = smov 32  }
  0x4b   :  { %427 = vrot.lane.b32.xlu0 %v1227_v8, %s1184_s27  ;;  %453 = vrot.lane.b32.xlu2 %v1231_v9, %s1184_s27 }
  0x4d   :  { %440 = vrot.lane.b32.xlu1 %v1234_v10, %s1184_s27 }
  0x53   :  { %466 = vrot.lane.b32.xlu0 %v1236_v11, %s1184_s27  ;;  %491 = vrot.lane.b32.xlu2 %v1234_v10, %s1185_s28 }
  0x55   :  { %478 = vrot.lane.b32.xlu1 %v1227_v8, %s1185_s28 }
  0x5b   :  { %504 = vrot.lane.b32.xlu0 %v1231_v9, %s1185_s28  ;;  %529 = vrot.lane.b32.xlu2 %v1227_v8, %s1186_s29 }
  0x5d   :  { %517 = vrot.lane.b32.xlu1 %v1236_v11, %s1185_s28 }
  0x63   :  { %542 = vrot.lane.b32.xlu0 %v1234_v10, %s1186_s29  ;;  %568 = vrot.lane.b32.xlu2 %v1236_v11, %s1186_s29 }
  0x65   :  { %555 = vrot.lane.b32.xlu1 %v1231_v9, %s1186_s29  ;;  %v173_v12 = vpop.permute.xlu2 %172   ;;  %s1192_s29 = smov 8  }
  0x66   :  { %939 = vst.msk [vmem:[%s2384_s1 + $0x2] ss:$16 sm:$0x3] %vm35_vm0, %v173_v12  }
  0x67   :  { %940 = vst.msk [vmem:[%s2384_s1 + $0x22] ss:$16 sm:$0xc] %vm35_vm0, %v173_v12  }
  0x68   :  { %941 = vst.msk [vmem:[%s2384_s1 + $0x42] ss:$16 sm:$0x30] %vm35_vm0, %v173_v12  }
  0x69   :  { %942 = vst.msk [vmem:[%s2384_s1 + $0x62] ss:$16 sm:$0xc0] %vm35_vm0, %v173_v12   ;;  %v77_v12 = vld [vmem:[#allocation0 + $0x20] sm:$0xf]  }
  0x6a   :  { %907 = vst.msk [vmem:[%s2384_s1 + $0x100] sm:$0x1] %vm35_vm0, %v77_v12  }
  0x6b   :  { %580 = vrot.lane.b32.xlu0 %v1227_v8, %s1187_s9  ;;  %606 = vrot.lane.b32.xlu2 %v1231_v9, %s1187_s9  ;;  %908 = vst.msk [vmem:[%s2384_s1 + $0x13f] sm:$0x2] %vm35_vm0, %v77_v12  }
  0x6c   :  { %909 = vst.msk [vmem:[%s2384_s1 + $0x17e] sm:$0x4] %vm35_vm0, %v77_v12  }
  0x6d   :  { %593 = vrot.lane.b32.xlu1 %v1234_v10, %s1187_s9  ;;  %v186_v13 = vpop.permute.xlu2 %185   ;;  %910 = vst.msk [vmem:[%s2384_s1 + $0x1bd] sm:$0x8] %vm35_vm0, %v77_v12  }
  0x6e   :  { %943 = vst.msk [vmem:[%s2384_s1 + $0x22] ss:$16 sm:$0x3] %vm35_vm0, %v186_v13  }
  0x6f   :  { %944 = vst.msk [vmem:[%s2384_s1 + $0x42] ss:$16 sm:$0xc] %vm35_vm0, %v186_v13  }
  0x70   :  { %945 = vst.msk [vmem:[%s2384_s1 + $0x62] ss:$16 sm:$0x30] %vm35_vm0, %v186_v13  }
  0x71   :  { %946 = vst.msk [vmem:[%s2384_s1 + $0x82] ss:$16 sm:$0xc0] %vm35_vm0, %v186_v13   ;;  %v88_v13 = vld [vmem:[#allocation0 + $0x28] sm:$0xf]  }
  0x72   :  { %911 = vst.msk [vmem:[%s2384_s1 + $0x110] sm:$0x1] %vm35_vm0, %v88_v13  }
  0x73   :  { %619 = vrot.lane.b32.xlu0 %v1236_v11, %s1187_s9  ;;  %644 = vrot.lane.b32.xlu2 %v1234_v10, %s1188_s18  ;;  %912 = vst.msk [vmem:[%s2384_s1 + $0x14f] sm:$0x2] %vm35_vm0, %v88_v13  }
  0x74   :  { %913 = vst.msk [vmem:[%s2384_s1 + $0x18e] sm:$0x4] %vm35_vm0, %v88_v13  }
  0x75   :  { %631 = vrot.lane.b32.xlu1 %v1227_v8, %s1188_s18  ;;  %v224_v14 = vpop.permute.xlu2 %223   ;;  %914 = vst.msk [vmem:[%s2384_s1 + $0x1cd] sm:$0x8] %vm35_vm0, %v88_v13  }
  0x76   :  { %955 = vst.msk [vmem:[%s2384_s1 + $0x3] ss:$16 sm:$0x3] %vm35_vm0, %v224_v14  }
  0x77   :  { %956 = vst.msk [vmem:[%s2384_s1 + $0x23] ss:$16 sm:$0xc] %vm35_vm0, %v224_v14  }
  0x78   :  { %957 = vst.msk [vmem:[%s2384_s1 + $0x43] ss:$16 sm:$0x30] %vm35_vm0, %v224_v14  }
  0x79   :  { %958 = vst.msk [vmem:[%s2384_s1 + $0x63] ss:$16 sm:$0xc0] %vm35_vm0, %v224_v14   ;;  %v99_v14 = vld [vmem:[#allocation0 + $0x30] sm:$0xf]  }
  0x7a   :  { %915 = vst.msk [vmem:[%s2384_s1 + $0x120] sm:$0x1] %vm35_vm0, %v99_v14  }
  0x7b   :  { %657 = vrot.lane.b32.xlu0 %v1231_v9, %s1188_s18  ;;  %682 = vrot.lane.b32.xlu2 %v1227_v8, %s1189_s26  ;;  %916 = vst.msk [vmem:[%s2384_s1 + $0x15f] sm:$0x2] %vm35_vm0, %v99_v14  }
  0x7c   :  { %917 = vst.msk [vmem:[%s2384_s1 + $0x19e] sm:$0x4] %vm35_vm0, %v99_v14  }
  0x7d   :  { %670 = vrot.lane.b32.xlu1 %v1236_v11, %s1188_s18  ;;  %v122_v15 = vpop.permute.xlu0 %121   ;;  %v263_v16 = vpop.permute.xlu2 %262   ;;  %918 = vst.msk [vmem:[%s2384_s1 + $0x1dd] sm:$0x8] %vm35_vm0, %v99_v14  }
  0x7e   :  { %923 = vst.msk [vmem:[%s2384_s1 + $0x1] ss:$16 sm:$0x3] %vm35_vm0, %v122_v15  }
  0x7f   :  { %924 = vst.msk [vmem:[%s2384_s1 + $0x21] ss:$16 sm:$0xc] %vm35_vm0, %v122_v15   ;;  %v148_v17 = vpop.permute.xlu1 %147  }
  0x80   :  { %925 = vst.msk [vmem:[%s2384_s1 + $0x41] ss:$16 sm:$0x30] %vm35_vm0, %v122_v15  }
  0x81   :  { %926 = vst.msk [vmem:[%s2384_s1 + $0x61] ss:$16 sm:$0xc0] %vm35_vm0, %v122_v15   ;;  %v110_v15 = vld [vmem:[#allocation0 + $0x38] sm:$0xf]  }
  0x82   :  { %931 = vst.msk [vmem:[%s2384_s1 + $0x101] ss:$16 sm:$0x3] %vm35_vm0, %v148_v17  }
  0x83   :  { %932 = vst.msk [vmem:[%s2384_s1 + $0x121] ss:$16 sm:$0xc] %vm35_vm0, %v148_v17   ;;  %695 = vrot.lane.b32.xlu0 %v1234_v10, %s1189_s26  ;;  %721 = vrot.lane.b32.xlu2 %v1236_v11, %s1189_s26 }
  0x84   :  { %933 = vst.msk [vmem:[%s2384_s1 + $0x141] ss:$16 sm:$0x30] %vm35_vm0, %v148_v17  }
  0x85   :  { %934 = vst.msk [vmem:[%s2384_s1 + $0x161] ss:$16 sm:$0xc0] %vm35_vm0, %v148_v17   ;;  %708 = vrot.lane.b32.xlu1 %v1231_v9, %s1189_s26  ;;  %v135_v18 = vpop.permute.xlu0 %134   ;;  %v301_v19 = vpop.permute.xlu2 %300  }
  0x86   :  { %927 = vst.msk [vmem:[%s2384_s1 + $0x21] ss:$16 sm:$0x3] %vm35_vm0, %v135_v18  }
  0x87   :  { %928 = vst.msk [vmem:[%s2384_s1 + $0x41] ss:$16 sm:$0xc] %vm35_vm0, %v135_v18   ;;  %v161_v20 = vpop.permute.xlu1 %160  }
  0x88   :  { %929 = vst.msk [vmem:[%s2384_s1 + $0x61] ss:$16 sm:$0x30] %vm35_vm0, %v135_v18  }
  0x89   :  { %930 = vst.msk [vmem:[%s2384_s1 + $0x81] ss:$16 sm:$0xc0] %vm35_vm0, %v135_v18  }
  0x8a   :  { %935 = vst.msk [vmem:[%s2384_s1 + $0x121] ss:$16 sm:$0x3] %vm35_vm0, %v161_v20  }
  0x8b   :  { %936 = vst.msk [vmem:[%s2384_s1 + $0x141] ss:$16 sm:$0xc] %vm35_vm0, %v161_v20   ;;  %733 = vrot.lane.b32.xlu0 %v1227_v8, %s1190_s25  ;;  %759 = vrot.lane.b32.xlu2 %v1231_v9, %s1190_s25 }
  0x8c   :  { %937 = vst.msk [vmem:[%s2384_s1 + $0x161] ss:$16 sm:$0x30] %vm35_vm0, %v161_v20  }
  0x8d   :  { %938 = vst.msk [vmem:[%s2384_s1 + $0x181] ss:$16 sm:$0xc0] %vm35_vm0, %v161_v20   ;;  %746 = vrot.lane.b32.xlu1 %v1234_v10, %s1190_s25  ;;  %v199_v21 = vpop.permute.xlu0 %198   ;;  %v339_v23 = vpop.permute.xlu2 %338  }
  0x8e   :  { %947 = vst.msk [vmem:[%s2384_s1 + $0x102] ss:$16 sm:$0x3] %vm35_vm0, %v199_v21  }
  0x8f   :  { %948 = vst.msk [vmem:[%s2384_s1 + $0x122] ss:$16 sm:$0xc] %vm35_vm0, %v199_v21   ;;  %v212_v22 = vpop.permute.xlu1 %211  }
  0x90   :  { %949 = vst.msk [vmem:[%s2384_s1 + $0x142] ss:$16 sm:$0x30] %vm35_vm0, %v199_v21  }
  0x91   :  { %950 = vst.msk [vmem:[%s2384_s1 + $0x162] ss:$16 sm:$0xc0] %vm35_vm0, %v199_v21  }
  0x92   :  { %951 = vst.msk [vmem:[%s2384_s1 + $0x122] ss:$16 sm:$0x3] %vm35_vm0, %v212_v22  }
  0x93   :  { %952 = vst.msk [vmem:[%s2384_s1 + $0x142] ss:$16 sm:$0xc] %vm35_vm0, %v212_v22   ;;  %772 = vrot.lane.b32.xlu0 %v1236_v11, %s1190_s25  ;;  %797 = vrot.lane.b32.xlu2 %v1234_v10, %s1191_s13 }
  0x94   :  { %953 = vst.msk [vmem:[%s2384_s1 + $0x162] ss:$16 sm:$0x30] %vm35_vm0, %v212_v22  }
  0x95   :  { %954 = vst.msk [vmem:[%s2384_s1 + $0x182] ss:$16 sm:$0xc0] %vm35_vm0, %v212_v22   ;;  %784 = vrot.lane.b32.xlu1 %v1227_v8, %s1191_s13  ;;  %v237_v24 = vpop.permute.xlu0 %236   ;;  %v377_v27 = vpop.permute.xlu2 %376  }
  0x96   :  { %959 = vst.msk [vmem:[%s2384_s1 + $0x23] ss:$16 sm:$0x3] %vm35_vm0, %v237_v24  }
  0x97   :  { %960 = vst.msk [vmem:[%s2384_s1 + $0x43] ss:$16 sm:$0xc] %vm35_vm0, %v237_v24   ;;  %v250_v25 = vpop.permute.xlu1 %249  }
  0x98   :  { %961 = vst.msk [vmem:[%s2384_s1 + $0x63] ss:$16 sm:$0x30] %vm35_vm0, %v237_v24  }
  0x99   :  { %962 = vst.msk [vmem:[%s2384_s1 + $0x83] ss:$16 sm:$0xc0] %vm35_vm0, %v237_v24  }
  0x9a   :  { %967 = vst.msk [vmem:[%s2384_s1 + $0x123] ss:$16 sm:$0x3] %vm35_vm0, %v263_v16  }
  0x9b   :  { %968 = vst.msk [vmem:[%s2384_s1 + $0x143] ss:$16 sm:$0xc] %vm35_vm0, %v263_v16   ;;  %810 = vrot.lane.b32.xlu0 %v1231_v9, %s1191_s13  ;;  %835 = vrot.lane.b32.xlu2 %v1227_v8, %s1192_s29  ;;  %v34_v8 = vld [vmem:[#allocation0] sm:$0xf]  }
  0x9c   :  { %969 = vst.msk [vmem:[%s2384_s1 + $0x163] ss:$16 sm:$0x30] %vm35_vm0, %v263_v16  }
  0x9d   :  { %970 = vst.msk [vmem:[%s2384_s1 + $0x183] ss:$16 sm:$0xc0] %vm35_vm0, %v263_v16   ;;  %823 = vrot.lane.b32.xlu1 %v1236_v11, %s1191_s13  ;;  %v275_v26 = vpop.permute.xlu0 %274   ;;  %v416_v31 = vpop.permute.xlu2 %415  }
  0x9e   :  { %963 = vst.msk [vmem:[%s2384_s1 + $0x103] ss:$16 sm:$0x3] %vm35_vm0, %v250_v25  }
  0x9f   :  { %964 = vst.msk [vmem:[%s2384_s1 + $0x123] ss:$16 sm:$0xc] %vm35_vm0, %v250_v25   ;;  %v288_v28 = vpop.permute.xlu1 %287  }
  0xa0   :  { %965 = vst.msk [vmem:[%s2384_s1 + $0x143] ss:$16 sm:$0x30] %vm35_vm0, %v250_v25  }
  0xa1   :  { %966 = vst.msk [vmem:[%s2384_s1 + $0x163] ss:$16 sm:$0xc0] %vm35_vm0, %v250_v25  }
  0xa2   :  { %971 = vst.msk [vmem:[%s2384_s1 + $0x4] ss:$16 sm:$0x3] %vm35_vm0, %v275_v26  }
  0xa3   :  { %972 = vst.msk [vmem:[%s2384_s1 + $0x24] ss:$16 sm:$0xc] %vm35_vm0, %v275_v26   ;;  %848 = vrot.lane.b32.xlu0 %v1234_v10, %s1192_s29  ;;  %874 = vrot.lane.b32.xlu2 %v1236_v11, %s1192_s29  ;;  %v55_v10 = vld [vmem:[#allocation0 + $0x10] sm:$0xf]  }
  0xa4   :  { %973 = vst.msk [vmem:[%s2384_s1 + $0x44] ss:$16 sm:$0x30] %vm35_vm0, %v275_v26   ;;  %v66_v11 = vld [vmem:[#allocation0 + $0x18] sm:$0xf]  }
  0xa5   :  { %974 = vst.msk [vmem:[%s2384_s1 + $0x64] ss:$16 sm:$0xc0] %vm35_vm0, %v275_v26   ;;  %861 = vrot.lane.b32.xlu1 %v1231_v9, %s1192_s29  ;;  %v314_v29 = vpop.permute.xlu0 %313   ;;  %v454_v35 = vpop.permute.xlu2 %453   ;;  %v44_v9 = vld [vmem:[#allocation0 + $0x8] sm:$0xf]  }
  0xa6   :  { %979 = vst.msk [vmem:[%s2384_s1 + $0x104] ss:$16 sm:$0x3] %vm35_vm0, %v301_v19  }
  0xa7   :  { %980 = vst.msk [vmem:[%s2384_s1 + $0x124] ss:$16 sm:$0xc] %vm35_vm0, %v301_v19   ;;  %v326_v30 = vpop.permute.xlu1 %325  }
  0xa8   :  { %981 = vst.msk [vmem:[%s2384_s1 + $0x144] ss:$16 sm:$0x30] %vm35_vm0, %v301_v19  }
  0xa9   :  { %982 = vst.msk [vmem:[%s2384_s1 + $0x164] ss:$16 sm:$0xc0] %vm35_vm0, %v301_v19  }
  0xaa   :  { %975 = vst.msk [vmem:[%s2384_s1 + $0x24] ss:$16 sm:$0x3] %vm35_vm0, %v288_v28  }
  0xab   :  { %976 = vst.msk [vmem:[%s2384_s1 + $0x44] ss:$16 sm:$0xc] %vm35_vm0, %v288_v28  }
  0xac   :  { %977 = vst.msk [vmem:[%s2384_s1 + $0x64] ss:$16 sm:$0x30] %vm35_vm0, %v288_v28  }
  0xad   :  { %978 = vst.msk [vmem:[%s2384_s1 + $0x84] ss:$16 sm:$0xc0] %vm35_vm0, %v288_v28   ;;  %v352_v32 = vpop.permute.xlu0 %351   ;;  %v492_v39 = vpop.permute.xlu2 %491  }
  0xae   :  { %983 = vst.msk [vmem:[%s2384_s1 + $0x124] ss:$16 sm:$0x3] %vm35_vm0, %v314_v29  }
  0xaf   :  { %984 = vst.msk [vmem:[%s2384_s1 + $0x144] ss:$16 sm:$0xc] %vm35_vm0, %v314_v29   ;;  %v365_v33 = vpop.permute.xlu1 %364  }
  0xb0   :  { %985 = vst.msk [vmem:[%s2384_s1 + $0x164] ss:$16 sm:$0x30] %vm35_vm0, %v314_v29  }
  0xb1   :  { %986 = vst.msk [vmem:[%s2384_s1 + $0x184] ss:$16 sm:$0xc0] %vm35_vm0, %v314_v29  }
  0xb2   :  { %991 = vst.msk [vmem:[%s2384_s1 + $0x25] ss:$16 sm:$0x3] %vm35_vm0, %v339_v23  }
  0xb3   :  { %992 = vst.msk [vmem:[%s2384_s1 + $0x45] ss:$16 sm:$0xc] %vm35_vm0, %v339_v23  }
  0xb4   :  { %993 = vst.msk [vmem:[%s2384_s1 + $0x65] ss:$16 sm:$0x30] %vm35_vm0, %v339_v23  }
  0xb5   :  { %994 = vst.msk [vmem:[%s2384_s1 + $0x85] ss:$16 sm:$0xc0] %vm35_vm0, %v339_v23   ;;  %v390_v34 = vpop.permute.xlu0 %389   ;;  %v530_v43 = vpop.permute.xlu2 %529  }
  0xb6   :  { %987 = vst.msk [vmem:[%s2384_s1 + $0x5] ss:$16 sm:$0x3] %vm35_vm0, %v326_v30  }
  0xb7   :  { %988 = vst.msk [vmem:[%s2384_s1 + $0x25] ss:$16 sm:$0xc] %vm35_vm0, %v326_v30   ;;  %v403_v36 = vpop.permute.xlu1 %402  }
  0xb8   :  { %989 = vst.msk [vmem:[%s2384_s1 + $0x45] ss:$16 sm:$0x30] %vm35_vm0, %v326_v30  }
  0xb9   :  { %990 = vst.msk [vmem:[%s2384_s1 + $0x65] ss:$16 sm:$0xc0] %vm35_vm0, %v326_v30  }
  0xba   :  { %995 = vst.msk [vmem:[%s2384_s1 + $0x105] ss:$16 sm:$0x3] %vm35_vm0, %v352_v32  }
  0xbb   :  { %996 = vst.msk [vmem:[%s2384_s1 + $0x125] ss:$16 sm:$0xc] %vm35_vm0, %v352_v32  }
  0xbc   :  { %997 = vst.msk [vmem:[%s2384_s1 + $0x145] ss:$16 sm:$0x30] %vm35_vm0, %v352_v32  }
  0xbd   :  { %998 = vst.msk [vmem:[%s2384_s1 + $0x165] ss:$16 sm:$0xc0] %vm35_vm0, %v352_v32   ;;  %v428_v37 = vpop.permute.xlu0 %427   ;;  %v569_v46 = vpop.permute.xlu2 %568  }
  0xbe   :  { %1003 = vst.msk [vmem:[%s2384_s1 + $0x6] ss:$16 sm:$0x3] %vm35_vm0, %v377_v27  }
  0xbf   :  { %1004 = vst.msk [vmem:[%s2384_s1 + $0x26] ss:$16 sm:$0xc] %vm35_vm0, %v377_v27   ;;  %v441_v38 = vpop.permute.xlu1 %440  }
  0xc0   :  { %1005 = vst.msk [vmem:[%s2384_s1 + $0x46] ss:$16 sm:$0x30] %vm35_vm0, %v377_v27  }
  0xc1   :  { %1006 = vst.msk [vmem:[%s2384_s1 + $0x66] ss:$16 sm:$0xc0] %vm35_vm0, %v377_v27  }
  0xc2   :  { %999 = vst.msk [vmem:[%s2384_s1 + $0x125] ss:$16 sm:$0x3] %vm35_vm0, %v365_v33  }
  0xc3   :  { %1000 = vst.msk [vmem:[%s2384_s1 + $0x145] ss:$16 sm:$0xc] %vm35_vm0, %v365_v33  }
  0xc4   :  { %1001 = vst.msk [vmem:[%s2384_s1 + $0x165] ss:$16 sm:$0x30] %vm35_vm0, %v365_v33  }
  0xc5   :  { %1002 = vst.msk [vmem:[%s2384_s1 + $0x185] ss:$16 sm:$0xc0] %vm35_vm0, %v365_v33   ;;  %v467_v40 = vpop.permute.xlu0 %466   ;;  %v607_v49 = vpop.permute.xlu2 %606  }
  0xc6   :  { %1007 = vst.msk [vmem:[%s2384_s1 + $0x26] ss:$16 sm:$0x3] %vm35_vm0, %v390_v34  }
  0xc7   :  { %1008 = vst.msk [vmem:[%s2384_s1 + $0x46] ss:$16 sm:$0xc] %vm35_vm0, %v390_v34   ;;  %v479_v41 = vpop.permute.xlu1 %478  }
  0xc8   :  { %1009 = vst.msk [vmem:[%s2384_s1 + $0x66] ss:$16 sm:$0x30] %vm35_vm0, %v390_v34  }
  0xc9   :  { %1010 = vst.msk [vmem:[%s2384_s1 + $0x86] ss:$16 sm:$0xc0] %vm35_vm0, %v390_v34  }
  0xca   :  { %1015 = vst.msk [vmem:[%s2384_s1 + $0x126] ss:$16 sm:$0x3] %vm35_vm0, %v416_v31  }
  0xcb   :  { %1016 = vst.msk [vmem:[%s2384_s1 + $0x146] ss:$16 sm:$0xc] %vm35_vm0, %v416_v31  }
  0xcc   :  { %1017 = vst.msk [vmem:[%s2384_s1 + $0x166] ss:$16 sm:$0x30] %vm35_vm0, %v416_v31  }
  0xcd   :  { %1018 = vst.msk [vmem:[%s2384_s1 + $0x186] ss:$16 sm:$0xc0] %vm35_vm0, %v416_v31   ;;  %v505_v42 = vpop.permute.xlu0 %504   ;;  %v645_v52 = vpop.permute.xlu2 %644  }
  0xce   :  { %1011 = vst.msk [vmem:[%s2384_s1 + $0x106] ss:$16 sm:$0x3] %vm35_vm0, %v403_v36  }
  0xcf   :  { %1012 = vst.msk [vmem:[%s2384_s1 + $0x126] ss:$16 sm:$0xc] %vm35_vm0, %v403_v36   ;;  %v518_v44 = vpop.permute.xlu1 %517  }
  0xd0   :  { %1013 = vst.msk [vmem:[%s2384_s1 + $0x146] ss:$16 sm:$0x30] %vm35_vm0, %v403_v36  }
  0xd1   :  { %1014 = vst.msk [vmem:[%s2384_s1 + $0x166] ss:$16 sm:$0xc0] %vm35_vm0, %v403_v36  }
  0xd2   :  { %1019 = vst.msk [vmem:[%s2384_s1 + $0x7] ss:$16 sm:$0x3] %vm35_vm0, %v428_v37  }
  0xd3   :  { %1020 = vst.msk [vmem:[%s2384_s1 + $0x27] ss:$16 sm:$0xc] %vm35_vm0, %v428_v37  }
  0xd4   :  { %1021 = vst.msk [vmem:[%s2384_s1 + $0x47] ss:$16 sm:$0x30] %vm35_vm0, %v428_v37  }
  0xd5   :  { %1022 = vst.msk [vmem:[%s2384_s1 + $0x67] ss:$16 sm:$0xc0] %vm35_vm0, %v428_v37   ;;  %v543_v45 = vpop.permute.xlu0 %542   ;;  %v683_v55 = vpop.permute.xlu2 %682  }
  0xd6   :  { %1027 = vst.msk [vmem:[%s2384_s1 + $0x107] ss:$16 sm:$0x3] %vm35_vm0, %v454_v35  }
  0xd7   :  { %1028 = vst.msk [vmem:[%s2384_s1 + $0x127] ss:$16 sm:$0xc] %vm35_vm0, %v454_v35   ;;  %v556_v47 = vpop.permute.xlu1 %555  }
  0xd8   :  { %1029 = vst.msk [vmem:[%s2384_s1 + $0x147] ss:$16 sm:$0x30] %vm35_vm0, %v454_v35  }
  0xd9   :  { %1030 = vst.msk [vmem:[%s2384_s1 + $0x167] ss:$16 sm:$0xc0] %vm35_vm0, %v454_v35  }
  0xda   :  { %1023 = vst.msk [vmem:[%s2384_s1 + $0x27] ss:$16 sm:$0x3] %vm35_vm0, %v441_v38  }
  0xdb   :  { %1024 = vst.msk [vmem:[%s2384_s1 + $0x47] ss:$16 sm:$0xc] %vm35_vm0, %v441_v38  }
  0xdc   :  { %1025 = vst.msk [vmem:[%s2384_s1 + $0x67] ss:$16 sm:$0x30] %vm35_vm0, %v441_v38  }
  0xdd   :  { %1026 = vst.msk [vmem:[%s2384_s1 + $0x87] ss:$16 sm:$0xc0] %vm35_vm0, %v441_v38   ;;  %v581_v48 = vpop.permute.xlu0 %580   ;;  %v722_v58 = vpop.permute.xlu2 %721  }
  0xde   :  { %1031 = vst.msk [vmem:[%s2384_s1 + $0x127] ss:$16 sm:$0x3] %vm35_vm0, %v467_v40  }
  0xdf   :  { %1032 = vst.msk [vmem:[%s2384_s1 + $0x147] ss:$16 sm:$0xc] %vm35_vm0, %v467_v40   ;;  %v594_v50 = vpop.permute.xlu1 %593  }
  0xe0   :  { %1033 = vst.msk [vmem:[%s2384_s1 + $0x167] ss:$16 sm:$0x30] %vm35_vm0, %v467_v40  }
  0xe1   :  { %1034 = vst.msk [vmem:[%s2384_s1 + $0x187] ss:$16 sm:$0xc0] %vm35_vm0, %v467_v40  }
  0xe2   :  { %1039 = vst.msk [vmem:[%s2384_s1 + $0x28] ss:$16 sm:$0x3] %vm35_vm0, %v492_v39  }
  0xe3   :  { %1040 = vst.msk [vmem:[%s2384_s1 + $0x48] ss:$16 sm:$0xc] %vm35_vm0, %v492_v39  }
  0xe4   :  { %1041 = vst.msk [vmem:[%s2384_s1 + $0x68] ss:$16 sm:$0x30] %vm35_vm0, %v492_v39  }
  0xe5   :  { %1042 = vst.msk [vmem:[%s2384_s1 + $0x88] ss:$16 sm:$0xc0] %vm35_vm0, %v492_v39   ;;  %v620_v51 = vpop.permute.xlu0 %619   ;;  %v760_v61 = vpop.permute.xlu2 %759  }
  0xe6   :  { %1035 = vst.msk [vmem:[%s2384_s1 + $0x8] ss:$16 sm:$0x3] %vm35_vm0, %v479_v41  }
  0xe7   :  { %1036 = vst.msk [vmem:[%s2384_s1 + $0x28] ss:$16 sm:$0xc] %vm35_vm0, %v479_v41   ;;  %v632_v53 = vpop.permute.xlu1 %631  }
  0xe8   :  { %1037 = vst.msk [vmem:[%s2384_s1 + $0x48] ss:$16 sm:$0x30] %vm35_vm0, %v479_v41  }
  0xe9   :  { %1038 = vst.msk [vmem:[%s2384_s1 + $0x68] ss:$16 sm:$0xc0] %vm35_vm0, %v479_v41  }
  0xea   :  { %1043 = vst.msk [vmem:[%s2384_s1 + $0x108] ss:$16 sm:$0x3] %vm35_vm0, %v505_v42  }
  0xeb   :  { %1044 = vst.msk [vmem:[%s2384_s1 + $0x128] ss:$16 sm:$0xc] %vm35_vm0, %v505_v42  }
  0xec   :  { %1045 = vst.msk [vmem:[%s2384_s1 + $0x148] ss:$16 sm:$0x30] %vm35_vm0, %v505_v42  }
  0xed   :  { %1046 = vst.msk [vmem:[%s2384_s1 + $0x168] ss:$16 sm:$0xc0] %vm35_vm0, %v505_v42   ;;  %v658_v54 = vpop.permute.xlu0 %657   ;;  %v798_v0 = vpop.permute.xlu2 %797  }
  0xee   :  { %1051 = vst.msk [vmem:[%s2384_s1 + $0x9] ss:$16 sm:$0x3] %vm35_vm0, %v530_v43  }
  0xef   :  { %1052 = vst.msk [vmem:[%s2384_s1 + $0x29] ss:$16 sm:$0xc] %vm35_vm0, %v530_v43   ;;  %v671_v56 = vpop.permute.xlu1 %670  }
  0xf0   :  { %1053 = vst.msk [vmem:[%s2384_s1 + $0x49] ss:$16 sm:$0x30] %vm35_vm0, %v530_v43  }
  0xf1   :  { %1054 = vst.msk [vmem:[%s2384_s1 + $0x69] ss:$16 sm:$0xc0] %vm35_vm0, %v530_v43  }
  0xf2   :  { %1047 = vst.msk [vmem:[%s2384_s1 + $0x128] ss:$16 sm:$0x3] %vm35_vm0, %v518_v44  }
  0xf3   :  { %1048 = vst.msk [vmem:[%s2384_s1 + $0x148] ss:$16 sm:$0xc] %vm35_vm0, %v518_v44  }
  0xf4   :  { %1049 = vst.msk [vmem:[%s2384_s1 + $0x168] ss:$16 sm:$0x30] %vm35_vm0, %v518_v44  }
  0xf5   :  { %1050 = vst.msk [vmem:[%s2384_s1 + $0x188] ss:$16 sm:$0xc0] %vm35_vm0, %v518_v44   ;;  %v696_v57 = vpop.permute.xlu0 %695   ;;  %v836_v3 = vpop.permute.xlu2 %835  }
  0xf6   :  { %1055 = vst.msk [vmem:[%s2384_s1 + $0x29] ss:$16 sm:$0x3] %vm35_vm0, %v543_v45  }
  0xf7   :  { %1056 = vst.msk [vmem:[%s2384_s1 + $0x49] ss:$16 sm:$0xc] %vm35_vm0, %v543_v45   ;;  %v709_v59 = vpop.permute.xlu1 %708  }
  0xf8   :  { %1057 = vst.msk [vmem:[%s2384_s1 + $0x69] ss:$16 sm:$0x30] %vm35_vm0, %v543_v45  }
  0xf9   :  { %1058 = vst.msk [vmem:[%s2384_s1 + $0x89] ss:$16 sm:$0xc0] %vm35_vm0, %v543_v45  }
  0xfa   :  { %1063 = vst.msk [vmem:[%s2384_s1 + $0x129] ss:$16 sm:$0x3] %vm35_vm0, %v569_v46  }
  0xfb   :  { %1064 = vst.msk [vmem:[%s2384_s1 + $0x149] ss:$16 sm:$0xc] %vm35_vm0, %v569_v46  }
  0xfc   :  { %1065 = vst.msk [vmem:[%s2384_s1 + $0x169] ss:$16 sm:$0x30] %vm35_vm0, %v569_v46  }
  0xfd   :  { %1066 = vst.msk [vmem:[%s2384_s1 + $0x189] ss:$16 sm:$0xc0] %vm35_vm0, %v569_v46   ;;  %v734_v60 = vpop.permute.xlu0 %733   ;;  %v875_v6 = vpop.permute.xlu2 %874  }
  0xfe   :  { %1059 = vst.msk [vmem:[%s2384_s1 + $0x109] ss:$16 sm:$0x3] %vm35_vm0, %v556_v47  }
  0xff   :  { %1060 = vst.msk [vmem:[%s2384_s1 + $0x129] ss:$16 sm:$0xc] %vm35_vm0, %v556_v47   ;;  %v747_v62 = vpop.permute.xlu1 %746  }
 0x100   :  { %1061 = vst.msk [vmem:[%s2384_s1 + $0x149] ss:$16 sm:$0x30] %vm35_vm0, %v556_v47  }
 0x101   :  { %1062 = vst.msk [vmem:[%s2384_s1 + $0x169] ss:$16 sm:$0xc0] %vm35_vm0, %v556_v47  }
 0x102   :  { %1067 = vst.msk [vmem:[%s2384_s1 + $0xa] ss:$16 sm:$0x3] %vm35_vm0, %v581_v48  }
 0x103   :  { %1068 = vst.msk [vmem:[%s2384_s1 + $0x2a] ss:$16 sm:$0xc] %vm35_vm0, %v581_v48  }
 0x104   :  { %1069 = vst.msk [vmem:[%s2384_s1 + $0x4a] ss:$16 sm:$0x30] %vm35_vm0, %v581_v48  }
 0x105   :  { %1070 = vst.msk [vmem:[%s2384_s1 + $0x6a] ss:$16 sm:$0xc0] %vm35_vm0, %v581_v48   ;;  %v773_v63 = vpop.permute.xlu0 %772  }
 0x106   :  { %1075 = vst.msk [vmem:[%s2384_s1 + $0x10a] ss:$16 sm:$0x3] %vm35_vm0, %v607_v49  }
 0x107   :  { %1076 = vst.msk [vmem:[%s2384_s1 + $0x12a] ss:$16 sm:$0xc] %vm35_vm0, %v607_v49   ;;  %v785_v1 = vpop.permute.xlu1 %784  }
 0x108   :  { %1077 = vst.msk [vmem:[%s2384_s1 + $0x14a] ss:$16 sm:$0x30] %vm35_vm0, %v607_v49  }
 0x109   :  { %1078 = vst.msk [vmem:[%s2384_s1 + $0x16a] ss:$16 sm:$0xc0] %vm35_vm0, %v607_v49  }
 0x10a   :  { %1071 = vst.msk [vmem:[%s2384_s1 + $0x2a] ss:$16 sm:$0x3] %vm35_vm0, %v594_v50  }
 0x10b   :  { %1072 = vst.msk [vmem:[%s2384_s1 + $0x4a] ss:$16 sm:$0xc] %vm35_vm0, %v594_v50  }
 0x10c   :  { %1073 = vst.msk [vmem:[%s2384_s1 + $0x6a] ss:$16 sm:$0x30] %vm35_vm0, %v594_v50  }
 0x10d   :  { %1074 = vst.msk [vmem:[%s2384_s1 + $0x8a] ss:$16 sm:$0xc0] %vm35_vm0, %v594_v50   ;;  %v811_v2 = vpop.permute.xlu0 %810  }
 0x10e   :  { %1079 = vst.msk [vmem:[%s2384_s1 + $0x12a] ss:$16 sm:$0x3] %vm35_vm0, %v620_v51  }
 0x10f   :  { %1080 = vst.msk [vmem:[%s2384_s1 + $0x14a] ss:$16 sm:$0xc] %vm35_vm0, %v620_v51   ;;  %v824_v4 = vpop.permute.xlu1 %823  }
 0x110   :  { %1081 = vst.msk [vmem:[%s2384_s1 + $0x16a] ss:$16 sm:$0x30] %vm35_vm0, %v620_v51  }
 0x111   :  { %1082 = vst.msk [vmem:[%s2384_s1 + $0x18a] ss:$16 sm:$0xc0] %vm35_vm0, %v620_v51  }
 0x112   :  { %1087 = vst.msk [vmem:[%s2384_s1 + $0x2b] ss:$16 sm:$0x3] %vm35_vm0, %v645_v52  }
 0x113   :  { %1088 = vst.msk [vmem:[%s2384_s1 + $0x4b] ss:$16 sm:$0xc] %vm35_vm0, %v645_v52  }
 0x114   :  { %1089 = vst.msk [vmem:[%s2384_s1 + $0x6b] ss:$16 sm:$0x30] %vm35_vm0, %v645_v52  }
 0x115   :  { %1090 = vst.msk [vmem:[%s2384_s1 + $0x8b] ss:$16 sm:$0xc0] %vm35_vm0, %v645_v52   ;;  %v849_v5 = vpop.permute.xlu0 %848  }
 0x116   :  { %1083 = vst.msk [vmem:[%s2384_s1 + $0xb] ss:$16 sm:$0x3] %vm35_vm0, %v632_v53  }
 0x117   :  { %1084 = vst.msk [vmem:[%s2384_s1 + $0x2b] ss:$16 sm:$0xc] %vm35_vm0, %v632_v53   ;;  %v862_v7 = vpop.permute.xlu1 %861  }
 0x118   :  { %1085 = vst.msk [vmem:[%s2384_s1 + $0x4b] ss:$16 sm:$0x30] %vm35_vm0, %v632_v53  }
 0x119   :  { %1086 = vst.msk [vmem:[%s2384_s1 + $0x6b] ss:$16 sm:$0xc0] %vm35_vm0, %v632_v53  }
 0x11a   :  { %1091 = vst.msk [vmem:[%s2384_s1 + $0x10b] ss:$16 sm:$0x3] %vm35_vm0, %v658_v54  }
 0x11b   :  { %1092 = vst.msk [vmem:[%s2384_s1 + $0x12b] ss:$16 sm:$0xc] %vm35_vm0, %v658_v54  }
 0x11c   :  { %1093 = vst.msk [vmem:[%s2384_s1 + $0x14b] ss:$16 sm:$0x30] %vm35_vm0, %v658_v54  }
 0x11d   :  { %1094 = vst.msk [vmem:[%s2384_s1 + $0x16b] ss:$16 sm:$0xc0] %vm35_vm0, %v658_v54  }
 0x11e   :  { %1099 = vst.msk [vmem:[%s2384_s1 + $0xc] ss:$16 sm:$0x3] %vm35_vm0, %v683_v55  }
 0x11f   :  { %1100 = vst.msk [vmem:[%s2384_s1 + $0x2c] ss:$16 sm:$0xc] %vm35_vm0, %v683_v55  }
 0x120   :  { %1101 = vst.msk [vmem:[%s2384_s1 + $0x4c] ss:$16 sm:$0x30] %vm35_vm0, %v683_v55  }
 0x121   :  { %1102 = vst.msk [vmem:[%s2384_s1 + $0x6c] ss:$16 sm:$0xc0] %vm35_vm0, %v683_v55  }
 0x122   :  { %1095 = vst.msk [vmem:[%s2384_s1 + $0x12b] ss:$16 sm:$0x3] %vm35_vm0, %v671_v56  }
 0x123   :  { %1096 = vst.msk [vmem:[%s2384_s1 + $0x14b] ss:$16 sm:$0xc] %vm35_vm0, %v671_v56  }
 0x124   :  { %1097 = vst.msk [vmem:[%s2384_s1 + $0x16b] ss:$16 sm:$0x30] %vm35_vm0, %v671_v56  }
 0x125   :  { %1098 = vst.msk [vmem:[%s2384_s1 + $0x18b] ss:$16 sm:$0xc0] %vm35_vm0, %v671_v56  }
 0x126   :  { %1103 = vst.msk [vmem:[%s2384_s1 + $0x2c] ss:$16 sm:$0x3] %vm35_vm0, %v696_v57  }
 0x127   :  { %1104 = vst.msk [vmem:[%s2384_s1 + $0x4c] ss:$16 sm:$0xc] %vm35_vm0, %v696_v57  }
 0x128   :  { %1105 = vst.msk [vmem:[%s2384_s1 + $0x6c] ss:$16 sm:$0x30] %vm35_vm0, %v696_v57  }
 0x129   :  { %1106 = vst.msk [vmem:[%s2384_s1 + $0x8c] ss:$16 sm:$0xc0] %vm35_vm0, %v696_v57  }
 0x12a   :  { %1111 = vst.msk [vmem:[%s2384_s1 + $0x12c] ss:$16 sm:$0x3] %vm35_vm0, %v722_v58  }
 0x12b   :  { %1112 = vst.msk [vmem:[%s2384_s1 + $0x14c] ss:$16 sm:$0xc] %vm35_vm0, %v722_v58  }
 0x12c   :  { %1113 = vst.msk [vmem:[%s2384_s1 + $0x16c] ss:$16 sm:$0x30] %vm35_vm0, %v722_v58  }
 0x12d   :  { %1114 = vst.msk [vmem:[%s2384_s1 + $0x18c] ss:$16 sm:$0xc0] %vm35_vm0, %v722_v58  }
 0x12e   :  { %1107 = vst.msk [vmem:[%s2384_s1 + $0x10c] ss:$16 sm:$0x3] %vm35_vm0, %v709_v59  }
 0x12f   :  { %1108 = vst.msk [vmem:[%s2384_s1 + $0x12c] ss:$16 sm:$0xc] %vm35_vm0, %v709_v59  }
 0x130   :  { %1109 = vst.msk [vmem:[%s2384_s1 + $0x14c] ss:$16 sm:$0x30] %vm35_vm0, %v709_v59  }
 0x131   :  { %1110 = vst.msk [vmem:[%s2384_s1 + $0x16c] ss:$16 sm:$0xc0] %vm35_vm0, %v709_v59  }
 0x132   :  { %1115 = vst.msk [vmem:[%s2384_s1 + $0xd] ss:$16 sm:$0x3] %vm35_vm0, %v734_v60  }
 0x133   :  { %1116 = vst.msk [vmem:[%s2384_s1 + $0x2d] ss:$16 sm:$0xc] %vm35_vm0, %v734_v60  }
 0x134   :  { %1117 = vst.msk [vmem:[%s2384_s1 + $0x4d] ss:$16 sm:$0x30] %vm35_vm0, %v734_v60  }
 0x135   :  { %1118 = vst.msk [vmem:[%s2384_s1 + $0x6d] ss:$16 sm:$0xc0] %vm35_vm0, %v734_v60  }
 0x136   :  { %1123 = vst.msk [vmem:[%s2384_s1 + $0x10d] ss:$16 sm:$0x3] %vm35_vm0, %v760_v61  }
 0x137   :  { %1124 = vst.msk [vmem:[%s2384_s1 + $0x12d] ss:$16 sm:$0xc] %vm35_vm0, %v760_v61  }
 0x138   :  { %1125 = vst.msk [vmem:[%s2384_s1 + $0x14d] ss:$16 sm:$0x30] %vm35_vm0, %v760_v61  }
 0x139   :  { %1126 = vst.msk [vmem:[%s2384_s1 + $0x16d] ss:$16 sm:$0xc0] %vm35_vm0, %v760_v61  }
 0x13a   :  { %1119 = vst.msk [vmem:[%s2384_s1 + $0x2d] ss:$16 sm:$0x3] %vm35_vm0, %v747_v62  }
 0x13b   :  { %1120 = vst.msk [vmem:[%s2384_s1 + $0x4d] ss:$16 sm:$0xc] %vm35_vm0, %v747_v62  }
 0x13c   :  { %1121 = vst.msk [vmem:[%s2384_s1 + $0x6d] ss:$16 sm:$0x30] %vm35_vm0, %v747_v62  }
 0x13d   :  { %1122 = vst.msk [vmem:[%s2384_s1 + $0x8d] ss:$16 sm:$0xc0] %vm35_vm0, %v747_v62  }
 0x13e   :  { %1127 = vst.msk [vmem:[%s2384_s1 + $0x12d] ss:$16 sm:$0x3] %vm35_vm0, %v773_v63  }
 0x13f   :  { %1128 = vst.msk [vmem:[%s2384_s1 + $0x14d] ss:$16 sm:$0xc] %vm35_vm0, %v773_v63  }
 0x140   :  { %1129 = vst.msk [vmem:[%s2384_s1 + $0x16d] ss:$16 sm:$0x30] %vm35_vm0, %v773_v63  }
 0x141   :  { %1130 = vst.msk [vmem:[%s2384_s1 + $0x18d] ss:$16 sm:$0xc0] %vm35_vm0, %v773_v63  }
 0x142   :  { %1135 = vst.msk [vmem:[%s2384_s1 + $0x2e] ss:$16 sm:$0x3] %vm35_vm0, %v798_v0  }
 0x143   :  { %1136 = vst.msk [vmem:[%s2384_s1 + $0x4e] ss:$16 sm:$0xc] %vm35_vm0, %v798_v0  }
 0x144   :  { %1137 = vst.msk [vmem:[%s2384_s1 + $0x6e] ss:$16 sm:$0x30] %vm35_vm0, %v798_v0  }
 0x145   :  { %1138 = vst.msk [vmem:[%s2384_s1 + $0x8e] ss:$16 sm:$0xc0] %vm35_vm0, %v798_v0  }
 0x146   :  { %1131 = vst.msk [vmem:[%s2384_s1 + $0xe] ss:$16 sm:$0x3] %vm35_vm0, %v785_v1  }
 0x147   :  { %1132 = vst.msk [vmem:[%s2384_s1 + $0x2e] ss:$16 sm:$0xc] %vm35_vm0, %v785_v1  }
 0x148   :  { %1133 = vst.msk [vmem:[%s2384_s1 + $0x4e] ss:$16 sm:$0x30] %vm35_vm0, %v785_v1  }
 0x149   :  { %1134 = vst.msk [vmem:[%s2384_s1 + $0x6e] ss:$16 sm:$0xc0] %vm35_vm0, %v785_v1  }
 0x14a   :  { %1139 = vst.msk [vmem:[%s2384_s1 + $0x10e] ss:$16 sm:$0x3] %vm35_vm0, %v811_v2  }
 0x14b   :  { %1140 = vst.msk [vmem:[%s2384_s1 + $0x12e] ss:$16 sm:$0xc] %vm35_vm0, %v811_v2  }
 0x14c   :  { %1141 = vst.msk [vmem:[%s2384_s1 + $0x14e] ss:$16 sm:$0x30] %vm35_vm0, %v811_v2  }
 0x14d   :  { %1142 = vst.msk [vmem:[%s2384_s1 + $0x16e] ss:$16 sm:$0xc0] %vm35_vm0, %v811_v2  }
 0x14e   :  { %1147 = vst.msk [vmem:[%s2384_s1 + $0xf] ss:$16 sm:$0x3] %vm35_vm0, %v836_v3  }
 0x14f   :  { %1148 = vst.msk [vmem:[%s2384_s1 + $0x2f] ss:$16 sm:$0xc] %vm35_vm0, %v836_v3  }
 0x150   :  { %1149 = vst.msk [vmem:[%s2384_s1 + $0x4f] ss:$16 sm:$0x30] %vm35_vm0, %v836_v3  }
 0x151   :  { %1150 = vst.msk [vmem:[%s2384_s1 + $0x6f] ss:$16 sm:$0xc0] %vm35_vm0, %v836_v3  }
 0x152   :  { %1143 = vst.msk [vmem:[%s2384_s1 + $0x12e] ss:$16 sm:$0x3] %vm35_vm0, %v824_v4  }
 0x153   :  { %1144 = vst.msk [vmem:[%s2384_s1 + $0x14e] ss:$16 sm:$0xc] %vm35_vm0, %v824_v4  }
 0x154   :  { %1145 = vst.msk [vmem:[%s2384_s1 + $0x16e] ss:$16 sm:$0x30] %vm35_vm0, %v824_v4  }
 0x155   :  { %1146 = vst.msk [vmem:[%s2384_s1 + $0x18e] ss:$16 sm:$0xc0] %vm35_vm0, %v824_v4  }
 0x156   :  { %1151 = vst.msk [vmem:[%s2384_s1 + $0x2f] ss:$16 sm:$0x3] %vm35_vm0, %v849_v5  }
 0x157   :  { %1152 = vst.msk [vmem:[%s2384_s1 + $0x4f] ss:$16 sm:$0xc] %vm35_vm0, %v849_v5  }
 0x158   :  { %1153 = vst.msk [vmem:[%s2384_s1 + $0x6f] ss:$16 sm:$0x30] %vm35_vm0, %v849_v5  }
 0x159   :  { %1154 = vst.msk [vmem:[%s2384_s1 + $0x8f] ss:$16 sm:$0xc0] %vm35_vm0, %v849_v5  }
 0x15a   :  { %1159 = vst.msk [vmem:[%s2384_s1 + $0x12f] ss:$16 sm:$0x3] %vm35_vm0, %v875_v6  }
 0x15b   :  { %1160 = vst.msk [vmem:[%s2384_s1 + $0x14f] ss:$16 sm:$0xc] %vm35_vm0, %v875_v6  }
 0x15c   :  { %1161 = vst.msk [vmem:[%s2384_s1 + $0x16f] ss:$16 sm:$0x30] %vm35_vm0, %v875_v6  }
 0x15d   :  { %1162 = vst.msk [vmem:[%s2384_s1 + $0x18f] ss:$16 sm:$0xc0] %vm35_vm0, %v875_v6  }
 0x15e   :  { %1155 = vst.msk [vmem:[%s2384_s1 + $0x10f] ss:$16 sm:$0x3] %vm35_vm0, %v862_v7  }
 0x15f   :  { %1156 = vst.msk [vmem:[%s2384_s1 + $0x12f] ss:$16 sm:$0xc] %vm35_vm0, %v862_v7  }
 0x160   :  { %1157 = vst.msk [vmem:[%s2384_s1 + $0x14f] ss:$16 sm:$0x30] %vm35_vm0, %v862_v7  }
 0x161   :  { %1158 = vst.msk [vmem:[%s2384_s1 + $0x16f] ss:$16 sm:$0xc0] %vm35_vm0, %v862_v7  }
 0x162   :  { %36 = vst.msk [vmem:[%s2384_s1] sm:$0x1] %vm35_vm0, %v34_v8  }
 0x163   :  { %892 = vst.msk [vmem:[%s2384_s1 + $0x3f] sm:$0x2] %vm35_vm0, %v34_v8  }
 0x164   :  { %893 = vst.msk [vmem:[%s2384_s1 + $0x7e] sm:$0x4] %vm35_vm0, %v34_v8  }
 0x165   :  { %894 = vst.msk [vmem:[%s2384_s1 + $0xbd] sm:$0x8] %vm35_vm0, %v34_v8  }
 0x166   :  { %895 = vst.msk [vmem:[%s2384_s1 + $0x10] sm:$0x1] %vm35_vm0, %v44_v9  }
 0x167   :  { %896 = vst.msk [vmem:[%s2384_s1 + $0x4f] sm:$0x2] %vm35_vm0, %v44_v9  }
 0x168   :  { %897 = vst.msk [vmem:[%s2384_s1 + $0x8e] sm:$0x4] %vm35_vm0, %v44_v9  }
 0x169   :  { %898 = vst.msk [vmem:[%s2384_s1 + $0xcd] sm:$0x8] %vm35_vm0, %v44_v9  }
 0x16a   :  { %899 = vst.msk [vmem:[%s2384_s1 + $0x20] sm:$0x1] %vm35_vm0, %v55_v10  }
 0x16b   :  { %900 = vst.msk [vmem:[%s2384_s1 + $0x5f] sm:$0x2] %vm35_vm0, %v55_v10  }
 0x16c   :  { %901 = vst.msk [vmem:[%s2384_s1 + $0x9e] sm:$0x4] %vm35_vm0, %v55_v10  }
 0x16d   :  { %902 = vst.msk [vmem:[%s2384_s1 + $0xdd] sm:$0x8] %vm35_vm0, %v55_v10  }
 0x16e   :  { %903 = vst.msk [vmem:[%s2384_s1 + $0x30] sm:$0x1] %vm35_vm0, %v66_v11  }
 0x16f   :  { %904 = vst.msk [vmem:[%s2384_s1 + $0x6f] sm:$0x2] %vm35_vm0, %v66_v11  }
 0x170   :  { %905 = vst.msk [vmem:[%s2384_s1 + $0xae] sm:$0x4] %vm35_vm0, %v66_v11  }
 0x171   :  { %906 = vst.msk [vmem:[%s2384_s1 + $0xed] sm:$0x8] %vm35_vm0, %v66_v11  }
 0x172   :  { %919 = vst.msk [vmem:[%s2384_s1 + $0x130] sm:$0x1] %vm35_vm0, %v110_v15  }
 0x173   :  { %920 = vst.msk [vmem:[%s2384_s1 + $0x16f] sm:$0x2] %vm35_vm0, %v110_v15  }
 0x174   :  { %921 = vst.msk [vmem:[%s2384_s1 + $0x1ae] sm:$0x4] %vm35_vm0, %v110_v15  }
 0x175   :  { %922 = vst.msk [vmem:[%s2384_s1 + $0x1ed] sm:$0x8] %vm35_vm0, %v110_v15  }

// kernel: hourglass_forward.13
= control target key start
LH: loop header
LB: loop body
LE: loop exit
PB: predicated region body
PF: predicated region fallthrough
CT: control target
= control target key end

     0   :  { %s1155_s15 = smov 0   ;;  %s1345_s0 = inlined_call_operand.vmem [shape: bf16[2,1,16,40], index: 0, kind: input, shape index: {}]   ;;  %s1346_s1 = inlined_call_operand.vmem [shape: bf16[27,8,16], index: 1, kind: input, shape index: {}]   ;;  %s1347_s2 = inlined_call_operand.vmem [shape: f32[8,1], index: 2, kind: input, shape index: {}]   ;;  %s1348_s3 = inlined_call_operand.vmem [shape: f32[2,8,8,27], index: 3, kind: input, shape index: {}]   ;;  %s1349_s4 = inlined_call_operand.vmem [shape: bf16[2,8,8,27], index: 4, kind: output, shape index: {}]  }
   0x1 LB: > { %s973_s16 = sadd.s32 4294967295, %s1120_s15   ;;  %p977_p0 = scmp.ge.s32.totalorder %s1120_s15, 1  ;;  %s1120_s15 = sphi %s1155_s15, %s14_s15  }
   0x2   : > { %p172_p1 = scmp.lt.s32.totalorder %s1120_s15, 3 }
   0x4   : > { %p173_p2 = pnand %p977_p0, %p172_p1 }
   0x5   : > { %p203_p3 = scmp.lt.s32.totalorder (!%p173_p2), %s973_s16, 1  ;;  %s1122_s21 = smov (!%p173_p2), 127  }
   0x6   : > { %176 = sbr.rel (%p173_p2) target bundleno = 370 (0x172), region = 36  ;;  %s1123_s22 = smov (!%p173_p2), 124  }
   0x7   : > { %s1124_s23 = smov (!%p173_p2), 125   ;;  %s1125_s24 = smov (!%p173_p2), 119  }
   0x8   : > { %s1126_s25 = smov (!%p173_p2), 118   ;;  %s1127_s30 = smov (!%p173_p2), 116  }
   0x9   : > { %s1128_s5 = smov (!%p173_p2), 115  }
   0xb   : > { %s1351_s16 = smov (!%p203_p3, %s973_s16), 1  ;;  %vm234_vm0 = vcmask 130048   ;;  %v989_v6 = vld [vmem:[%s1346_s1 + $0x4] sm:$0xf]  ;;  %v222_v7 = vld [vmem:[%s1346_s1] sm:$0xf] }
   0xc   : > { %s1085_s17 = sshll.u32 %s1351_s16, 3  ;;  %v1009_v10 = vld [vmem:[%s1346_s1 + $0x14] sm:$0xf]  ;;  %v999_v11 = vld [vmem:[%s1346_s1 + $0xc] sm:$0xf]  ;;  %v219_v13 = vld [vmem:[%s1347_s2] sm:$0xff] }
   0xd   : > { %s1169_s20 = scalar_lea.vmem %s1345_s0, %s1085_s17  ;;  %v1129_v14 = vmov 0   ;;  %v1023_v15 = vld [vmem:[%s1346_s1 + $0x24] sm:$0xf]  ;;  %v1019_v16 = vld [vmem:[%s1346_s1 + $0x20] sm:$0xf]  ;;  %s1086_s8 = sshll.u32 %s1351_s16, 6 }
   0xe   : > { %v1089_v0 = vld [vmem:[%s1169_s20] sm:$0xff]  ;;  %1112 = vset.pattern.permute.xlu1 %v1129_v14  ;;  %1113 = vset.pattern.permute.xlu0 %v1129_v14  ;;  %v990_v19 = vld [vmem:[%s1346_s1 + $0x8] sm:$0xf]  ;;  %v1000_v23 = vld [vmem:[%s1346_s1 + $0x10] sm:$0xf]  ;;  %s1296_s11 = scalar_lea.vmem %s1348_s3, %s1086_s8  ;;  %s1087_s14 = sshll.u32 %s1351_s16, 5 }
   0xf   : > { %v1091_v1 = vld [vmem:[%s1169_s20] sm:$0xff]  ;;  %268 = vrot.lane.b32.xlu0 %v1089_v0, %s1122_s21  ;;  %298 = vmatpush.bf16.msra.mxu2 %v1089_v0  ;;  %v1033_v24 = vld [vmem:[%s1346_s1 + $0x2c] sm:$0xf]  ;;  %v1010_v27 = vld [vmem:[%s1346_s1 + $0x18] sm:$0xf]  ;;  %s1310_s19 = scalar_lea.vmem %s1349_s4, %s1087_s14  ;;  %vm255_vm1 = vcmask 216064  }
  0x10   : > { %378 = vrot.lane.b32.xlu1 %v1091_v1, %s1122_s21  ;;  %438 = vrot.lane.b32.xlu2 %v1091_v1, %s1123_s22  ;;  %v1090_v2 = vld [vmem:[%s1169_s20] sm:$0xff]  ;;  %v1043_v28 = vld [vmem:[%s1346_s1 + $0x38] sm:$0xf] }
  0x11   : > { %v1092_v3 = vld [vmem:[%s1169_s20] sm:$0xff]  ;;  %v1017_v31 = vld [vmem:[%s1346_s1 + $0x1c] sm:$0xf]  ;;  %v1024_v36 = vld [vmem:[%s1346_s1 + $0x28] sm:$0xf] }
  0x12   : > { %v1093_v4 = vld [vmem:[%s1169_s20] sm:$0xff]  ;;  %996 = vmatmul.msk.bf16.vlgmr.msra.gmra.mxu2 %vm234_vm0, %v989_v6  ;;  %v1047_v33 = vld [vmem:[%s1346_s1 + $0x3c] sm:$0xf]  ;;  %v1057_v37 = vld [vmem:[%s1346_s1 + $0x48] sm:$0xf] }
  0x13   : > { %408 = vmatpush.bf16.msrb.mxu2 %v1091_v1  ;;  %v1088_v5 = vld [vmem:[%s1169_s20] sm:$0xff]  ;;  %v1034_v39 = vld [vmem:[%s1346_s1 + $0x30] sm:$0xf]  ;;  %v1061_v41 = vld [vmem:[%s1346_s1 + $0x4c] sm:$0xf] }
  0x14   : > { %245 = vmatpush.bf16.msra.mxu0 %v1088_v5  ;;  %v1094_v8 = vld [vmem:[%s1169_s20] sm:$0xff]  ;;  %v1041_v44 = vld [vmem:[%s1346_s1 + $0x34] sm:$0xf]  ;;  %v1071_v45 = vld [vmem:[%s1346_s1 + $0x58] sm:$0xf] }
  0x15   : > { %v1095_v9 = vld [vmem:[%s1169_s20] sm:$0xff]  ;;  %v1079_v50 = vld [vmem:[%s1346_s1 + $0x68] sm:$0xf]  ;;  %v1062_v54 = vld [vmem:[%s1346_s1 + $0x50] sm:$0xf] }
  0x16   : > { %v1048_v47 = vld [vmem:[%s1346_s1 + $0x40] sm:$0xf]  ;;  %v1055_v49 = vld [vmem:[%s1346_s1 + $0x44] sm:$0xf]  ;;  %v1069_v57 = vld [vmem:[%s1346_s1 + $0x54] sm:$0xf] }
  0x17   : > { %323 = vrot.lane.b32.xlu0 %v1090_v2, %s1124_s23  ;;  %507 = vmatpush.bf16.msra.mxu2 %v1092_v3  ;;  %v1075_v48 = vld [vmem:[%s1346_s1 + $0x60] sm:$0xf]  ;;  %v1073_v58 = vld [vmem:[%s1346_s1 + $0x5c] sm:$0xf]  ;;  %v1077_v61 = vld [vmem:[%s1346_s1 + $0x64] sm:$0xf] }
  0x18   : > { %416 = vrot.lane.b32.xlu1 %v1091_v1, %s1124_s23  ;;  %477 = vrot.lane.b32.xlu2 %v1092_v3, %s1125_s24  ;;  %v251_v59 = vld [vmem:[%s1296_s11] sm:$0xff] }
  0x19   : > { %353 = vmatpush.bf16.msrb.mxu0 %v1090_v2 }
  0x1a   : > { %988 = vmatmul.msk.bf16.vlgmr.msra.gmra.mxu0 %vm234_vm0, %v222_v7 }
  0x1f   : > { %532 = vrot.lane.b32.xlu0 %v1093_v4, %s1122_s21 }
  0x20   : > { %592 = vrot.lane.b32.xlu1 %v1093_v4, %s1126_s25  ;;  %570 = vrot.lane.b32.xlu2 %v1093_v4, %s1125_s24 }
  0x22   : > { %1016 = vmatmul.msk.bf16.vlgmr.msrb.gmra.mxu2 %vm234_vm0, %v1009_v10 }
  0x27   : > { %631 = vrot.lane.b32.xlu0 %v1094_v8, %s1124_s23 }
  0x28   : > { %691 = vrot.lane.b32.xlu1 %v1094_v8, %s1127_s30  ;;  %669 = vrot.lane.b32.xlu2 %v1094_v8, %s1125_s24 }
  0x2a   : > { %1006 = vmatmul.msk.bf16.vlgmr.msrb.gmra.mxu0 %vm234_vm0, %v999_v11  ;;  %v997_v11 = vld [vmem:[%s1296_s11 + $0x8] sm:$0xff] }
  0x2f   : > { %730 = vrot.lane.b32.xlu0 %v1095_v9, %s1122_s21 }
  0x30   : > { %790 = vrot.lane.b32.xlu1 %v1095_v9, %s1123_s22  ;;  %768 = vrot.lane.b32.xlu2 %v1095_v9, %s1124_s23 }
  0x32   : > { %1030 = vmatmul.msk.bf16.vlgmr.msra.gmra.mxu2 %vm234_vm0, %v1023_v15 }
  0x37   : > { %812 = vrot.lane.b32.xlu0 %v1095_v9, %s1125_s24 }
  0x38   : > { %878 = vrot.lane.b32.xlu1 %v1095_v9, %s1128_s5  ;;  %834 = vrot.lane.b32.xlu2 %v1095_v9, %s1126_s25 }
  0x3f   : > { %856 = vrot.lane.b32.xlu0 %v1095_v9, %s1127_s30 }
  0x40   : > { %225 = vperm.xlu1 %1112, %v219_v13  }
  0x6a   : > { %v439_v12 = vpop.permute.xlu2 %438 }
  0x6b   : > { %451 = vmatpush.bf16.msra.mxu0 %v439_v12 }
  0x6e   : > { %1020 = vmatmul.msk.bf16.vlgmr.msra.gmra.mxu0 %vm234_vm0, %v1019_v16 }
  0x6f   : > { %562 = vmatpush.bf16.msrb.mxu0 %v1093_v4 }
  0x72   : > { %v478_v20 = vpop.permute.xlu2 %477 }
  0x73   : > { %661 = vmatpush.bf16.msra.mxu0 %v1094_v8 }
  0x7a   : > { %v571_v29 = vpop.permute.xlu2 %570 }
  0x7e   : > { %1040 = vmatmul.msk.bf16.vlgmr.msrb.gmra.mxu0 %vm234_vm0, %v1033_v24 }
  0x7f   : > { %760 = vmatpush.bf16.msrb.mxu0 %v1095_v9 }
  0x81   : > { %v269_v17 = vpop.permute.xlu0 %268 }
  0x82   : > { %v379_v18 = vpop.permute.xlu1 %378  ;;  %281 = vmatpush.bf16.msra.mxu1 %v269_v17  ;;  %v670_v34 = vpop.permute.xlu2 %669 }
  0x85   : > { %995 = vmatmul.msk.bf16.vlgmr.msra.gmra.mxu1 %vm234_vm0, %v990_v19 }
  0x86   : > { %391 = vmatpush.bf16.msrb.mxu1 %v379_v18 }
  0x89   : > { %v324_v21 = vpop.permute.xlu0 %323 }
  0x8a   : > { %490 = vmatpush.bf16.msra.mxu1 %v478_v20  ;;  %v417_v22 = vpop.permute.xlu1 %416  ;;  %336 = vmatpush.bf16.msra.mxu3 %v324_v21  ;;  %v769_v38 = vpop.permute.xlu2 %768  ;;  %v1007_v21 = vld [vmem:[%s1296_s11 + $0x10] sm:$0xff] }
  0x8d   : > { %1005 = vmatmul.msk.bf16.vlgmr.msra.gmra.mxu3 %vm234_vm0, %v1000_v23 }
  0x8e   : > { %429 = vmatpush.bf16.msrb.mxu3 %v417_v22  ;;  %1054 = vmatmul.msk.bf16.vlgmr.msra.gmra.mxu0 %vm234_vm0, %v1047_v33 }
  0x91   : > { %v533_v25 = vpop.permute.xlu0 %532 }
  0x92   : > { %v593_v26 = vpop.permute.xlu1 %592  ;;  %545 = vmatpush.bf16.msra.mxu3 %v533_v25  ;;  %v835_v43 = vpop.permute.xlu2 %834 }
  0x93   : > { %605 = vmatpush.bf16.msrb.mxu2 %v593_v26  ;;  %847 = vmatpush.bf16.msra.mxu0 %v835_v43 }
  0x95   : > { %1015 = vmatmul.msk.bf16.vlgmr.msrb.gmra.mxu1 %vm234_vm0, %v1010_v27  ;;  %v300_v53 = vpop.f32.mrf.mxu2 }
  0x96   : > { %1044 = vmatmul.msk.bf16.vlgmr.msrb.gmra.mxu2 %vm234_vm0, %v1043_v28  ;;  %583 = vmatpush.bf16.msrb.mxu1 %v571_v29 }
  0x97   : > { %v247_v52 = vpop.f32.mrf.mxu0 }
  0x99   : > { %v632_v32 = vpop.permute.xlu0 %631 }
  0x9a   : > { %v692_v30 = vpop.permute.xlu1 %691 }
  0x9b   : > { %704 = vmatpush.bf16.msra.mxu2 %v692_v30 }
  0x9d   : > { %1018 = vmatmul.msk.bf16.vlgmr.msrb.gmra.mxu3 %vm234_vm0, %v1017_v31  ;;  %v302_v56 = vpop.f32.mrf.mxu2 }
  0x9e   : > { %644 = vmatpush.bf16.msrb.mxu3 %v632_v32  ;;  %1068 = vmatmul.msk.bf16.vlgmr.msrb.gmra.mxu0 %vm234_vm0, %v1061_v41  ;;  %v1031_v41 = vld [vmem:[%s1296_s11 + $0x20] sm:$0xff] }
  0x9f   : > { %v249_v55 = vpop.f32.mrf.mxu0 }
  0xa1   : > { %v731_v40 = vpop.permute.xlu0 %730 }
  0xa2   : > { %v791_v35 = vpop.permute.xlu1 %790 }
  0xa3   : > { %803 = vmatpush.bf16.msrb.mxu2 %v791_v35 }
  0xa5   : > { %1029 = vmatmul.msk.bf16.vlgmr.msra.gmra.mxu1 %vm234_vm0, %v1024_v36  ;;  %v410_v3 = vpop.f32.mrf.mxu2 }
  0xa6   : > { %1058 = vmatmul.msk.bf16.vlgmr.msra.gmra.mxu2 %vm234_vm0, %v1057_v37  ;;  %682 = vmatpush.bf16.msra.mxu1 %v670_v34 }
  0xa7   : > { %v355_v2 = vpop.f32.mrf.mxu0 }
  0xa9   : > { %v813_v46 = vpop.permute.xlu0 %812 }
  0xaa   : > { %v879_v42 = vpop.permute.xlu1 %878 }
  0xab   : > { %891 = vmatpush.bf16.msra.mxu2 %v879_v42 }
  0xad   : > { %1039 = vmatmul.msk.bf16.vlgmr.msra.gmra.mxu3 %vm234_vm0, %v1034_v39  ;;  %v412_v5 = vpop.f32.mrf.mxu2 }
  0xae   : > { %743 = vmatpush.bf16.msra.mxu3 %v731_v40  ;;  %1076 = vmatmul.msk.bf16.vlgmr.msra.gmra.mxu0 %vm234_vm0, %v1075_v48  ;;  %v1021_v40 = vld [vmem:[%s1296_s11 + $0x18] sm:$0xff] }
  0xaf   : > { %v357_v4 = vpop.f32.mrf.mxu0 }
  0xb1   : > { %v857_v51 = vpop.permute.xlu0 %856 }
  0xb2   : > { %v1299_v60 = vpop.permute.xlu1 %225 }
  0xb3   : > { %v248_v62 = vadd.f32 %v247_v52, %v1299_v60 }
  0xb5   : > { %1042 = vmatmul.msk.bf16.vlgmr.msrb.gmra.mxu1 %vm234_vm0, %v1041_v44  ;;  %v252_v63 = vadd.f32 %v251_v59, %v248_v62  ;;  %v509_v7 = vpop.f32.mrf.mxu2  ;;  %v1045_v62 = vld [vmem:[%s1296_s11 + $0x28] sm:$0xff] }
  0xb6   : > { %1072 = vmatmul.msk.bf16.vlgmr.msrb.gmra.mxu2 %vm234_vm0, %v1071_v45  ;;  %781 = vmatpush.bf16.msrb.mxu1 %v769_v38 }
  0xb7   : > { %v253_v0 = vmax.f32 %v252_v63, 0.0 }
  0xb9   : > { %v254_v1 = vpack.c.bf16 %v253_v0, %v253_v0 }
  0xbb   : > { %256 = vst.msk [vmem:[%s1310_s19] sm:$0xf] %vm255_vm1, %v254_v1 }
  0xbd   : > { %1053 = vmatmul.msk.bf16.vlgmr.msrb.gmra.mxu3 %vm234_vm0, %v1048_v47  ;;  %v511_v13 = vpop.f32.mrf.mxu2 }
  0xbe   : > { %825 = vmatpush.bf16.msrb.mxu3 %v813_v46 }
  0xc5   : > { %1056 = vmatmul.msk.bf16.vlgmr.msra.gmra.mxu1 %vm234_vm0, %v1055_v49 }
  0xc6   : > { %1080 = vmatmul.msk.bf16.vlgmr.msra.gmra.mxu2 %vm234_vm0, %v1079_v50  ;;  %869 = vmatpush.bf16.msra.mxu1 %v857_v51 }
  0xcd   : > { %1067 = vmatmul.msk.bf16.vlgmr.msra.gmra.mxu3 %vm234_vm0, %v1062_v54 }
  0xd5   : > { %1070 = vmatmul.msk.bf16.vlgmr.msrb.gmra.mxu1 %vm234_vm0, %v1069_v57 }
  0xdd   : > { %1074 = vmatmul.msk.bf16.vlgmr.msrb.gmra.mxu3 %vm234_vm0, %v1073_v58 }
  0xe5   : > { %1078 = vmatmul.msk.bf16.vlgmr.msra.gmra.mxu1 %vm234_vm0, %v1077_v61 }
  0xeb   : > { %v453_v6 = vpop.f32.mrf.mxu0 }
  0xf3   : > { %v455_v9 = vpop.f32.mrf.mxu0 }
  0xfb   : > { %v564_v17 = vpop.f32.mrf.mxu0 }
 0x102   : > { %v283_v8 = vpop.f32.mrf.mxu1 }
 0x103   : > { %v301_v10 = vadd.f32 %v300_v53, %v283_v8  ;;  %v566_v23 = vpop.f32.mrf.mxu0 }
 0x105   : > { %v304_v12 = vadd.f32 %v301_v10, %v1299_v60 }
 0x107   : > { %v307_v14 = vadd.f32 %v997_v11, %v304_v12 }
 0x109   : > { %v308_v15 = vmax.f32 %v307_v14, 0.0  ;;  %v1059_v14 = vld [vmem:[%s1296_s11 + $0x30] sm:$0xff] }
 0x10a   : > { %v285_v16 = vpop.f32.mrf.mxu1 }
 0x10b   : > { %v309_v18 = vpack.c.bf16 %v308_v15, %v308_v15  ;;  %v663_v31 = vpop.f32.mrf.mxu0 }
 0x10d   : > { %998 = vst.msk [vmem:[%s1310_s19 + $0x4] sm:$0xf] %vm255_vm1, %v309_v18 }
 0x110   : > { %v338_v19 = vpop.f32.mrf.mxu3 }
 0x111   : > { %v356_v20 = vadd.f32 %v355_v2, %v338_v19 }
 0x112   : > { %v393_v22 = vpop.f32.mrf.mxu1 }
 0x113   : > { %v359_v24 = vadd.f32 %v356_v20, %v1299_v60  ;;  %v411_v32 = vadd.f32 %v410_v3, %v393_v22  ;;  %v665_v37 = vpop.f32.mrf.mxu0 }
 0x115   : > { %v362_v25 = vadd.f32 %v1007_v21, %v359_v24 }
 0x117   : > { %v363_v26 = vmax.f32 %v362_v25, 0.0 }
 0x118   : > { %v340_v27 = vpop.f32.mrf.mxu3 }
 0x119   : > { %v607_v28 = vpop.f32.mrf.mxu2  ;;  %v364_v29 = vpack.c.bf16 %v363_v26, %v363_v26 }
 0x11a   : > { %v395_v30 = vpop.f32.mrf.mxu1 }
 0x11b   : > { %1008 = vst.msk [vmem:[%s1310_s19 + $0x8] sm:$0xf] %vm255_vm1, %v364_v29  ;;  %v762_v51 = vpop.f32.mrf.mxu0 }
 0x120   : > { %v431_v33 = vpop.f32.mrf.mxu3 }
 0x121   : > { %v609_v34 = vpop.f32.mrf.mxu2  ;;  %v435_v35 = vadd.f32 %v431_v33, %v411_v32 }
 0x122   : > { %v492_v36 = vpop.f32.mrf.mxu1 }
 0x123   : > { %v457_v38 = vadd.f32 %v453_v6, %v435_v35  ;;  %v510_v39 = vadd.f32 %v509_v7, %v492_v36  ;;  %v764_v58 = vpop.f32.mrf.mxu0  ;;  %v1081_v36 = vld [vmem:[%s1296_s11 + $0x38] sm:$0xff] }
 0x125   : > { %v458_v42 = vadd.f32 %v457_v38, %v1299_v60  ;;  %v513_v43 = vadd.f32 %v510_v39, %v1299_v60 }
 0x127   : > { %v461_v44 = vadd.f32 %v1021_v40, %v458_v42  ;;  %v516_v45 = vadd.f32 %v1031_v41, %v513_v43 }
 0x128   : > { %v433_v46 = vpop.f32.mrf.mxu3 }
 0x129   : > { %v706_v47 = vpop.f32.mrf.mxu2  ;;  %v462_v48 = vmax.f32 %v461_v44, 0.0  ;;  %v517_v49 = vmax.f32 %v516_v45, 0.0 }
 0x12a   : > { %v494_v50 = vpop.f32.mrf.mxu1 }
 0x12b   : > { %v463_v52 = vpack.c.bf16 %v462_v48, %v462_v48  ;;  %v518_v53 = vpack.c.bf16 %v517_v49, %v517_v49  ;;  %v849_v4 = vpop.f32.mrf.mxu0 }
 0x12d   : > { %1022 = vst.msk [vmem:[%s1310_s19 + $0xc] sm:$0xf] %vm255_vm1, %v463_v52 }
 0x12e   : > { %1032 = vst.msk [vmem:[%s1310_s19 + $0x10] sm:$0xf] %vm255_vm1, %v518_v53 }
 0x130   : > { %v547_v54 = vpop.f32.mrf.mxu3 }
 0x131   : > { %v708_v55 = vpop.f32.mrf.mxu2  ;;  %v565_v56 = vadd.f32 %v564_v17, %v547_v54 }
 0x132   : > { %v585_v57 = vpop.f32.mrf.mxu1 }
 0x133   : > { %v589_v59 = vadd.f32 %v585_v57, %v565_v56  ;;  %v851_v11 = vpop.f32.mrf.mxu0 }
 0x135   : > { %v611_v61 = vadd.f32 %v607_v28, %v589_v59 }
 0x137   : > { %v612_v63 = vadd.f32 %v611_v61, %v1299_v60 }
 0x138   : > { %v549_v0 = vpop.f32.mrf.mxu3 }
 0x139   : > { %v805_v1 = vpop.f32.mrf.mxu2  ;;  %v615_v2 = vadd.f32 %v1045_v62, %v612_v63 }
 0x13a   : > { %v587_v3 = vpop.f32.mrf.mxu1 }
 0x13b   : > { %v616_v5 = vmax.f32 %v615_v2, 0.0 }
 0x13d   : > { %v617_v6 = vpack.c.bf16 %v616_v5, %v616_v5 }
 0x13f   : > { %1046 = vst.msk [vmem:[%s1310_s19 + $0x14] sm:$0xf] %vm255_vm1, %v617_v6 }
 0x140   : > { %v646_v7 = vpop.f32.mrf.mxu3 }
 0x141   : > { %v807_v8 = vpop.f32.mrf.mxu2  ;;  %v664_v9 = vadd.f32 %v663_v31, %v646_v7 }
 0x142   : > { %v684_v10 = vpop.f32.mrf.mxu1 }
 0x143   : > { %v688_v12 = vadd.f32 %v684_v10, %v664_v9 }
 0x145   : > { %v710_v13 = vadd.f32 %v706_v47, %v688_v12 }
 0x147   : > { %v711_v15 = vadd.f32 %v710_v13, %v1299_v60 }
 0x148   : > { %v648_v16 = vpop.f32.mrf.mxu3 }
 0x149   : > { %v893_v17 = vpop.f32.mrf.mxu2  ;;  %v714_v18 = vadd.f32 %v1059_v14, %v711_v15 }
 0x14a   : > { %v686_v19 = vpop.f32.mrf.mxu1 }
 0x14b   : > { %v715_v20 = vmax.f32 %v714_v18, 0.0 }
 0x14d   : > { %v716_v21 = vpack.c.bf16 %v715_v20, %v715_v20 }
 0x14f   : > { %1060 = vst.msk [vmem:[%s1310_s19 + $0x18] sm:$0xf] %vm255_vm1, %v716_v21 }
 0x150   : > { %v745_v22 = vpop.f32.mrf.mxu3 }
 0x151   : > { %v895_v23 = vpop.f32.mrf.mxu2  ;;  %v763_v25 = vadd.f32 %v762_v51, %v745_v22 }
 0x152   : > { %v783_v24 = vpop.f32.mrf.mxu1 }
 0x153   : > { %v787_v28 = vadd.f32 %v783_v24, %v763_v25 }
 0x155   : > { %v809_v29 = vadd.f32 %v805_v1, %v787_v28 }
 0x158   : > { %v747_v26 = vpop.f32.mrf.mxu3 }
 0x15a   : > { %v785_v27 = vpop.f32.mrf.mxu1 }
 0x160   : > { %v827_v30 = vpop.f32.mrf.mxu3 }
 0x161   : > { %v831_v31 = vadd.f32 %v827_v30, %v809_v29 }
 0x162   : > { %v871_v32 = vpop.f32.mrf.mxu1 }
 0x163   : > { %v853_v33 = vadd.f32 %v849_v4, %v831_v31 }
 0x165   : > { %v875_v34 = vadd.f32 %v871_v32, %v853_v33 }
 0x167   : > { %v897_v35 = vadd.f32 %v893_v17, %v875_v34 }
 0x168   : > { %v829_v37 = vpop.f32.mrf.mxu3 }
 0x169   : > { %v898_v38 = vadd.f32 %v897_v35, %v1299_v60 }
 0x16a   : > { %v873_v39 = vpop.f32.mrf.mxu1 }
 0x16b   : > { %v901_v40 = vadd.f32 %v1081_v36, %v898_v38 }
 0x16d   : > { %v902_v41 = vmax.f32 %v901_v40, 0.0 }
 0x16f   : > { %v903_v42 = vpack.c.bf16 %v902_v41, %v902_v41 }
 0x171   : > { %1082 = vst.msk [vmem:[%s1310_s19 + $0x1c] sm:$0xf] %vm255_vm1, %v903_v42 }
 0x172 PF: > { %s14_s15 = sadd.s32 1, %s1120_s15  }
 0x173   : > { %p11_p4 = scmp.ge.s32.totalorder %s14_s15, 4  }
 0x175   :  { %13 = sbr.rel (!%p11_p4) target bundleno = 1 (0x1), region = 109 }

// kernel: hourglass_forward.15
= control target key start
LH: loop header
LB: loop body
LE: loop exit
PB: predicated region body
PF: predicated region fallthrough
CT: control target
= control target key end

     0   :  { %s1213_s15 = smov 0   ;;  %s1495_s0 = inlined_call_operand.vmem [shape: bf16[2,1,8,156], index: 0, kind: input, shape index: {}]   ;;  %s1496_s1 = inlined_call_operand.vmem [shape: bf16[27,4,8], index: 1, kind: input, shape index: {}]   ;;  %s1497_s2 = inlined_call_operand.vmem [shape: f32[4,1], index: 2, kind: input, shape index: {}]   ;;  %s1498_s3 = inlined_call_operand.vmem [shape: f32[2,8,4,125], index: 3, kind: input, shape index: {}]   ;;  %s1499_s4 = inlined_call_operand.vmem [shape: f32[2,8,4,125], index: 4, kind: output, shape index: {}]  }
   0x1 LB: > { %s1071_s16 = sadd.s32 4294967295, %s1178_s15   ;;  %p1075_p0 = scmp.ge.s32.totalorder %s1178_s15, 1  ;;  %s1178_s15 = sphi %s1213_s15, %s14_s15  }
   0x2   : > { %p172_p1 = scmp.lt.s32.totalorder %s1178_s15, 3 }
   0x4   : > { %p173_p2 = pnand %p1075_p0, %p172_p1 }
   0x5   : > { %p203_p3 = scmp.lt.s32.totalorder (!%p173_p2), %s1071_s16, 1  ;;  %s1180_s21 = smov (!%p173_p2), 123  }
   0x6   : > { %176 = sbr.rel (%p173_p2) target bundleno = 375 (0x177), region = 36  ;;  %s1181_s22 = smov (!%p173_p2), 127  }
   0x7   : > { %s1182_s23 = smov (!%p173_p2), 122   ;;  %s1183_s24 = smov (!%p173_p2), 103  }
   0x8   : > { %s1184_s25 = smov (!%p173_p2), 102   ;;  %s1185_s26 = smov (!%p173_p2), 98  }
   0x9   : > { %s1186_s29 = smov (!%p173_p2), 97  }
   0xb   : > { %s1501_s16 = smov (!%p203_p3, %s1071_s16), 1  ;;  %vm231_vm0 = vcmask 1043456   ;;  %vm227_vm1 = vcmask 64512   ;;  %v1083_v19 = vld [vmem:[%s1496_s1 + $0x2] sm:$0x3]  ;;  %v1187_v28 = vmov 0  }
   0xc   : > { %s1151_s17 = sshll.u32 %s1501_s16, 3  ;;  %v221_v21 = vld [vmem:[%s1496_s1] sm:$0x3]  ;;  %v1095_v25 = vld [vmem:[%s1496_s1 + $0xa] sm:$0x3]  ;;  %1170 = vset.pattern.permute.xlu1 %v1187_v28  ;;  %1171 = vset.pattern.permute.xlu0 %v1187_v28  ;;  %vm323_vm2 = vcmask 1006592  }
   0xd   : > { %s1227_s20 = scalar_lea.vmem %s1495_s0, %s1151_s17  ;;  %v1089_v27 = vld [vmem:[%s1496_s1 + $0x6] sm:$0x3]  ;;  %v219_v29 = vld [vmem:[%s1497_s2] sm:$0xf]  ;;  %v1105_v33 = vld [vmem:[%s1496_s1 + $0x12] sm:$0x3] }
   0xe   : > { %v311_v0 = vld [vmem:[%s1227_s20] sm:$0xff]  ;;  %v1090_v47 = vld [vmem:[%s1496_s1 + $0x8] sm:$0x3]  ;;  %vm457_vm3 = vcmask 998400   ;;  %v1096_v53 = vld [vmem:[%s1496_s1 + $0xc] sm:$0x3] }
   0xf   : > { %v253_v1 = vld [vmem:[%s1227_s20] sm:$0xf]  ;;  %v316_v2 = vunpack.c.h.b16 %v311_v0  ;;  %v315_v3 = vunpack.c.l.b16 %v311_v0  ;;  %v1084_v38 = vld [vmem:[%s1496_s1 + $0x4] sm:$0x3]  ;;  %v1101_v54 = vld [vmem:[%s1496_s1 + $0x10] sm:$0x3] }
  0x10   : > { %v259_v4 = vunpack.c.l.b16 %v253_v1  ;;  %v1232_v5 = vld [vmem:[%s1227_s20] sm:$0xf]  ;;  %v286_v17 = vsel %vm231_vm0, %v253_v1, 0  ;;  %vm501_vm4 = vcmask 842752   ;;  %v1099_v63 = vld [vmem:[%s1496_s1 + $0xe] sm:$0x3] }
  0x11   : > { %v1234_v6 = vpack.c.b16 %v316_v2, %v316_v2  ;;  %v317_v8 = vpack.c.b16 %v315_v3, %v315_v3  ;;  %v376_v9 = vunpack.c.l.b16 %v1232_v5  ;;  %v1246_v11 = vld [vmem:[%s1227_s20] sm:$0xf]  ;;  %295 = vmatpush.bf16.msra.mxu2 %v286_v17  ;;  %v403_v22 = vsel %vm231_vm0, %v1232_v5, 0  ;;  %v1112_v17 = vld [vmem:[%s1496_s1 + $0x18] sm:$0x3]  ;;  %s1152_s8 = sshll.u32 %s1501_s16, 5 }
  0x12   : > { %v260_v7 = vpack.c.b16 %v259_v4, %v259_v4  ;;  %v554_v12 = vunpack.c.l.b16 %v1246_v11  ;;  %v1265_v14 = vld [vmem:[%s1227_s20] sm:$0xf]  ;;  %v581_v51 = vsel %vm231_vm0, %v1246_v11, 0  ;;  %vm635_vm5 = vcmask 834560   ;;  %s1447_s11 = scalar_lea.vmem %s1498_s3, %s1152_s8  ;;  %s1460_s17 = scalar_lea.vmem %s1499_s4, %s1152_s8 }
  0x13   : > { %321 = vrot.lane.b32.xlu1 %v1234_v6, %s1180_s21  ;;  %426 = vrot.lane.b32.xlu2 %v317_v8, %s1180_s21  ;;  %v377_v10 = vpack.c.b16 %v376_v9, %v376_v9  ;;  %v786_v15 = vunpack.c.l.b16 %v1265_v14  ;;  %v220_v18 = vld [vmem:[%s1227_s20] sm:$0xf]  ;;  %v1111_v9 = vld [vmem:[%s1496_s1 + $0x16] sm:$0x3]  ;;  %vm751_vm6 = vcmask 801792   ;;  %vm975_vm7 = vcmask 793600  }
  0x14   : > { %261 = vrot.lane.b32.xlu0 %v260_v7, %s1181_s22  ;;  %v555_v13 = vpack.c.b16 %v554_v12, %v554_v12  ;;  %v233_v20 = vsel %vm231_vm0, %v220_v18, 0  ;;  %1086 = vmatmul.msk.bf16.vlgmr.msra.gmra.mxu2 %vm227_vm1, %v1083_v19  ;;  %v308_v23 = vld [vmem:[%s1227_s20] sm:$0xf]  ;;  %vm251_vm8 = vcmask 1018880  }
  0x15   : > { %v787_v16 = vpack.c.b16 %v786_v15, %v786_v15  ;;  %242 = vmatpush.bf16.msra.mxu0 %v233_v20  ;;  %412 = vmatpush.bf16.msrb.mxu2 %v403_v22  ;;  %v348_v24 = vsel %vm231_vm0, %v308_v23, 0  ;;  %v486_v30 = vld [vmem:[%s1227_s20] sm:$0xf] }
  0x16   : > { %v526_v31 = vsel %vm231_vm0, %v486_v30, 0  ;;  %v664_v60 = vld [vmem:[%s1227_s20] sm:$0xf] }
  0x17   : > { %v703_v62 = vsel %vm231_vm0, %v664_v60, 0  ;;  %v1139_v60 = vld [vmem:[%s1496_s1 + $0x2e] sm:$0x3] }
  0x18   : > { %1082 = vmatmul.msk.bf16.vlgmr.msra.gmra.mxu0 %vm227_vm1, %v221_v21 }
  0x19   : > { %357 = vmatpush.bf16.msrb.mxu0 %v348_v24  ;;  %535 = vmatpush.bf16.msra.mxu2 %v526_v31 }
  0x1b   : > { %378 = vrot.lane.b32.xlu1 %v377_v10, %s1181_s22  ;;  %428 = vrot.lane.b32.xlu2 %v1234_v6, %s1180_s21 }
  0x1c   : > { %319 = vrot.lane.b32.xlu0 %v317_v8, %s1180_s21 }
  0x23   : > { %455 = vrot.lane.b32.xlu1 %v1234_v6, %s1182_s23  ;;  %497 = vrot.lane.b32.xlu2 %v317_v8, %s1183_s24 }
  0x24   : > { %453 = vrot.lane.b32.xlu0 %v317_v8, %s1182_s23  ;;  %1098 = vmatmul.msk.bf16.vlgmr.msrb.gmra.mxu2 %vm227_vm1, %v1095_v25  ;;  %v1127_v25 = vld [vmem:[%s1496_s1 + $0x24] sm:$0x3] }
  0x28   : > { %1092 = vmatmul.msk.bf16.vlgmr.msrb.gmra.mxu0 %vm227_vm1, %v1089_v27 }
  0x2b   : > { %556 = vrot.lane.b32.xlu1 %v555_v13, %s1181_s22  ;;  %631 = vrot.lane.b32.xlu2 %v317_v8, %s1184_s25 }
  0x2c   : > { %499 = vrot.lane.b32.xlu0 %v1234_v6, %s1183_s24 }
  0x33   : > { %604 = vrot.lane.b32.xlu1 %v317_v8, %s1183_s24  ;;  %606 = vrot.lane.b32.xlu2 %v1234_v6, %s1183_s24 }
  0x34   : > { %633 = vrot.lane.b32.xlu0 %v1234_v6, %s1184_s25  ;;  %1108 = vmatmul.msk.bf16.vlgmr.msra.gmra.mxu2 %vm227_vm1, %v1105_v33 }
  0x3b   : > { %677 = vrot.lane.b32.xlu1 %v1234_v6, %s1180_s21  ;;  %747 = vrot.lane.b32.xlu2 %v317_v8, %s1185_s26 }
  0x3c   : > { %675 = vrot.lane.b32.xlu0 %v317_v8, %s1180_s21 }
  0x43   : > { %720 = vrot.lane.b32.xlu1 %v317_v8, %s1183_s24  ;;  %722 = vrot.lane.b32.xlu2 %v1234_v6, %s1183_s24 }
  0x44   : > { %749 = vrot.lane.b32.xlu0 %v1234_v6, %s1185_s26 }
  0x4b   : > { %863 = vrot.lane.b32.xlu1 %v317_v8, %s1182_s23  ;;  %865 = vrot.lane.b32.xlu2 %v1234_v6, %s1182_s23 }
  0x4c   : > { %788 = vrot.lane.b32.xlu0 %v787_v16, %s1181_s22  ;;  %v813_v16 = vsel %vm231_vm0, %v1265_v14, 0  ;;  %v1115_v14 = vld [vmem:[%s1496_s1 + $0x1a] sm:$0x3] }
  0x53   : > { %838 = vrot.lane.b32.xlu1 %v1234_v6, %s1180_s21  ;;  %890 = vrot.lane.b32.xlu2 %v317_v8, %s1183_s24 }
  0x54   : > { %836 = vrot.lane.b32.xlu0 %v317_v8, %s1180_s21 }
  0x5b   : > { %971 = vrot.lane.b32.xlu1 %v317_v8, %s1186_s29  ;;  %973 = vrot.lane.b32.xlu2 %v1234_v6, %s1186_s29 }
  0x5c   : > { %892 = vrot.lane.b32.xlu0 %v1234_v6, %s1183_s24 }
  0x63   : > { %919 = vrot.lane.b32.xlu1 %v1234_v6, %s1184_s25  ;;  %944 = vrot.lane.b32.xlu2 %v317_v8, %s1185_s26 }
  0x64   : > { %917 = vrot.lane.b32.xlu0 %v317_v8, %s1184_s25  ;;  %v1117_v8 = vld [vmem:[%s1496_s1 + $0x1c] sm:$0x3] }
  0x6b   : > { %224 = vperm.xlu1 %1170, %v219_v29  }
  0x6c   : > { %946 = vrot.lane.b32.xlu0 %v1234_v6, %s1185_s26  ;;  %v1106_v6 = vld [vmem:[%s1496_s1 + $0x14] sm:$0x3] }
  0x6d   : > { %v427_v26 = vpop.permute.xlu2 %426 }
  0x75   : > { %v429_v32 = vpop.permute.xlu2 %428 }
  0x76   : > { %v430_v39 = vsel %vm323_vm2, %v427_v26, %v429_v32  ;;  %v1121_v26 = vld [vmem:[%s1496_s1 + $0x1e] sm:$0x3]  ;;  %v1122_v32 = vld [vmem:[%s1496_s1 + $0x20] sm:$0x3] }
  0x77   : > { %v435_v44 = vsel %vm231_vm0, %v430_v39, 0  ;;  %v1137_v39 = vld [vmem:[%s1496_s1 + $0x2c] sm:$0x3] }
  0x7d   : > { %v498_v34 = vpop.permute.xlu2 %497 }
  0x85   : > { %v322_v35 = vpop.permute.xlu1 %321  ;;  %v632_v45 = vpop.permute.xlu2 %631 }
  0x86   : > { %v262_v36 = vpop.permute.xlu0 %261 }
  0x87   : > { %v267_v37 = vsel %vm231_vm0, %v262_v36, 0 }
  0x88   : > { %276 = vmatpush.bf16.msra.mxu1 %v267_v37 }
  0x8b   : > { %1085 = vmatmul.msk.bf16.vlgmr.msra.gmra.mxu1 %vm227_vm1, %v1084_v38  ;;  %v1125_v38 = vld [vmem:[%s1496_s1 + $0x22] sm:$0x3] }
  0x8d   : > { %v379_v40 = vpop.permute.xlu1 %378  ;;  %v607_v55 = vpop.permute.xlu2 %606 }
  0x8e   : > { %v320_v41 = vpop.permute.xlu0 %319  ;;  %v384_v43 = vsel %vm231_vm0, %v379_v40, 0  ;;  %v1131_v40 = vld [vmem:[%s1496_s1 + $0x26] sm:$0x3] }
  0x8f   : > { %v324_v42 = vsel %vm323_vm2, %v320_v41, %v322_v35  ;;  %393 = vmatpush.bf16.msrb.mxu1 %v384_v43 }
  0x90   : > { %v329_v46 = vsel %vm231_vm0, %v324_v42, 0 }
  0x91   : > { %338 = vmatpush.bf16.msra.mxu3 %v329_v46 }
  0x94   : > { %1091 = vmatmul.msk.bf16.vlgmr.msra.gmra.mxu3 %vm227_vm1, %v1090_v47 }
  0x95   : > { %444 = vmatpush.bf16.msrb.mxu3 %v435_v44  ;;  %v456_v48 = vpop.permute.xlu1 %455  ;;  %v748_v0 = vpop.permute.xlu2 %747 }
  0x96   : > { %v454_v49 = vpop.permute.xlu0 %453 }
  0x97   : > { %v458_v50 = vsel %vm457_vm3, %v454_v49, %v456_v48  ;;  %v1132_v48 = vld [vmem:[%s1496_s1 + $0x28] sm:$0x3] }
  0x98   : > { %v463_v52 = vsel %vm231_vm0, %v458_v50, 0 }
  0x99   : > { %472 = vmatpush.bf16.msra.mxu0 %v463_v52 }
  0x9b   : > { %1097 = vmatmul.msk.bf16.vlgmr.msrb.gmra.mxu1 %vm227_vm1, %v1096_v53  ;;  %v1135_v53 = vld [vmem:[%s1496_s1 + $0x2a] sm:$0x3] }
  0x9c   : > { %1102 = vmatmul.msk.bf16.vlgmr.msra.gmra.mxu0 %vm227_vm1, %v1101_v54  ;;  %v1145_v54 = vld [vmem:[%s1496_s1 + $0x34] sm:$0x3] }
  0x9d   : > { %590 = vmatpush.bf16.msrb.mxu0 %v581_v51  ;;  %v557_v56 = vpop.permute.xlu1 %556  ;;  %v723_v10 = vpop.permute.xlu2 %722 }
  0x9e   : > { %v500_v57 = vpop.permute.xlu0 %499  ;;  %v562_v58 = vsel %vm231_vm0, %v557_v56, 0 }
  0x9f   : > { %v502_v59 = vsel %vm501_vm4, %v498_v34, %v500_v57  ;;  %571 = vmatpush.bf16.msra.mxu3 %v562_v58 }
  0xa0   : > { %v507_v61 = vsel %vm231_vm0, %v502_v59, 0 }
  0xa1   : > { %516 = vmatpush.bf16.msra.mxu1 %v507_v61  ;;  %712 = vmatpush.bf16.msra.mxu0 %v703_v62  ;;  %v244_v61 = vpop.f32.mrf.mxu0  ;;  %v297_v62 = vpop.f32.mrf.mxu2 }
  0xa4   : > { %1100 = vmatmul.msk.bf16.vlgmr.msrb.gmra.mxu3 %vm227_vm1, %v1099_v63  ;;  %v1143_v63 = vld [vmem:[%s1496_s1 + $0x32] sm:$0x3] }
  0xa5   : > { %v605_v1 = vpop.permute.xlu1 %604  ;;  %v866_v24 = vpop.permute.xlu2 %865 }
  0xa6   : > { %v634_v2 = vpop.permute.xlu0 %633  ;;  %v608_v4 = vsel %vm501_vm4, %v605_v1, %v607_v55  ;;  %v1141_v55 = vld [vmem:[%s1496_s1 + $0x30] sm:$0x3] }
  0xa7   : > { %v636_v3 = vsel %vm635_vm5, %v632_v45, %v634_v2  ;;  %v613_v7 = vsel %vm231_vm0, %v608_v4, 0 }
  0xa8   : > { %v641_v5 = vsel %vm231_vm0, %v636_v3, 0  ;;  %622 = vmatpush.bf16.msrb.mxu1 %v613_v7 }
  0xa9   : > { %650 = vmatpush.bf16.msrb.mxu2 %v641_v5  ;;  %v246_v3 = vpop.f32.mrf.mxu0  ;;  %v299_v5 = vpop.f32.mrf.mxu2 }
  0xab   : > { %1107 = vmatmul.msk.bf16.vlgmr.msra.gmra.mxu1 %vm227_vm1, %v1106_v6 }
  0xac   : > { %1118 = vmatmul.msk.bf16.vlgmr.msrb.gmra.mxu2 %vm227_vm1, %v1117_v8  ;;  %1114 = vmatmul.msk.bf16.vlgmr.msrb.gmra.mxu0 %vm227_vm1, %v1111_v9 }
  0xad   : > { %v678_v11 = vpop.permute.xlu1 %677  ;;  %822 = vmatpush.bf16.msrb.mxu0 %v813_v16  ;;  %v891_v33 = vpop.permute.xlu2 %890 }
  0xae   : > { %v676_v12 = vpop.permute.xlu0 %675 }
  0xaf   : > { %v679_v13 = vsel %vm323_vm2, %v676_v12, %v678_v11 }
  0xb0   : > { %v684_v15 = vsel %vm231_vm0, %v679_v13, 0 }
  0xb1   : > { %693 = vmatpush.bf16.msrb.mxu3 %v684_v15  ;;  %v359_v7 = vpop.f32.mrf.mxu0  ;;  %v414_v8 = vpop.f32.mrf.mxu2  ;;  %v1087_v15 = vld [vmem:[%s1447_s11 + $0x4] sm:$0xf] }
  0xb4   : > { %1113 = vmatmul.msk.bf16.vlgmr.msra.gmra.mxu3 %vm227_vm1, %v1112_v17 }
  0xb5   : > { %v721_v18 = vpop.permute.xlu1 %720  ;;  %v974_v41 = vpop.permute.xlu2 %973 }
  0xb6   : > { %v750_v19 = vpop.permute.xlu0 %749  ;;  %v724_v21 = vsel %vm501_vm4, %v721_v18, %v723_v10 }
  0xb7   : > { %v752_v20 = vsel %vm751_vm6, %v748_v0, %v750_v19  ;;  %v729_v23 = vsel %vm231_vm0, %v724_v21, 0  ;;  %v248_v0 = vld [vmem:[%s1447_s11] sm:$0xf] }
  0xb8   : > { %v757_v22 = vsel %vm231_vm0, %v752_v20, 0  ;;  %738 = vmatpush.bf16.msra.mxu1 %v729_v23  ;;  %v1093_v23 = vld [vmem:[%s1447_s11 + $0x8] sm:$0xf] }
  0xb9   : > { %766 = vmatpush.bf16.msra.mxu2 %v757_v22  ;;  %v361_v9 = vpop.f32.mrf.mxu0  ;;  %v416_v10 = vpop.f32.mrf.mxu2 }
  0xba   : > { %v1129_v9 = vld [vmem:[%s1447_s11 + $0x18] sm:$0xf] }
  0xbb   : > { %1116 = vmatmul.msk.bf16.vlgmr.msrb.gmra.mxu1 %vm227_vm1, %v1115_v14 }
  0xbc   : > { %1128 = vmatmul.msk.bf16.vlgmr.msra.gmra.mxu2 %vm227_vm1, %v1127_v25  ;;  %1124 = vmatmul.msk.bf16.vlgmr.msra.gmra.mxu0 %vm227_vm1, %v1121_v26 }
  0xbd   : > { %v864_v27 = vpop.permute.xlu1 %863  ;;  %v945_v56 = vpop.permute.xlu2 %944 }
  0xbe   : > { %v789_v28 = vpop.permute.xlu0 %788  ;;  %v867_v30 = vsel %vm457_vm3, %v864_v27, %v866_v24 }
  0xbf   : > { %v794_v29 = vsel %vm231_vm0, %v789_v28, 0  ;;  %v872_v31 = vsel %vm231_vm0, %v867_v30, 0 }
  0xc0   : > { %803 = vmatpush.bf16.msra.mxu3 %v794_v29  ;;  %881 = vmatpush.bf16.msrb.mxu2 %v872_v31 }
  0xc1   : > { %v537_v11 = vpop.f32.mrf.mxu2 }
  0xc4   : > { %1123 = vmatmul.msk.bf16.vlgmr.msrb.gmra.mxu3 %vm227_vm1, %v1122_v32 }
  0xc5   : > { %v839_v34 = vpop.permute.xlu1 %838 }
  0xc6   : > { %v837_v35 = vpop.permute.xlu0 %836 }
  0xc7   : > { %v840_v36 = vsel %vm323_vm2, %v837_v35, %v839_v34 }
  0xc8   : > { %v845_v37 = vsel %vm231_vm0, %v840_v36, 0 }
  0xc9   : > { %854 = vmatpush.bf16.msrb.mxu1 %v845_v37  ;;  %v539_v18 = vpop.f32.mrf.mxu2 }
  0xcb   : > { %1126 = vmatmul.msk.bf16.vlgmr.msra.gmra.mxu1 %vm227_vm1, %v1125_v38  ;;  %v1109_v38 = vld [vmem:[%s1447_s11 + $0x10] sm:$0xf] }
  0xcc   : > { %1138 = vmatmul.msk.bf16.vlgmr.msrb.gmra.mxu2 %vm227_vm1, %v1137_v39  ;;  %1134 = vmatmul.msk.bf16.vlgmr.msrb.gmra.mxu0 %vm227_vm1, %v1131_v40  ;;  %v1103_v39 = vld [vmem:[%s1447_s11 + $0xc] sm:$0xf] }
  0xcd   : > { %v972_v42 = vpop.permute.xlu1 %971 }
  0xce   : > { %v893_v43 = vpop.permute.xlu0 %892  ;;  %v976_v45 = vsel %vm975_vm7, %v972_v42, %v974_v41 }
  0xcf   : > { %v894_v44 = vsel %vm501_vm4, %v891_v33, %v893_v43  ;;  %v981_v47 = vsel %vm231_vm0, %v976_v45, 0 }
  0xd0   : > { %v899_v46 = vsel %vm231_vm0, %v894_v44, 0  ;;  %990 = vmatpush.bf16.msra.mxu2 %v981_v47 }
  0xd1   : > { %908 = vmatpush.bf16.msrb.mxu3 %v899_v46 }
  0xd4   : > { %1133 = vmatmul.msk.bf16.vlgmr.msra.gmra.mxu3 %vm227_vm1, %v1132_v48 }
  0xd5   : > { %v920_v49 = vpop.permute.xlu1 %919 }
  0xd6   : > { %v918_v50 = vpop.permute.xlu0 %917 }
  0xd7   : > { %v921_v51 = vsel %vm635_vm5, %v918_v50, %v920_v49 }
  0xd8   : > { %v926_v52 = vsel %vm231_vm0, %v921_v51, 0 }
  0xd9   : > { %935 = vmatpush.bf16.msra.mxu0 %v926_v52 }
  0xdb   : > { %1136 = vmatmul.msk.bf16.vlgmr.msrb.gmra.mxu1 %vm227_vm1, %v1135_v53 }
  0xdc   : > { %1146 = vmatmul.msk.bf16.vlgmr.msra.gmra.mxu2 %vm227_vm1, %v1145_v54  ;;  %1142 = vmatmul.msk.bf16.vlgmr.msra.gmra.mxu0 %vm227_vm1, %v1141_v55 }
  0xdd   : > { %v1453_v1 = vpop.permute.xlu1 %224 }
  0xde   : > { %v947_v57 = vpop.permute.xlu0 %946  ;;  %v245_v2 = vadd.f32 %v244_v61, %v1453_v1 }
  0xdf   : > { %v948_v58 = vsel %vm751_vm6, %v945_v56, %v947_v57  ;;  %v1119_v57 = vld [vmem:[%s1447_s11 + $0x14] sm:$0xf] }
  0xe0   : > { %v953_v59 = vsel %vm231_vm0, %v948_v58, 0  ;;  %v249_v4 = vadd.f32 %v248_v0, %v245_v2 }
  0xe1   : > { %962 = vmatpush.bf16.msra.mxu1 %v953_v59 }
  0xe2   : > { %v250_v6 = vmax.f32 %v249_v4, 0.0 }
  0xe4   : > { %1140 = vmatmul.msk.bf16.vlgmr.msrb.gmra.mxu3 %vm227_vm1, %v1139_v60  ;;  %252 = vst.msk [vmem:[%s1460_s17] sm:$0xf] %vm251_vm8, %v250_v6 }
  0xeb   : > { %1144 = vmatmul.msk.bf16.vlgmr.msra.gmra.mxu1 %vm227_vm1, %v1143_v63 }
 0x108   : > { %v278_v12 = vpop.f32.mrf.mxu1 }
 0x109   : > { %v298_v13 = vadd.f32 %v297_v62, %v278_v12 }
 0x10b   : > { %v301_v16 = vadd.f32 %v298_v13, %v1453_v1 }
 0x10d   : > { %v304_v17 = vadd.f32 %v1087_v15, %v301_v16 }
 0x10f   : > { %v305_v19 = vmax.f32 %v304_v17, 0.0 }
 0x110   : > { %v280_v20 = vpop.f32.mrf.mxu1 }
 0x111   : > { %1088 = vst.msk [vmem:[%s1460_s17 + $0x4] sm:$0xf] %vm251_vm8, %v305_v19 }
 0x117   : > { %v340_v21 = vpop.f32.mrf.mxu3 }
 0x118   : > { %v360_v22 = vadd.f32 %v359_v7, %v340_v21  ;;  %v395_v14 = vpop.f32.mrf.mxu1 }
 0x119   : > { %v474_v24 = vpop.f32.mrf.mxu0  ;;  %v415_v31 = vadd.f32 %v414_v8, %v395_v14 }
 0x11a   : > { %v363_v25 = vadd.f32 %v360_v22, %v1453_v1 }
 0x11c   : > { %v366_v26 = vadd.f32 %v1093_v23, %v363_v25 }
 0x11e   : > { %v367_v27 = vmax.f32 %v366_v26, 0.0 }
 0x11f   : > { %v342_v28 = vpop.f32.mrf.mxu3 }
 0x120   : > { %1094 = vst.msk [vmem:[%s1460_s17 + $0x8] sm:$0xf] %vm251_vm8, %v367_v27  ;;  %v397_v29 = vpop.f32.mrf.mxu1 }
 0x121   : > { %v476_v30 = vpop.f32.mrf.mxu0 }
 0x127   : > { %v446_v32 = vpop.f32.mrf.mxu3 }
 0x128   : > { %v450_v33 = vadd.f32 %v446_v32, %v415_v31  ;;  %v518_v34 = vpop.f32.mrf.mxu1 }
 0x129   : > { %v538_v35 = vadd.f32 %v537_v11, %v518_v34  ;;  %v592_v36 = vpop.f32.mrf.mxu0 }
 0x12a   : > { %v478_v37 = vadd.f32 %v474_v24, %v450_v33 }
 0x12b   : > { %v541_v40 = vadd.f32 %v538_v35, %v1453_v1  ;;  %v1147_v35 = vld [vmem:[%s1447_s11 + $0x1c] sm:$0xf] }
 0x12c   : > { %v479_v41 = vadd.f32 %v478_v37, %v1453_v1 }
 0x12d   : > { %v544_v42 = vadd.f32 %v1109_v38, %v541_v40 }
 0x12e   : > { %v482_v43 = vadd.f32 %v1103_v39, %v479_v41 }
 0x12f   : > { %v545_v44 = vmax.f32 %v544_v42, 0.0  ;;  %v448_v45 = vpop.f32.mrf.mxu3  ;;  %v652_v46 = vpop.f32.mrf.mxu2 }
 0x130   : > { %v483_v47 = vmax.f32 %v482_v43, 0.0  ;;  %v520_v48 = vpop.f32.mrf.mxu1 }
 0x131   : > { %1110 = vst.msk [vmem:[%s1460_s17 + $0x10] sm:$0xf] %vm251_vm8, %v545_v44  ;;  %v594_v49 = vpop.f32.mrf.mxu0 }
 0x132   : > { %1104 = vst.msk [vmem:[%s1460_s17 + $0xc] sm:$0xf] %vm251_vm8, %v483_v47 }
 0x137   : > { %v573_v50 = vpop.f32.mrf.mxu3  ;;  %v654_v51 = vpop.f32.mrf.mxu2 }
 0x138   : > { %v593_v52 = vadd.f32 %v592_v36, %v573_v50  ;;  %v624_v53 = vpop.f32.mrf.mxu1 }
 0x139   : > { %v714_v54 = vpop.f32.mrf.mxu0 }
 0x13a   : > { %v628_v55 = vadd.f32 %v624_v53, %v593_v52 }
 0x13c   : > { %v656_v56 = vadd.f32 %v652_v46, %v628_v55 }
 0x13e   : > { %v657_v58 = vadd.f32 %v656_v56, %v1453_v1 }
 0x13f   : > { %v575_v59 = vpop.f32.mrf.mxu3  ;;  %v768_v60 = vpop.f32.mrf.mxu2 }
 0x140   : > { %v660_v61 = vadd.f32 %v1119_v57, %v657_v58  ;;  %v626_v62 = vpop.f32.mrf.mxu1 }
 0x141   : > { %v716_v63 = vpop.f32.mrf.mxu0 }
 0x142   : > { %v661_v0 = vmax.f32 %v660_v61, 0.0 }
 0x144   : > { %1120 = vst.msk [vmem:[%s1460_s17 + $0x14] sm:$0xf] %vm251_vm8, %v661_v0 }
 0x147   : > { %v695_v2 = vpop.f32.mrf.mxu3  ;;  %v770_v3 = vpop.f32.mrf.mxu2 }
 0x148   : > { %v715_v4 = vadd.f32 %v714_v54, %v695_v2  ;;  %v740_v5 = vpop.f32.mrf.mxu1 }
 0x149   : > { %v824_v6 = vpop.f32.mrf.mxu0 }
 0x14a   : > { %v744_v7 = vadd.f32 %v740_v5, %v715_v4 }
 0x14c   : > { %v772_v8 = vadd.f32 %v768_v60, %v744_v7 }
 0x14e   : > { %v773_v10 = vadd.f32 %v772_v8, %v1453_v1 }
 0x14f   : > { %v697_v11 = vpop.f32.mrf.mxu3  ;;  %v883_v12 = vpop.f32.mrf.mxu2 }
 0x150   : > { %v776_v13 = vadd.f32 %v1129_v9, %v773_v10  ;;  %v742_v15 = vpop.f32.mrf.mxu1 }
 0x151   : > { %v826_v16 = vpop.f32.mrf.mxu0 }
 0x152   : > { %v777_v17 = vmax.f32 %v776_v13, 0.0 }
 0x154   : > { %1130 = vst.msk [vmem:[%s1460_s17 + $0x18] sm:$0xf] %vm251_vm8, %v777_v17 }
 0x157   : > { %v805_v18 = vpop.f32.mrf.mxu3  ;;  %v885_v19 = vpop.f32.mrf.mxu2 }
 0x158   : > { %v856_v20 = vpop.f32.mrf.mxu1  ;;  %v825_v22 = vadd.f32 %v824_v6, %v805_v18 }
 0x159   : > { %v937_v21 = vpop.f32.mrf.mxu0 }
 0x15a   : > { %v860_v26 = vadd.f32 %v856_v20, %v825_v22 }
 0x15c   : > { %v887_v27 = vadd.f32 %v883_v12, %v860_v26 }
 0x15f   : > { %v807_v14 = vpop.f32.mrf.mxu3  ;;  %v992_v23 = vpop.f32.mrf.mxu2 }
 0x160   : > { %v858_v24 = vpop.f32.mrf.mxu1 }
 0x161   : > { %v939_v25 = vpop.f32.mrf.mxu0 }
 0x167   : > { %v910_v28 = vpop.f32.mrf.mxu3  ;;  %v994_v29 = vpop.f32.mrf.mxu2 }
 0x168   : > { %v914_v30 = vadd.f32 %v910_v28, %v887_v27  ;;  %v964_v31 = vpop.f32.mrf.mxu1 }
 0x16a   : > { %v941_v32 = vadd.f32 %v937_v21, %v914_v30 }
 0x16c   : > { %v968_v33 = vadd.f32 %v964_v31, %v941_v32 }
 0x16e   : > { %v996_v34 = vadd.f32 %v992_v23, %v968_v33 }
 0x16f   : > { %v912_v36 = vpop.f32.mrf.mxu3 }
 0x170   : > { %v997_v37 = vadd.f32 %v996_v34, %v1453_v1  ;;  %v966_v38 = vpop.f32.mrf.mxu1 }
 0x172   : > { %v1000_v39 = vadd.f32 %v1147_v35, %v997_v37 }
 0x174   : > { %v1001_v40 = vmax.f32 %v1000_v39, 0.0 }
 0x176   : > { %1148 = vst.msk [vmem:[%s1460_s17 + $0x1c] sm:$0xf] %vm251_vm8, %v1001_v40 }
 0x177 PF: > { %s14_s15 = sadd.s32 1, %s1178_s15  }
 0x178   : > { %p11_p4 = scmp.ge.s32.totalorder %s14_s15, 4  }
 0x17a   :  { %13 = sbr.rel (!%p11_p4) target bundleno = 1 (0x1), region = 109 }

</bundles_post_ra>
